<compile_context>
chip_gen: v6e
topology: v6e:2x2x1
jax: 0.10.0
libtpu: 0.0.40
codegen_flags: <defaults>
</compile_context>

<pallas_src>
import math

import numpy as np

import jax
import jax.numpy as jnp
from jax import lax
from jax.experimental import pallas as pl
from jax.experimental.pallas import tpu as pltpu

LANE = 128


def _round_up(x, m):
    return (x + m - 1) // m * m


# ---------------------------------------------------------------------------
# Kernels
# ---------------------------------------------------------------------------
def _conv_pool_kernel(x_ref, w0_ref, w1_ref, w2_ref, b_ref, o_ref, acc_ref):
    """Fused implicit-GEMM Conv2d(5,1,2) + bias + ReLU + MaxPool2d(2).

    x_ref:   [tm, K2]   f32  row-pair view of the padded NHWC input.
    w*_ref:  [K2, 4*Qp] bf16 Toeplitz-expanded weights for row shifts 0/1/2.
    b_ref:   [1, Qp]    f32  bias tiled over pooled x.
    o_ref:   [tm, Qp]   f32  pooled output rows, columns = (x_pooled, cout).
    acc_ref: [tm, 4*Qp] f32  pre-pool accumulator (4 pool corners = quarters).
    """
    tm = x_ref.shape[0]
    qp = o_ref.shape[1]

    # Row shift j=0: full tile (also initializes every row of the scratch).
    acc_ref[...] = jnp.dot(x_ref[...].astype(jnp.bfloat16), w0_ref[...],
                           preferred_element_type=jnp.float32)
    # Row shifts j=1,2: output row t also consumes row-pairs t+1, t+2 of the
    # same image.  Tiles hold whole images, so these never leave the tile for
    # valid output rows; the last 1-2 rows they skip are per-image pad rows.
    x1 = x_ref[pl.ds(1, tm - 1), :].astype(jnp.bfloat16)
    acc_ref[pl.ds(0, tm - 1), :] += jnp.dot(
        x1, w1_ref[...], preferred_element_type=jnp.float32)
    x2 = x_ref[pl.ds(2, tm - 2), :].astype(jnp.bfloat16)
    acc_ref[pl.ds(0, tm - 2), :] += jnp.dot(
        x2, w2_ref[...], preferred_element_type=jnp.float32)

    # 2x2 max-pool = max over the four column quarters (256-lane aligned),
    # then a single bias add and a single ReLU (hoisted past the max).
    pooled = jnp.maximum(
        jnp.maximum(acc_ref[:, pl.ds(0, qp)], acc_ref[:, pl.ds(qp, qp)]),
        jnp.maximum(acc_ref[:, pl.ds(2 * qp, qp)],
                    acc_ref[:, pl.ds(3 * qp, qp)]))
    o_ref[...] = jnp.maximum(pooled + b_ref[...], 0.0).astype(o_ref.dtype)


def _linear_kernel(x_ref, w_ref, b_ref, o_ref):
    acc = jnp.dot(x_ref[...].astype(jnp.bfloat16), w_ref[...],
                  preferred_element_type=jnp.float32)
    o_ref[...] = (acc + b_ref[...]).astype(o_ref.dtype)


# ---------------------------------------------------------------------------
# One-time parameter re-layout (runs outside the jitted forward)
# ---------------------------------------------------------------------------
def _build_stage_weights(w_oihw, bias, H, W):
    """Expand a [Cout,Cin,5,5] conv weight into 3 Toeplitz GEMM weights.

    W_j maps one row-pair of the padded input (lanes (parity d, x_in, cin))
    to the four 2x2-pool corners of one pooled output row
    (lanes (corner, x_pooled, cout)), for row-pair shift j in {0,1,2}.
    """
    w = np.asarray(jax.device_get(w_oihw), np.float32)
    b = np.asarray(jax.device_get(bias), np.float32)
    cout, cin, kh, kw = w.shape
    hp, wp = H + 4, W + 4
    wo = W // 2
    q_width = wo * cout
    qp = _round_up(q_width, LANE)                 # 224 -> 256
    k2 = 2 * wp * cin
    wjs = np.zeros((3, k2, 4 * qp), np.float32)
    for j in range(3):
        for d in range(2):                        # parity inside the row pair
            for dy in range(2):                   # pool corner (row)
                ky = 2 * j + d - dy
                if not 0 <= ky < kh:
                    continue
                for dx in range(2):               # pool corner (col)
                    corner = 2 * dy + dx
                    for xq in range(wo):
                        for kx in range(kw):
                            win = 2 * xq + dx + kx
                            icol = (d * wp + win) * cin
                            ocol = corner * qp + xq * cout
                            wjs[j, icol:icol + cin, ocol:ocol + cout] += \
                                w[:, :, ky, kx].T
    bias_row = np.zeros((1, qp), np.float32)
    bias_row[0, :q_width] = np.tile(b, wo)
    return ([jnp.asarray(wjs[j], jnp.bfloat16) for j in range(3)],
            jnp.asarray(bias_row, jnp.float32))


def prepare_params(params):
    """One-time weight re-layout.  Call OUTSIDE jit, pass the result in."""
    (w1_0, w1_1, w1_2), b1 = _build_stage_weights(
        params["w1"], params["b1"], 28, 28)
    (w2_0, w2_1, w2_2), b2 = _build_stage_weights(
        params["w2"], params["b2"], 14, 14)
    # PyTorch's .view(-1, 32*7*7) flattens NCHW (c,h,w); our activations are
    # NHWC (h,w,c) -> permute the Linear weight once here instead.
    wout = np.asarray(jax.device_get(params["wout"]), np.float32)
    wout = wout.reshape(10, 32, 7, 7).transpose(0, 2, 3, 1)
    wout = wout.reshape(10, 32 * 7 * 7).T                      # [(h,w,c), 10]
    wout_pad = np.zeros((32 * 7 * 7, LANE), np.float32)
    wout_pad[:, :10] = wout
    bout_pad = np.zeros((1, LANE), np.float32)
    bout_pad[0, :10] = np.asarray(jax.device_get(params["bout"]), np.float32)
    return {
        "conv1": {"w0": w1_0, "w1": w1_1, "w2": w1_2, "bias": b1},
        "conv2": {"w0": w2_0, "w1": w2_1, "w2": w2_2, "bias": b2},
        "wout": jnp.asarray(wout_pad, jnp.bfloat16),
        "bout": jnp.asarray(bout_pad, jnp.float32),
    }


# ---------------------------------------------------------------------------
# Wrappers
# ---------------------------------------------------------------------------
def fused_conv_relu_pool(x_nhwc, stage, *, cout, max_images_per_block=32):
    """Conv2d(k=5, s=1, p=2) + ReLU + MaxPool2d(2), NHWC in / NHWC out."""
    w0, w1, w2, bias_row = stage["w0"], stage["w1"], stage["w2"], stage["bias"]
    B, H, W, cin = x_nhwc.shape
    hp, wp = H + 4, W + 4
    t_rows = hp // 2                    # row-pairs per image (= H//2 + 2)
    ho, wo = H // 2, W // 2
    k2 = 2 * wp * cin
    qp = bias_row.shape[1]
    n_cols = 4 * qp

    # Images per grid step: tm = nbi * t_rows must be a multiple of 8 (f32
    # sublanes) and the grid must have length >= 2 (v7x megacore + pipelining).
    g = 8 // math.gcd(t_rows, 8)
    nbi = min(max_images_per_block, _round_up(max(1, B // 2), g))
    nbi = max(g, nbi - nbi % g)
    b_pad = max(2 * nbi, _round_up(B, nbi))
    tm = nbi * t_rows
    rows = b_pad * t_rows
    grid = (b_pad // nbi,)

    xp = jnp.pad(x_nhwc.astype(jnp.float32),
                 ((0, b_pad - B), (2, 2), (2, 2), (0, 0)))
    a0 = xp.reshape(rows, k2)           # pure reshape: row-pair layout

    row_spec = pl.BlockSpec((tm, k2), lambda i: (i, 0))
    w_spec = pl.BlockSpec((k2, n_cols), lambda i: (0, 0))
    b_spec = pl.BlockSpec((1, qp), lambda i: (0, 0))

    cost = pl.CostEstimate(
        flops=2 * rows * k2 * n_cols * 3,
        transcendentals=0,
        bytes_accessed=rows * k2 * 4 + 3 * k2 * n_cols * 2 + rows * qp * 4)

    out = pl.pallas_call(
        _conv_pool_kernel,
        out_shape=jax.ShapeDtypeStruct((rows, qp), jnp.float32),
        grid=grid,
        in_specs=[row_spec, w_spec, w_spec, w_spec, b_spec],
        out_specs=pl.BlockSpec((tm, qp), lambda i: (i, 0)),
        scratch_shapes=[pltpu.VMEM((tm, n_cols), jnp.float32)],
        compiler_params=pltpu.CompilerParams(
            dimension_semantics=("parallel",),
            vmem_limit_bytes=32 * 1024 * 1024),
        cost_estimate=cost,
    )(a0, w0, w1, w2, bias_row)

    out = out.reshape(b_pad, t_rows, qp)[:B, :ho, :wo * cout]
    return out.reshape(B, ho, wo, cout)


def linear(x, w_pad, b_row, *, n_out, max_tm=256):
    """y = x @ w_pad + b_row with the N dim lane-padded to 128."""
    bm, k = x.shape
    np_cols = w_pad.shape[1]
    tm = max(8, min(max_tm, _round_up(max(1, bm // 2), 8)))
    m_pad = max(2 * tm, _round_up(bm, tm))      # grid >= 2

    xb = jnp.pad(x.astype(jnp.float32), ((0, m_pad - bm), (0, 0)))
    out = pl.pallas_call(
        _linear_kernel,
        out_shape=jax.ShapeDtypeStruct((m_pad, np_cols), jnp.float32),
        grid=(m_pad // tm,),
        in_specs=[pl.BlockSpec((tm, k), lambda i: (i, 0)),
                  pl.BlockSpec((k, np_cols), lambda i: (0, 0)),
                  pl.BlockSpec((1, np_cols), lambda i: (0, 0))],
        out_specs=pl.BlockSpec((tm, np_cols), lambda i: (i, 0)),
        compiler_params=pltpu.CompilerParams(
            dimension_semantics=("parallel",),
            vmem_limit_bytes=32 * 1024 * 1024),
        cost_estimate=pl.CostEstimate(
            flops=2 * m_pad * k * np_cols, transcendentals=0,
            bytes_accessed=m_pad * k * 4 + k * np_cols * 2
            + m_pad * np_cols * 4),
    )(xb, w_pad, b_row)
    return out[:bm, :n_out]


def convnets_forward(x_nchw, prepared):
    # NCHW -> NHWC once; channels ride the lane axis from here on.
    x = jnp.transpose(x_nchw, (0, 2, 3, 1))
    x = fused_conv_relu_pool(x, prepared["conv1"], cout=16)   # [B,14,14,16]
    x = fused_conv_relu_pool(x, prepared["conv2"], cout=32)   # [B, 7, 7,32]
    xf = x.reshape(x.shape[0], 7 * 7 * 32)
    return linear(xf, prepared["wout"], prepared["bout"], n_out=10)  # [B,10]


# ---------------------------------------------------------------------------
# Reference (pure JAX, f32) and test harness
# ---------------------------------------------------------------------------
def _reference_forward(x_nchw, params):
    x = jnp.transpose(x_nchw, (0, 2, 3, 1)).astype(jnp.float32)

    def conv_relu_pool(x, w, b):
        y = lax.conv_general_dilated(
            x, jnp.transpose(w, (2, 3, 1, 0)), window_strides=(1, 1),
            padding=((2, 2), (2, 2)),
            dimension_numbers=("NHWC", "HWIO", "NHWC"))
        y = jnp.maximum(y + b[None, None, None, :], 0.0)
        return lax.reduce_window(y, -jnp.inf, lax.max,
                                 (1, 2, 2, 1), (1, 2, 2, 1), "VALID")

    x = conv_relu_pool(x, params["w1"], params["b1"])
    x = conv_relu_pool(x, params["w2"], params["b2"])
    xf = jnp.transpose(x, (0, 3, 1, 2)).reshape(x.shape[0], -1)  # NCHW flatten
    return xf @ params["wout"].T + params["bout"]


def init_params(key):
    k1, k2, k3, k4, k5, k6 = jax.random.split(key, 6)
    s = 0.05
    return {
        "w1": s * jax.random.normal(k1, (16, 1, 5, 5), jnp.float32),
        "b1": s * jax.random.normal(k2, (16,), jnp.float32),
        "w2": s * jax.random.normal(k3, (32, 16, 5, 5), jnp.float32),
        "b2": s * jax.random.normal(k4, (32,), jnp.float32),
        "wout": s * jax.random.normal(k5, (10, 32 * 7 * 7), jnp.float32),
        "bout": s * jax.random.normal(k6, (10,), jnp.float32),
    }


if __name__ == "__main__":
    key = jax.random.PRNGKey(0)
    pkey, xkey = jax.random.split(key)
    params = init_params(pkey)
    prepared = prepare_params(params)        # one-time weight re-layout
    # 28x28, 1-channel input is required by the 32*7*7 flatten in the module.
    x = jax.random.normal(xkey, (2, 1, 28, 28), jnp.float32)

    logits = jax.jit(convnets_forward)(x, prepared)
    logits = jax.block_until_ready(logits)
    assert logits.shape == (2, 10) and logits.dtype == jnp.float32

    # Coarse sanity check vs the f32 XLA reference (bf16 MXU operands =>
    # small numerical differences are expected).
    ref = _reference_forward(x, params)
    tol = 2e-2 + 5e-2 * float(jnp.max(jnp.abs(ref)))
    err = float(jnp.max(jnp.abs(logits - ref)))
    assert err < tol, f"mismatch vs reference: {err} (tol {tol})"
    print("KERNEL_OK")
</pallas_src>

<mosaic_0001>
module attributes {stable_mosaic.version = 11 : i64} {
  func.func @_conv_pool_kernel(%arg0: i32, %arg1: memref<16x64xf32, #tpu.memory_space<vmem>>, %arg2: memref<64x1024xbf16, #tpu.memory_space<vmem>>, %arg3: memref<64x1024xbf16, #tpu.memory_space<vmem>>, %arg4: memref<64x1024xbf16, #tpu.memory_space<vmem>>, %arg5: memref<1x256xf32, #tpu.memory_space<vmem>>, %arg6: memref<16x256xf32, #tpu.memory_space<vmem>>, %arg7: memref<16x1024xf32, #tpu.memory_space<vmem>>) attributes {dimension_semantics = [#tpu.dimension_semantics<parallel>], iteration_bounds = array<i64: 2>, scalar_prefetch = 0 : i64, scratch_operands = 1 : i64, tpu.core_type = #tpu.core_type<tc>, window_params = [{transform_indices = @transform_0, window_bounds = array<i64: 16, 64>}, {pipeline_mode = #tpu.pipeline_mode<synchronous>, transform_indices = @transform_1, window_bounds = array<i64: 64, 1024>}, {pipeline_mode = #tpu.pipeline_mode<synchronous>, transform_indices = @transform_2, window_bounds = array<i64: 64, 1024>}, {pipeline_mode = #tpu.pipeline_mode<synchronous>, transform_indices = @transform_3, window_bounds = array<i64: 64, 1024>}, {pipeline_mode = #tpu.pipeline_mode<synchronous>, transform_indices = @transform_4, window_bounds = array<i64: 1, 256>}, {transform_indices = @transform_5, window_bounds = array<i64: 16, 256>}]} {
    %c0 = arith.constant 0 : index
    %c0_0 = arith.constant 0 : index
    %0 = vector.load %arg1[%c0, %c0_0] : memref<16x64xf32, #tpu.memory_space<vmem>>, vector<16x64xf32>
    %1 = arith.truncf %0 : vector<16x64xf32> to vector<16x64xbf16>
    %c0_1 = arith.constant 0 : index
    %c0_2 = arith.constant 0 : index
    %2 = vector.load %arg2[%c0_1, %c0_2] : memref<64x1024xbf16, #tpu.memory_space<vmem>>, vector<64x1024xbf16>
    %cst = arith.constant dense<0.000000e+00> : vector<16x1024xf32>
    %3 = tpu.matmul %1, %2, %cst {dimension_numbers = #tpu.dot_dimension_numbers<[1], [0], [0], [1], [0, 0, 1, 1], [], []>} : vector<16x64xbf16>, vector<64x1024xbf16>, vector<16x1024xf32> -> vector<16x1024xf32>
    %c0_3 = arith.constant 0 : index
    %c0_4 = arith.constant 0 : index
    %4 = vector.load %arg7[%c0_3, %c0_4] : memref<16x1024xf32, #tpu.memory_space<vmem>>, vector<16x1024xf32>
    tpu.vector_store %arg7[%c0_3, %c0_4], %3 {strides = array<i32>} : memref<16x1024xf32, #tpu.memory_space<vmem>>, vector<16x1024xf32>,
    %c1 = arith.constant 1 : index
    %c0_5 = arith.constant 0 : index
    %5 = vector.load %arg1[%c1, %c0_5] : memref<16x64xf32, #tpu.memory_space<vmem>>, vector<15x64xf32>
    %6 = arith.truncf %5 : vector<15x64xf32> to vector<15x64xbf16>
    %c0_6 = arith.constant 0 : index
    %c0_7 = arith.constant 0 : index
    %7 = vector.load %arg7[%c0_6, %c0_7] : memref<16x1024xf32, #tpu.memory_space<vmem>>, vector<15x1024xf32>
    %c0_8 = arith.constant 0 : index
    %c0_9 = arith.constant 0 : index
    %8 = vector.load %arg3[%c0_8, %c0_9] : memref<64x1024xbf16, #tpu.memory_space<vmem>>, vector<64x1024xbf16>
    %cst_10 = arith.constant dense<0.000000e+00> : vector<15x1024xf32>
    %9 = tpu.matmul %6, %8, %cst_10 {dimension_numbers = #tpu.dot_dimension_numbers<[1], [0], [0], [1], [0, 0, 1, 1], [], []>} : vector<15x64xbf16>, vector<64x1024xbf16>, vector<15x1024xf32> -> vector<15x1024xf32>
    %10 = arith.addf %7, %9 : vector<15x1024xf32>
    %c0_11 = arith.constant 0 : index
    %c0_12 = arith.constant 0 : index
    %11 = vector.load %arg7[%c0_11, %c0_12] : memref<16x1024xf32, #tpu.memory_space<vmem>>, vector<15x1024xf32>
    tpu.vector_store %arg7[%c0_11, %c0_12], %10 {strides = array<i32>} : memref<16x1024xf32, #tpu.memory_space<vmem>>, vector<15x1024xf32>,
    %c2 = arith.constant 2 : index
    %c0_13 = arith.constant 0 : index
    %12 = vector.load %arg1[%c2, %c0_13] : memref<16x64xf32, #tpu.memory_space<vmem>>, vector<14x64xf32>
    %13 = arith.truncf %12 : vector<14x64xf32> to vector<14x64xbf16>
    %c0_14 = arith.constant 0 : index
    %c0_15 = arith.constant 0 : index
    %14 = vector.load %arg7[%c0_14, %c0_15] : memref<16x1024xf32, #tpu.memory_space<vmem>>, vector<14x1024xf32>
    %c0_16 = arith.constant 0 : index
    %c0_17 = arith.constant 0 : index
    %15 = vector.load %arg4[%c0_16, %c0_17] : memref<64x1024xbf16, #tpu.memory_space<vmem>>, vector<64x1024xbf16>
    %cst_18 = arith.constant dense<0.000000e+00> : vector<14x1024xf32>
    %16 = tpu.matmul %13, %15, %cst_18 {dimension_numbers = #tpu.dot_dimension_numbers<[1], [0], [0], [1], [0, 0, 1, 1], [], []>} : vector<14x64xbf16>, vector<64x1024xbf16>, vector<14x1024xf32> -> vector<14x1024xf32>
    %17 = arith.addf %14, %16 : vector<14x1024xf32>
    %c0_19 = arith.constant 0 : index
    %c0_20 = arith.constant 0 : index
    %18 = vector.load %arg7[%c0_19, %c0_20] : memref<16x1024xf32, #tpu.memory_space<vmem>>, vector<14x1024xf32>
    tpu.vector_store %arg7[%c0_19, %c0_20], %17 {strides = array<i32>} : memref<16x1024xf32, #tpu.memory_space<vmem>>, vector<14x1024xf32>,
    %c0_21 = arith.constant 0 : index
    %c0_22 = arith.constant 0 : index
    %19 = vector.load %arg7[%c0_21, %c0_22] : memref<16x1024xf32, #tpu.memory_space<vmem>>, vector<16x256xf32>
    %c0_23 = arith.constant 0 : index
    %c256 = arith.constant 256 : index
    %20 = vector.load %arg7[%c0_23, %c256] : memref<16x1024xf32, #tpu.memory_space<vmem>>, vector<16x256xf32>
    %21 = arith.maximumf %19, %20 : vector<16x256xf32>
    %c0_24 = arith.constant 0 : index
    %c512 = arith.constant 512 : index
    %22 = vector.load %arg7[%c0_24, %c512] : memref<16x1024xf32, #tpu.memory_space<vmem>>, vector<16x256xf32>
    %c0_25 = arith.constant 0 : index
    %c768 = arith.constant 768 : index
    %23 = vector.load %arg7[%c0_25, %c768] : memref<16x1024xf32, #tpu.memory_space<vmem>>, vector<16x256xf32>
    %24 = arith.maximumf %22, %23 : vector<16x256xf32>
    %25 = arith.maximumf %21, %24 : vector<16x256xf32>
    %c0_26 = arith.constant 0 : index
    %c0_27 = arith.constant 0 : index
    %26 = vector.load %arg5[%c0_26, %c0_27] : memref<1x256xf32, #tpu.memory_space<vmem>>, vector<1x256xf32>
    %27 = vector.broadcast %26 : vector<1x256xf32> to vector<16x256xf32>
    %28 = arith.addf %25, %27 : vector<16x256xf32>
    %cst_28 = arith.constant 0.000000e+00 : f32
    %29 = vector.broadcast %cst_28 : f32 to vector<16x256xf32>
    %30 = arith.maximumf %28, %29 : vector<16x256xf32>
    %c0_29 = arith.constant 0 : index
    %c0_30 = arith.constant 0 : index
    %31 = vector.load %arg6[%c0_29, %c0_30] : memref<16x256xf32, #tpu.memory_space<vmem>>, vector<16x256xf32>
    tpu.vector_store %arg6[%c0_29, %c0_30], %30 {strides = array<i32>} : memref<16x256xf32, #tpu.memory_space<vmem>>, vector<16x256xf32>,
    return
  }
  func.func @transform_0(%arg0: i32) -> (i32, i32) {
    %c0_i32 = arith.constant 0 : i32
    %c0_i32_0 = arith.constant 0 : i32
    return %arg0, %c0_i32 : i32, i32
  }
  func.func @transform_1(%arg0: i32) -> (i32, i32) {
    %c0_i32 = arith.constant 0 : i32
    %c0_i32_0 = arith.constant 0 : i32
    %c0_i32_1 = arith.constant 0 : i32
    return %c0_i32, %c0_i32_0 : i32, i32
  }
  func.func @transform_2(%arg0: i32) -> (i32, i32) {
    %c0_i32 = arith.constant 0 : i32
    %c0_i32_0 = arith.constant 0 : i32
    %c0_i32_1 = arith.constant 0 : i32
    return %c0_i32, %c0_i32_0 : i32, i32
  }
  func.func @transform_3(%arg0: i32) -> (i32, i32) {
    %c0_i32 = arith.constant 0 : i32
    %c0_i32_0 = arith.constant 0 : i32
    %c0_i32_1 = arith.constant 0 : i32
    return %c0_i32, %c0_i32_0 : i32, i32
  }
  func.func @transform_4(%arg0: i32) -> (i32, i32) {
    %c0_i32 = arith.constant 0 : i32
    %c0_i32_0 = arith.constant 0 : i32
    %c0_i32_1 = arith.constant 0 : i32
    return %c0_i32, %c0_i32_0 : i32, i32
  }
  func.func @transform_5(%arg0: i32) -> (i32, i32) {
    %c0_i32 = arith.constant 0 : i32
    %c0_i32_0 = arith.constant 0 : i32
    return %arg0, %c0_i32 : i32, i32
  }
}

module attributes {stable_mosaic.version = 11 : i64} {
  func.func @_conv_pool_kernel(%arg0: i32, %arg1: memref<72x576xf32, #tpu.memory_space<vmem>>, %arg2: memref<576x1024xbf16, #tpu.memory_space<vmem>>, %arg3: memref<576x1024xbf16, #tpu.memory_space<vmem>>, %arg4: memref<576x1024xbf16, #tpu.memory_space<vmem>>, %arg5: memref<1x256xf32, #tpu.memory_space<vmem>>, %arg6: memref<72x256xf32, #tpu.memory_space<vmem>>, %arg7: memref<72x1024xf32, #tpu.memory_space<vmem>>) attributes {dimension_semantics = [#tpu.dimension_semantics<parallel>], iteration_bounds = array<i64: 2>, scalar_prefetch = 0 : i64, scratch_operands = 1 : i64, tpu.core_type = #tpu.core_type<tc>, window_params = [{transform_indices = @transform_0, window_bounds = array<i64: 72, 576>}, {pipeline_mode = #tpu.pipeline_mode<synchronous>, transform_indices = @transform_1, window_bounds = array<i64: 576, 1024>}, {pipeline_mode = #tpu.pipeline_mode<synchronous>, transform_indices = @transform_2, window_bounds = array<i64: 576, 1024>}, {pipeline_mode = #tpu.pipeline_mode<synchronous>, transform_indices = @transform_3, window_bounds = array<i64: 576, 1024>}, {pipeline_mode = #tpu.pipeline_mode<synchronous>, transform_indices = @transform_4, window_bounds = array<i64: 1, 256>}, {transform_indices = @transform_5, window_bounds = array<i64: 72, 256>}]} {
    %c0 = arith.constant 0 : index
    %c0_0 = arith.constant 0 : index
    %0 = vector.load %arg1[%c0, %c0_0] : memref<72x576xf32, #tpu.memory_space<vmem>>, vector<72x576xf32>
    %1 = arith.truncf %0 : vector<72x576xf32> to vector<72x576xbf16>
    %c0_1 = arith.constant 0 : index
    %c0_2 = arith.constant 0 : index
    %2 = vector.load %arg2[%c0_1, %c0_2] : memref<576x1024xbf16, #tpu.memory_space<vmem>>, vector<576x1024xbf16>
    %cst = arith.constant dense<0.000000e+00> : vector<72x1024xf32>
    %3 = tpu.matmul %1, %2, %cst {dimension_numbers = #tpu.dot_dimension_numbers<[1], [0], [0], [1], [0, 0, 1, 1], [], []>} : vector<72x576xbf16>, vector<576x1024xbf16>, vector<72x1024xf32> -> vector<72x1024xf32>
    %c0_3 = arith.constant 0 : index
    %c0_4 = arith.constant 0 : index
    %4 = vector.load %arg7[%c0_3, %c0_4] : memref<72x1024xf32, #tpu.memory_space<vmem>>, vector<72x1024xf32>
    tpu.vector_store %arg7[%c0_3, %c0_4], %3 {strides = array<i32>} : memref<72x1024xf32, #tpu.memory_space<vmem>>, vector<72x1024xf32>,
    %c1 = arith.constant 1 : index
    %c0_5 = arith.constant 0 : index
    %5 = vector.load %arg1[%c1, %c0_5] : memref<72x576xf32, #tpu.memory_space<vmem>>, vector<71x576xf32>
    %6 = arith.truncf %5 : vector<71x576xf32> to vector<71x576xbf16>
    %c0_6 = arith.constant 0 : index
    %c0_7 = arith.constant 0 : index
    %7 = vector.load %arg7[%c0_6, %c0_7] : memref<72x1024xf32, #tpu.memory_space<vmem>>, vector<71x1024xf32>
    %c0_8 = arith.constant 0 : index
    %c0_9 = arith.constant 0 : index
    %8 = vector.load %arg3[%c0_8, %c0_9] : memref<576x1024xbf16, #tpu.memory_space<vmem>>, vector<576x1024xbf16>
    %cst_10 = arith.constant dense<0.000000e+00> : vector<71x1024xf32>
    %9 = tpu.matmul %6, %8, %cst_10 {dimension_numbers = #tpu.dot_dimension_numbers<[1], [0], [0], [1], [0, 0, 1, 1], [], []>} : vector<71x576xbf16>, vector<576x1024xbf16>, vector<71x1024xf32> -> vector<71x1024xf32>
    %10 = arith.addf %7, %9 : vector<71x1024xf32>
    %c0_11 = arith.constant 0 : index
    %c0_12 = arith.constant 0 : index
    %11 = vector.load %arg7[%c0_11, %c0_12] : memref<72x1024xf32, #tpu.memory_space<vmem>>, vector<71x1024xf32>
    tpu.vector_store %arg7[%c0_11, %c0_12], %10 {strides = array<i32>} : memref<72x1024xf32, #tpu.memory_space<vmem>>, vector<71x1024xf32>,
    %c2 = arith.constant 2 : index
    %c0_13 = arith.constant 0 : index
    %12 = vector.load %arg1[%c2, %c0_13] : memref<72x576xf32, #tpu.memory_space<vmem>>, vector<70x576xf32>
    %13 = arith.truncf %12 : vector<70x576xf32> to vector<70x576xbf16>
    %c0_14 = arith.constant 0 : index
    %c0_15 = arith.constant 0 : index
    %14 = vector.load %arg7[%c0_14, %c0_15] : memref<72x1024xf32, #tpu.memory_space<vmem>>, vector<70x1024xf32>
    %c0_16 = arith.constant 0 : index
    %c0_17 = arith.constant 0 : index
    %15 = vector.load %arg4[%c0_16, %c0_17] : memref<576x1024xbf16, #tpu.memory_space<vmem>>, vector<576x1024xbf16>
    %cst_18 = arith.constant dense<0.000000e+00> : vector<70x1024xf32>
    %16 = tpu.matmul %13, %15, %cst_18 {dimension_numbers = #tpu.dot_dimension_numbers<[1], [0], [0], [1], [0, 0, 1, 1], [], []>} : vector<70x576xbf16>, vector<576x1024xbf16>, vector<70x1024xf32> -> vector<70x1024xf32>
    %17 = arith.addf %14, %16 : vector<70x1024xf32>
    %c0_19 = arith.constant 0 : index
    %c0_20 = arith.constant 0 : index
    %18 = vector.load %arg7[%c0_19, %c0_20] : memref<72x1024xf32, #tpu.memory_space<vmem>>, vector<70x1024xf32>
    tpu.vector_store %arg7[%c0_19, %c0_20], %17 {strides = array<i32>} : memref<72x1024xf32, #tpu.memory_space<vmem>>, vector<70x1024xf32>,
    %c0_21 = arith.constant 0 : index
    %c0_22 = arith.constant 0 : index
    %19 = vector.load %arg7[%c0_21, %c0_22] : memref<72x1024xf32, #tpu.memory_space<vmem>>, vector<72x256xf32>
    %c0_23 = arith.constant 0 : index
    %c256 = arith.constant 256 : index
    %20 = vector.load %arg7[%c0_23, %c256] : memref<72x1024xf32, #tpu.memory_space<vmem>>, vector<72x256xf32>
    %21 = arith.maximumf %19, %20 : vector<72x256xf32>
    %c0_24 = arith.constant 0 : index
    %c512 = arith.constant 512 : index
    %22 = vector.load %arg7[%c0_24, %c512] : memref<72x1024xf32, #tpu.memory_space<vmem>>, vector<72x256xf32>
    %c0_25 = arith.constant 0 : index
    %c768 = arith.constant 768 : index
    %23 = vector.load %arg7[%c0_25, %c768] : memref<72x1024xf32, #tpu.memory_space<vmem>>, vector<72x256xf32>
    %24 = arith.maximumf %22, %23 : vector<72x256xf32>
    %25 = arith.maximumf %21, %24 : vector<72x256xf32>
    %c0_26 = arith.constant 0 : index
    %c0_27 = arith.constant 0 : index
    %26 = vector.load %arg5[%c0_26, %c0_27] : memref<1x256xf32, #tpu.memory_space<vmem>>, vector<1x256xf32>
    %27 = vector.broadcast %26 : vector<1x256xf32> to vector<72x256xf32>
    %28 = arith.addf %25, %27 : vector<72x256xf32>
    %cst_28 = arith.constant 0.000000e+00 : f32
    %29 = vector.broadcast %cst_28 : f32 to vector<72x256xf32>
    %30 = arith.maximumf %28, %29 : vector<72x256xf32>
    %c0_29 = arith.constant 0 : index
    %c0_30 = arith.constant 0 : index
    %31 = vector.load %arg6[%c0_29, %c0_30] : memref<72x256xf32, #tpu.memory_space<vmem>>, vector<72x256xf32>
    tpu.vector_store %arg6[%c0_29, %c0_30], %30 {strides = array<i32>} : memref<72x256xf32, #tpu.memory_space<vmem>>, vector<72x256xf32>,
    return
  }
  func.func @transform_0(%arg0: i32) -> (i32, i32) {
    %c0_i32 = arith.constant 0 : i32
    %c0_i32_0 = arith.constant 0 : i32
    return %arg0, %c0_i32 : i32, i32
  }
  func.func @transform_1(%arg0: i32) -> (i32, i32) {
    %c0_i32 = arith.constant 0 : i32
    %c0_i32_0 = arith.constant 0 : i32
    %c0_i32_1 = arith.constant 0 : i32
    return %c0_i32, %c0_i32_0 : i32, i32
  }
  func.func @transform_2(%arg0: i32) -> (i32, i32) {
    %c0_i32 = arith.constant 0 : i32
    %c0_i32_0 = arith.constant 0 : i32
    %c0_i32_1 = arith.constant 0 : i32
    return %c0_i32, %c0_i32_0 : i32, i32
  }
  func.func @transform_3(%arg0: i32) -> (i32, i32) {
    %c0_i32 = arith.constant 0 : i32
    %c0_i32_0 = arith.constant 0 : i32
    %c0_i32_1 = arith.constant 0 : i32
    return %c0_i32, %c0_i32_0 : i32, i32
  }
  func.func @transform_4(%arg0: i32) -> (i32, i32) {
    %c0_i32 = arith.constant 0 : i32
    %c0_i32_0 = arith.constant 0 : i32
    %c0_i32_1 = arith.constant 0 : i32
    return %c0_i32, %c0_i32_0 : i32, i32
  }
  func.func @transform_5(%arg0: i32) -> (i32, i32) {
    %c0_i32 = arith.constant 0 : i32
    %c0_i32_0 = arith.constant 0 : i32
    return %arg0, %c0_i32 : i32, i32
  }
}

module attributes {stable_mosaic.version = 11 : i64} {
  func.func @_linear_kernel(%arg0: i32, %arg1: memref<8x1568xf32, #tpu.memory_space<vmem>>, %arg2: memref<1568x128xbf16, #tpu.memory_space<vmem>>, %arg3: memref<1x128xf32, #tpu.memory_space<vmem>>, %arg4: memref<8x128xf32, #tpu.memory_space<vmem>>) attributes {dimension_semantics = [#tpu.dimension_semantics<parallel>], iteration_bounds = array<i64: 2>, scalar_prefetch = 0 : i64, scratch_operands = 0 : i64, tpu.core_type = #tpu.core_type<tc>, window_params = [{transform_indices = @transform_0, window_bounds = array<i64: 8, 1568>}, {pipeline_mode = #tpu.pipeline_mode<synchronous>, transform_indices = @transform_1, window_bounds = array<i64: 1568, 128>}, {pipeline_mode = #tpu.pipeline_mode<synchronous>, transform_indices = @transform_2, window_bounds = array<i64: 1, 128>}, {transform_indices = @transform_3, window_bounds = array<i64: 8, 128>}]} {
    %c0 = arith.constant 0 : index
    %c0_0 = arith.constant 0 : index
    %0 = vector.load %arg1[%c0, %c0_0] : memref<8x1568xf32, #tpu.memory_space<vmem>>, vector<8x1568xf32>
    %1 = arith.truncf %0 : vector<8x1568xf32> to vector<8x1568xbf16>
    %c0_1 = arith.constant 0 : index
    %c0_2 = arith.constant 0 : index
    %2 = vector.load %arg2[%c0_1, %c0_2] : memref<1568x128xbf16, #tpu.memory_space<vmem>>, vector<1568x128xbf16>
    %cst = arith.constant dense<0.000000e+00> : vector<8x128xf32>
    %3 = tpu.matmul %1, %2, %cst {dimension_numbers = #tpu.dot_dimension_numbers<[1], [0], [0], [1], [0, 0, 1, 1], [], []>} : vector<8x1568xbf16>, vector<1568x128xbf16>, vector<8x128xf32> -> vector<8x128xf32>
    %c0_3 = arith.constant 0 : index
    %c0_4 = arith.constant 0 : index
    %4 = vector.load %arg3[%c0_3, %c0_4] : memref<1x128xf32, #tpu.memory_space<vmem>>, vector<1x128xf32>
    %5 = vector.broadcast %4 : vector<1x128xf32> to vector<8x128xf32>
    %6 = arith.addf %3, %5 : vector<8x128xf32>
    %c0_5 = arith.constant 0 : index
    %c0_6 = arith.constant 0 : index
    %7 = vector.load %arg4[%c0_5, %c0_6] : memref<8x128xf32, #tpu.memory_space<vmem>>, vector<8x128xf32>
    tpu.vector_store %arg4[%c0_5, %c0_6], %6 {strides = array<i32>} : memref<8x128xf32, #tpu.memory_space<vmem>>, vector<8x128xf32>,
    return
  }
  func.func @transform_0(%arg0: i32) -> (i32, i32) {
    %c0_i32 = arith.constant 0 : i32
    %c0_i32_0 = arith.constant 0 : i32
    return %arg0, %c0_i32 : i32, i32
  }
  func.func @transform_1(%arg0: i32) -> (i32, i32) {
    %c0_i32 = arith.constant 0 : i32
    %c0_i32_0 = arith.constant 0 : i32
    %c0_i32_1 = arith.constant 0 : i32
    return %c0_i32, %c0_i32_0 : i32, i32
  }
  func.func @transform_2(%arg0: i32) -> (i32, i32) {
    %c0_i32 = arith.constant 0 : i32
    %c0_i32_0 = arith.constant 0 : i32
    %c0_i32_1 = arith.constant 0 : i32
    return %c0_i32, %c0_i32_0 : i32, i32
  }
  func.func @transform_3(%arg0: i32) -> (i32, i32) {
    %c0_i32 = arith.constant 0 : i32
    %c0_i32_0 = arith.constant 0 : i32
    return %arg0, %c0_i32 : i32, i32
  }
}

</mosaic_0001>

<bundles_post_ra>
// kernel: convnets_forward.3
= control target key start
LH: loop header
LB: loop body
LE: loop exit
PB: predicated region body
PF: predicated region fallthrough
CT: control target
= control target key end

     0   :  { %10 = vsyncpa [#allocation4], 0  ;;  %s2179_s0 = inlined_call_operand.vmem [shape: f32[32,64], index: 0, kind: input, shape index: {}]   ;;  %s2180_s1 = inlined_call_operand.hbm [shape: bf16[64,1024], index: 1, kind: input, shape index: {}]   ;;  %s2181_s2 = inlined_call_operand.hbm [shape: bf16[64,1024], index: 2, kind: input, shape index: {}]   ;;  %s2182_s3 = inlined_call_operand.hbm [shape: bf16[64,1024], index: 3, kind: input, shape index: {}]   ;;  %s2183_s4 = inlined_call_operand.hbm [shape: f32[1,256], index: 4, kind: input, shape index: {}]   ;;  %s2184_s5 = inlined_call_operand.vmem [shape: f32[32,256], index: 5, kind: output, shape index: {}]  }
   0x1   :  { %11 = vsyncpa [#allocation6], 0 }
   0x2   :  { %12 = vsyncpa [#allocation9], 0  ;;  %s2004_s18 = smov 0  }
   0x3 LB: > { %s1662_s19 = sadd.s32 4294967295, %s1965_s18   ;;  %p1664_p0 = scmp.ge.s32.totalorder %s1965_s18, 1  ;;  %s1965_s18 = sphi %s2004_s18, %s18_s18  }
   0x4   : > { %p159_p1 = scmp.lt.s32.totalorder %s1965_s18, 3  ;;  %p2014_p2 = scmp.eq.s32.totalorder %s1662_s19, 0 }
   0x5   : > { %s1967_s22 = smov [#allocation5]   ;;  %s1968_s24 = smov [#allocation3]  }
   0x6   : > { %p2018_p3 = pnand %p1664_p0, %p159_p1  ;;  %s184_s23 = sshll.u32 %s1967_s22, 4  ;;  %s185_s23 = int_to_ptr.vmem [resolvable:$true] %s184_s23 }
   0x7   : > { %s171_s25 = sshll.u32 %s1968_s24, 4  ;;  %s1969_s27 = smov [#allocation7]   ;;  %s2024_s25 = int_to_ptr.vmem [resolvable:$true] %s171_s25 }
   0x8   : > { %p1807_p4 = pneg %p2018_p3  ;;  %s197_s28 = sshll.u32 %s1969_s27, 4  ;;  %s2032_s28 = int_to_ptr.vmem [resolvable:$true] %s197_s28 }
   0x9   : > { %s1970_s29 = smov [#allocation8]   ;;  %s1854_s6 = scalar_lea.vmem %s185_s23, 4096 }
   0xa   : > { %p2028_p5 = pnand %p2014_p2, %p1807_p4  ;;  %s2034_s30 = sshll.u32 %s1970_s29, 4  ;;  %s212_s30 = int_to_ptr.vmem [resolvable:$true] %s2034_s30 }
   0xb   : > { %p1855_p7 = scmp.ne.s32.totalorder %s185_s23, %s1854_s6  ;;  %p1862_p10 = scmp.lt.s32.totalorder %s185_s23, %s185_s23 }
   0xc   : > { %p1845_p6 = pneg %p2028_p5  ;;  %p1863_p11 = scmp.lt.s32.totalorder %s1854_s6, %s1854_s6 }
   0xe   : > { %p1857_p8 = pnand %p1855_p7, %p1845_p6  ;;  %p1864_p12 = por %p1863_p11, %p1862_p10 }
  0x10   : > { %p1858_p9 = pneg %p1857_p8 }
  0x12   : > { %p1865_p13 = pnand %p1864_p12, %p1858_p9 }
  0x14   : > { %1868 = shalt.err (!%p1865_p13)
}
  0x15   : > { %s1971_s7 = smov 512   ;;  %s1972_s8 = smov 32  }
  0x16   : > { %1813 = dma.hbm_to_vmem [thread:$0]  (!%p2028_p5), %s2181_s2, 4096, %s185_s23, [#allocation6], %s1971_s7, %s1971_s7, %s1972_s8  }
  0x17   : > { %s1880_s11 = scalar_lea.vmem %s2024_s25, 4096  ;;  %p1888_p7 = scmp.lt.s32.totalorder %s2024_s25, %s2024_s25 }
  0x18   : > { %p1881_p0 = scmp.ne.s32.totalorder %s2024_s25, %s1880_s11  ;;  %p1889_p8 = scmp.lt.s32.totalorder %s1880_s11, %s1880_s11 }
  0x1a   : > { %p1883_p1 = pnand %p1881_p0, %p1845_p6  ;;  %p1890_p9 = por %p1889_p8, %p1888_p7 }
  0x1c   : > { %p1884_p4 = pneg %p1883_p1 }
  0x1e   : > { %p1891_p10 = pnand %p1890_p9, %p1884_p4 }
  0x20   : > { %1894 = shalt.err (!%p1891_p10)
}
  0x21   : > { %1810 = dma.hbm_to_vmem [thread:$0]  (!%p2028_p5), %s2180_s1, 4096, %s2024_s25, [#allocation4], %s1971_s7, %s1971_s7, %s1972_s8  }
  0x22   : > { %s1906_s14 = scalar_lea.vmem %s2032_s28, 4096  ;;  %p1914_p0 = scmp.lt.s32.totalorder %s2032_s28, %s2032_s28 }
  0x23   : > { %p1907_p11 = scmp.ne.s32.totalorder %s2032_s28, %s1906_s14  ;;  %p1915_p1 = scmp.lt.s32.totalorder %s1906_s14, %s1906_s14 }
  0x25   : > { %p1909_p12 = pnand %p1907_p11, %p1845_p6  ;;  %p1916_p4 = por %p1915_p1, %p1914_p0 }
  0x27   : > { %p1910_p13 = pneg %p1909_p12 }
  0x29   : > { %p1917_p7 = pnand %p1916_p4, %p1910_p13 }
  0x2b   : > { %1920 = shalt.err (!%p1917_p7)
}
  0x2c   : > { %1816 = dma.hbm_to_vmem [thread:$0]  (!%p2028_p5), %s2182_s3, 4096, %s2032_s28, [#allocation6], %s1971_s7, %s1971_s7, %s1972_s8  }
  0x2d   : > { %s1932_s17 = scalar_lea.vmem %s212_s30, 32  ;;  %p1940_p11 = scmp.lt.s32.totalorder %s212_s30, %s212_s30 }
  0x2e   : > { %p1933_p8 = scmp.ne.s32.totalorder %s212_s30, %s1932_s17  ;;  %p1941_p12 = scmp.lt.s32.totalorder %s1932_s17, %s1932_s17 }
  0x30   : > { %p1935_p9 = pnand %p1933_p8, %p1845_p6  ;;  %p1942_p13 = por %p1941_p12, %p1940_p11 }
  0x32   : > { %p1936_p10 = pneg %p1935_p9 }
  0x34   : > { %p1943_p0 = pnand %p1942_p13, %p1936_p10 }
  0x36   : > { %1946 = shalt.err (!%p1943_p0)
}
  0x37   : > { %1819 = dma.hbm_to_vmem [thread:$0]  (!%p2028_p5), %s2183_s4, 32, %s212_s30, [#allocation9]  }
  0x38   : > { %233 = sbr.rel (%p2018_p3) target bundleno = 385 (0x181), region = 40 }
  0x3d   : > { %1952 = dma.done.wait (%p2014_p2), [#allocation4], 4096  }
  0x3e   : > { %1954 = vsyncadd (%p2014_p2), [#allocation4], 4294963200 }
  0x3f   : > { %1956 = dma.done.wait (%p2014_p2), [#allocation6], 8192  }
  0x40   : > { %1958 = vsyncadd (%p2014_p2), [#allocation6], 4294959104 }
  0x41   : > { %1960 = dma.done.wait (%p2014_p2), [#allocation9], 32  }
  0x42   : > { %1962 = vsyncadd (%p2014_p2), [#allocation9], 4294967264  ;;  %v1973_v0 = vmov 0   ;;  %s1675_s21 = sshll.u32 %s1662_s19, 1  ;;  %v315_v1 = vld [vmem:[#allocation3 + $0xc0] sm:$0xff]  ;;  %v316_v3 = vld [vmem:[#allocation3 + $0xc8] sm:$0xff] }
  0x43   : > { %519 = vmatprep.mubr.bf16.mxu0 %v1973_v0  ;;  %562 = vmatprep.mubr.bf16.mxu1 %v1973_v0  ;;  %p275_p3 = scmp.lt.s32.totalorder %s1675_s21, 3  ;;  %v319_v2 = vld [vmem:[#allocation3 + $0xe0] sm:$0xff]  ;;  %v320_v5 = vld [vmem:[#allocation3 + $0xe8] sm:$0xff]  ;;  %v317_v31 = vld [vmem:[#allocation3 + $0xd0] sm:$0xff]  ;;  %vm483_vm0 = vcmask 523264  }
  0x44   : > { %v1705_v4 = vcombine.high %v315_v1, %v319_v2  ;;  %v1704_v6 = vcombine.low %v315_v1, %v319_v2  ;;  %v307_v7 = vld [vmem:[#allocation3 + $0x80] sm:$0xff]  ;;  %v1707_v9 = vcombine.high %v316_v3, %v320_v5  ;;  %v1706_v10 = vcombine.low %v316_v3, %v320_v5  ;;  %v308_v12 = vld [vmem:[#allocation3 + $0x88] sm:$0xff]  ;;  %v321_v32 = vld [vmem:[#allocation3 + $0xf0] sm:$0xff] }
  0x45   : > { %v311_v8 = vld [vmem:[#allocation3 + $0xa0] sm:$0xff]  ;;  %v312_v13 = vld [vmem:[#allocation3 + $0xa8] sm:$0xff]  ;;  %s2189_s21 = smov (!%p275_p3, %s1675_s21), 3  ;;  %v318_v33 = vld [vmem:[#allocation3 + $0xd8] sm:$0xff]  ;;  %v1709_v39 = vcombine.high %v317_v31, %v321_v32  ;;  %v1708_v46 = vcombine.low %v317_v31, %v321_v32 }
  0x46   : > { %v1697_v11 = vcombine.high %v307_v7, %v311_v8  ;;  %v299_v14 = vld [vmem:[#allocation3 + $0x40] sm:$0xff]  ;;  %495 = vmatprep.subr.bf16.mxu0 %v1705_v4  ;;  %v1699_v15 = vcombine.high %v308_v12, %v312_v13  ;;  %v300_v17 = vld [vmem:[#allocation3 + $0x48] sm:$0xff]  ;;  %538 = vmatprep.subr.bf16.mxu1 %v1707_v9  ;;  %v1696_v19 = vcombine.low %v307_v7, %v311_v8  ;;  %s1676_s19 = sshll.u32 %s2189_s21, 3  ;;  %v322_v34 = vld [vmem:[#allocation3 + $0xf8] sm:$0xff]  ;;  %s1790_s26 = sshll.u32 %s2189_s21, 4 }
  0x47   : > { %v303_v16 = vld [vmem:[#allocation3 + $0x60] sm:$0xff]  ;;  %v304_v18 = vld [vmem:[#allocation3 + $0x68] sm:$0xff]  ;;  %496 = vmatpush1.bf16.msra.mxu0 %v1704_v6  ;;  %539 = vmatpush1.bf16.msra.mxu1 %v1706_v10  ;;  %v1698_v20 = vcombine.low %v308_v12, %v312_v13  ;;  %s2106_s25 = scalar_lea.vmem %s2179_s0, %s1676_s19  ;;  %v1711_v40 = vcombine.high %v318_v33, %v322_v34  ;;  %v309_v41 = vld [vmem:[#allocation3 + $0x90] sm:$0xff]  ;;  %v1710_v47 = vcombine.low %v318_v33, %v322_v34  ;;  %s285_s29 = scalar_lea.vmem %s2184_s5, %s1790_s26 }
  0x48   : > { %497 = vmatprep.subr.bf16.mxu0 %v1697_v11  ;;  %v1689_v21 = vcombine.high %v299_v14, %v303_v16  ;;  %540 = vmatprep.subr.bf16.mxu1 %v1699_v15  ;;  %v1691_v22 = vcombine.high %v300_v17, %v304_v18  ;;  %v291_v23 = vld [vmem:[#allocation3] sm:$0xff]  ;;  %v292_v25 = vld [vmem:[#allocation3 + $0x8] sm:$0xff]  ;;  %v1688_v27 = vcombine.low %v299_v14, %v303_v16  ;;  %v313_v42 = vld [vmem:[#allocation3 + $0xb0] sm:$0xff] }
  0x49   : > { %v295_v24 = vld [vmem:[#allocation3 + $0x20] sm:$0xff]  ;;  %v296_v26 = vld [vmem:[#allocation3 + $0x28] sm:$0xff]  ;;  %v1690_v28 = vcombine.low %v300_v17, %v304_v18  ;;  %v310_v44 = vld [vmem:[#allocation3 + $0x98] sm:$0xff]  ;;  %v1701_v48 = vcombine.high %v309_v41, %v313_v42  ;;  %v1700_v54 = vcombine.low %v309_v41, %v313_v42 }
  0x4a   : > { %v1681_v29 = vcombine.high %v291_v23, %v295_v24  ;;  %v1683_v30 = vcombine.high %v292_v25, %v296_v26  ;;  %v1680_v35 = vcombine.low %v291_v23, %v295_v24  ;;  %v288_v36 = vld [vmem:[%s2106_s25] sm:$0xff]  ;;  %v289_v37 = vld [vmem:[%s2106_s25 + $0x8] sm:$0xff]  ;;  %v1682_v38 = vcombine.low %v292_v25, %v296_v26  ;;  %v314_v45 = vld [vmem:[#allocation3 + $0xb8] sm:$0xff] }
  0x4b   : > { %498 = vmatpush1.bf16.msra.mxu0 %v1696_v19  ;;  %541 = vmatpush1.bf16.msra.mxu1 %v1698_v20  ;;  %v2110_v43 = vpack.c.bf16 %v289_v37, %v288_v36  ;;  %v1703_v49 = vcombine.high %v310_v44, %v314_v45  ;;  %v301_v50 = vld [vmem:[#allocation3 + $0x50] sm:$0xff]  ;;  %v302_v52 = vld [vmem:[#allocation3 + $0x58] sm:$0xff]  ;;  %v1702_v55 = vcombine.low %v310_v44, %v314_v45  ;;  %v718_v3 = vld [vmem:[#allocation5 + $0xc0] sm:$0xff] }
  0x4c   : > { %499 = vmatprep.subr.bf16.mxu0 %v1689_v21  ;;  %542 = vmatprep.subr.bf16.mxu1 %v1691_v22  ;;  %v305_v51 = vld [vmem:[#allocation3 + $0x70] sm:$0xff]  ;;  %v306_v53 = vld [vmem:[#allocation3 + $0x78] sm:$0xff]  ;;  %v722_v4 = vld [vmem:[#allocation5 + $0xe0] sm:$0xff] }
  0x4d   : > { %v1693_v56 = vcombine.high %v301_v50, %v305_v51  ;;  %v1695_v57 = vcombine.high %v302_v52, %v306_v53  ;;  %v293_v58 = vld [vmem:[#allocation3 + $0x10] sm:$0xff]  ;;  %v294_v60 = vld [vmem:[#allocation3 + $0x18] sm:$0xff]  ;;  %v1692_v62 = vcombine.low %v301_v50, %v305_v51  ;;  %v1694_v63 = vcombine.low %v302_v52, %v306_v53  ;;  %v719_v5 = vld [vmem:[#allocation5 + $0xc8] sm:$0xff] }
  0x4e   : > { %v297_v59 = vld [vmem:[#allocation3 + $0x30] sm:$0xff]  ;;  %v298_v61 = vld [vmem:[#allocation3 + $0x38] sm:$0xff]  ;;  %v723_v6 = vld [vmem:[#allocation5 + $0xe8] sm:$0xff]  ;;  %v1741_v9 = vcombine.high %v718_v3, %v722_v4  ;;  %v1740_v15 = vcombine.low %v718_v3, %v722_v4 }
  0x4f   : > { %500 = vmatpush1.bf16.msra.mxu0 %v1688_v27  ;;  %543 = vmatpush1.bf16.msra.mxu1 %v1690_v28  ;;  %v1685_v1 = vcombine.high %v293_v58, %v297_v59  ;;  %v1687_v2 = vcombine.high %v294_v60, %v298_v61  ;;  %v1684_v7 = vcombine.low %v293_v58, %v297_v59  ;;  %v710_v11 = vld [vmem:[#allocation5 + $0x80] sm:$0xff]  ;;  %v711_v13 = vld [vmem:[#allocation5 + $0x88] sm:$0xff]  ;;  %v724_v36 = vld [vmem:[#allocation5 + $0xf0] sm:$0xff] }
  0x50   : > { %501 = vmatprep.subr.bf16.mxu0 %v1681_v29  ;;  %544 = vmatprep.subr.bf16.mxu1 %v1683_v30  ;;  %v1686_v8 = vcombine.low %v294_v60, %v298_v61  ;;  %v1743_v10 = vcombine.high %v719_v5, %v723_v6  ;;  %v714_v12 = vld [vmem:[#allocation5 + $0xa0] sm:$0xff]  ;;  %v715_v14 = vld [vmem:[#allocation5 + $0xa8] sm:$0xff]  ;;  %v1742_v16 = vcombine.low %v719_v5, %v723_v6  ;;  %v721_v37 = vld [vmem:[#allocation5 + $0xd8] sm:$0xff] }
  0x51   : > { %v1733_v17 = vcombine.high %v710_v11, %v714_v12  ;;  %v1735_v18 = vcombine.high %v711_v13, %v715_v14  ;;  %v702_v19 = vld [vmem:[#allocation5 + $0x40] sm:$0xff]  ;;  %v703_v21 = vld [vmem:[#allocation5 + $0x48] sm:$0xff]  ;;  %v1732_v23 = vcombine.low %v710_v11, %v714_v12  ;;  %v1734_v24 = vcombine.low %v711_v13, %v715_v14  ;;  %v712_v45 = vld [vmem:[#allocation5 + $0x90] sm:$0xff] }
  0x52   : > { %v706_v20 = vld [vmem:[#allocation5 + $0x60] sm:$0xff]  ;;  %v707_v22 = vld [vmem:[#allocation5 + $0x68] sm:$0xff] }
  0x53   : > { %502 = vmatpush1.bf16.msra.mxu0 %v1680_v35  ;;  %545 = vmatpush1.bf16.msra.mxu1 %v1682_v38  ;;  %v1725_v25 = vcombine.high %v702_v19, %v706_v20  ;;  %v1727_v26 = vcombine.high %v703_v21, %v707_v22  ;;  %v694_v27 = vld [vmem:[#allocation5] sm:$0xff]  ;;  %v695_v29 = vld [vmem:[#allocation5 + $0x8] sm:$0xff]  ;;  %v1724_v31 = vcombine.low %v702_v19, %v706_v20  ;;  %v720_v35 = vld [vmem:[#allocation5 + $0xd0] sm:$0xff] }
  0x54   : > { %581 = vmatprep.subr.bf16.mxu0 %v1709_v39  ;;  %624 = vmatprep.subr.bf16.mxu1 %v1711_v40  ;;  %v698_v28 = vld [vmem:[#allocation5 + $0x20] sm:$0xff]  ;;  %v699_v30 = vld [vmem:[#allocation5 + $0x28] sm:$0xff]  ;;  %v1726_v32 = vcombine.low %v703_v21, %v707_v22  ;;  %v725_v38 = vld [vmem:[#allocation5 + $0xf8] sm:$0xff]  ;;  %v1744_v50 = vcombine.low %v720_v35, %v724_v36 }
  0x55   : > { %v1717_v33 = vcombine.high %v694_v27, %v698_v28  ;;  %v1719_v34 = vcombine.high %v695_v29, %v699_v30  ;;  %v1716_v39 = vcombine.low %v694_v27, %v698_v28  ;;  %v675_v40 = vld [vmem:[%s2106_s25 + $0x1] sm:$0xff]  ;;  %v676_v41 = vld [vmem:[%s2106_s25 + $0x9] sm:$0x7f]  ;;  %v1718_v42 = vcombine.low %v695_v29, %v699_v30 }
  0x56   : > { %1712 = vmatmul.mubr.msk.bf16.vlgmr.msra.gmra.mxu0 %vm483_vm0, %v2110_v43  ;;  %1713 = vmatmul.mubr.msk.bf16.vlgmr.msra.gmra.mxu1 %vm483_vm0, %v2110_v43  ;;  %v1747_v44 = vcombine.high %v721_v37, %v725_v38  ;;  %v1746_v51 = vcombine.low %v721_v37, %v725_v38 }
  0x57   : > { %582 = vmatpush1.bf16.msra.mxu0 %v1708_v46  ;;  %625 = vmatpush1.bf16.msra.mxu1 %v1710_v47  ;;  %v716_v46 = vld [vmem:[#allocation5 + $0xb0] sm:$0xff]  ;;  %v2126_v47 = vpack.c.bf16 %v676_v41, %v675_v40  ;;  %v1139_v41 = vld [vmem:[#allocation7 + $0xd8] sm:$0xff] }
  0x58   : > { %583 = vmatprep.subr.bf16.mxu0 %v1701_v48  ;;  %626 = vmatprep.subr.bf16.mxu1 %v1703_v49  ;;  %v713_v48 = vld [vmem:[#allocation5 + $0x98] sm:$0xff]  ;;  %v1737_v52 = vcombine.high %v712_v45, %v716_v46  ;;  %v1736_v58 = vcombine.low %v712_v45, %v716_v46  ;;  %v1142_v40 = vld [vmem:[#allocation7 + $0xf0] sm:$0xff]  ;;  %v1094_v45 = vld [vmem:[%s2106_s25 + $0xa] sm:$0x3f] }
  0x59   : > { %605 = vmatprep.mubr.bf16.mxu0 %v1973_v0  ;;  %648 = vmatprep.mubr.bf16.mxu1 %v1973_v0  ;;  %v717_v49 = vld [vmem:[#allocation5 + $0xb8] sm:$0xff] }
  0x5a   : > { %v1739_v53 = vcombine.high %v713_v48, %v717_v49  ;;  %v1738_v59 = vcombine.low %v713_v48, %v717_v49  ;;  %v1130_v49 = vld [vmem:[#allocation7 + $0x90] sm:$0xff] }
  0x5b   : > { %584 = vmatpush1.bf16.msra.mxu0 %v1700_v54  ;;  %627 = vmatpush1.bf16.msra.mxu1 %v1702_v55  ;;  %v704_v54 = vld [vmem:[#allocation5 + $0x50] sm:$0xff] }
  0x5c   : > { %585 = vmatprep.subr.bf16.mxu0 %v1693_v56  ;;  %628 = vmatprep.subr.bf16.mxu1 %v1695_v57  ;;  %v708_v55 = vld [vmem:[#allocation5 + $0x70] sm:$0xff]  ;;  %v705_v56 = vld [vmem:[#allocation5 + $0x58] sm:$0xff] }
  0x5d   : > { %v709_v57 = vld [vmem:[#allocation5 + $0x78] sm:$0xff]  ;;  %v1729_v60 = vcombine.high %v704_v54, %v708_v55  ;;  %v1728_v3 = vcombine.low %v704_v54, %v708_v55 }
  0x5e   : > { %v1731_v61 = vcombine.high %v705_v56, %v709_v57  ;;  %v1730_v4 = vcombine.low %v705_v56, %v709_v57 }
  0x5f   : > { %586 = vmatpush1.bf16.msra.mxu0 %v1692_v62  ;;  %629 = vmatpush1.bf16.msra.mxu1 %v1694_v63  ;;  %v696_v62 = vld [vmem:[#allocation5 + $0x10] sm:$0xff] }
  0x60   : > { %587 = vmatprep.subr.bf16.mxu0 %v1685_v1  ;;  %630 = vmatprep.subr.bf16.mxu1 %v1687_v2  ;;  %v700_v63 = vld [vmem:[#allocation5 + $0x30] sm:$0xff]  ;;  %v697_v1 = vld [vmem:[#allocation5 + $0x18] sm:$0xff] }
  0x61   : > { %v701_v2 = vld [vmem:[#allocation5 + $0x38] sm:$0xff]  ;;  %v1721_v5 = vcombine.high %v696_v62, %v700_v63  ;;  %v1720_v11 = vcombine.low %v696_v62, %v700_v63 }
  0x62   : > { %v1723_v6 = vcombine.high %v697_v1, %v701_v2  ;;  %v1722_v12 = vcombine.low %v697_v1, %v701_v2 }
  0x63   : > { %588 = vmatpush1.bf16.msra.mxu0 %v1684_v7  ;;  %631 = vmatpush1.bf16.msra.mxu1 %v1686_v8  ;;  %v1136_v7 = vld [vmem:[#allocation7 + $0xc0] sm:$0xff] }
  0x64   : > { %897 = vmatprep.subr.bf16.mxu0 %v1741_v9  ;;  %940 = vmatprep.subr.bf16.mxu1 %v1743_v10  ;;  %v1140_v8 = vld [vmem:[#allocation7 + $0xe0] sm:$0xff]  ;;  %v1137_v9 = vld [vmem:[#allocation7 + $0xc8] sm:$0xff] }
  0x65   : > { %v1141_v10 = vld [vmem:[#allocation7 + $0xe8] sm:$0xff]  ;;  %v1777_v13 = vcombine.high %v1136_v7, %v1140_v8  ;;  %v1776_v19 = vcombine.low %v1136_v7, %v1140_v8 }
  0x66   : > { %1714 = vmatmul.mubr.msk.bf16.vlgmr.msra.gmra.mxu0 %vm483_vm0, %v2110_v43  ;;  %1715 = vmatmul.mubr.msk.bf16.vlgmr.msra.gmra.mxu1 %vm483_vm0, %v2110_v43  ;;  %v1745_v43 = vcombine.high %v720_v35, %v724_v36  ;;  %v1779_v14 = vcombine.high %v1137_v9, %v1141_v10  ;;  %v1778_v20 = vcombine.low %v1137_v9, %v1141_v10 }
  0x67   : > { %898 = vmatpush1.bf16.msra.mxu0 %v1740_v15  ;;  %941 = vmatpush1.bf16.msra.mxu1 %v1742_v16  ;;  %v1128_v15 = vld [vmem:[#allocation7 + $0x80] sm:$0xff] }
  0x68   : > { %899 = vmatprep.subr.bf16.mxu0 %v1733_v17  ;;  %942 = vmatprep.subr.bf16.mxu1 %v1735_v18  ;;  %v1132_v16 = vld [vmem:[#allocation7 + $0xa0] sm:$0xff]  ;;  %v1129_v17 = vld [vmem:[#allocation7 + $0x88] sm:$0xff] }
  0x69   : > { %921 = vmatprep.mubr.bf16.mxu0 %v1973_v0  ;;  %964 = vmatprep.mubr.bf16.mxu1 %v1973_v0  ;;  %v1133_v18 = vld [vmem:[#allocation7 + $0xa8] sm:$0xff]  ;;  %v1769_v21 = vcombine.high %v1128_v15, %v1132_v16  ;;  %v1768_v27 = vcombine.low %v1128_v15, %v1132_v16 }
  0x6a   : > { %v1771_v22 = vcombine.high %v1129_v17, %v1133_v18  ;;  %v1770_v28 = vcombine.low %v1129_v17, %v1133_v18 }
  0x6b   : > { %900 = vmatpush1.bf16.msra.mxu0 %v1732_v23  ;;  %943 = vmatpush1.bf16.msra.mxu1 %v1734_v24  ;;  %v1120_v23 = vld [vmem:[#allocation7 + $0x40] sm:$0xff] }
  0x6c   : > { %901 = vmatprep.subr.bf16.mxu0 %v1725_v25  ;;  %944 = vmatprep.subr.bf16.mxu1 %v1727_v26  ;;  %v1124_v24 = vld [vmem:[#allocation7 + $0x60] sm:$0xff]  ;;  %v1121_v25 = vld [vmem:[#allocation7 + $0x48] sm:$0xff] }
  0x6d   : > { %v1125_v26 = vld [vmem:[#allocation7 + $0x68] sm:$0xff]  ;;  %v1761_v29 = vcombine.high %v1120_v23, %v1124_v24  ;;  %v1760_v35 = vcombine.low %v1120_v23, %v1124_v24 }
  0x6e   : > { %v1763_v30 = vcombine.high %v1121_v25, %v1125_v26  ;;  %v1762_v36 = vcombine.low %v1121_v25, %v1125_v26 }
  0x6f   : > { %902 = vmatpush1.bf16.msra.mxu0 %v1724_v31  ;;  %945 = vmatpush1.bf16.msra.mxu1 %v1726_v32  ;;  %v1112_v31 = vld [vmem:[#allocation7] sm:$0xff] }
  0x70   : > { %903 = vmatprep.subr.bf16.mxu0 %v1717_v33  ;;  %946 = vmatprep.subr.bf16.mxu1 %v1719_v34  ;;  %v1116_v32 = vld [vmem:[#allocation7 + $0x20] sm:$0xff]  ;;  %v1113_v33 = vld [vmem:[#allocation7 + $0x8] sm:$0xff] }
  0x71   : > { %v1117_v34 = vld [vmem:[#allocation7 + $0x28] sm:$0xff]  ;;  %v1753_v37 = vcombine.high %v1112_v31, %v1116_v32 }
  0x72   : > { %v1755_v38 = vcombine.high %v1113_v33, %v1117_v34  ;;  %v1754_v46 = vcombine.low %v1113_v33, %v1117_v34 }
  0x73   : > { %904 = vmatpush1.bf16.msra.mxu0 %v1716_v39  ;;  %947 = vmatpush1.bf16.msra.mxu1 %v1718_v42  ;;  %v1138_v39 = vld [vmem:[#allocation7 + $0xd0] sm:$0xff]  ;;  %v1143_v42 = vld [vmem:[#allocation7 + $0xf8] sm:$0xff] }
  0x74   : > { %983 = vmatprep.subr.bf16.mxu0 %v1745_v43  ;;  %1026 = vmatprep.subr.bf16.mxu1 %v1747_v44  ;;  %v1752_v43 = vcombine.low %v1112_v31, %v1116_v32  ;;  %v1093_v44 = vld [vmem:[%s2106_s25 + $0x2] sm:$0xff]  ;;  %v1783_v48 = vcombine.high %v1139_v41, %v1143_v42  ;;  %v1780_v54 = vcombine.low %v1138_v39, %v1142_v40 }
  0x75   : > { %v1782_v55 = vcombine.low %v1139_v41, %v1143_v42 }
  0x76   : > { %1748 = vmatmul.mubr.msk.bf16.vlgmr.msra.gmra.mxu0 %vm483_vm0, %v2126_v47  ;;  %1749 = vmatmul.mubr.msk.bf16.vlgmr.msra.gmra.mxu1 %vm483_vm0, %v2126_v47 }
  0x77   : > { %984 = vmatpush1.bf16.msra.mxu0 %v1744_v50  ;;  %1027 = vmatpush1.bf16.msra.mxu1 %v1746_v51  ;;  %v1134_v50 = vld [vmem:[#allocation7 + $0xb0] sm:$0xff]  ;;  %v1095_v51 = vpack.c.bf16 %v1094_v45, %v1093_v44 }
  0x78   : > { %985 = vmatprep.subr.bf16.mxu0 %v1737_v52  ;;  %1028 = vmatprep.subr.bf16.mxu1 %v1739_v53  ;;  %v1131_v52 = vld [vmem:[#allocation7 + $0x98] sm:$0xff]  ;;  %v1773_v56 = vcombine.high %v1130_v49, %v1134_v50  ;;  %v1772_v62 = vcombine.low %v1130_v49, %v1134_v50 }
  0x79   : > { %1007 = vmatprep.mubr.bf16.mxu0 %v1973_v0  ;;  %1050 = vmatprep.mubr.bf16.mxu1 %v1973_v0  ;;  %v1135_v53 = vld [vmem:[#allocation7 + $0xb8] sm:$0xff] }
  0x7a   : > { %v1775_v57 = vcombine.high %v1131_v52, %v1135_v53  ;;  %v1774_v63 = vcombine.low %v1131_v52, %v1135_v53 }
  0x7b   : > { %986 = vmatpush1.bf16.msra.mxu0 %v1736_v58  ;;  %1029 = vmatpush1.bf16.msra.mxu1 %v1738_v59  ;;  %v1122_v58 = vld [vmem:[#allocation7 + $0x50] sm:$0xff] }
  0x7c   : > { %987 = vmatprep.subr.bf16.mxu0 %v1729_v60  ;;  %1030 = vmatprep.subr.bf16.mxu1 %v1731_v61  ;;  %v1126_v59 = vld [vmem:[#allocation7 + $0x70] sm:$0xff]  ;;  %v1123_v60 = vld [vmem:[#allocation7 + $0x58] sm:$0xff] }
  0x7d   : > { %v1127_v61 = vld [vmem:[#allocation7 + $0x78] sm:$0xff]  ;;  %v1765_v1 = vcombine.high %v1122_v58, %v1126_v59  ;;  %v1764_v7 = vcombine.low %v1122_v58, %v1126_v59 }
  0x7e   : > { %v1767_v2 = vcombine.high %v1123_v60, %v1127_v61  ;;  %v1766_v8 = vcombine.low %v1123_v60, %v1127_v61 }
  0x7f   : > { %988 = vmatpush1.bf16.msra.mxu0 %v1728_v3  ;;  %1031 = vmatpush1.bf16.msra.mxu1 %v1730_v4  ;;  %v1114_v3 = vld [vmem:[#allocation7 + $0x10] sm:$0xff] }
  0x80   : > { %989 = vmatprep.subr.bf16.mxu0 %v1721_v5  ;;  %1032 = vmatprep.subr.bf16.mxu1 %v1723_v6  ;;  %v1118_v4 = vld [vmem:[#allocation7 + $0x30] sm:$0xff]  ;;  %v1115_v5 = vld [vmem:[#allocation7 + $0x18] sm:$0xff] }
  0x81   : > { %v1119_v6 = vld [vmem:[#allocation7 + $0x38] sm:$0xff]  ;;  %v1757_v9 = vcombine.high %v1114_v3, %v1118_v4 }
  0x82   : > { %v1759_v10 = vcombine.high %v1115_v5, %v1119_v6 }
  0x83   : > { %990 = vmatpush1.bf16.msra.mxu0 %v1720_v11  ;;  %1033 = vmatpush1.bf16.msra.mxu1 %v1722_v12  ;;  %v1756_v11 = vcombine.low %v1114_v3, %v1118_v4  ;;  %v1758_v12 = vcombine.low %v1115_v5, %v1119_v6 }
  0x84   : > { %1315 = vmatprep.subr.bf16.mxu0 %v1777_v13  ;;  %1358 = vmatprep.subr.bf16.mxu1 %v1779_v14 }
  0x86   : > { %1750 = vmatmul.mubr.msk.bf16.vlgmr.msra.gmra.mxu0 %vm483_vm0, %v2126_v47  ;;  %1751 = vmatmul.mubr.msk.bf16.vlgmr.msra.gmra.mxu1 %vm483_vm0, %v2126_v47  ;;  %v1781_v47 = vcombine.high %v1138_v39, %v1142_v40 }
  0x87   : > { %1316 = vmatpush1.bf16.msra.mxu0 %v1776_v19  ;;  %1359 = vmatpush1.bf16.msra.mxu1 %v1778_v20 }
  0x88   : > { %1317 = vmatprep.subr.bf16.mxu0 %v1769_v21  ;;  %1360 = vmatprep.subr.bf16.mxu1 %v1771_v22 }
  0x89   : > { %1339 = vmatprep.mubr.bf16.mxu0 %v1973_v0  ;;  %1382 = vmatprep.mubr.bf16.mxu1 %v1973_v0 }
  0x8b   : > { %1318 = vmatpush1.bf16.msra.mxu0 %v1768_v27  ;;  %1361 = vmatpush1.bf16.msra.mxu1 %v1770_v28 }
  0x8c   : > { %1319 = vmatprep.subr.bf16.mxu0 %v1761_v29  ;;  %1362 = vmatprep.subr.bf16.mxu1 %v1763_v30 }
  0x8f   : > { %1320 = vmatpush1.bf16.msra.mxu0 %v1760_v35  ;;  %1363 = vmatpush1.bf16.msra.mxu1 %v1762_v36 }
  0x90   : > { %1321 = vmatprep.subr.bf16.mxu0 %v1753_v37  ;;  %1364 = vmatprep.subr.bf16.mxu1 %v1755_v38 }
  0x93   : > { %1322 = vmatpush1.bf16.msra.mxu0 %v1752_v43  ;;  %1365 = vmatpush1.bf16.msra.mxu1 %v1754_v46 }
  0x94   : > { %1401 = vmatprep.subr.bf16.mxu0 %v1781_v47  ;;  %1444 = vmatprep.subr.bf16.mxu1 %v1783_v48 }
  0x96   : > { %1784 = vmatmul.mubr.msk.bf16.vlgmr.msra.gmra.mxu0 %vm483_vm0, %v1095_v51  ;;  %1785 = vmatmul.mubr.msk.bf16.vlgmr.msra.gmra.mxu1 %vm483_vm0, %v1095_v51 }
  0x97   : > { %1402 = vmatpush1.bf16.msra.mxu0 %v1780_v54  ;;  %1445 = vmatpush1.bf16.msra.mxu1 %v1782_v55 }
  0x98   : > { %1403 = vmatprep.subr.bf16.mxu0 %v1773_v56  ;;  %1446 = vmatprep.subr.bf16.mxu1 %v1775_v57 }
  0x99   : > { %1425 = vmatprep.mubr.bf16.mxu0 %v1973_v0  ;;  %1468 = vmatprep.mubr.bf16.mxu1 %v1973_v0 }
  0x9b   : > { %1404 = vmatpush1.bf16.msra.mxu0 %v1772_v62  ;;  %1447 = vmatpush1.bf16.msra.mxu1 %v1774_v63 }
  0x9c   : > { %1405 = vmatprep.subr.bf16.mxu0 %v1765_v1  ;;  %1448 = vmatprep.subr.bf16.mxu1 %v1767_v2 }
  0x9f   : > { %1406 = vmatpush1.bf16.msra.mxu0 %v1764_v7  ;;  %1449 = vmatpush1.bf16.msra.mxu1 %v1766_v8 }
  0xa0   : > { %1407 = vmatprep.subr.bf16.mxu0 %v1757_v9  ;;  %1450 = vmatprep.subr.bf16.mxu1 %v1759_v10 }
  0xa3   : > { %1408 = vmatpush1.bf16.msra.mxu0 %v1756_v11  ;;  %1451 = vmatpush1.bf16.msra.mxu1 %v1758_v12 }
  0xa6   : > { %1786 = vmatmul.mubr.msk.bf16.vlgmr.msra.gmra.mxu0 %vm483_vm0, %v1095_v51  ;;  %1787 = vmatmul.mubr.msk.bf16.vlgmr.msra.gmra.mxu1 %vm483_vm0, %v1095_v51 }
 0x116   : > { %v2148_v0 = vpop.f32.mrf.mxu0  ;;  %v2150_v13 = vpop.f32.mrf.mxu1 }
 0x118   : > { %v2152_v14 = vpop.f32.mrf.mxu0  ;;  %v2154_v15 = vpop.f32.mrf.mxu1 }
 0x11a   : > { %v525_v16 = vpop.f32.mrf.mxu0  ;;  %v568_v17 = vpop.f32.mrf.mxu1 }
 0x11b   : > { %667 = vst [vmem:[#allocation2 + $0x40] sm:$0xff] %v525_v16  ;;  %669 = vst [vmem:[#allocation2 + $0x10] sm:$0xff] %v568_v17 }
 0x11c   : > { %v527_v18 = vpop.f32.mrf.mxu0  ;;  %v570_v19 = vpop.f32.mrf.mxu1 }
 0x11d   : > { %668 = vst [vmem:[#allocation2 + $0x20] sm:$0xff] %v527_v18  ;;  %670 = vst [vmem:[#allocation2 + $0x38] sm:$0xff] %v570_v19 }
 0x122   : > { %v686_v32 = vld [vmem:[#allocation2 + $0x40] sm:$0x7f]  ;;  %v688_v35 = vld [vmem:[#allocation2 + $0x10] sm:$0x7f] }
 0x124   : > { %v687_v38 = vld [vmem:[#allocation2 + $0x20] sm:$0x7f]  ;;  %v689_v41 = vld [vmem:[#allocation2 + $0x38] sm:$0x7f] }
 0x126   : > { %v2156_v20 = vpop.f32.mrf.mxu0  ;;  %v2158_v21 = vpop.f32.mrf.mxu1 }
 0x128   : > { %v2160_v22 = vpop.f32.mrf.mxu0  ;;  %v2162_v23 = vpop.f32.mrf.mxu1 }
 0x12a   : > { %v611_v24 = vpop.f32.mrf.mxu0  ;;  %v654_v25 = vpop.f32.mrf.mxu1 }
 0x12b   : > { %671 = vst [vmem:[#allocation2 + $0x60] sm:$0xff] %v611_v24  ;;  %673 = vst [vmem:[#allocation2 + $0x78] sm:$0xff] %v654_v25 }
 0x12c   : > { %v613_v26 = vpop.f32.mrf.mxu0  ;;  %v656_v27 = vpop.f32.mrf.mxu1 }
 0x12d   : > { %672 = vst [vmem:[#allocation2 + $0x70] sm:$0xff] %v613_v26  ;;  %674 = vst [vmem:[#allocation2 + $0x28] sm:$0xff] %v656_v27 }
 0x132   : > { %v690_v48 = vld [vmem:[#allocation2 + $0x60] sm:$0x7f]  ;;  %v692_v51 = vld [vmem:[#allocation2 + $0x78] sm:$0x7f] }
 0x134   : > { %v691_v54 = vld [vmem:[#allocation2 + $0x70] sm:$0x7f]  ;;  %v693_v57 = vld [vmem:[#allocation2 + $0x28] sm:$0x7f] }
 0x136   : > { %v923_v28 = vpop.f32.mrf.mxu0  ;;  %v966_v29 = vpop.f32.mrf.mxu1 }
 0x137   : > { %v1061_v60 = vadd.f32 %v923_v28, %v2148_v0  ;;  %v1063_v61 = vadd.f32 %v966_v29, %v2150_v13 }
 0x138   : > { %v925_v30 = vpop.f32.mrf.mxu0  ;;  %v968_v31 = vpop.f32.mrf.mxu1 }
 0x139   : > { %v1062_v63 = vadd.f32 %v925_v30, %v2152_v14  ;;  %v1064_v3 = vadd.f32 %v968_v31, %v2154_v15  ;;  %v1541_v15 = vlaneseq }
 0x13a   : > { %v927_v33 = vpop.f32.mrf.mxu0  ;;  %v970_v36 = vpop.f32.mrf.mxu1 }
 0x13b   : > { %v1069_v34 = vadd.f32 %v927_v33, %v686_v32  ;;  %v1071_v37 = vadd.f32 %v970_v36, %v688_v35  ;;  %v1542_v25 = vshrl.u32 %v1541_v15, 7  ;;  %v1539_v33 = vld [vmem:[#allocation8] sm:$0x3] }
 0x13c   : > { %v929_v39 = vpop.f32.mrf.mxu0  ;;  %v972_v42 = vpop.f32.mrf.mxu1 }
 0x13d   : > { %1085 = vst [vmem:[#allocation2 + $0x40] sm:$0x7f] %v1069_v34  ;;  %v1070_v40 = vadd.f32 %v929_v39, %v687_v38  ;;  %1087 = vst [vmem:[#allocation2 + $0x10] sm:$0x7f] %v1071_v37  ;;  %v1072_v43 = vadd.f32 %v972_v42, %v689_v41  ;;  %v1543_v29 = vsub.s32 0, %v1542_v25  ;;  %v1547_v34 = vsub.s32 1, %v1542_v25 }
 0x13f   : > { %1086 = vst [vmem:[#allocation2 + $0x20] sm:$0x7f] %v1070_v40  ;;  %1088 = vst [vmem:[#allocation2 + $0x38] sm:$0x7f] %v1072_v43 }
 0x144   : > { %v1104_v9 = vld [vmem:[#allocation2 + $0x40] sm:$0x3f]  ;;  %v1106_v12 = vld [vmem:[#allocation2 + $0x10] sm:$0x3f] }
 0x146   : > { %v1009_v44 = vpop.f32.mrf.mxu0  ;;  %v1052_v45 = vpop.f32.mrf.mxu1  ;;  %v1105_v17 = vld [vmem:[#allocation2 + $0x20] sm:$0x3f]  ;;  %v1107_v14 = vld [vmem:[#allocation2 + $0x38] sm:$0x3f] }
 0x147   : > { %v1065_v26 = vadd.f32 %v1009_v44, %v2156_v20  ;;  %v1067_v27 = vadd.f32 %v1052_v45, %v2158_v21  ;;  %v1544_v20 = vrot.slane %v1539_v33, %v1543_v29  ;;  %v1548_v44 = vrot.slane %v1539_v33, %v1547_v34 }
 0x148   : > { %v1011_v46 = vpop.f32.mrf.mxu0  ;;  %v1054_v47 = vpop.f32.mrf.mxu1 }
 0x149   : > { %v1066_v30 = vadd.f32 %v1011_v46, %v2160_v22  ;;  %v1068_v35 = vadd.f32 %v1054_v47, %v2162_v23 }
 0x14a   : > { %v1013_v49 = vpop.f32.mrf.mxu0  ;;  %v1056_v52 = vpop.f32.mrf.mxu1 }
 0x14b   : > { %v1073_v50 = vadd.f32 %v1013_v49, %v690_v48  ;;  %v1075_v53 = vadd.f32 %v1056_v52, %v692_v51 }
 0x14c   : > { %v1015_v55 = vpop.f32.mrf.mxu0  ;;  %v1058_v58 = vpop.f32.mrf.mxu1 }
 0x14d   : > { %1089 = vst [vmem:[#allocation2 + $0x60] sm:$0x7f] %v1073_v50  ;;  %v1074_v56 = vadd.f32 %v1015_v55, %v691_v54  ;;  %1091 = vst [vmem:[#allocation2 + $0x78] sm:$0x7f] %v1075_v53  ;;  %v1076_v59 = vadd.f32 %v1058_v58, %v693_v57 }
 0x14f   : > { %1090 = vst [vmem:[#allocation2 + $0x70] sm:$0x7f] %v1074_v56  ;;  %1092 = vst [vmem:[#allocation2 + $0x28] sm:$0x7f] %v1076_v59 }
 0x154   : > { %v1108_v21 = vld [vmem:[#allocation2 + $0x60] sm:$0x3f]  ;;  %v1110_v22 = vld [vmem:[#allocation2 + $0x78] sm:$0x3f] }
 0x156   : > { %v1341_v62 = vpop.f32.mrf.mxu0  ;;  %v1384_v2 = vpop.f32.mrf.mxu1  ;;  %v1109_v23 = vld [vmem:[#allocation2 + $0x70] sm:$0x3f]  ;;  %v1111_v53 = vld [vmem:[#allocation2 + $0x28] sm:$0x3f] }
 0x157   : > { %v1479_v1 = vadd.f32 %v1341_v62, %v1061_v60  ;;  %v1481_v4 = vadd.f32 %v1384_v2, %v1063_v61 }
 0x158   : > { %v1343_v5 = vpop.f32.mrf.mxu0  ;;  %v1386_v7 = vpop.f32.mrf.mxu1 }
 0x159   : > { %v1480_v6 = vadd.f32 %v1343_v5, %v1062_v63  ;;  %v1482_v8 = vadd.f32 %v1386_v7, %v1064_v3  ;;  %v1519_v40 = vmax.f32 %v1479_v1, %v1481_v4 }
 0x15a   : > { %v1345_v10 = vpop.f32.mrf.mxu0  ;;  %v1388_v16 = vpop.f32.mrf.mxu1 }
 0x15b   : > { %v1487_v11 = vadd.f32 %v1345_v10, %v1104_v9  ;;  %v1489_v0 = vadd.f32 %v1388_v16, %v1106_v12  ;;  %v1520_v48 = vmax.f32 %v1480_v6, %v1482_v8 }
 0x15c   : > { %v1347_v13 = vpop.f32.mrf.mxu0  ;;  %v1390_v19 = vpop.f32.mrf.mxu1 }
 0x15d   : > { %1503 = vst [vmem:[#allocation2 + $0x40] sm:$0x3f] %v1487_v11  ;;  %v1488_v18 = vadd.f32 %v1347_v13, %v1105_v17  ;;  %1505 = vst [vmem:[#allocation2 + $0x10] sm:$0x3f] %v1489_v0  ;;  %v1490_v24 = vadd.f32 %v1390_v19, %v1107_v14 }
 0x15f   : > { %1504 = vst [vmem:[#allocation2 + $0x20] sm:$0x3f] %v1488_v18  ;;  %1506 = vst [vmem:[#allocation2 + $0x38] sm:$0x3f] %v1490_v24 }
 0x164   : > { %v1513_v61 = vld [vmem:[#allocation2 + $0x40] sm:$0xff]  ;;  %v1517_v62 = vld [vmem:[#allocation2 + $0x10] sm:$0xff] }
 0x165   : > { %v1521_v4 = vmax.f32 %v1513_v61, %v1517_v62 }
 0x166   : > { %v1427_v28 = vpop.f32.mrf.mxu0  ;;  %v1470_v32 = vpop.f32.mrf.mxu1  ;;  %v1514_v1 = vld [vmem:[#allocation2 + $0x20] sm:$0xff]  ;;  %v1518_v2 = vld [vmem:[#allocation2 + $0x38] sm:$0xff] }
 0x167   : > { %v1483_v31 = vadd.f32 %v1427_v28, %v1065_v26  ;;  %v1485_v36 = vadd.f32 %v1470_v32, %v1067_v27  ;;  %v1522_v8 = vmax.f32 %v1514_v1, %v1518_v2 }
 0x168   : > { %v1429_v37 = vpop.f32.mrf.mxu0  ;;  %v1472_v39 = vpop.f32.mrf.mxu1 }
 0x169   : > { %v1484_v38 = vadd.f32 %v1429_v37, %v1066_v30  ;;  %v1531_v41 = vmax.f32 %v1483_v31, %v1485_v36  ;;  %v1486_v42 = vadd.f32 %v1472_v39, %v1068_v35 }
 0x16a   : > { %v1431_v43 = vpop.f32.mrf.mxu0  ;;  %v1474_v46 = vpop.f32.mrf.mxu1 }
 0x16b   : > { %v1491_v45 = vadd.f32 %v1431_v43, %v1108_v21  ;;  %v1535_v49 = vmax.f32 %v1519_v40, %v1531_v41  ;;  %v1532_v50 = vmax.f32 %v1484_v38, %v1486_v42  ;;  %v1493_v51 = vadd.f32 %v1474_v46, %v1110_v22 }
 0x16c   : > { %v1433_v47 = vpop.f32.mrf.mxu0  ;;  %v1476_v54 = vpop.f32.mrf.mxu1 }
 0x16d   : > { %1507 = vst [vmem:[#allocation2 + $0x60] sm:$0x3f] %v1491_v45  ;;  %v1492_v52 = vadd.f32 %v1433_v47, %v1109_v23  ;;  %v1551_v55 = vadd.f32 %v1544_v20, %v1535_v49  ;;  %v1536_v56 = vmax.f32 %v1520_v48, %v1532_v50  ;;  %1509 = vst [vmem:[#allocation2 + $0x78] sm:$0x3f] %v1493_v51 }
 0x16e   : > { %v1494_v57 = vadd.f32 %v1476_v54, %v1111_v53 }
 0x16f   : > { %1508 = vst [vmem:[#allocation2 + $0x70] sm:$0x3f] %v1492_v52  ;;  %v1555_v58 = vmax.f32 %v1551_v55, 0.0  ;;  %v1552_v59 = vadd.f32 %v1548_v44, %v1536_v56 }
 0x170   : > { %1510 = vst [vmem:[#allocation2 + $0x28] sm:$0x3f] %v1494_v57 }
 0x171   : > { %1559 = vst [vmem:[%s285_s29] sm:$0xff] %v1555_v58  ;;  %v1556_v60 = vmax.f32 %v1552_v59, 0.0 }
 0x173   : > { %1560 = vst [vmem:[%s285_s29 + $0x8] sm:$0xff] %v1556_v60 }
 0x174   : > { %v1525_v63 = vld [vmem:[#allocation2 + $0x60] sm:$0xff]  ;;  %v1529_v3 = vld [vmem:[#allocation2 + $0x78] sm:$0xff] }
 0x175   : > { %v1533_v5 = vmax.f32 %v1525_v63, %v1529_v3 }
 0x176   : > { %v1526_v6 = vld [vmem:[#allocation2 + $0x70] sm:$0xff] }
 0x177   : > { %v1530_v7 = vld [vmem:[#allocation2 + $0x28] sm:$0xff]  ;;  %v1537_v9 = vmax.f32 %v1521_v4, %v1533_v5 }
 0x178   : > { %v1534_v10 = vmax.f32 %v1526_v6, %v1530_v7 }
 0x179   : > { %v1553_v11 = vadd.f32 %v1544_v20, %v1537_v9 }
 0x17a   : > { %v1538_v12 = vmax.f32 %v1522_v8, %v1534_v10 }
 0x17b   : > { %v1557_v16 = vmax.f32 %v1553_v11, 0.0 }
 0x17c   : > { %v1554_v0 = vadd.f32 %v1548_v44, %v1538_v12 }
 0x17d   : > { %1561 = vst [vmem:[%s285_s29 + $0x10] sm:$0xff] %v1557_v16 }
 0x17e   : > { %v1558_v17 = vmax.f32 %v1554_v0, 0.0 }
 0x180   : > { %1562 = vst [vmem:[%s285_s29 + $0x18] sm:$0xff] %v1558_v17 }
 0x181 PF: > { %s18_s18 = sadd.s32 1, %s1965_s18  }
 0x182   : > { %p15_p2 = scmp.ge.s32.totalorder %s18_s18, 4  }
 0x184   :  { %17 = sbr.rel (!%p15_p2) target bundleno = 3 (0x3), region = 87 }
 0x189   :  { %1587 = vsyncpa [#allocation4], 1 }
 0x18a   :  { %1589 = vsyncpa [#allocation4 + $0x1], 1 }
 0x18b   :  { %1590 = vsyncpa [#allocation6], 1 }
 0x18c   :  { %1591 = vsyncpa [#allocation9], 1 }

// kernel: convnets_forward.5
= control target key start
LH: loop header
LB: loop body
LE: loop exit
PB: predicated region body
PF: predicated region fallthrough
CT: control target
= control target key end

     0   :  { %s1716_s12 = smov 0   ;;  %s2053_s0 = inlined_call_operand.vmem [shape: f32[16,1568], index: 0, kind: input, shape index: {}]   ;;  %s2054_s1 = inlined_call_operand.vmem [shape: bf16[1568,128], index: 1, kind: input, shape index: {}]   ;;  %s2055_s2 = inlined_call_operand.vmem [shape: f32[1,128], index: 2, kind: input, shape index: {}]   ;;  %s2056_s3 = inlined_call_operand.vmem [shape: f32[16,128], index: 3, kind: output, shape index: {}]  }
   0x1 LB: > { %s1325_s13 = sadd.s32 4294967295, %s1692_s12   ;;  %p1329_p0 = scmp.ge.s32.totalorder %s1692_s12, 1  ;;  %s1692_s12 = sphi %s1716_s12, %s13_s12  }
   0x2   : > { %p137_p1 = scmp.lt.s32.totalorder %s1692_s12, 3 }
   0x4   : > { %p138_p2 = pnand %p1329_p0, %p137_p1 }
   0x5   : > { %p160_p3 = scmp.lt.s32.totalorder (!%p138_p2), %s1325_s13, 1 }
   0x6   : > { %141 = sbr.rel (%p138_p2) target bundleno = 316 (0x13c), region = 32 }
   0xb   : > { %v1588_v0 = vld [vmem:[%s2054_s1 + $0x78] sm:$0xff]   ;;  %v1592_v4 = vld [vmem:[%s2054_s1 + $0x70] sm:$0xff]   ;;  %v1596_v8 = vld [vmem:[%s2054_s1 + $0x68] sm:$0xff]   ;;  %s2058_s13 = smov (!%p160_p3, %s1325_s13), 1  ;;  %vm1695_vm0 = vmmov 0   ;;  %vm987_vm1 = vcmask 261120  }
   0xc   : > { %v1589_v1 = vld [vmem:[%s2054_s1 + $0xf8] sm:$0xff]   ;;  %1434 = vmatprep.subr.bf16.mxu0 %v1588_v0  ;;  %v1593_v5 = vld [vmem:[%s2054_s1 + $0xf0] sm:$0xff]   ;;  %v1597_v9 = vld [vmem:[%s2054_s1 + $0xe8] sm:$0xff]   ;;  %s1577_s16 = smul.u32 104, %s2058_s13  ;;  %s1331_s20 = sshll.u32 %s2058_s13, 3 }
   0xd   : > { %v1590_v2 = vld [vmem:[%s2054_s1 + $0x38] sm:$0xff]   ;;  %1456 = vmatprep.subr.bf16.mxu1 %v1589_v1  ;;  %v1594_v6 = vld [vmem:[%s2054_s1 + $0x30] sm:$0xff]   ;;  %v1598_v10 = vld [vmem:[%s2054_s1 + $0x28] sm:$0xff]   ;;  %s168_s23 = scalar_lea.vmem %s2056_s3, %s1331_s20 }
   0xe   : > { %v1591_v3 = vld [vmem:[%s2054_s1 + $0xb8] sm:$0xff]   ;;  %1435 = vmatpush3.bf16.msra.mxu0 %v1590_v2  ;;  %v1595_v7 = vld [vmem:[%s2054_s1 + $0xb0] sm:$0xff]   ;;  %v1599_v11 = vld [vmem:[%s2054_s1 + $0xa8] sm:$0xff]   ;;  %s1824_s27 = scalar_lea.vmem %s2053_s0, %s1577_s16 }
   0xf   : > { %1457 = vmatpush3.bf16.msra.mxu1 %v1591_v3  ;;  %1436 = vmatprep.subr.bf16.mxu0 %v1592_v4  ;;  %v1600_v12 = vld [vmem:[%s2054_s1 + $0x60] sm:$0xff]   ;;  %v1604_v16 = vld [vmem:[%s2054_s1 + $0x58] sm:$0xff]   ;;  %v1608_v20 = vld [vmem:[%s2054_s1 + $0x50] sm:$0xff]  }
  0x10   : > { %1458 = vmatprep.subr.bf16.mxu1 %v1593_v5  ;;  %v1601_v13 = vld [vmem:[%s2054_s1 + $0xe0] sm:$0xff]   ;;  %v1605_v17 = vld [vmem:[%s2054_s1 + $0xd8] sm:$0xff]   ;;  %v1609_v21 = vld [vmem:[%s2054_s1 + $0xd0] sm:$0xff]  }
  0x11   : > { %v1602_v14 = vld [vmem:[%s2054_s1 + $0x20] sm:$0xff]   ;;  %v1606_v18 = vld [vmem:[%s2054_s1 + $0x18] sm:$0xff]   ;;  %v1610_v22 = vld [vmem:[%s2054_s1 + $0x10] sm:$0xff]  }
  0x12   : > { %1437 = vmatpush3.bf16.msra.mxu0 %v1594_v6  ;;  %v1603_v15 = vld [vmem:[%s2054_s1 + $0xa0] sm:$0xff]   ;;  %v1607_v19 = vld [vmem:[%s2054_s1 + $0x98] sm:$0xff]   ;;  %v1611_v23 = vld [vmem:[%s2054_s1 + $0x90] sm:$0xff]  }
  0x13   : > { %1459 = vmatpush3.bf16.msra.mxu1 %v1595_v7  ;;  %1438 = vmatprep.subr.bf16.mxu0 %v1596_v8  ;;  %v1612_v24 = vld [vmem:[%s2054_s1 + $0x48] sm:$0xff]   ;;  %v1616_v28 = vld [vmem:[%s2054_s1 + $0x40] sm:$0xff]   ;;  %v173_v34 = vld [vmem:[%s1824_s27 + $0x18] sm:$0xff] }
  0x14   : > { %1460 = vmatprep.subr.bf16.mxu1 %v1597_v9  ;;  %v1613_v25 = vld [vmem:[%s2054_s1 + $0xc8] sm:$0xff]   ;;  %v1617_v29 = vld [vmem:[%s2054_s1 + $0xc0] sm:$0xff]   ;;  %v186_v37 = vpack.c.bf16 %v173_v34, %v173_v34  ;;  %v1620_v38 = vld [vmem:[%s2054_s1 + $0x178] sm:$0xff]  }
  0x15   : > { %v1614_v26 = vld [vmem:[%s2054_s1 + $0x8] sm:$0xff]   ;;  %v1618_v30 = vld [vmem:[%s2054_s1] sm:$0xff]   ;;  %v1621_v39 = vld [vmem:[%s2054_s1 + $0x1f8] sm:$0xff]  }
  0x16   : > { %1439 = vmatpush3.bf16.msra.mxu0 %v1598_v10  ;;  %v1615_v27 = vld [vmem:[%s2054_s1 + $0x88] sm:$0xff]   ;;  %v1619_v31 = vld [vmem:[%s2054_s1 + $0x80] sm:$0xff]   ;;  %1063 = vmatprep.mubr.bf16.mxu1 %v186_v37  ;;  %v172_v40 = vld [vmem:[%s1824_s27 + $0x10] sm:$0xff] }
  0x17   : > { %1461 = vmatpush3.bf16.msra.mxu1 %v1599_v11  ;;  %1440 = vmatprep.subr.bf16.mxu0 %v1600_v12  ;;  %v171_v32 = vld [vmem:[%s1824_s27 + $0x8] sm:$0xff]  ;;  %v170_v33 = vld [vmem:[%s1824_s27] sm:$0xff]  ;;  %v185_v41 = vpack.c.bf16 %v172_v40, %v172_v40  ;;  %v1622_v42 = vld [vmem:[%s2054_s1 + $0x138] sm:$0xff]  }
  0x18   : > { %1462 = vmatprep.subr.bf16.mxu1 %v1601_v13  ;;  %v184_v35 = vpack.c.bf16 %v171_v32, %v171_v32  ;;  %v183_v36 = vpack.c.bf16 %v170_v33, %v170_v33  ;;  %v1623_v43 = vld [vmem:[%s2054_s1 + $0x1b8] sm:$0xff]   ;;  %v1624_v44 = vld [vmem:[%s2054_s1 + $0x170] sm:$0xff]   ;;  %v1628_v48 = vld [vmem:[%s2054_s1 + $0x168] sm:$0xff]  }
  0x19   : > { %v1625_v45 = vld [vmem:[%s2054_s1 + $0x1f0] sm:$0xff]   ;;  %v1629_v49 = vld [vmem:[%s2054_s1 + $0x1e8] sm:$0xff]   ;;  %v1632_v52 = vld [vmem:[%s2054_s1 + $0x160] sm:$0xff]  }
  0x1a   : > { %1441 = vmatpush3.bf16.msra.mxu0 %v1602_v14  ;;  %1023 = vmatprep.mubr.bf16.mxu0 %v184_v35  ;;  %v1626_v46 = vld [vmem:[%s2054_s1 + $0x130] sm:$0xff]   ;;  %v1630_v50 = vld [vmem:[%s2054_s1 + $0x128] sm:$0xff]   ;;  %v1633_v53 = vld [vmem:[%s2054_s1 + $0x1e0] sm:$0xff]  }
  0x1b   : > { %1463 = vmatpush3.bf16.msra.mxu1 %v1603_v15  ;;  %1442 = vmatprep.subr.bf16.mxu0 %v1604_v16  ;;  %v1627_v47 = vld [vmem:[%s2054_s1 + $0x1b0] sm:$0xff]   ;;  %v1631_v51 = vld [vmem:[%s2054_s1 + $0x1a8] sm:$0xff]   ;;  %v1634_v54 = vld [vmem:[%s2054_s1 + $0x120] sm:$0xff]  }
  0x1c   : > { %1464 = vmatprep.subr.bf16.mxu1 %v1605_v17  ;;  %v1635_v55 = vld [vmem:[%s2054_s1 + $0x1a0] sm:$0xff]   ;;  %v1636_v56 = vld [vmem:[%s2054_s1 + $0x158] sm:$0xff]   ;;  %v1640_v60 = vld [vmem:[%s2054_s1 + $0x150] sm:$0xff]  }
  0x1d   : > { %v1637_v57 = vld [vmem:[%s2054_s1 + $0x1d8] sm:$0xff]   ;;  %v1641_v61 = vld [vmem:[%s2054_s1 + $0x1d0] sm:$0xff]   ;;  %v1644_v0 = vld [vmem:[%s2054_s1 + $0x148] sm:$0xff]  }
  0x1e   : > { %1443 = vmatpush3.bf16.msra.mxu0 %v1606_v18  ;;  %v1638_v58 = vld [vmem:[%s2054_s1 + $0x118] sm:$0xff]   ;;  %v1642_v62 = vld [vmem:[%s2054_s1 + $0x110] sm:$0xff]   ;;  %v1645_v1 = vld [vmem:[%s2054_s1 + $0x1c8] sm:$0xff]  }
  0x1f   : > { %1465 = vmatpush3.bf16.msra.mxu1 %v1607_v19  ;;  %1444 = vmatprep.subr.bf16.mxu0 %v1608_v20  ;;  %v1639_v59 = vld [vmem:[%s2054_s1 + $0x198] sm:$0xff]   ;;  %v1643_v63 = vld [vmem:[%s2054_s1 + $0x190] sm:$0xff]   ;;  %v1646_v2 = vld [vmem:[%s2054_s1 + $0x108] sm:$0xff]  }
  0x20   : > { %1466 = vmatprep.subr.bf16.mxu1 %v1609_v21  ;;  %v1647_v3 = vld [vmem:[%s2054_s1 + $0x188] sm:$0xff]   ;;  %v1648_v4 = vld [vmem:[%s2054_s1 + $0x140] sm:$0xff]   ;;  %v177_v12 = vld [vmem:[%s1824_s27 + $0x38] sm:$0xff] }
  0x21   : > { %v1649_v5 = vld [vmem:[%s2054_s1 + $0x1c0] sm:$0xff]   ;;  %v175_v8 = vld [vmem:[%s1824_s27 + $0x28] sm:$0xff]  ;;  %v190_v13 = vpack.c.bf16 %v177_v12, %v177_v12  ;;  %v1652_v14 = vld [vmem:[%s2054_s1 + $0x278] sm:$0xff]  }
  0x22   : > { %1445 = vmatpush3.bf16.msra.mxu0 %v1610_v22  ;;  %v1650_v6 = vld [vmem:[%s2054_s1 + $0x100] sm:$0xff]   ;;  %v188_v10 = vpack.c.bf16 %v175_v8, %v175_v8  ;;  %v1653_v15 = vld [vmem:[%s2054_s1 + $0x2f8] sm:$0xff]   ;;  %v176_v16 = vld [vmem:[%s1824_s27 + $0x30] sm:$0xff] }
  0x23   : > { %1467 = vmatpush3.bf16.msra.mxu1 %v1611_v23  ;;  %1446 = vmatprep.subr.bf16.mxu0 %v1612_v24  ;;  %v1651_v7 = vld [vmem:[%s2054_s1 + $0x180] sm:$0xff]   ;;  %v189_v17 = vpack.c.bf16 %v176_v16, %v176_v16  ;;  %v1654_v18 = vld [vmem:[%s2054_s1 + $0x238] sm:$0xff]   ;;  %v1656_v20 = vld [vmem:[%s2054_s1 + $0x270] sm:$0xff]  }
  0x24   : > { %1468 = vmatprep.subr.bf16.mxu1 %v1613_v25  ;;  %v174_v9 = vld [vmem:[%s1824_s27 + $0x20] sm:$0xff]  ;;  %v1655_v19 = vld [vmem:[%s2054_s1 + $0x2b8] sm:$0xff]   ;;  %v1657_v21 = vld [vmem:[%s2054_s1 + $0x2f0] sm:$0xff]  }
  0x25   : > { %v187_v11 = vpack.c.bf16 %v174_v9, %v174_v9  ;;  %v1658_v22 = vld [vmem:[%s2054_s1 + $0x230] sm:$0xff]   ;;  %v1660_v24 = vld [vmem:[%s2054_s1 + $0x268] sm:$0xff]   ;;  %v1668_v32 = vld [vmem:[%s2054_s1 + $0x258] sm:$0xff]  }
  0x26   : > { %1447 = vmatpush3.bf16.msra.mxu0 %v1614_v26  ;;  %v1659_v23 = vld [vmem:[%s2054_s1 + $0x2b0] sm:$0xff]   ;;  %v1661_v25 = vld [vmem:[%s2054_s1 + $0x2e8] sm:$0xff]   ;;  %v1669_v33 = vld [vmem:[%s2054_s1 + $0x2d8] sm:$0xff]  }
  0x27   : > { %1469 = vmatpush3.bf16.msra.mxu1 %v1615_v27  ;;  %1448 = vmatprep.subr.bf16.mxu0 %v1616_v28  ;;  %v1662_v26 = vld [vmem:[%s2054_s1 + $0x228] sm:$0xff]   ;;  %v1664_v28 = vld [vmem:[%s2054_s1 + $0x260] sm:$0xff]   ;;  %v1670_v34 = vld [vmem:[%s2054_s1 + $0x218] sm:$0xff]  }
  0x28   : > { %1470 = vmatprep.subr.bf16.mxu1 %v1617_v29  ;;  %v1663_v27 = vld [vmem:[%s2054_s1 + $0x2a8] sm:$0xff]   ;;  %v1665_v29 = vld [vmem:[%s2054_s1 + $0x2e0] sm:$0xff]   ;;  %v1671_v35 = vld [vmem:[%s2054_s1 + $0x298] sm:$0xff]  }
  0x29   : > { %v1673_v37 = vld [vmem:[%s2054_s1 + $0x2d0] sm:$0xff]   ;;  %v1676_v40 = vld [vmem:[%s2054_s1 + $0x248] sm:$0xff]  }
  0x2a   : > { %1449 = vmatpush3.bf16.msra.mxu0 %v1618_v30  ;;  %v1666_v30 = vld [vmem:[%s2054_s1 + $0x220] sm:$0xff]  }
  0x2b   : > { %1471 = vmatpush3.bf16.msra.mxu1 %v1619_v31  ;;  %1478 = vmatprep.subr.bf16.mxu0 %v1620_v38  ;;  %v1667_v31 = vld [vmem:[%s2054_s1 + $0x2a0] sm:$0xff]   ;;  %v1674_v38 = vld [vmem:[%s2054_s1 + $0x210] sm:$0xff]  }
  0x2c   : > { %1500 = vmatprep.subr.bf16.mxu1 %v1621_v39  ;;  %v1675_v39 = vld [vmem:[%s2054_s1 + $0x290] sm:$0xff]  }
  0x2d   : > { %1024 = vmatmul.mubr.bf16.vlgmr.msra.gmra.mxu0 %v183_v36  ;;  %v1672_v36 = vld [vmem:[%s2054_s1 + $0x250] sm:$0xff]  }
  0x2e   : > { %1064 = vmatmul.mubr.bf16.vlgmr.msra.gmra.mxu1 %v185_v41  ;;  %1479 = vmatpush3.bf16.msra.mxu0 %v1622_v42  ;;  %v1677_v41 = vld [vmem:[%s2054_s1 + $0x2c8] sm:$0xff]  }
  0x2f   : > { %1501 = vmatpush3.bf16.msra.mxu1 %v1623_v43  ;;  %1480 = vmatprep.subr.bf16.mxu0 %v1624_v44  ;;  %v1678_v42 = vld [vmem:[%s2054_s1 + $0x208] sm:$0xff]   ;;  %v1680_v44 = vld [vmem:[%s2054_s1 + $0x240] sm:$0xff]  }
  0x30   : > { %1502 = vmatprep.subr.bf16.mxu1 %v1625_v45  ;;  %1103 = vmatprep.mubr.bf16.mxu0 %v188_v10  ;;  %v1679_v43 = vld [vmem:[%s2054_s1 + $0x288] sm:$0xff]   ;;  %v1681_v45 = vld [vmem:[%s2054_s1 + $0x2c0] sm:$0xff]  }
  0x31   : > { %1143 = vmatprep.mubr.bf16.mxu1 %v190_v13 }
  0x32   : > { %1481 = vmatpush3.bf16.msra.mxu0 %v1626_v46  ;;  %v1682_v46 = vld [vmem:[%s2054_s1 + $0x200] sm:$0xff]  }
  0x33   : > { %1503 = vmatpush3.bf16.msra.mxu1 %v1627_v47  ;;  %1482 = vmatprep.subr.bf16.mxu0 %v1628_v48  ;;  %v1683_v47 = vld [vmem:[%s2054_s1 + $0x280] sm:$0xff]   ;;  %v179_v48 = vld [vmem:[%s1824_s27 + $0x48] sm:$0xff] }
  0x34   : > { %1504 = vmatprep.subr.bf16.mxu1 %v1629_v49  ;;  %v192_v49 = vpack.c.bf16 %v179_v48, %v179_v48 }
  0x36   : > { %1483 = vmatpush3.bf16.msra.mxu0 %v1630_v50  ;;  %v181_v50 = vld [vmem:[%s1824_s27 + $0x58] sm:$0xff] }
  0x37   : > { %1505 = vmatpush3.bf16.msra.mxu1 %v1631_v51  ;;  %1484 = vmatprep.subr.bf16.mxu0 %v1632_v52  ;;  %v178_v51 = vld [vmem:[%s1824_s27 + $0x40] sm:$0xff]  ;;  %v180_v52 = vld [vmem:[%s1824_s27 + $0x50] sm:$0xff] }
  0x38   : > { %1506 = vmatprep.subr.bf16.mxu1 %v1633_v53  ;;  %v194_v53 = vpack.c.bf16 %v181_v50, %v181_v50 }
  0x3a   : > { %1485 = vmatpush3.bf16.msra.mxu0 %v1634_v54  ;;  %v191_v54 = vpack.c.bf16 %v178_v51, %v178_v51 }
  0x3b   : > { %1507 = vmatpush3.bf16.msra.mxu1 %v1635_v55  ;;  %1486 = vmatprep.subr.bf16.mxu0 %v1636_v56  ;;  %v193_v55 = vpack.c.bf16 %v180_v52, %v180_v52  ;;  %v1694_v56 = vmov 0.0  }
  0x3c   : > { %1508 = vmatprep.subr.bf16.mxu1 %v1637_v57  ;;  %v1684_v57 = vld [vmem:[%s2054_s1 + $0x308] sm:$0xff]  }
  0x3e   : > { %1487 = vmatpush3.bf16.msra.mxu0 %v1638_v58  ;;  %v1685_v58 = vld [vmem:[%s2054_s1 + $0x300] sm:$0xff]  }
  0x3f   : > { %1509 = vmatpush3.bf16.msra.mxu1 %v1639_v59  ;;  %1488 = vmatprep.subr.bf16.mxu0 %v1640_v60  ;;  %v182_v59 = vld [vmem:[%s1824_s27 + $0x60] sm:$0xff] }
  0x40   : > { %1510 = vmatprep.subr.bf16.mxu1 %v1641_v61  ;;  %v195_v60 = vpack.c.bf16 %v182_v59, %v182_v59 }
  0x42   : > { %1489 = vmatpush3.bf16.msra.mxu0 %v1642_v62 }
  0x43   : > { %1511 = vmatpush3.bf16.msra.mxu1 %v1643_v63  ;;  %1490 = vmatprep.subr.bf16.mxu0 %v1644_v0 }
  0x44   : > { %1512 = vmatprep.subr.bf16.mxu1 %v1645_v1 }
  0x46   : > { %1491 = vmatpush3.bf16.msra.mxu0 %v1646_v2 }
  0x47   : > { %1513 = vmatpush3.bf16.msra.mxu1 %v1647_v3  ;;  %1492 = vmatprep.subr.bf16.mxu0 %v1648_v4 }
  0x48   : > { %1514 = vmatprep.subr.bf16.mxu1 %v1649_v5 }
  0x4a   : > { %1493 = vmatpush3.bf16.msra.mxu0 %v1650_v6 }
  0x4b   : > { %1515 = vmatpush3.bf16.msra.mxu1 %v1651_v7  ;;  %1522 = vmatprep.subr.bf16.mxu0 %v1652_v14  ;;  %v1332_v14 = vld [vmem:[%s2055_s2] ss:$0 sm:$0xff] }
  0x4c   : > { %1544 = vmatprep.subr.bf16.mxu1 %v1653_v15 }
  0x4d   : > { %1104 = vmatmul.mubr.bf16.vlgmr.msra.gmra.mxu0 %v187_v11 }
  0x4e   : > { %1144 = vmatmul.mubr.bf16.vlgmr.msra.gmra.mxu1 %v189_v17  ;;  %1523 = vmatpush3.bf16.msra.mxu0 %v1654_v18 }
  0x4f   : > { %1545 = vmatpush3.bf16.msra.mxu1 %v1655_v19  ;;  %1524 = vmatprep.subr.bf16.mxu0 %v1656_v20 }
  0x50   : > { %1546 = vmatprep.subr.bf16.mxu1 %v1657_v21  ;;  %1183 = vmatprep.mubr.bf16.mxu0 %v192_v49 }
  0x51   : > { %1223 = vmatprep.mubr.bf16.mxu1 %v194_v53 }
  0x52   : > { %1525 = vmatpush3.bf16.msra.mxu0 %v1658_v22 }
  0x53   : > { %1547 = vmatpush3.bf16.msra.mxu1 %v1659_v23  ;;  %1526 = vmatprep.subr.bf16.mxu0 %v1660_v24 }
  0x54   : > { %1548 = vmatprep.subr.bf16.mxu1 %v1661_v25 }
  0x56   : > { %1527 = vmatpush3.bf16.msra.mxu0 %v1662_v26 }
  0x57   : > { %1549 = vmatpush3.bf16.msra.mxu1 %v1663_v27  ;;  %1528 = vmatprep.subr.bf16.mxu0 %v1664_v28 }
  0x58   : > { %1550 = vmatprep.subr.bf16.mxu1 %v1665_v29 }
  0x5a   : > { %1529 = vmatpush3.bf16.msra.mxu0 %v1666_v30 }
  0x5b   : > { %1551 = vmatpush3.bf16.msra.mxu1 %v1667_v31  ;;  %1530 = vmatprep.subr.bf16.mxu0 %v1668_v32 }
  0x5c   : > { %1552 = vmatprep.subr.bf16.mxu1 %v1669_v33 }
  0x5e   : > { %1531 = vmatpush3.bf16.msra.mxu0 %v1670_v34 }
  0x5f   : > { %1553 = vmatpush3.bf16.msra.mxu1 %v1671_v35  ;;  %1532 = vmatprep.subr.bf16.mxu0 %v1672_v36 }
  0x60   : > { %1554 = vmatprep.subr.bf16.mxu1 %v1673_v37 }
  0x62   : > { %1533 = vmatpush3.bf16.msra.mxu0 %v1674_v38 }
  0x63   : > { %1555 = vmatpush3.bf16.msra.mxu1 %v1675_v39  ;;  %1534 = vmatprep.subr.bf16.mxu0 %v1676_v40 }
  0x64   : > { %1556 = vmatprep.subr.bf16.mxu1 %v1677_v41 }
  0x66   : > { %1535 = vmatpush3.bf16.msra.mxu0 %v1678_v42 }
  0x67   : > { %1557 = vmatpush3.bf16.msra.mxu1 %v1679_v43  ;;  %1536 = vmatprep.subr.bf16.mxu0 %v1680_v44 }
  0x68   : > { %1558 = vmatprep.subr.bf16.mxu1 %v1681_v45 }
  0x6a   : > { %1537 = vmatpush3.bf16.msra.mxu0 %v1682_v46 }
  0x6b   : > { %1559 = vmatpush3.bf16.msra.mxu1 %v1683_v47  ;;  %1569 = vmatprep.subr.bf16.mxu0 %v1694_v56 }
  0x6d   : > { %1184 = vmatmul.mubr.bf16.vlgmr.msra.gmra.mxu0 %v191_v54 }
  0x6e   : > { %1224 = vmatmul.mubr.bf16.vlgmr.msra.gmra.mxu1 %v193_v55  ;;  %1570 = vmatpush3.bf16.msra.mxu0 %v1684_v57 }
  0x6f   : > { %1571 = vmatprep.subr.bf16.mxu0 %v1694_v56  ;;  %1573 = vmatprep.mubr.msk.bf16.mxu0 %vm1695_vm0, %v1694_v56 }
  0x72   : > { %1572 = vmatpush3.bf16.msra.mxu0 %v1685_v58 }
  0x75   : > { %1574 = vmatmul.mubr.msk.bf16.vlgmr.msra.gmra.mxu0 %vm987_vm1, %v195_v60 }
  0xed   : > { %v1450_v61 = vpop.f32.mrf.mxu0 }
  0xee   : > { %v1472_v62 = vpop.f32.mrf.mxu1 }
  0xef   : > { %v1451_v63 = vpop.f32.mrf.mxu0 }
  0xf0   : > { %v1473_v0 = vpop.f32.mrf.mxu1  ;;  %v1452_v13 = vadd.f32 %v1451_v63, %v1450_v61 }
  0xf1   : > { %v1453_v1 = vpop.f32.mrf.mxu0  ;;  %v1474_v16 = vadd.f32 %v1473_v0, %v1472_v62 }
  0xf2   : > { %v1475_v2 = vpop.f32.mrf.mxu1  ;;  %v1026_v15 = vadd.f32 %v1452_v13, %v1332_v14 }
  0xf3   : > { %v1454_v3 = vpop.f32.mrf.mxu0 }
  0xf4   : > { %v1476_v4 = vpop.f32.mrf.mxu1  ;;  %v1066_v18 = vadd.f32 %v1474_v16, %v1026_v15 }
 0x10d   : > { %v1494_v5 = vpop.f32.mrf.mxu0 }
 0x10e   : > { %v1516_v6 = vpop.f32.mrf.mxu1 }
 0x10f   : > { %v1495_v7 = vpop.f32.mrf.mxu0 }
 0x110   : > { %v1517_v8 = vpop.f32.mrf.mxu1  ;;  %v1496_v17 = vadd.f32 %v1495_v7, %v1494_v5 }
 0x111   : > { %v1497_v9 = vpop.f32.mrf.mxu0  ;;  %v1518_v20 = vadd.f32 %v1517_v8, %v1516_v6 }
 0x112   : > { %v1519_v10 = vpop.f32.mrf.mxu1  ;;  %v1106_v19 = vadd.f32 %v1496_v17, %v1066_v18 }
 0x113   : > { %v1498_v11 = vpop.f32.mrf.mxu0 }
 0x114   : > { %v1520_v12 = vpop.f32.mrf.mxu1  ;;  %v1146_v24 = vadd.f32 %v1518_v20, %v1106_v19 }
 0x12d   : > { %v1538_v21 = vpop.f32.mrf.mxu0 }
 0x12e   : > { %v1560_v22 = vpop.f32.mrf.mxu1 }
 0x12f   : > { %v1539_v23 = vpop.f32.mrf.mxu0 }
 0x130   : > { %v1540_v25 = vadd.f32 %v1539_v23, %v1538_v21  ;;  %v1561_v26 = vpop.f32.mrf.mxu1 }
 0x131   : > { %v1562_v27 = vadd.f32 %v1561_v26, %v1560_v22  ;;  %v1541_v28 = vpop.f32.mrf.mxu0 }
 0x132   : > { %v1186_v29 = vadd.f32 %v1540_v25, %v1146_v24  ;;  %v1563_v30 = vpop.f32.mrf.mxu1 }
 0x133   : > { %v1542_v31 = vpop.f32.mrf.mxu0 }
 0x134   : > { %v1564_v32 = vpop.f32.mrf.mxu1  ;;  %v1226_v33 = vadd.f32 %v1562_v27, %v1186_v29 }
 0x135   : > { %v1265_v34 = vpop.f32.mrf.mxu0 }
 0x136   : > { %v1266_v35 = vadd.f32 %v1265_v34, %v1226_v33 }
 0x137   : > { %v1575_v36 = vpop.f32.mrf.mxu0 }
 0x138   : > { %1271 = vst [vmem:[%s168_s23] sm:$0xff] %v1266_v35 }
 0x139   : > { %v1268_v37 = vpop.f32.mrf.mxu0 }
 0x13b   : > { %v1576_v38 = vpop.f32.mrf.mxu0 }
 0x13c PF: > { %s13_s12 = sadd.s32 1, %s1692_s12  }
 0x13d   : > { %p10_p4 = scmp.ge.s32.totalorder %s13_s12, 4  }
 0x13f   :  { %12 = sbr.rel (!%p10_p4) target bundleno = 1 (0x1), region = 62 }

// kernel: convnets_forward.4
= control target key start
LH: loop header
LB: loop body
LE: loop exit
PB: predicated region body
PF: predicated region fallthrough
CT: control target
= control target key end

     0   :  { %s10650_s18 = smov 0   ;;  %s15755_s0 = inlined_call_operand.vmem [shape: f32[144,576], index: 0, kind: input, shape index: {}]   ;;  %s15756_s1 = inlined_call_operand.vmem [shape: bf16[576,1024], index: 1, kind: input, shape index: {}]   ;;  %s15757_s2 = inlined_call_operand.vmem [shape: bf16[576,1024], index: 2, kind: input, shape index: {}]   ;;  %s15758_s3 = inlined_call_operand.vmem [shape: bf16[576,1024], index: 3, kind: input, shape index: {}]   ;;  %s15759_s4 = inlined_call_operand.vmem [shape: f32[1,256], index: 4, kind: input, shape index: {}]   ;;  %s15760_s5 = inlined_call_operand.vmem [shape: f32[144,256], index: 5, kind: output, shape index: {}]  }
   0x1 LB: > { %s9651_s19 = sadd.s32 4294967295, %s10617_s18   ;;  %p9655_p0 = scmp.ge.s32.totalorder %s10617_s18, 1  ;;  %s10617_s18 = sphi %s10650_s18, %s15_s18  }
   0x2   : > { %p189_p1 = scmp.lt.s32.totalorder %s10617_s18, 3 }
   0x4   : > { %p190_p2 = pnand %p9655_p0, %p189_p1 }
   0x6   : > { %193 = sbr.rel (%p190_p2) target bundleno = 1277 (0x4fd), region = 40 }
   0xb   : > { %v360_v0 = vld [vmem:[%s15756_s1 + $0x1c0] sm:$0xff]  ;;  %s10685_s13 = smul.u32 9, %s9651_s19  ;;  %vm2032_vm0 = vcmask 523264   ;;  %vm3522_vm1 = vsmask.f32 7424  ;;  %vm6764_vm2 = vcmask 1046528  }
   0xc   : > { %v364_v1 = vld [vmem:[%s15756_s1 + $0x1e0] sm:$0xff] }
   0xd   : > { %v488_v2 = vld [vmem:[%s15756_s1 + $0x5c0] sm:$0xff]  ;;  %v9716_v3 = vcombine.high %v360_v0, %v364_v1  ;;  %v9715_v5 = vcombine.low %v360_v0, %v364_v1  ;;  %p220_p3 = scmp.lt.s32.totalorder %s10685_s13, 17 }
   0xe   : > { %v492_v4 = vld [vmem:[%s15756_s1 + $0x5e0] sm:$0xff] }
   0xf   : > { %v352_v6 = vld [vmem:[%s15756_s1 + $0x180] sm:$0xff]  ;;  %v9844_v8 = vcombine.high %v488_v2, %v492_v4  ;;  %v9843_v9 = vcombine.low %v488_v2, %v492_v4  ;;  %2048 = vmatprep.subr.bf16.mxu0 %v9716_v3  ;;  %s16056_s13 = smov (!%p220_p3, %s10685_s13), 17 }
  0x10   : > { %v356_v7 = vld [vmem:[%s15756_s1 + $0x1a0] sm:$0xff]  ;;  %2049 = vmatpush1.bf16.msra.mxu0 %v9715_v5  ;;  %s10586_s17 = smul.u32 40, %s16056_s13  ;;  %s10585_s20 = sshll.u32 %s16056_s13, 4 }
  0x11   : > { %v9708_v10 = vcombine.high %v352_v6, %v356_v7  ;;  %v480_v11 = vld [vmem:[%s15756_s1 + $0x580] sm:$0xff]  ;;  %2129 = vmatprep.subr.bf16.mxu1 %v9844_v8  ;;  %v9707_v18 = vcombine.low %v352_v6, %v356_v7  ;;  %s15677_s19 = scalar_lea.vmem %s15760_s5, %s10585_s20 }
  0x12   : > { %v484_v12 = vld [vmem:[%s15756_s1 + $0x5a0] sm:$0xff]  ;;  %2130 = vmatpush1.bf16.msra.mxu1 %v9843_v9  ;;  %s10746_s29 = scalar_lea.vmem %s15755_s0, %s10586_s17 }
  0x13   : > { %v344_v13 = vld [vmem:[%s15756_s1 + $0x140] sm:$0xff]  ;;  %v9836_v14 = vcombine.high %v480_v11, %v484_v12  ;;  %2050 = vmatprep.subr.bf16.mxu0 %v9708_v10  ;;  %v9835_v19 = vcombine.low %v480_v11, %v484_v12  ;;  %v235_v54 = vld [vmem:[%s10746_s29 + $0x8] sm:$0xff]  ;;  %v240_v55 = vld [vmem:[%s10746_s29 + $0x30] sm:$0xff] }
  0x14   : > { %v348_v15 = vld [vmem:[%s15756_s1 + $0x160] sm:$0xff]  ;;  %2051 = vmatpush1.bf16.msra.mxu0 %v9707_v18  ;;  %v10762_v58 = vpack.c.bf16 %v240_v55, %v235_v54  ;;  %v237_v59 = vld [vmem:[%s10746_s29 + $0x18] sm:$0xff] }
  0x15   : > { %v472_v16 = vld [vmem:[%s15756_s1 + $0x540] sm:$0xff]  ;;  %v9700_v20 = vcombine.high %v344_v13, %v348_v15  ;;  %2131 = vmatprep.subr.bf16.mxu1 %v9836_v14  ;;  %v9699_v26 = vcombine.low %v344_v13, %v348_v15 }
  0x16   : > { %v476_v17 = vld [vmem:[%s15756_s1 + $0x560] sm:$0xff]  ;;  %2132 = vmatpush1.bf16.msra.mxu1 %v9835_v19  ;;  %2080 = vmatprep.mubr.bf16.mxu0 %v10762_v58 }
  0x17   : > { %v9828_v21 = vcombine.high %v472_v16, %v476_v17  ;;  %v336_v22 = vld [vmem:[%s15756_s1 + $0x100] sm:$0xff]  ;;  %2052 = vmatprep.subr.bf16.mxu0 %v9700_v20  ;;  %v9827_v27 = vcombine.low %v472_v16, %v476_v17 }
  0x18   : > { %v340_v23 = vld [vmem:[%s15756_s1 + $0x120] sm:$0xff]  ;;  %2053 = vmatpush1.bf16.msra.mxu0 %v9699_v26 }
  0x19   : > { %v464_v24 = vld [vmem:[%s15756_s1 + $0x500] sm:$0xff]  ;;  %v9692_v28 = vcombine.high %v336_v22, %v340_v23  ;;  %2133 = vmatprep.subr.bf16.mxu1 %v9828_v21  ;;  %v9691_v34 = vcombine.low %v336_v22, %v340_v23 }
  0x1a   : > { %v468_v25 = vld [vmem:[%s15756_s1 + $0x520] sm:$0xff]  ;;  %2134 = vmatpush1.bf16.msra.mxu1 %v9827_v27 }
  0x1b   : > { %v9820_v29 = vcombine.high %v464_v24, %v468_v25  ;;  %v328_v30 = vld [vmem:[%s15756_s1 + $0xc0] sm:$0xff]  ;;  %2054 = vmatprep.subr.bf16.mxu0 %v9692_v28  ;;  %v9819_v35 = vcombine.low %v464_v24, %v468_v25 }
  0x1c   : > { %v332_v31 = vld [vmem:[%s15756_s1 + $0xe0] sm:$0xff]  ;;  %2055 = vmatpush1.bf16.msra.mxu0 %v9691_v34 }
  0x1d   : > { %v456_v32 = vld [vmem:[%s15756_s1 + $0x4c0] sm:$0xff]  ;;  %v9684_v36 = vcombine.high %v328_v30, %v332_v31  ;;  %2135 = vmatprep.subr.bf16.mxu1 %v9820_v29  ;;  %v9683_v42 = vcombine.low %v328_v30, %v332_v31 }
  0x1e   : > { %v460_v33 = vld [vmem:[%s15756_s1 + $0x4e0] sm:$0xff]  ;;  %2136 = vmatpush1.bf16.msra.mxu1 %v9819_v35 }
  0x1f   : > { %v9812_v37 = vcombine.high %v456_v32, %v460_v33  ;;  %v320_v38 = vld [vmem:[%s15756_s1 + $0x80] sm:$0xff]  ;;  %2056 = vmatprep.subr.bf16.mxu0 %v9684_v36  ;;  %v9811_v43 = vcombine.low %v456_v32, %v460_v33 }
  0x20   : > { %v324_v39 = vld [vmem:[%s15756_s1 + $0xa0] sm:$0xff]  ;;  %2057 = vmatpush1.bf16.msra.mxu0 %v9683_v42 }
  0x21   : > { %v448_v40 = vld [vmem:[%s15756_s1 + $0x480] sm:$0xff]  ;;  %v9676_v44 = vcombine.high %v320_v38, %v324_v39  ;;  %2137 = vmatprep.subr.bf16.mxu1 %v9812_v37  ;;  %v9675_v50 = vcombine.low %v320_v38, %v324_v39 }
  0x22   : > { %v452_v41 = vld [vmem:[%s15756_s1 + $0x4a0] sm:$0xff]  ;;  %2138 = vmatpush1.bf16.msra.mxu1 %v9811_v43 }
  0x23   : > { %v9804_v45 = vcombine.high %v448_v40, %v452_v41  ;;  %v312_v46 = vld [vmem:[%s15756_s1 + $0x40] sm:$0xff]  ;;  %2058 = vmatprep.subr.bf16.mxu0 %v9676_v44  ;;  %v9803_v51 = vcombine.low %v448_v40, %v452_v41 }
  0x24   : > { %v316_v47 = vld [vmem:[%s15756_s1 + $0x60] sm:$0xff]  ;;  %2059 = vmatpush1.bf16.msra.mxu0 %v9675_v50 }
  0x25   : > { %v440_v48 = vld [vmem:[%s15756_s1 + $0x440] sm:$0xff]  ;;  %v9668_v52 = vcombine.high %v312_v46, %v316_v47  ;;  %2139 = vmatprep.subr.bf16.mxu1 %v9804_v45  ;;  %v9667_v0 = vcombine.low %v312_v46, %v316_v47 }
  0x26   : > { %v444_v49 = vld [vmem:[%s15756_s1 + $0x460] sm:$0xff]  ;;  %2140 = vmatpush1.bf16.msra.mxu1 %v9803_v51 }
  0x27   : > { %v304_v53 = vld [vmem:[%s15756_s1] sm:$0xff]  ;;  %v9796_v56 = vcombine.high %v440_v48, %v444_v49  ;;  %2060 = vmatprep.subr.bf16.mxu0 %v9668_v52  ;;  %v9795_v1 = vcombine.low %v440_v48, %v444_v49 }
  0x28   : > { %v308_v57 = vld [vmem:[%s15756_s1 + $0x20] sm:$0xff]  ;;  %2061 = vmatpush1.bf16.msra.mxu0 %v9667_v0 }
  0x29   : > { %v242_v60 = vld [vmem:[%s10746_s29 + $0x40] sm:$0xff]  ;;  %v9660_v2 = vcombine.high %v304_v53, %v308_v57  ;;  %2141 = vmatprep.subr.bf16.mxu1 %v9796_v56  ;;  %v9659_v8 = vcombine.low %v304_v53, %v308_v57 }
  0x2a   : > { %v432_v61 = vld [vmem:[%s15756_s1 + $0x400] sm:$0xff]  ;;  %v10772_v63 = vpack.c.bf16 %v242_v60, %v237_v59  ;;  %2142 = vmatpush1.bf16.msra.mxu1 %v9795_v1 }
  0x2b   : > { %v436_v62 = vld [vmem:[%s15756_s1 + $0x420] sm:$0xff]  ;;  %2062 = vmatprep.subr.bf16.mxu0 %v9660_v2 }
  0x2c   : > { %v9788_v3 = vcombine.high %v432_v61, %v436_v62  ;;  %v424_v4 = vld [vmem:[%s15756_s1 + $0x3c0] sm:$0xff]  ;;  %2161 = vmatprep.mubr.bf16.mxu1 %v10772_v63  ;;  %v9787_v9 = vcombine.low %v432_v61, %v436_v62  ;;  %2063 = vmatpush1.bf16.msra.mxu0 %v9659_v8  ;;  %v361_v8 = vld [vmem:[%s15756_s1 + $0x1c8] sm:$0xff] }
  0x2d   : > { %v428_v5 = vld [vmem:[%s15756_s1 + $0x3e0] sm:$0xff] }
  0x2e   : > { %v552_v6 = vld [vmem:[%s15756_s1 + $0x7c0] sm:$0xff]  ;;  %v9780_v10 = vcombine.high %v424_v4, %v428_v5  ;;  %2143 = vmatprep.subr.bf16.mxu1 %v9788_v3  ;;  %v9779_v16 = vcombine.low %v424_v4, %v428_v5 }
  0x2f   : > { %v556_v7 = vld [vmem:[%s15756_s1 + $0x7e0] sm:$0xff]  ;;  %2144 = vmatpush1.bf16.msra.mxu1 %v9787_v9  ;;  %v365_v9 = vld [vmem:[%s15756_s1 + $0x1e8] sm:$0xff] }
  0x30   : > { %v9908_v11 = vcombine.high %v552_v6, %v556_v7  ;;  %v416_v12 = vld [vmem:[%s15756_s1 + $0x380] sm:$0xff]  ;;  %2064 = vmatprep.subr.bf16.mxu0 %v9780_v10  ;;  %v9907_v17 = vcombine.low %v552_v6, %v556_v7 }
  0x31   : > { %v420_v13 = vld [vmem:[%s15756_s1 + $0x3a0] sm:$0xff]  ;;  %2065 = vmatpush2.bf16.msra.mxu0 %v9779_v16 }
  0x32   : > { %v544_v14 = vld [vmem:[%s15756_s1 + $0x780] sm:$0xff]  ;;  %v9772_v18 = vcombine.high %v416_v12, %v420_v13  ;;  %2145 = vmatprep.subr.bf16.mxu1 %v9908_v11  ;;  %v9771_v24 = vcombine.low %v416_v12, %v420_v13  ;;  %v239_v12 = vld [vmem:[%s10746_s29 + $0x28] sm:$0xff] }
  0x33   : > { %v548_v15 = vld [vmem:[%s15756_s1 + $0x7a0] sm:$0xff]  ;;  %2146 = vmatpush2.bf16.msra.mxu1 %v9907_v17  ;;  %v9718_v17 = vcombine.high %v361_v8, %v365_v9 }
  0x34   : > { %v9900_v19 = vcombine.high %v544_v14, %v548_v15  ;;  %v408_v20 = vld [vmem:[%s15756_s1 + $0x340] sm:$0xff]  ;;  %2066 = vmatprep.subr.bf16.mxu0 %v9772_v18  ;;  %v9899_v25 = vcombine.low %v544_v14, %v548_v15  ;;  %v236_v14 = vld [vmem:[%s10746_s29 + $0x10] sm:$0xff]  ;;  %v241_v15 = vld [vmem:[%s10746_s29 + $0x38] sm:$0xff] }
  0x35   : > { %v412_v21 = vld [vmem:[%s15756_s1 + $0x360] sm:$0xff]  ;;  %2067 = vmatpush2.bf16.msra.mxu0 %v9771_v24  ;;  %v353_v18 = vld [vmem:[%s15756_s1 + $0x188] sm:$0xff]  ;;  %v252_v24 = vld [vmem:[%s10746_s29 + $0x90] sm:$0xff] }
  0x36   : > { %v536_v22 = vld [vmem:[%s15756_s1 + $0x740] sm:$0xff]  ;;  %v9764_v26 = vcombine.high %v408_v20, %v412_v21  ;;  %2147 = vmatprep.subr.bf16.mxu1 %v9900_v19  ;;  %v9763_v32 = vcombine.low %v408_v20, %v412_v21  ;;  %v245_v19 = vld [vmem:[%s10746_s29 + $0x58] sm:$0xff] }
  0x37   : > { %v540_v23 = vld [vmem:[%s15756_s1 + $0x760] sm:$0xff]  ;;  %2148 = vmatpush2.bf16.msra.mxu1 %v9899_v25  ;;  %v10900_v25 = vpack.c.bf16 %v241_v15, %v236_v14 }
  0x38   : > { %v9892_v27 = vcombine.high %v536_v22, %v540_v23  ;;  %v400_v28 = vld [vmem:[%s15756_s1 + $0x300] sm:$0xff]  ;;  %2068 = vmatprep.subr.bf16.mxu0 %v9764_v26  ;;  %v9891_v33 = vcombine.low %v536_v22, %v540_v23  ;;  %v357_v22 = vld [vmem:[%s15756_s1 + $0x1a8] sm:$0xff] }
  0x39   : > { %v404_v29 = vld [vmem:[%s15756_s1 + $0x320] sm:$0xff]  ;;  %2069 = vmatpush2.bf16.msra.mxu0 %v9763_v32  ;;  %v247_v23 = vld [vmem:[%s10746_s29 + $0x68] sm:$0xff]  ;;  %15866 = vst [vmem:[#allocation3_spill] sm:$0xff] %v10900_v25 }
  0x3a   : > { %v528_v30 = vld [vmem:[%s15756_s1 + $0x700] sm:$0xff]  ;;  %v9756_v34 = vcombine.high %v400_v28, %v404_v29  ;;  %2149 = vmatprep.subr.bf16.mxu1 %v9892_v27  ;;  %v9755_v40 = vcombine.low %v400_v28, %v404_v29  ;;  %v9717_v29 = vcombine.low %v361_v8, %v365_v9  ;;  %v10910_v32 = vpack.c.bf16 %v252_v24, %v247_v23  ;;  %v261_v8 = vld [vmem:[%s10746_s29 + $0xd8] sm:$0xff] }
  0x3b   : > { %v532_v31 = vld [vmem:[%s15756_s1 + $0x720] sm:$0xff]  ;;  %2150 = vmatpush2.bf16.msra.mxu1 %v9891_v33  ;;  %v265_v9 = vld [vmem:[%s10746_s29 + $0xf8] sm:$0xff] }
  0x3c   : > { %v9884_v35 = vcombine.high %v528_v30, %v532_v31  ;;  %v392_v36 = vld [vmem:[%s15756_s1 + $0x2c0] sm:$0xff]  ;;  %2070 = vmatprep.subr.bf16.mxu0 %v9756_v34  ;;  %v9883_v41 = vcombine.low %v528_v30, %v532_v31  ;;  %v9710_v31 = vcombine.high %v353_v18, %v357_v22  ;;  %15867 = vst [vmem:[#allocation4_spill] sm:$0xff] %v10910_v32 }
  0x3d   : > { %v396_v37 = vld [vmem:[%s15756_s1 + $0x2e0] sm:$0xff]  ;;  %2071 = vmatpush2.bf16.msra.mxu0 %v9755_v40 }
  0x3e   : > { %v520_v38 = vld [vmem:[%s15756_s1 + $0x6c0] sm:$0xff]  ;;  %v9748_v42 = vcombine.high %v392_v36, %v396_v37  ;;  %2151 = vmatprep.subr.bf16.mxu1 %v9884_v35  ;;  %v9747_v48 = vcombine.low %v392_v36, %v396_v37  ;;  %v345_v35 = vld [vmem:[%s15756_s1 + $0x148] sm:$0xff] }
  0x3f   : > { %v524_v39 = vld [vmem:[%s15756_s1 + $0x6e0] sm:$0xff]  ;;  %2152 = vmatpush2.bf16.msra.mxu1 %v9883_v41  ;;  %v349_v36 = vld [vmem:[%s15756_s1 + $0x168] sm:$0xff] }
  0x40   : > { %v9876_v43 = vcombine.high %v520_v38, %v524_v39  ;;  %v384_v44 = vld [vmem:[%s15756_s1 + $0x280] sm:$0xff]  ;;  %2072 = vmatprep.subr.bf16.mxu0 %v9748_v42  ;;  %v9875_v49 = vcombine.low %v520_v38, %v524_v39  ;;  %v244_v38 = vld [vmem:[%s10746_s29 + $0x50] sm:$0xff]  ;;  %v249_v39 = vld [vmem:[%s10746_s29 + $0x78] sm:$0xff]  ;;  %v9709_v42 = vcombine.low %v353_v18, %v357_v22 }
  0x41   : > { %v388_v45 = vld [vmem:[%s15756_s1 + $0x2a0] sm:$0xff]  ;;  %2073 = vmatpush2.bf16.msra.mxu0 %v9747_v48  ;;  %v257_v48 = vld [vmem:[%s10746_s29 + $0xb8] sm:$0xff] }
  0x42   : > { %v512_v46 = vld [vmem:[%s15756_s1 + $0x680] sm:$0xff]  ;;  %v9740_v50 = vcombine.high %v384_v44, %v388_v45  ;;  %2153 = vmatprep.subr.bf16.mxu1 %v9876_v43  ;;  %v9739_v56 = vcombine.low %v384_v44, %v388_v45  ;;  %v251_v43 = vld [vmem:[%s10746_s29 + $0x88] sm:$0xff]  ;;  %v260_v45 = vld [vmem:[%s10746_s29 + $0xd0] sm:$0xff] }
  0x43   : > { %v516_v47 = vld [vmem:[%s15756_s1 + $0x6a0] sm:$0xff]  ;;  %2154 = vmatpush2.bf16.msra.mxu1 %v9875_v49  ;;  %v255_v44 = vld [vmem:[%s10746_s29 + $0xa8] sm:$0xff] }
  0x44   : > { %v9868_v51 = vcombine.high %v512_v46, %v516_v47  ;;  %v376_v52 = vld [vmem:[%s15756_s1 + $0x240] sm:$0xff]  ;;  %2074 = vmatprep.subr.bf16.mxu0 %v9740_v50  ;;  %v9867_v57 = vcombine.low %v512_v46, %v516_v47  ;;  %v9702_v47 = vcombine.high %v345_v35, %v349_v36  ;;  %v10936_v50 = vpack.c.bf16 %v249_v39, %v244_v38  ;;  %v305_v39 = vld [vmem:[%s15756_s1 + $0x8] sm:$0xff] }
  0x45   : > { %v380_v53 = vld [vmem:[%s15756_s1 + $0x260] sm:$0xff]  ;;  %2075 = vmatpush2.bf16.msra.mxu0 %v9739_v56 }
  0x46   : > { %v504_v54 = vld [vmem:[%s15756_s1 + $0x640] sm:$0xff]  ;;  %v9732_v59 = vcombine.high %v376_v52, %v380_v53  ;;  %2155 = vmatprep.subr.bf16.mxu1 %v9868_v51  ;;  %v9731_v2 = vcombine.low %v376_v52, %v380_v53  ;;  %v337_v51 = vld [vmem:[%s15756_s1 + $0x108] sm:$0xff] }
  0x47   : > { %v508_v55 = vld [vmem:[%s15756_s1 + $0x660] sm:$0xff]  ;;  %2156 = vmatpush2.bf16.msra.mxu1 %v9867_v57  ;;  %v341_v52 = vld [vmem:[%s15756_s1 + $0x128] sm:$0xff]  ;;  %v9701_v57 = vcombine.low %v345_v35, %v349_v36 }
  0x48   : > { %v9860_v60 = vcombine.high %v504_v54, %v508_v55  ;;  %v368_v61 = vld [vmem:[%s15756_s1 + $0x200] sm:$0xff]  ;;  %2076 = vmatprep.subr.bf16.mxu0 %v9732_v59  ;;  %v9859_v3 = vcombine.low %v504_v54, %v508_v55  ;;  %v10946_v54 = vpack.c.bf16 %v260_v45, %v255_v44  ;;  %v275_v35 = vld [vmem:[%s10746_s29 + $0x148] sm:$0xff] }
  0x49   : > { %v372_v62 = vld [vmem:[%s15756_s1 + $0x220] sm:$0xff]  ;;  %2077 = vmatpush2.bf16.msra.mxu0 %v9731_v2  ;;  %v333_v2 = vld [vmem:[%s15756_s1 + $0xe8] sm:$0xff] }
  0x4a   : > { %v496_v0 = vld [vmem:[%s15756_s1 + $0x600] sm:$0xff]  ;;  %v9724_v4 = vcombine.high %v368_v61, %v372_v62  ;;  %2157 = vmatprep.subr.bf16.mxu1 %v9860_v60  ;;  %v9723_v10 = vcombine.low %v368_v61, %v372_v62  ;;  %v9694_v60 = vcombine.high %v337_v51, %v341_v52 }
  0x4b   : > { %v500_v1 = vld [vmem:[%s15756_s1 + $0x620] sm:$0xff]  ;;  %2158 = vmatpush2.bf16.msra.mxu1 %v9859_v3 }
  0x4c   : > { %v9852_v5 = vcombine.high %v496_v0, %v500_v1  ;;  %v584_v6 = vld [vmem:[%s15756_s1 + $0x8c0] sm:$0xff]  ;;  %2078 = vmatprep.subr.bf16.mxu0 %v9724_v4  ;;  %v9851_v13 = vcombine.low %v496_v0, %v500_v1  ;;  %v259_v0 = vld [vmem:[%s10746_s29 + $0xc8] sm:$0xff]  ;;  %v256_v4 = vld [vmem:[%s10746_s29 + $0xb0] sm:$0xff] }
  0x4d   : > { %v588_v7 = vld [vmem:[%s15756_s1 + $0x8e0] sm:$0xff]  ;;  %2079 = vmatpush2.bf16.msra.mxu0 %v9723_v10  ;;  %v329_v1 = vld [vmem:[%s15756_s1 + $0xc8] sm:$0xff] }
  0x4e   : > { %v234_v11 = vld [vmem:[%s10746_s29] sm:$0xff]  ;;  %v9940_v16 = vcombine.high %v584_v6, %v588_v7  ;;  %2159 = vmatprep.subr.bf16.mxu1 %v9852_v5  ;;  %v9939_v26 = vcombine.low %v584_v6, %v588_v7  ;;  %v10971_v5 = vld [vmem:[%s15756_s1 + $0x5c8] sm:$0xff]  ;;  %v9693_v7 = vcombine.low %v337_v51, %v341_v52  ;;  %v9685_v22 = vcombine.low %v329_v1, %v333_v2  ;;  %v276_v51 = vld [vmem:[%s10746_s29 + $0x150] sm:$0xff] }
  0x4f   : > { %v250_v20 = vld [vmem:[%s10746_s29 + $0x80] sm:$0xff]  ;;  %v10893_v21 = vpack.c.bf16 %v239_v12, %v234_v11  ;;  %2160 = vmatpush2.bf16.msra.mxu1 %v9851_v13  ;;  %v10976_v6 = vld [vmem:[%s15756_s1 + $0x5e8] sm:$0xff]  ;;  %v9686_v11 = vcombine.high %v329_v1, %v333_v2  ;;  %v272_v13 = vld [vmem:[%s10746_s29 + $0x130] sm:$0xff]  ;;  %v15761_v2 = vmov 0  }
  0x50   : > { %v576_v27 = vld [vmem:[%s15756_s1 + $0x880] sm:$0xff]  ;;  %2218 = vmatprep.subr.bf16.mxu0 %v9940_v16  ;;  %v10908_v30 = vpack.c.bf16 %v250_v20, %v245_v19  ;;  %2291 = vmatprep.subr.bf16.mxu1 %v9718_v17  ;;  %v267_v12 = vld [vmem:[%s10746_s29 + $0x108] sm:$0xff]  ;;  %v9846_v18 = vcombine.high %v10971_v5, %v10976_v6  ;;  %v10994_v19 = vpack.c.bf16 %v261_v8, %v256_v4 }
  0x51   : > { %v580_v28 = vld [vmem:[%s15756_s1 + $0x8a0] sm:$0xff]  ;;  %2081 = vmatmul.mubr.bf16.vlgmr.msra.gmra.mxu0 %v10893_v21  ;;  %v321_v16 = vld [vmem:[%s15756_s1 + $0x88] sm:$0xff]  ;;  %v10998_v23 = vpack.c.bf16 %v272_v13, %v267_v12 }
  0x52   : > { %v568_v33 = vld [vmem:[%s15756_s1 + $0x840] sm:$0xff]  ;;  %v9932_v37 = vcombine.high %v576_v27, %v580_v28  ;;  %2162 = vmatmul.mubr.bf16.vlgmr.msra.gmra.mxu1 %v10900_v25  ;;  %2219 = vmatpush1.bf16.msra.mxu0 %v9939_v26  ;;  %v9931_v41 = vcombine.low %v576_v27, %v580_v28  ;;  %v325_v17 = vld [vmem:[%s15756_s1 + $0xa8] sm:$0xff]  ;;  %15870 = vst [vmem:[#allocation7_spill] sm:$0xff] %v10994_v19  ;;  %v264_v28 = vld [vmem:[%s10746_s29 + $0xf0] sm:$0xff] }
  0x53   : > { %v572_v34 = vld [vmem:[%s15756_s1 + $0x860] sm:$0xff]  ;;  %2292 = vmatpush1.bf16.msra.mxu1 %v9717_v29  ;;  %2090 = vmatprep.mubr.bf16.mxu0 %v10908_v30  ;;  %15871 = vst [vmem:[#allocation8_spill] sm:$0xff] %v10998_v23  ;;  %v9678_v24 = vcombine.high %v321_v16, %v325_v17  ;;  %v313_v26 = vld [vmem:[%s15756_s1 + $0x48] sm:$0xff]  ;;  %v269_v29 = vld [vmem:[%s10746_s29 + $0x118] sm:$0xff] }
  0x54   : > { %v246_v40 = vld [vmem:[%s10746_s29 + $0x60] sm:$0xff]  ;;  %v9924_v46 = vcombine.high %v568_v33, %v572_v34  ;;  %2293 = vmatprep.subr.bf16.mxu1 %v9710_v31  ;;  %2171 = vmatprep.mubr.bf16.mxu1 %v10910_v32  ;;  %v9923_v62 = vcombine.low %v568_v33, %v572_v34  ;;  %v317_v27 = vld [vmem:[%s15756_s1 + $0x68] sm:$0xff]  ;;  %v9677_v31 = vcombine.low %v321_v16, %v325_v17 }
  0x55   : > { %v262_v49 = vld [vmem:[%s10746_s29 + $0xe0] sm:$0xff]  ;;  %2220 = vmatprep.subr.bf16.mxu0 %v9932_v37  ;;  %v10944_v53 = vpack.c.bf16 %v251_v43, %v246_v40  ;;  %v271_v34 = vld [vmem:[%s10746_s29 + $0x128] sm:$0xff]  ;;  %v9670_v36 = vcombine.high %v313_v26, %v317_v27  ;;  %v277_v37 = vld [vmem:[%s10746_s29 + $0x158] sm:$0xff]  ;;  %v11016_v38 = vpack.c.bf16 %v269_v29, %v264_v28  ;;  %v9669_v43 = vcombine.low %v313_v26, %v317_v27 }
  0x56   : > { %2221 = vmatpush1.bf16.msra.mxu0 %v9931_v41  ;;  %v560_v55 = vld [vmem:[%s15756_s1 + $0x800] sm:$0xff]  ;;  %v10954_v59 = vpack.c.bf16 %v262_v49, %v257_v48  ;;  %v309_v40 = vld [vmem:[%s15756_s1 + $0x28] sm:$0xff]  ;;  %v11028_v44 = vpack.c.bf16 %v277_v37, %v277_v37  ;;  %v248_v27 = vld [vmem:[%s10746_s29 + $0x70] sm:$0xff] }
  0x57   : > { %15868 = vst [vmem:[#allocation5_spill] sm:$0xff] %v10944_v53  ;;  %v564_v56 = vld [vmem:[%s15756_s1 + $0x820] sm:$0xff]  ;;  %2294 = vmatpush1.bf16.msra.mxu1 %v9709_v42  ;;  %2222 = vmatprep.subr.bf16.mxu0 %v9924_v46  ;;  %v11026_v42 = vpack.c.bf16 %v275_v35, %v275_v35  ;;  %v9662_v45 = vcombine.high %v305_v39, %v309_v40  ;;  %v425_v46 = vld [vmem:[%s15756_s1 + $0x3c8] sm:$0xff]  ;;  %v253_v28 = vld [vmem:[%s10746_s29 + $0x98] sm:$0xff] }
  0x58   : > { %15869 = vst [vmem:[#allocation6_spill] sm:$0xff] %v10954_v59  ;;  %2295 = vmatprep.subr.bf16.mxu1 %v9702_v47  ;;  %v254_v61 = vld [vmem:[%s10746_s29 + $0xa0] sm:$0xff]  ;;  %v9916_v3 = vcombine.high %v560_v55, %v564_v56  ;;  %v9915_v14 = vcombine.low %v560_v55, %v564_v56  ;;  %15873 = vst [vmem:[#allocation10_spill] sm:$0xff] %v11028_v44  ;;  %v429_v47 = vld [vmem:[%s15756_s1 + $0x3e8] sm:$0xff]  ;;  %v9661_v49 = vcombine.low %v305_v39, %v309_v40 }
  0x59   : > { %2091 = vmatmul.mubr.bf16.gmra.mxu0 %v10936_v50  ;;  %v270_v10 = vld [vmem:[%s10746_s29 + $0x120] sm:$0xff]  ;;  %v10984_v15 = vpack.c.bf16 %v259_v0, %v254_v61  ;;  %v9782_v52 = vcombine.high %v425_v46, %v429_v47  ;;  %v417_v56 = vld [vmem:[%s15756_s1 + $0x388] sm:$0xff]  ;;  %v9781_v61 = vcombine.low %v425_v46, %v429_v47 }
  0x5a   : > { %2172 = vmatmul.mubr.bf16.gmra.mxu1 %v10944_v53  ;;  %2100 = vmatprep.mubr.bf16.mxu0 %v10946_v54  ;;  %v10996_v20 = vpack.c.bf16 %v270_v10, %v265_v9  ;;  %v266_v33 = vld [vmem:[%s10746_s29 + $0x100] sm:$0xff]  ;;  %v409_v0 = vld [vmem:[%s15756_s1 + $0x348] sm:$0xff] }
  0x5b   : > { %2296 = vmatpush1.bf16.msra.mxu1 %v9701_v57  ;;  %2181 = vmatprep.mubr.bf16.mxu1 %v10954_v59  ;;  %v11024_v41 = vpack.c.bf16 %v271_v34, %v266_v33  ;;  %v274_v48 = vld [vmem:[%s10746_s29 + $0x140] sm:$0xff]  ;;  %v421_v57 = vld [vmem:[%s15756_s1 + $0x3a8] sm:$0xff] }
  0x5c   : > { %2297 = vmatprep.subr.bf16.mxu1 %v9694_v60  ;;  %2223 = vmatpush1.bf16.msra.mxu0 %v9923_v62  ;;  %v11042_v55 = vpack.c.bf16 %v274_v48, %v274_v48  ;;  %v11050_v60 = vpack.c.bf16 %v276_v51, %v276_v51  ;;  %v9774_v62 = vcombine.high %v417_v56, %v421_v57  ;;  %v413_v1 = vld [vmem:[%s15756_s1 + $0x368] sm:$0xff] }
  0x5d   : > { %2224 = vmatprep.subr.bf16.mxu0 %v9916_v3  ;;  %15872 = vst [vmem:[#allocation9_spill] sm:$0xff] %v11024_v41  ;;  %v238_v3 = vld [vmem:[%s10746_s29 + $0x20] sm:$0xff]  ;;  %v243_v4 = vld [vmem:[%s10746_s29 + $0x48] sm:$0xff]  ;;  %v9766_v8 = vcombine.high %v409_v0, %v413_v1  ;;  %v9765_v16 = vcombine.low %v409_v0, %v413_v1 }
  0x5e   : > { %15874 = vst [vmem:[#allocation11_spill] sm:$0xff] %v11042_v55  ;;  %15875 = vst [vmem:[#allocation12_spill] sm:$0xff] %v11050_v60  ;;  %v481_v9 = vld [vmem:[%s15756_s1 + $0x588] sm:$0xff] }
  0x5f   : > { %2298 = vmatpush1.bf16.msra.mxu1 %v9693_v7  ;;  %v9773_v7 = vcombine.low %v417_v56, %v421_v57  ;;  %v485_v10 = vld [vmem:[%s15756_s1 + $0x5a8] sm:$0xff]  ;;  %v258_v56 = vld [vmem:[%s10746_s29 + $0xc0] sm:$0xff] }
  0x60   : > { %2299 = vmatprep.subr.bf16.mxu1 %v9686_v11  ;;  %2225 = vmatpush1.bf16.msra.mxu0 %v9915_v14  ;;  %v11070_v11 = vpack.c.bf16 %v243_v4, %v238_v3  ;;  %v401_v12 = vld [vmem:[%s15756_s1 + $0x308] sm:$0xff]  ;;  %v9845_v14 = vcombine.low %v10971_v5, %v10976_v6  ;;  %v9838_v17 = vcombine.high %v481_v9, %v485_v10 }
  0x61   : > { %2101 = vmatmul.mubr.bf16.gmra.mxu0 %v10984_v15  ;;  %2372 = vmatprep.subr.bf16.mxu0 %v9846_v18  ;;  %v405_v13 = vld [vmem:[%s15756_s1 + $0x328] sm:$0xff]  ;;  %v9837_v26 = vcombine.low %v481_v9, %v485_v10 }
  0x62   : > { %2182 = vmatmul.mubr.bf16.gmra.mxu1 %v10994_v19  ;;  %2110 = vmatprep.mubr.bf16.mxu0 %v10996_v20  ;;  %15876 = vst [vmem:[#allocation13_spill] sm:$0xff] %v11070_v11  ;;  %v9758_v18 = vcombine.high %v401_v12, %v405_v13  ;;  %v393_v5 = vld [vmem:[%s15756_s1 + $0x2c8] sm:$0xff]  ;;  %v9757_v29 = vcombine.low %v401_v12, %v405_v13 }
  0x63   : > { %2300 = vmatpush1.bf16.msra.mxu1 %v9685_v22  ;;  %2191 = vmatprep.mubr.bf16.mxu1 %v10998_v23  ;;  %v473_v22 = vld [vmem:[%s15756_s1 + $0x548] sm:$0xff] }
  0x64   : > { %2301 = vmatprep.subr.bf16.mxu1 %v9678_v24  ;;  %v477_v24 = vld [vmem:[%s15756_s1 + $0x568] sm:$0xff] }
  0x65   : > { %v397_v6 = vld [vmem:[%s15756_s1 + $0x2e8] sm:$0xff]  ;;  %v9829_v40 = vcombine.low %v473_v22, %v477_v24 }
  0x66   : > { %v9750_v33 = vcombine.high %v393_v5, %v397_v6  ;;  %v465_v34 = vld [vmem:[%s15756_s1 + $0x508] sm:$0xff] }
  0x67   : > { %2302 = vmatpush1.bf16.msra.mxu1 %v9677_v31  ;;  %v9830_v31 = vcombine.high %v473_v22, %v477_v24  ;;  %v469_v35 = vld [vmem:[%s15756_s1 + $0x528] sm:$0xff]  ;;  %v268_v24 = vld [vmem:[%s10746_s29 + $0x110] sm:$0xff] }
  0x68   : > { %2303 = vmatprep.subr.bf16.mxu1 %v9670_v36  ;;  %v11103_v36 = vpack.c.bf16 %v253_v28, %v248_v27  ;;  %v385_v37 = vld [vmem:[%s15756_s1 + $0x288] sm:$0xff] }
  0x69   : > { %2111 = vmatmul.mubr.bf16.gmra.mxu0 %v11016_v38  ;;  %v389_v39 = vld [vmem:[%s15756_s1 + $0x2a8] sm:$0xff] }
  0x6a   : > { %2192 = vmatmul.mubr.bf16.gmra.mxu1 %v11024_v41  ;;  %2120 = vmatprep.mubr.bf16.mxu0 %v11026_v42  ;;  %15877 = vst [vmem:[#allocation14_spill] sm:$0xff] %v11103_v36  ;;  %v9742_v46 = vcombine.high %v385_v37, %v389_v39  ;;  %v457_v47 = vld [vmem:[%s15756_s1 + $0x4c8] sm:$0xff] }
  0x6b   : > { %2304 = vmatpush1.bf16.msra.mxu1 %v9669_v43  ;;  %2201 = vmatprep.mubr.bf16.mxu1 %v11028_v44  ;;  %v9749_v43 = vcombine.low %v393_v5, %v397_v6  ;;  %v461_v48 = vld [vmem:[%s15756_s1 + $0x4e8] sm:$0xff]  ;;  %v273_v5 = vld [vmem:[%s10746_s29 + $0x138] sm:$0xff] }
  0x6c   : > { %2305 = vmatprep.subr.bf16.mxu1 %v9662_v45  ;;  %v9822_v45 = vcombine.high %v465_v34, %v469_v35  ;;  %v381_v51 = vld [vmem:[%s15756_s1 + $0x268] sm:$0xff]  ;;  %v9813_v9 = vcombine.low %v457_v47, %v461_v48 }
  0x6d   : > { %v263_v57 = vld [vmem:[%s10746_s29 + $0xe8] sm:$0xff] }
  0x6e   : > { %v449_v1 = vld [vmem:[%s15756_s1 + $0x488] sm:$0xff]  ;;  %v11134_v4 = vpack.c.bf16 %v263_v57, %v258_v56 }
  0x6f   : > { %2306 = vmatpush1.bf16.msra.mxu1 %v9661_v49  ;;  %v377_v49 = vld [vmem:[%s15756_s1 + $0x248] sm:$0xff] }
  0x70   : > { %2307 = vmatprep.subr.bf16.mxu1 %v9782_v52  ;;  %v9821_v52 = vcombine.low %v465_v34, %v469_v35  ;;  %v9734_v0 = vcombine.high %v377_v49, %v381_v51  ;;  %v453_v3 = vld [vmem:[%s15756_s1 + $0x4a8] sm:$0xff]  ;;  %15878 = vst [vmem:[#allocation15_spill] sm:$0xff] %v11134_v4  ;;  %v9733_v10 = vcombine.low %v377_v49, %v381_v51  ;;  %v278_v49 = vld [vmem:[%s10746_s29 + $0x160] sm:$0xff] }
  0x71   : > { %2121 = vmatmul.mubr.bf16.gmra.mxu0 %v11042_v55  ;;  %v9806_v12 = vcombine.high %v449_v1, %v453_v3  ;;  %v9805_v22 = vcombine.low %v449_v1, %v453_v3  ;;  %v433_v28 = vld [vmem:[%s15756_s1 + $0x408] sm:$0xff] }
  0x72   : > { %2202 = vmatmul.mubr.bf16.gmra.mxu1 %v11050_v60  ;;  %2242 = vmatprep.mubr.bf16.mxu0 %v15761_v2  ;;  %v577_v34 = vld [vmem:[%s15756_s1 + $0x888] sm:$0xff] }
  0x73   : > { %2308 = vmatpush2.bf16.msra.mxu1 %v9781_v61  ;;  %2323 = vmatprep.mubr.bf16.mxu1 %v10762_v58  ;;  %v9741_v61 = vcombine.low %v385_v37, %v389_v39  ;;  %v581_v35 = vld [vmem:[%s15756_s1 + $0x8a8] sm:$0xff] }
  0x74   : > { %2309 = vmatprep.subr.bf16.mxu1 %v9774_v62  ;;  %v9814_v62 = vcombine.high %v457_v47, %v461_v48  ;;  %v573_v47 = vld [vmem:[%s15756_s1 + $0x868] sm:$0xff] }
  0x75   : > { %v545_v56 = vld [vmem:[%s15756_s1 + $0x788] sm:$0xff] }
  0x76   : > { %v549_v57 = vld [vmem:[%s15756_s1 + $0x7a8] sm:$0xff] }
  0x77   : > { %2310 = vmatpush2.bf16.msra.mxu1 %v9773_v7  ;;  %v369_v7 = vld [vmem:[%s15756_s1 + $0x208] sm:$0xff] }
  0x78   : > { %2311 = vmatprep.subr.bf16.mxu1 %v9766_v8  ;;  %v373_v8 = vld [vmem:[%s15756_s1 + $0x228] sm:$0xff] }
  0x79   : > { %9947 = vmatmul.mubr.msk.bf16.vlgmr.msra.gmra.mxu0 %vm2032_vm0, %v11070_v11  ;;  %v9726_v13 = vcombine.high %v369_v7, %v373_v8  ;;  %v9725_v6 = vcombine.low %v369_v7, %v373_v8  ;;  %v561_v1 = vld [vmem:[%s15756_s1 + $0x808] sm:$0xff]  ;;  %v9902_v7 = vcombine.high %v545_v56, %v549_v57 }
  0x7a   : > { %2373 = vmatpush1.bf16.msra.mxu0 %v9845_v14  ;;  %2252 = vmatprep.mubr.bf16.mxu0 %v15761_v2  ;;  %v441_v14 = vld [vmem:[%s15756_s1 + $0x448] sm:$0xff] }
  0x7b   : > { %2312 = vmatpush2.bf16.msra.mxu1 %v9765_v16  ;;  %2374 = vmatprep.subr.bf16.mxu0 %v9838_v17  ;;  %v445_v16 = vld [vmem:[%s15756_s1 + $0x468] sm:$0xff] }
  0x7c   : > { %2313 = vmatprep.subr.bf16.mxu1 %v9758_v18  ;;  %v585_v17 = vld [vmem:[%s15756_s1 + $0x8c8] sm:$0xff] }
  0x7d   : > { %v589_v18 = vld [vmem:[%s15756_s1 + $0x8e8] sm:$0xff] }
  0x7e   : > { %2375 = vmatpush1.bf16.msra.mxu0 %v9837_v26  ;;  %v9798_v26 = vcombine.high %v441_v14, %v445_v16  ;;  %v9942_v27 = vcombine.high %v585_v17, %v589_v18  ;;  %v9941_v37 = vcombine.low %v585_v17, %v589_v18  ;;  %v565_v3 = vld [vmem:[%s15756_s1 + $0x828] sm:$0xff] }
  0x7f   : > { %2314 = vmatpush2.bf16.msra.mxu1 %v9757_v29  ;;  %2376 = vmatprep.subr.bf16.mxu0 %v9830_v31  ;;  %v437_v29 = vld [vmem:[%s15756_s1 + $0x428] sm:$0xff]  ;;  %v11165_v31 = vpack.c.bf16 %v273_v5, %v268_v24  ;;  %v9917_v24 = vcombine.low %v561_v1, %v565_v3 }
  0x80   : > { %2315 = vmatprep.subr.bf16.mxu1 %v9750_v33  ;;  %v9797_v33 = vcombine.low %v441_v14, %v445_v16  ;;  %v9790_v39 = vcombine.high %v433_v28, %v437_v29  ;;  %v9789_v48 = vcombine.low %v433_v28, %v437_v29  ;;  %v537_v8 = vld [vmem:[%s15756_s1 + $0x748] sm:$0xff]  ;;  %v11217_v14 = vld [vmem:[%s15756_s1 + $0x5d0] sm:$0xff] }
  0x81   : > { %9948 = vmatmul.mubr.msk.bf16.gmra.mxu0 %vm2032_vm0, %v11103_v36  ;;  %15879 = vst [vmem:[#allocation16_spill] sm:$0xff] %v11165_v31  ;;  %v11222_v16 = vld [vmem:[%s15756_s1 + $0x5f0] sm:$0xff]  ;;  %v529_v18 = vld [vmem:[%s15756_s1 + $0x708] sm:$0xff] }
  0x82   : > { %2377 = vmatpush1.bf16.msra.mxu0 %v9829_v40  ;;  %2262 = vmatprep.mubr.bf16.mxu0 %v15761_v2  ;;  %v553_v40 = vld [vmem:[%s15756_s1 + $0x7c8] sm:$0xff]  ;;  %v9848_v5 = vcombine.high %v11217_v14, %v11222_v16 }
  0x83   : > { %2316 = vmatpush2.bf16.msra.mxu1 %v9749_v43  ;;  %2378 = vmatprep.subr.bf16.mxu0 %v9822_v45  ;;  %v557_v43 = vld [vmem:[%s15756_s1 + $0x7e8] sm:$0xff]  ;;  %v9934_v45 = vcombine.high %v577_v34, %v581_v35 }
  0x84   : > { %2317 = vmatprep.subr.bf16.mxu1 %v9742_v46  ;;  %v569_v46 = vld [vmem:[%s15756_s1 + $0x848] sm:$0xff]  ;;  %v9910_v51 = vcombine.high %v553_v40, %v557_v43 }
  0x85   : > { %v525_v28 = vld [vmem:[%s15756_s1 + $0x6e8] sm:$0xff] }
  0x86   : > { %2379 = vmatpush1.bf16.msra.mxu0 %v9821_v52  ;;  %v9933_v52 = vcombine.low %v577_v34, %v581_v35  ;;  %v513_v34 = vld [vmem:[%s15756_s1 + $0x688] sm:$0xff] }
  0x87   : > { %2318 = vmatpush2.bf16.msra.mxu1 %v9741_v61  ;;  %2380 = vmatprep.subr.bf16.mxu0 %v9814_v62  ;;  %v9926_v61 = vcombine.high %v569_v46, %v573_v47  ;;  %v11197_v62 = vpack.c.bf16 %v278_v49, %v278_v49  ;;  %v517_v35 = vld [vmem:[%s15756_s1 + $0x6a8] sm:$0xff] }
  0x88   : > { %2319 = vmatprep.subr.bf16.mxu1 %v9734_v0  ;;  %v9909_v0 = vcombine.low %v553_v40, %v557_v43  ;;  %v505_v40 = vld [vmem:[%s15756_s1 + $0x648] sm:$0xff] }
  0x89   : > { %9949 = vmatmul.mubr.msk.bf16.gmra.mxu0 %vm2032_vm0, %v11134_v4  ;;  %v509_v43 = vld [vmem:[%s15756_s1 + $0x668] sm:$0xff] }
  0x8a   : > { %2381 = vmatpush1.bf16.msra.mxu0 %v9813_v9  ;;  %2272 = vmatprep.mubr.bf16.mxu0 %v15761_v2  ;;  %v541_v9 = vld [vmem:[%s15756_s1 + $0x768] sm:$0xff]  ;;  %v9861_v49 = vcombine.low %v505_v40, %v509_v43 }
  0x8b   : > { %2320 = vmatpush2.bf16.msra.mxu1 %v9733_v10  ;;  %2382 = vmatprep.subr.bf16.mxu0 %v9806_v12  ;;  %v9925_v10 = vcombine.low %v569_v46, %v573_v47  ;;  %v9918_v12 = vcombine.high %v561_v1, %v565_v3  ;;  %v9894_v17 = vcombine.high %v537_v8, %v541_v9  ;;  %v497_v47 = vld [vmem:[%s15756_s1 + $0x608] sm:$0xff]  ;;  %v358_v1 = vld [vmem:[%s15756_s1 + $0x1b0] sm:$0xff] }
  0x8c   : > { %2321 = vmatprep.subr.bf16.mxu1 %v9726_v13  ;;  %v9901_v13 = vcombine.low %v545_v56, %v549_v57  ;;  %v9862_v46 = vcombine.high %v505_v40, %v509_v43  ;;  %v366_v56 = vld [vmem:[%s15756_s1 + $0x1f0] sm:$0xff] }
  0x8d   : > { %v482_v3 = vld [vmem:[%s15756_s1 + $0x590] sm:$0xff] }
  0x8e   : > { %2383 = vmatpush1.bf16.msra.mxu0 %v9805_v22  ;;  %v533_v22 = vld [vmem:[%s15756_s1 + $0x728] sm:$0xff]  ;;  %v458_v40 = vld [vmem:[%s15756_s1 + $0x4d0] sm:$0xff] }
  0x8f   : > { %2322 = vmatpush2.bf16.msra.mxu1 %v9725_v6  ;;  %2384 = vmatprep.subr.bf16.mxu0 %v9798_v26  ;;  %v9893_v6 = vcombine.low %v537_v8, %v541_v9  ;;  %v9886_v26 = vcombine.high %v529_v18, %v533_v22  ;;  %v9885_v29 = vcombine.low %v529_v18, %v533_v22  ;;  %v474_v18 = vld [vmem:[%s15756_s1 + $0x550] sm:$0xff] }
  0x90   : > { %2461 = vmatprep.subr.bf16.mxu1 %v9942_v27  ;;  %v521_v27 = vld [vmem:[%s15756_s1 + $0x6c8] sm:$0xff]  ;;  %v9847_v9 = vcombine.low %v11217_v14, %v11222_v16  ;;  %v478_v14 = vld [vmem:[%s15756_s1 + $0x570] sm:$0xff] }
  0x91   : > { %9950 = vmatmul.mubr.msk.bf16.gmra.mxu0 %vm2032_vm0, %v11165_v31  ;;  %v462_v43 = vld [vmem:[%s15756_s1 + $0x4f0] sm:$0xff] }
  0x92   : > { %2324 = vmatmul.mubr.bf16.vlgmr.msra.gmra.mxu1 %v10893_v21  ;;  %2385 = vmatpush1.bf16.msra.mxu0 %v9797_v33  ;;  %v9878_v33 = vcombine.high %v521_v27, %v525_v28 }
  0x93   : > { %2462 = vmatpush1.bf16.msra.mxu1 %v9941_v37  ;;  %2386 = vmatprep.subr.bf16.mxu0 %v9790_v39  ;;  %v9877_v37 = vcombine.low %v521_v27, %v525_v28  ;;  %v9870_v39 = vcombine.high %v513_v34, %v517_v35  ;;  %v466_v27 = vld [vmem:[%s15756_s1 + $0x510] sm:$0xff] }
  0x94   : > { %2282 = vmatprep.mubr.bf16.mxu0 %v15761_v2  ;;  %2333 = vmatprep.mubr.bf16.mxu1 %v10908_v30  ;;  %v470_v28 = vld [vmem:[%s15756_s1 + $0x530] sm:$0xff] }
  0x95   : > { %2463 = vmatprep.subr.bf16.mxu1 %v9934_v45  ;;  %v9869_v45 = vcombine.low %v513_v34, %v517_v35  ;;  %v9824_v35 = vcombine.high %v466_v27, %v470_v28 }
  0x96   : > { %2387 = vmatpush1.bf16.msra.mxu0 %v9789_v48  ;;  %v501_v48 = vld [vmem:[%s15756_s1 + $0x628] sm:$0xff] }
  0x97   : > { %2388 = vmatprep.subr.bf16.mxu0 %v9910_v51  ;;  %2464 = vmatpush1.bf16.msra.mxu1 %v9933_v52  ;;  %v9854_v51 = vcombine.high %v497_v47, %v501_v48  ;;  %v362_v52 = vld [vmem:[%s15756_s1 + $0x1d0] sm:$0xff]  ;;  %v9853_v57 = vcombine.low %v497_v47, %v501_v48  ;;  %v9816_v48 = vcombine.high %v458_v40, %v462_v43 }
  0x98   : > { %2465 = vmatprep.subr.bf16.mxu1 %v9926_v61  ;;  %v9720_v61 = vcombine.high %v362_v52, %v366_v56  ;;  %v9719_v8 = vcombine.low %v362_v52, %v366_v56  ;;  %v450_v52 = vld [vmem:[%s15756_s1 + $0x490] sm:$0xff] }
  0x99   : > { %9951 = vmatmul.mubr.msk.bf16.gmra.mxu0 %vm2032_vm0, %v11197_v62  ;;  %v454_v56 = vld [vmem:[%s15756_s1 + $0x4b0] sm:$0xff] }
  0x9a   : > { %2334 = vmatmul.mubr.bf16.gmra.mxu1 %v10936_v50  ;;  %2389 = vmatpush2.bf16.msra.mxu0 %v9909_v0  ;;  %v354_v0 = vld [vmem:[%s15756_s1 + $0x190] sm:$0xff] }
  0x9b   : > { %2390 = vmatprep.subr.bf16.mxu0 %v9902_v7  ;;  %2343 = vmatprep.mubr.bf16.mxu1 %v10946_v54  ;;  %v486_v7 = vld [vmem:[%s15756_s1 + $0x5b0] sm:$0xff]  ;;  %v9711_v16 = vcombine.low %v354_v0, %v358_v1 }
  0x9c   : > { %2466 = vmatpush1.bf16.msra.mxu1 %v9925_v10  ;;  %2404 = vmatprep.mubr.bf16.mxu0 %v10772_v63  ;;  %v9712_v10 = vcombine.high %v354_v0, %v358_v1  ;;  %v9839_v22 = vcombine.low %v482_v3, %v486_v7  ;;  %v9808_v1 = vcombine.high %v450_v52, %v454_v56 }
  0x9d   : > { %2467 = vmatprep.subr.bf16.mxu1 %v9918_v12  ;;  %v9840_v12 = vcombine.high %v482_v3, %v486_v7  ;;  %v314_v3 = vld [vmem:[%s15756_s1 + $0x50] sm:$0xff] }
  0x9e   : > { %2391 = vmatpush2.bf16.msra.mxu0 %v9901_v13  ;;  %v346_v13 = vld [vmem:[%s15756_s1 + $0x150] sm:$0xff] }
  0x9f   : > { %2392 = vmatprep.subr.bf16.mxu0 %v9894_v17  ;;  %v350_v17 = vld [vmem:[%s15756_s1 + $0x170] sm:$0xff] }
  0xa0   : > { %2468 = vmatpush1.bf16.msra.mxu1 %v9917_v24  ;;  %v9704_v24 = vcombine.high %v346_v13, %v350_v17  ;;  %v318_v7 = vld [vmem:[%s15756_s1 + $0x70] sm:$0xff] }
  0xa1   : > { %2615 = vmatprep.subr.bf16.mxu1 %v9848_v5  ;;  %v9832_v5 = vcombine.high %v474_v18, %v478_v14 }
  0xa2   : > { %2344 = vmatmul.mubr.bf16.gmra.mxu1 %v10984_v15  ;;  %2393 = vmatpush2.bf16.msra.mxu0 %v9893_v6  ;;  %v338_v6 = vld [vmem:[%s15756_s1 + $0x110] sm:$0xff] }
  0xa3   : > { %2394 = vmatprep.subr.bf16.mxu0 %v9886_v26  ;;  %2353 = vmatprep.mubr.bf16.mxu1 %v10996_v20  ;;  %v342_v26 = vld [vmem:[%s15756_s1 + $0x130] sm:$0xff] }
  0xa4   : > { %v9696_v34 = vcombine.high %v338_v6, %v342_v26 }
  0xa6   : > { %2395 = vmatpush2.bf16.msra.mxu0 %v9885_v29  ;;  %v9703_v29 = vcombine.low %v346_v13, %v350_v17  ;;  %v9672_v13 = vcombine.high %v314_v3, %v318_v7 }
  0xa7   : > { %2396 = vmatprep.subr.bf16.mxu0 %v9878_v33  ;;  %v9831_v33 = vcombine.low %v474_v18, %v478_v14  ;;  %v306_v18 = vld [vmem:[%s15756_s1 + $0x10] sm:$0xff] }
  0xa8   : > { %v310_v14 = vld [vmem:[%s15756_s1 + $0x30] sm:$0xff] }
  0xaa   : > { %2354 = vmatmul.mubr.bf16.gmra.mxu1 %v11016_v38  ;;  %2397 = vmatpush2.bf16.msra.mxu0 %v9877_v37  ;;  %v330_v37 = vld [vmem:[%s15756_s1 + $0xd0] sm:$0xff] }
  0xab   : > { %2398 = vmatprep.subr.bf16.mxu0 %v9870_v39  ;;  %2363 = vmatprep.mubr.bf16.mxu1 %v11026_v42  ;;  %v334_v39 = vld [vmem:[%s15756_s1 + $0xf0] sm:$0xff] }
  0xac   : > { %v9688_v47 = vcombine.high %v330_v37, %v334_v39 }
  0xae   : > { %2399 = vmatpush2.bf16.msra.mxu0 %v9869_v45  ;;  %v9695_v45 = vcombine.low %v338_v6, %v342_v26  ;;  %v9664_v6 = vcombine.high %v306_v18, %v310_v14 }
  0xaf   : > { %2400 = vmatprep.subr.bf16.mxu0 %v9862_v46  ;;  %v9823_v46 = vcombine.low %v466_v27, %v470_v28  ;;  %v426_v27 = vld [vmem:[%s15756_s1 + $0x3d0] sm:$0xff] }
  0xb0   : > { %v430_v28 = vld [vmem:[%s15756_s1 + $0x3f0] sm:$0xff] }
  0xb2   : > { %2364 = vmatmul.mubr.bf16.gmra.mxu1 %v11042_v55  ;;  %2401 = vmatpush2.bf16.msra.mxu0 %v9861_v49  ;;  %v322_v49 = vld [vmem:[%s15756_s1 + $0x90] sm:$0xff] }
  0xb3   : > { %2402 = vmatprep.subr.bf16.mxu0 %v9854_v51  ;;  %2485 = vmatprep.mubr.bf16.mxu1 %v15761_v2  ;;  %v326_v51 = vld [vmem:[%s15756_s1 + $0xb0] sm:$0xff] }
  0xb4   : > { %v9680_v0 = vcombine.high %v322_v49, %v326_v51 }
  0xb6   : > { %2403 = vmatpush2.bf16.msra.mxu0 %v9853_v57  ;;  %v9687_v57 = vcombine.low %v330_v37, %v334_v39  ;;  %v9784_v37 = vcombine.high %v426_v27, %v430_v28 }
  0xb7   : > { %2534 = vmatprep.subr.bf16.mxu0 %v9720_v61  ;;  %v9815_v61 = vcombine.low %v458_v40, %v462_v43  ;;  %v418_v40 = vld [vmem:[%s15756_s1 + $0x390] sm:$0xff] }
  0xb8   : > { %v422_v43 = vld [vmem:[%s15756_s1 + $0x3b0] sm:$0xff] }
  0xb9   : > { %2405 = vmatmul.mubr.bf16.vlgmr.msra.gmra.mxu0 %v10900_v25 }
  0xba   : > { %9952 = vmatmul.mubr.msk.bf16.vlgmr.msra.gmra.mxu1 %vm2032_vm0, %v11070_v11  ;;  %2535 = vmatpush1.bf16.msra.mxu0 %v9719_v8  ;;  %v442_v8 = vld [vmem:[%s15756_s1 + $0x450] sm:$0xff] }
  0xbb   : > { %2616 = vmatpush1.bf16.msra.mxu1 %v9847_v9  ;;  %2536 = vmatprep.subr.bf16.mxu0 %v9712_v10  ;;  %v446_v9 = vld [vmem:[%s15756_s1 + $0x470] sm:$0xff]  ;;  %v9679_v10 = vcombine.low %v322_v49, %v326_v51  ;;  %v9776_v49 = vcombine.high %v418_v40, %v422_v43 }
  0xbc   : > { %2617 = vmatprep.subr.bf16.mxu1 %v9840_v12  ;;  %2414 = vmatprep.mubr.bf16.mxu0 %v10910_v32  ;;  %v9807_v12 = vcombine.low %v450_v52, %v454_v56  ;;  %v9800_v17 = vcombine.high %v442_v8, %v446_v9  ;;  %v410_v52 = vld [vmem:[%s15756_s1 + $0x350] sm:$0xff] }
  0xbd   : > { %2495 = vmatprep.mubr.bf16.mxu1 %v15761_v2  ;;  %v414_v56 = vld [vmem:[%s15756_s1 + $0x370] sm:$0xff] }
  0xbe   : > { %2537 = vmatpush1.bf16.msra.mxu0 %v9711_v16  ;;  %v434_v16 = vld [vmem:[%s15756_s1 + $0x410] sm:$0xff] }
  0xbf   : > { %2618 = vmatpush1.bf16.msra.mxu1 %v9839_v22  ;;  %2538 = vmatprep.subr.bf16.mxu0 %v9704_v24  ;;  %v438_v22 = vld [vmem:[%s15756_s1 + $0x430] sm:$0xff]  ;;  %v9671_v24 = vcombine.low %v314_v3, %v318_v7  ;;  %v9768_v3 = vcombine.high %v410_v52, %v414_v56 }
  0xc0   : > { %2619 = vmatprep.subr.bf16.mxu1 %v9832_v5  ;;  %v9799_v5 = vcombine.low %v442_v8, %v446_v9  ;;  %v9792_v26 = vcombine.high %v434_v16, %v438_v22  ;;  %v402_v8 = vld [vmem:[%s15756_s1 + $0x310] sm:$0xff] }
  0xc1   : > { %2415 = vmatmul.mubr.bf16.gmra.mxu0 %v10944_v53  ;;  %v406_v9 = vld [vmem:[%s15756_s1 + $0x330] sm:$0xff] }
  0xc2   : > { %2539 = vmatpush1.bf16.msra.mxu0 %v9703_v29  ;;  %9953 = vmatmul.mubr.msk.bf16.gmra.mxu1 %vm2032_vm0, %v11103_v36  ;;  %v554_v29 = vld [vmem:[%s15756_s1 + $0x7d0] sm:$0xff] }
  0xc3   : > { %2620 = vmatpush1.bf16.msra.mxu1 %v9831_v33  ;;  %2540 = vmatprep.subr.bf16.mxu0 %v9696_v34  ;;  %v558_v33 = vld [vmem:[%s15756_s1 + $0x7f0] sm:$0xff]  ;;  %v9663_v34 = vcombine.low %v306_v18, %v310_v14  ;;  %v9760_v18 = vcombine.high %v402_v8, %v406_v9 }
  0xc4   : > { %2621 = vmatprep.subr.bf16.mxu1 %v9824_v35  ;;  %2424 = vmatprep.mubr.bf16.mxu0 %v10954_v59  ;;  %v9791_v35 = vcombine.low %v434_v16, %v438_v22  ;;  %v9912_v39 = vcombine.high %v554_v29, %v558_v33  ;;  %v394_v16 = vld [vmem:[%s15756_s1 + $0x2d0] sm:$0xff] }
  0xc5   : > { %2505 = vmatprep.mubr.bf16.mxu1 %v15761_v2  ;;  %v398_v22 = vld [vmem:[%s15756_s1 + $0x2f0] sm:$0xff] }
  0xc6   : > { %2541 = vmatpush1.bf16.msra.mxu0 %v9695_v45  ;;  %v546_v45 = vld [vmem:[%s15756_s1 + $0x790] sm:$0xff] }
  0xc7   : > { %2622 = vmatpush1.bf16.msra.mxu1 %v9823_v46  ;;  %2542 = vmatprep.subr.bf16.mxu0 %v9688_v47  ;;  %v550_v46 = vld [vmem:[%s15756_s1 + $0x7b0] sm:$0xff]  ;;  %v9783_v47 = vcombine.low %v426_v27, %v430_v28  ;;  %v9752_v27 = vcombine.high %v394_v16, %v398_v22 }
  0xc8   : > { %2623 = vmatprep.subr.bf16.mxu1 %v9816_v48  ;;  %v9911_v48 = vcombine.low %v554_v29, %v558_v33  ;;  %v9904_v51 = vcombine.high %v546_v45, %v550_v46  ;;  %v386_v29 = vld [vmem:[%s15756_s1 + $0x290] sm:$0xff] }
  0xc9   : > { %2425 = vmatmul.mubr.bf16.gmra.mxu0 %v10994_v19  ;;  %v390_v33 = vld [vmem:[%s15756_s1 + $0x2b0] sm:$0xff] }
  0xca   : > { %2543 = vmatpush1.bf16.msra.mxu0 %v9687_v57  ;;  %9954 = vmatmul.mubr.msk.bf16.gmra.mxu1 %vm2032_vm0, %v11134_v4  ;;  %v538_v57 = vld [vmem:[%s15756_s1 + $0x750] sm:$0xff] }
  0xcb   : > { %2624 = vmatpush1.bf16.msra.mxu1 %v9815_v61  ;;  %2544 = vmatprep.subr.bf16.mxu0 %v9680_v0  ;;  %v542_v61 = vld [vmem:[%s15756_s1 + $0x770] sm:$0xff]  ;;  %v9775_v0 = vcombine.low %v418_v40, %v422_v43  ;;  %v9744_v40 = vcombine.high %v386_v29, %v390_v33 }
  0xcc   : > { %2625 = vmatprep.subr.bf16.mxu1 %v9808_v1  ;;  %2434 = vmatprep.mubr.bf16.mxu0 %v10998_v23  ;;  %v9903_v1 = vcombine.low %v546_v45, %v550_v46  ;;  %v9896_v7 = vcombine.high %v538_v57, %v542_v61  ;;  %v378_v45 = vld [vmem:[%s15756_s1 + $0x250] sm:$0xff] }
  0xcd   : > { %2515 = vmatprep.mubr.bf16.mxu1 %v15761_v2  ;;  %v382_v46 = vld [vmem:[%s15756_s1 + $0x270] sm:$0xff] }
  0xce   : > { %2545 = vmatpush1.bf16.msra.mxu0 %v9679_v10  ;;  %v530_v10 = vld [vmem:[%s15756_s1 + $0x710] sm:$0xff] }
  0xcf   : > { %2626 = vmatpush1.bf16.msra.mxu1 %v9807_v12  ;;  %2546 = vmatprep.subr.bf16.mxu0 %v9672_v13  ;;  %v534_v12 = vld [vmem:[%s15756_s1 + $0x730] sm:$0xff]  ;;  %v9767_v13 = vcombine.low %v410_v52, %v414_v56  ;;  %v9736_v52 = vcombine.high %v378_v45, %v382_v46 }
  0xd0   : > { %2627 = vmatprep.subr.bf16.mxu1 %v9800_v17  ;;  %v9895_v17 = vcombine.low %v538_v57, %v542_v61  ;;  %v9888_v14 = vcombine.high %v530_v10, %v534_v12  ;;  %v370_v57 = vld [vmem:[%s15756_s1 + $0x210] sm:$0xff] }
  0xd1   : > { %2435 = vmatmul.mubr.bf16.gmra.mxu0 %v11024_v41  ;;  %v374_v61 = vld [vmem:[%s15756_s1 + $0x230] sm:$0xff] }
  0xd2   : > { %2547 = vmatpush1.bf16.msra.mxu0 %v9671_v24  ;;  %9955 = vmatmul.mubr.msk.bf16.gmra.mxu1 %vm2032_vm0, %v11165_v31  ;;  %v522_v24 = vld [vmem:[%s15756_s1 + $0x6d0] sm:$0xff] }
  0xd3   : > { %2628 = vmatpush1.bf16.msra.mxu1 %v9799_v5  ;;  %2548 = vmatprep.subr.bf16.mxu0 %v9664_v6  ;;  %v526_v5 = vld [vmem:[%s15756_s1 + $0x6f0] sm:$0xff]  ;;  %v9759_v6 = vcombine.low %v402_v8, %v406_v9  ;;  %v9728_v8 = vcombine.high %v370_v57, %v374_v61 }
  0xd4   : > { %2629 = vmatprep.subr.bf16.mxu1 %v9792_v26  ;;  %2444 = vmatprep.mubr.bf16.mxu0 %v11028_v44  ;;  %v9887_v26 = vcombine.low %v530_v10, %v534_v12  ;;  %v9880_v28 = vcombine.high %v522_v24, %v526_v5  ;;  %v586_v10 = vld [vmem:[%s15756_s1 + $0x8d0] sm:$0xff] }
  0xd5   : > { %2525 = vmatprep.mubr.bf16.mxu1 %v15761_v2  ;;  %v590_v12 = vld [vmem:[%s15756_s1 + $0x8f0] sm:$0xff] }
  0xd6   : > { %2549 = vmatpush1.bf16.msra.mxu0 %v9663_v34  ;;  %v514_v34 = vld [vmem:[%s15756_s1 + $0x690] sm:$0xff] }
  0xd7   : > { %2630 = vmatpush1.bf16.msra.mxu1 %v9791_v35  ;;  %2550 = vmatprep.subr.bf16.mxu0 %v9784_v37  ;;  %v518_v35 = vld [vmem:[%s15756_s1 + $0x6b0] sm:$0xff]  ;;  %v9751_v37 = vcombine.low %v394_v16, %v398_v22  ;;  %v9944_v16 = vcombine.high %v586_v10, %v590_v12 }
  0xd8   : > { %2631 = vmatprep.subr.bf16.mxu1 %v9912_v39  ;;  %v9879_v39 = vcombine.low %v522_v24, %v526_v5  ;;  %v9872_v43 = vcombine.high %v514_v34, %v518_v35  ;;  %v355_v24 = vld [vmem:[%s15756_s1 + $0x198] sm:$0xff] }
  0xd9   : > { %2445 = vmatmul.mubr.bf16.gmra.mxu0 %v11050_v60  ;;  %v359_v5 = vld [vmem:[%s15756_s1 + $0x1b8] sm:$0xff] }
  0xda   : > { %2551 = vmatpush2.bf16.msra.mxu0 %v9783_v47  ;;  %9956 = vmatmul.mubr.msk.bf16.gmra.mxu1 %vm2032_vm0, %v11197_v62  ;;  %v506_v47 = vld [vmem:[%s15756_s1 + $0x650] sm:$0xff] }
  0xdb   : > { %2632 = vmatpush2.bf16.msra.mxu1 %v9911_v48  ;;  %2552 = vmatprep.subr.bf16.mxu0 %v9776_v49  ;;  %v510_v48 = vld [vmem:[%s15756_s1 + $0x670] sm:$0xff]  ;;  %v9743_v49 = vcombine.low %v386_v29, %v390_v33  ;;  %v9714_v29 = vcombine.high %v355_v24, %v359_v5 }
  0xdc   : > { %2633 = vmatprep.subr.bf16.mxu1 %v9904_v51  ;;  %2566 = vmatprep.mubr.bf16.mxu0 %v10762_v58  ;;  %v9871_v51 = vcombine.low %v514_v34, %v518_v35  ;;  %v9864_v56 = vcombine.high %v506_v47, %v510_v48  ;;  %v570_v33 = vld [vmem:[%s15756_s1 + $0x850] sm:$0xff]  ;;  %v347_v35 = vld [vmem:[%s15756_s1 + $0x158] sm:$0xff] }
  0xdd   : > { %2647 = vmatprep.mubr.bf16.mxu1 %v10772_v63  ;;  %v574_v34 = vld [vmem:[%s15756_s1 + $0x870] sm:$0xff] }
  0xde   : > { %2553 = vmatpush2.bf16.msra.mxu0 %v9775_v0  ;;  %v498_v0 = vld [vmem:[%s15756_s1 + $0x610] sm:$0xff] }
  0xdf   : > { %2634 = vmatpush2.bf16.msra.mxu1 %v9903_v1  ;;  %2554 = vmatprep.subr.bf16.mxu0 %v9768_v3  ;;  %v502_v1 = vld [vmem:[%s15756_s1 + $0x630] sm:$0xff]  ;;  %v9735_v3 = vcombine.low %v378_v45, %v382_v46  ;;  %v9928_v45 = vcombine.high %v570_v33, %v574_v34 }
  0xe0   : > { %2635 = vmatprep.subr.bf16.mxu1 %v9896_v7  ;;  %v9863_v7 = vcombine.low %v506_v47, %v510_v48  ;;  %v9856_v9 = vcombine.high %v498_v0, %v502_v1  ;;  %v339_v47 = vld [vmem:[%s15756_s1 + $0x118] sm:$0xff] }
  0xe1   : > { %v343_v48 = vld [vmem:[%s15756_s1 + $0x138] sm:$0xff] }
  0xe2   : > { %2555 = vmatpush2.bf16.msra.mxu0 %v9767_v13  ;;  %v363_v13 = vld [vmem:[%s15756_s1 + $0x1d8] sm:$0xff] }
  0xe3   : > { %2636 = vmatpush2.bf16.msra.mxu1 %v9895_v17  ;;  %2556 = vmatprep.subr.bf16.mxu0 %v9760_v18  ;;  %v367_v17 = vld [vmem:[%s15756_s1 + $0x1f8] sm:$0xff]  ;;  %v9727_v18 = vcombine.low %v370_v57, %v374_v61  ;;  %v9927_v57 = vcombine.low %v570_v33, %v574_v34 }
  0xe4   : > { %2637 = vmatprep.subr.bf16.mxu1 %v9888_v14  ;;  %v9855_v14 = vcombine.low %v498_v0, %v502_v1  ;;  %v9722_v22 = vcombine.high %v363_v13, %v367_v17  ;;  %v331_v61 = vld [vmem:[%s15756_s1 + $0xd8] sm:$0xff] }
  0xe5   : > { %v335_v0 = vld [vmem:[%s15756_s1 + $0xf8] sm:$0xff] }
  0xe6   : > { %2557 = vmatpush2.bf16.msra.mxu0 %v9759_v6  ;;  %v9943_v6 = vcombine.low %v586_v10, %v590_v12  ;;  %v323_v12 = vld [vmem:[%s15756_s1 + $0x98] sm:$0xff] }
  0xe7   : > { %2638 = vmatpush2.bf16.msra.mxu1 %v9887_v26  ;;  %2558 = vmatprep.subr.bf16.mxu0 %v9752_v27  ;;  %v578_v26 = vld [vmem:[%s15756_s1 + $0x890] sm:$0xff]  ;;  %v427_v33 = vld [vmem:[%s15756_s1 + $0x3d8] sm:$0xff] }
  0xe8   : > { %2639 = vmatprep.subr.bf16.mxu1 %v9880_v28  ;;  %v582_v27 = vld [vmem:[%s15756_s1 + $0x8b0] sm:$0xff]  ;;  %v9721_v28 = vcombine.low %v363_v13, %v367_v17  ;;  %v327_v13 = vld [vmem:[%s15756_s1 + $0xb8] sm:$0xff] }
  0xe9   : > { %v431_v34 = vld [vmem:[%s15756_s1 + $0x3f8] sm:$0xff] }
  0xea   : > { %2559 = vmatpush2.bf16.msra.mxu0 %v9751_v37  ;;  %v351_v37 = vld [vmem:[%s15756_s1 + $0x178] sm:$0xff] }
  0xeb   : > { %2640 = vmatpush2.bf16.msra.mxu1 %v9879_v39  ;;  %2560 = vmatprep.subr.bf16.mxu0 %v9744_v40  ;;  %v9936_v39 = vcombine.high %v578_v26, %v582_v27  ;;  %v9935_v40 = vcombine.low %v578_v26, %v582_v27  ;;  %v9706_v46 = vcombine.high %v347_v35, %v351_v37  ;;  %v311_v26 = vld [vmem:[%s15756_s1 + $0x38] sm:$0xff] }
  0xec   : > { %2641 = vmatprep.subr.bf16.mxu1 %v9872_v43  ;;  %v9713_v43 = vcombine.low %v355_v24, %v359_v5  ;;  %v9681_v24 = vcombine.low %v323_v12, %v327_v13 }
  0xee   : > { %2561 = vmatpush2.bf16.msra.mxu0 %v9743_v49  ;;  %v562_v49 = vld [vmem:[%s15756_s1 + $0x810] sm:$0xff] }
  0xef   : > { %2642 = vmatpush2.bf16.msra.mxu1 %v9871_v51  ;;  %2562 = vmatprep.subr.bf16.mxu0 %v9736_v52  ;;  %v566_v51 = vld [vmem:[%s15756_s1 + $0x830] sm:$0xff]  ;;  %v9705_v52 = vcombine.low %v347_v35, %v351_v37 }
  0xf0   : > { %2643 = vmatprep.subr.bf16.mxu1 %v9864_v56  ;;  %v9698_v56 = vcombine.high %v339_v47, %v343_v48  ;;  %v9920_v1 = vcombine.high %v562_v49, %v566_v51  ;;  %v9919_v10 = vcombine.low %v562_v49, %v566_v51  ;;  %v9785_v51 = vcombine.low %v427_v33, %v431_v34 }
  0xf2   : > { %2563 = vmatpush2.bf16.msra.mxu0 %v9735_v3  ;;  %v11541_v3 = vld [vmem:[%s15756_s1 + $0x5d8] sm:$0xff] }
  0xf3   : > { %2644 = vmatpush2.bf16.msra.mxu1 %v9863_v7  ;;  %2564 = vmatprep.subr.bf16.mxu0 %v9728_v8  ;;  %v11546_v7 = vld [vmem:[%s15756_s1 + $0x5f8] sm:$0xff]  ;;  %v9697_v8 = vcombine.low %v339_v47, %v343_v48 }
  0xf4   : > { %2645 = vmatprep.subr.bf16.mxu1 %v9856_v9  ;;  %v9690_v9 = vcombine.high %v331_v61, %v335_v0  ;;  %v9850_v17 = vcombine.high %v11541_v3, %v11546_v7  ;;  %v423_v47 = vld [vmem:[%s15756_s1 + $0x3b8] sm:$0xff] }
  0xf6   : > { %2565 = vmatpush2.bf16.msra.mxu0 %v9727_v18  ;;  %v9689_v18 = vcombine.low %v331_v61, %v335_v0  ;;  %v411_v61 = vld [vmem:[%s15756_s1 + $0x358] sm:$0xff] }
  0xf7   : > { %2646 = vmatpush2.bf16.msra.mxu1 %v9855_v14  ;;  %2704 = vmatprep.subr.bf16.mxu0 %v9944_v16  ;;  %v9682_v14 = vcombine.high %v323_v12, %v327_v13  ;;  %v315_v16 = vld [vmem:[%s15756_s1 + $0x58] sm:$0xff] }
  0xf8   : > { %2777 = vmatprep.subr.bf16.mxu1 %v9722_v22  ;;  %v319_v22 = vld [vmem:[%s15756_s1 + $0x78] sm:$0xff] }
  0xf9   : > { %2567 = vmatmul.mubr.bf16.vlgmr.msra.gmra.mxu0 %v10893_v21  ;;  %v9674_v5 = vcombine.high %v315_v16, %v319_v22  ;;  %v9673_v27 = vcombine.low %v315_v16, %v319_v22  ;;  %v415_v0 = vld [vmem:[%s15756_s1 + $0x378] sm:$0xff]  ;;  %v9849_v22 = vcombine.low %v11541_v3, %v11546_v7 }
  0xfa   : > { %2648 = vmatmul.mubr.bf16.vlgmr.msra.gmra.mxu1 %v10900_v25  ;;  %2705 = vmatpush1.bf16.msra.mxu0 %v9943_v6  ;;  %v307_v6 = vld [vmem:[%s15756_s1 + $0x18] sm:$0xff]  ;;  %v9770_v12 = vcombine.high %v411_v61, %v415_v0 }
  0xfb   : > { %2778 = vmatpush1.bf16.msra.mxu1 %v9721_v28  ;;  %2576 = vmatprep.mubr.bf16.mxu0 %v10908_v30  ;;  %v9666_v28 = vcombine.high %v307_v6, %v311_v26  ;;  %v483_v13 = vld [vmem:[%s15756_s1 + $0x598] sm:$0xff] }
  0xfc   : > { %2779 = vmatprep.subr.bf16.mxu1 %v9714_v29  ;;  %2657 = vmatprep.mubr.bf16.mxu1 %v10910_v32  ;;  %v395_v7 = vld [vmem:[%s15756_s1 + $0x2d8] sm:$0xff] }
  0xfd   : > { %2706 = vmatprep.subr.bf16.mxu0 %v9936_v39  ;;  %v9665_v39 = vcombine.low %v307_v6, %v311_v26 }
  0xfe   : > { %2707 = vmatpush1.bf16.msra.mxu0 %v9935_v40 }
  0xff   : > { %2780 = vmatpush1.bf16.msra.mxu1 %v9713_v43  ;;  %2708 = vmatprep.subr.bf16.mxu0 %v9928_v45  ;;  %v9786_v43 = vcombine.high %v427_v33, %v431_v34  ;;  %v479_v33 = vld [vmem:[%s15756_s1 + $0x578] sm:$0xff] }
 0x100   : > { %2781 = vmatprep.subr.bf16.mxu1 %v9706_v46  ;;  %v419_v46 = vld [vmem:[%s15756_s1 + $0x398] sm:$0xff] }
 0x101   : > { %2577 = vmatmul.mubr.bf16.gmra.mxu0 %v10936_v50  ;;  %v399_v34 = vld [vmem:[%s15756_s1 + $0x2f8] sm:$0xff] }
 0x102   : > { %2658 = vmatmul.mubr.bf16.gmra.mxu1 %v10944_v53  ;;  %2586 = vmatprep.mubr.bf16.mxu0 %v10946_v54 }
 0x103   : > { %2782 = vmatpush1.bf16.msra.mxu1 %v9705_v52  ;;  %2667 = vmatprep.mubr.bf16.mxu1 %v10954_v59  ;;  %v451_v59 = vld [vmem:[%s15756_s1 + $0x498] sm:$0xff] }
 0x104   : > { %2783 = vmatprep.subr.bf16.mxu1 %v9698_v56  ;;  %2709 = vmatpush1.bf16.msra.mxu0 %v9927_v57  ;;  %v9778_v56 = vcombine.high %v419_v46, %v423_v47 }
 0x105   : > { %2710 = vmatprep.subr.bf16.mxu0 %v9920_v1 }
 0x107   : > { %2784 = vmatpush1.bf16.msra.mxu1 %v9697_v8 }
 0x108   : > { %2785 = vmatprep.subr.bf16.mxu1 %v9690_v9  ;;  %2711 = vmatpush1.bf16.msra.mxu0 %v9919_v10  ;;  %v9777_v9 = vcombine.low %v419_v46, %v423_v47 }
 0x109   : > { %2587 = vmatmul.mubr.bf16.gmra.mxu0 %v10984_v15  ;;  %2858 = vmatprep.subr.bf16.mxu0 %v9850_v17  ;;  %v487_v17 = vld [vmem:[%s15756_s1 + $0x5b8] sm:$0xff] }
 0x10a   : > { %2668 = vmatmul.mubr.bf16.gmra.mxu1 %v10994_v19  ;;  %2596 = vmatprep.mubr.bf16.mxu0 %v10996_v20  ;;  %v9842_v6 = vcombine.high %v483_v13, %v487_v17 }
 0x10b   : > { %2786 = vmatpush1.bf16.msra.mxu1 %v9689_v18  ;;  %2677 = vmatprep.mubr.bf16.mxu1 %v10998_v23 }
 0x10c   : > { %2787 = vmatprep.subr.bf16.mxu1 %v9682_v14  ;;  %v403_v14 = vld [vmem:[%s15756_s1 + $0x318] sm:$0xff] }
 0x10f   : > { %2788 = vmatpush1.bf16.msra.mxu1 %v9681_v24 }
 0x110   : > { %2789 = vmatprep.subr.bf16.mxu1 %v9674_v5  ;;  %v9769_v5 = vcombine.low %v411_v61, %v415_v0  ;;  %v9754_v61 = vcombine.high %v395_v7, %v399_v34  ;;  %v467_v0 = vld [vmem:[%s15756_s1 + $0x518] sm:$0xff] }
 0x111   : > { %2597 = vmatmul.mubr.bf16.gmra.mxu0 %v11016_v38  ;;  %v11574_v29 = vpop.f32.mrf.mxu0 }
 0x112   : > { %2678 = vmatmul.mubr.bf16.gmra.mxu1 %v11024_v41  ;;  %v11583_v35 = vpop.f32.mrf.mxu1  ;;  %2606 = vmatprep.mubr.bf16.mxu0 %v11026_v42 }
 0x113   : > { %2790 = vmatpush1.bf16.msra.mxu1 %v9673_v27  ;;  %v11586_v37 = vpop.f32.mrf.mxu0  ;;  %2687 = vmatprep.mubr.bf16.mxu1 %v11028_v44 }
 0x114   : > { %v11589_v40 = vpop.f32.mrf.mxu1  ;;  %2791 = vmatprep.subr.bf16.mxu1 %v9666_v28  ;;  %v475_v28 = vld [vmem:[%s15756_s1 + $0x558] sm:$0xff] }
 0x115   : > { %v11591_v45 = vpop.f32.mrf.mxu0 }
 0x116   : > { %v11599_v48 = vpop.f32.mrf.mxu1 }
 0x117   : > { %2792 = vmatpush1.bf16.msra.mxu1 %v9665_v39  ;;  %v11601_v49 = vpop.f32.mrf.mxu0 }
 0x118   : > { %v11603_v52 = vpop.f32.mrf.mxu1  ;;  %2793 = vmatprep.subr.bf16.mxu1 %v9786_v43  ;;  %v9841_v43 = vcombine.low %v483_v13, %v487_v17  ;;  %v387_v13 = vld [vmem:[%s15756_s1 + $0x298] sm:$0xff] }
 0x119   : > { %2607 = vmatmul.mubr.bf16.gmra.mxu0 %v11042_v55  ;;  %v11606_v57 = vpop.f32.mrf.mxu0  ;;  %v391_v17 = vld [vmem:[%s15756_s1 + $0x2b8] sm:$0xff] }
 0x11a   : > { %2688 = vmatmul.mubr.bf16.gmra.mxu1 %v11050_v60  ;;  %v11615_v1 = vpop.f32.mrf.mxu1  ;;  %2728 = vmatprep.mubr.bf16.mxu0 %v15761_v2  ;;  %v459_v60 = vld [vmem:[%s15756_s1 + $0x4d8] sm:$0xff]  ;;  %v9745_v44 = vcombine.low %v387_v13, %v391_v17 }
 0x11b   : > { %2794 = vmatpush2.bf16.msra.mxu1 %v9785_v51  ;;  %v11618_v8 = vpop.f32.mrf.mxu0  ;;  %2809 = vmatprep.mubr.bf16.mxu1 %v10762_v58  ;;  %v407_v58 = vld [vmem:[%s15756_s1 + $0x338] sm:$0xff]  ;;  %v9834_v51 = vcombine.high %v475_v28, %v479_v33 }
 0x11c   : > { %v11621_v10 = vpop.f32.mrf.mxu1  ;;  %2795 = vmatprep.subr.bf16.mxu1 %v9778_v56  ;;  %v9762_v27 = vcombine.high %v403_v14, %v407_v58  ;;  %v9761_v47 = vcombine.low %v403_v14, %v407_v58  ;;  %v9833_v58 = vcombine.low %v475_v28, %v479_v33  ;;  %v379_v33 = vld [vmem:[%s15756_s1 + $0x258] sm:$0xff] }
 0x11d   : > { %v11629_v18 = vpop.f32.mrf.mxu0 }
 0x11e   : > { %v11637_v16 = vpop.f32.mrf.mxu1 }
 0x11f   : > { %2796 = vmatpush2.bf16.msra.mxu1 %v9777_v9  ;;  %v11641_v24 = vpop.f32.mrf.mxu0  ;;  %v471_v9 = vld [vmem:[%s15756_s1 + $0x538] sm:$0xff] }
 0x120   : > { %v11643_v26 = vpop.f32.mrf.mxu1  ;;  %2797 = vmatprep.subr.bf16.mxu1 %v9770_v12 }
 0x121   : > { %9957 = vmatmul.mubr.msk.bf16.vlgmr.msra.gmra.mxu0 %vm2032_vm0, %v11070_v11  ;;  %v11653_v3 = vpop.f32.mrf.mxu0  ;;  %v443_v11 = vld [vmem:[%s15756_s1 + $0x458] sm:$0xff] }
 0x122   : > { %2859 = vmatpush1.bf16.msra.mxu0 %v9849_v22  ;;  %v11661_v39 = vpop.f32.mrf.mxu1  ;;  %2738 = vmatprep.mubr.bf16.mxu0 %v15761_v2  ;;  %v9746_v2 = vcombine.high %v387_v13, %v391_v17  ;;  %v375_v13 = vld [vmem:[%s15756_s1 + $0x238] sm:$0xff] }
 0x123   : > { %2798 = vmatpush2.bf16.msra.mxu1 %v9769_v5  ;;  %v11664_v46 = vpop.f32.mrf.mxu0  ;;  %2860 = vmatprep.subr.bf16.mxu0 %v9842_v6  ;;  %v9753_v5 = vcombine.low %v395_v7, %v399_v34  ;;  %v9826_v6 = vcombine.high %v467_v0, %v471_v9  ;;  %v383_v7 = vld [vmem:[%s15756_s1 + $0x278] sm:$0xff] }
 0x124   : > { %v11666_v56 = vpop.f32.mrf.mxu1  ;;  %2799 = vmatprep.subr.bf16.mxu1 %v9762_v27  ;;  %v9738_v19 = vcombine.high %v379_v33, %v383_v7 }
 0x125   : > { %v11674_v12 = vpop.f32.mrf.mxu0 }
 0x126   : > { %2861 = vmatpush1.bf16.msra.mxu0 %v9841_v43  ;;  %v11682_v14 = vpop.f32.mrf.mxu1  ;;  %v463_v43 = vld [vmem:[%s15756_s1 + $0x4f8] sm:$0xff] }
 0x127   : > { %2800 = vmatpush2.bf16.msra.mxu1 %v9761_v47  ;;  %v11684_v22 = vpop.f32.mrf.mxu0  ;;  %2862 = vmatprep.subr.bf16.mxu0 %v9834_v51  ;;  %v9825_v47 = vcombine.low %v467_v0, %v471_v9  ;;  %v15880_v51 = vmov 0   ;;  %v9818_v41 = vcombine.high %v459_v60, %v463_v43  ;;  %v455_v0 = vld [vmem:[%s15756_s1 + $0x4b8] sm:$0xff]  ;;  %v9817_v17 = vcombine.low %v459_v60, %v463_v43 }
 0x128   : > { %v11686_v27 = vpop.f32.mrf.mxu1  ;;  %2801 = vmatprep.subr.bf16.mxu1 %v9754_v61  ;;  %v9809_v43 = vcombine.low %v451_v59, %v455_v0 }
 0x129   : > { %9958 = vmatmul.mubr.msk.bf16.gmra.mxu0 %vm2032_vm0, %v11103_v36  ;;  %v11696_v28 = vpop.f32.mrf.mxu0  ;;  %v9810_v36 = vcombine.high %v451_v59, %v455_v0  ;;  %v439_v59 = vld [vmem:[%s15756_s1 + $0x438] sm:$0xff] }
 0x12a   : > { %2863 = vmatpush1.bf16.msra.mxu0 %v9833_v58  ;;  %v11704_v34 = vpop.f32.mrf.mxu1  ;;  %2748 = vmatprep.mubr.bf16.mxu0 %v15880_v51  ;;  %v371_v58 = vld [vmem:[%s15756_s1 + $0x218] sm:$0xff] }
 0x12b   : > { %2802 = vmatpush2.bf16.msra.mxu1 %v9753_v5  ;;  %v11707_v61 = vpop.f32.mrf.mxu0  ;;  %2864 = vmatprep.subr.bf16.mxu0 %v9826_v6  ;;  %v9737_v6 = vcombine.low %v379_v33, %v383_v7  ;;  %v9730_v32 = vcombine.high %v371_v58, %v375_v13  ;;  %v9729_v7 = vcombine.low %v371_v58, %v375_v13 }
 0x12c   : > { %v11709_v23 = vpop.f32.mrf.mxu1  ;;  %2803 = vmatprep.subr.bf16.mxu1 %v9746_v2 }
 0x12d   : > { %v11717_v9 = vpop.f32.mrf.mxu0 }
 0x12e   : > { %2865 = vmatpush1.bf16.msra.mxu0 %v9825_v47  ;;  %v11725_v2 = vpop.f32.mrf.mxu1  ;;  %v447_v47 = vld [vmem:[%s15756_s1 + $0x478] sm:$0xff] }
 0x12f   : > { %2804 = vmatpush2.bf16.msra.mxu1 %v9745_v44  ;;  %v11727_v5 = vpop.f32.mrf.mxu0  ;;  %2866 = vmatprep.subr.bf16.mxu0 %v9818_v41  ;;  %v587_v41 = vld [vmem:[%s15756_s1 + $0x8d8] sm:$0xff] }
 0x130   : > { %v11729_v53 = vpop.f32.mrf.mxu1  ;;  %2805 = vmatprep.subr.bf16.mxu1 %v9738_v19  ;;  %v591_v19 = vld [vmem:[%s15756_s1 + $0x8f8] sm:$0xff] }
 0x131   : > { %9959 = vmatmul.mubr.msk.bf16.gmra.mxu0 %vm2032_vm0, %v11134_v4  ;;  %v11739_v44 = vpop.f32.mrf.mxu0  ;;  %v9802_v4 = vcombine.high %v443_v11, %v447_v47  ;;  %v9946_v55 = vcombine.high %v587_v41, %v591_v19 }
 0x132   : > { %15881 = vst [vmem:[#allocation17_spill] sm:$0xff] %v11739_v44  ;;  %2867 = vmatpush1.bf16.msra.mxu0 %v9817_v17  ;;  %v11747_v60 = vpop.f32.mrf.mxu1  ;;  %2758 = vmatprep.mubr.bf16.mxu0 %v15880_v51  ;;  %v435_v44 = vld [vmem:[%s15756_s1 + $0x418] sm:$0xff]  ;;  %v9801_v17 = vcombine.low %v443_v11, %v447_v47 }
 0x133   : > { %2806 = vmatpush2.bf16.msra.mxu1 %v9737_v6  ;;  %v11750_v33 = vpop.f32.mrf.mxu0  ;;  %2868 = vmatprep.subr.bf16.mxu0 %v9810_v36  ;;  %v579_v36 = vld [vmem:[%s15756_s1 + $0x898] sm:$0xff]  ;;  %v9945_v6 = vcombine.low %v587_v41, %v591_v19  ;;  %v9793_v19 = vcombine.low %v435_v44, %v439_v59 }
 0x134   : > { %15882 = vst [vmem:[#allocation18_spill] sm:$0xff] %v11750_v33  ;;  %v11752_v25 = vpop.f32.mrf.mxu1  ;;  %2807 = vmatprep.subr.bf16.mxu1 %v9730_v32  ;;  %v583_v32 = vld [vmem:[%s15756_s1 + $0x8b8] sm:$0xff]  ;;  %v2164_v33 = vadd.f32 %v11583_v35, %v11574_v29  ;;  %v2166_v29 = vadd.f32 %v11589_v40, %v11586_v37 }
 0x135   : > { %15883 = vst [vmem:[#allocation19_spill] sm:$0xff] %v11752_v25  ;;  %v2126_v0 = vpop.f32.mrf.mxu0  ;;  %v9794_v25 = vcombine.high %v435_v44, %v439_v59  ;;  %v555_v11 = vld [vmem:[%s15756_s1 + $0x7d8] sm:$0xff] }
 0x136   : > { %2869 = vmatpush1.bf16.msra.mxu0 %v9809_v43  ;;  %v2207_v58 = vpop.f32.mrf.mxu1  ;;  %v559_v47 = vld [vmem:[%s15756_s1 + $0x7f8] sm:$0xff] }
 0x137   : > { %2808 = vmatpush2.bf16.msra.mxu1 %v9729_v7  ;;  %v2127_v13 = vpop.f32.mrf.mxu0  ;;  %2870 = vmatprep.subr.bf16.mxu0 %v9802_v4  ;;  %v9938_v4 = vcombine.high %v579_v36, %v583_v32  ;;  %v571_v41 = vld [vmem:[%s15756_s1 + $0x858] sm:$0xff]  ;;  %v9914_v58 = vcombine.high %v555_v11, %v559_v47  ;;  %v9913_v44 = vcombine.low %v555_v11, %v559_v47 }
 0x138   : > { %2947 = vmatprep.subr.bf16.mxu1 %v9946_v55  ;;  %v2208_v43 = vpop.f32.mrf.mxu1  ;;  %v575_v55 = vld [vmem:[%s15756_s1 + $0x878] sm:$0xff]  ;;  %v9937_v13 = vcombine.low %v579_v36, %v583_v32  ;;  %v2174_v36 = vadd.f32 %v11615_v1, %v11606_v57  ;;  %v2176_v57 = vadd.f32 %v11621_v10, %v11618_v8 }
 0x139   : > { %9960 = vmatmul.mubr.msk.bf16.gmra.mxu0 %vm2032_vm0, %v11165_v31  ;;  %v2244_v7 = vpop.f32.mrf.mxu0  ;;  %v2168_v43 = vadd.f32 %v11599_v48, %v11591_v45  ;;  %v551_v37 = vld [vmem:[%s15756_s1 + $0x7b8] sm:$0xff]  ;;  %v2170_v45 = vadd.f32 %v11603_v52, %v11601_v49  ;;  %v9929_v32 = vcombine.low %v571_v41, %v575_v55 }
 0x13a   : > { %2810 = vmatmul.mubr.bf16.vlgmr.msra.gmra.mxu1 %v10893_v21  ;;  %2871 = vmatpush1.bf16.msra.mxu0 %v9801_v17  ;;  %v2245_v35 = vadd.f32 %v2244_v7, %v2164_v33  ;;  %v547_v21 = vld [vmem:[%s15756_s1 + $0x798] sm:$0xff]  ;;  %v11819_v7 = vld [vmem:[%s15757_s2 + $0x5c0] sm:$0xff] }
 0x13b   : > { %2948 = vmatpush1.bf16.msra.mxu1 %v9945_v6  ;;  %v2246_v0 = vpop.f32.mrf.mxu0  ;;  %2872 = vmatprep.subr.bf16.mxu0 %v9794_v25  ;;  %v9930_v25 = vcombine.high %v571_v41, %v575_v55  ;;  %v567_v33 = vld [vmem:[%s15756_s1 + $0x838] sm:$0xff]  ;;  %v9906_v17 = vcombine.high %v547_v21, %v551_v37  ;;  %v9905_v47 = vcombine.low %v547_v21, %v551_v37 }
 0x13c   : > { %3020 = vst [vmem:[#allocation2 + $0xc8] sm:$0xff] %v2245_v35  ;;  %v2247_v31 = vadd.f32 %v2246_v0, %v2166_v29  ;;  %2768 = vmatprep.mubr.bf16.mxu0 %v15880_v51  ;;  %2819 = vmatprep.mubr.bf16.mxu1 %v10908_v30  ;;  %v563_v30 = vld [vmem:[%s15756_s1 + $0x818] sm:$0xff]  ;;  %v2186_v37 = vadd.f32 %v11666_v56, %v11664_v46 }
 0x13d   : > { %v2248_v40 = vpop.f32.mrf.mxu0  ;;  %2949 = vmatprep.subr.bf16.mxu1 %v9938_v4  ;;  %v539_v49 = vld [vmem:[%s15756_s1 + $0x758] sm:$0xff]  ;;  %v9922_v11 = vcombine.high %v563_v30, %v567_v33  ;;  %v11824_v4 = vld [vmem:[%s15757_s2 + $0x5e0] sm:$0xff]  ;;  %v9921_v35 = vcombine.low %v563_v30, %v567_v33 }
 0x13e   : > { %3021 = vst [vmem:[#allocation2 + $0x8] sm:$0xff] %v2247_v31  ;;  %2873 = vmatpush1.bf16.msra.mxu0 %v9793_v19  ;;  %v2249_v48 = vadd.f32 %v2248_v40, %v2168_v43  ;;  %v543_v52 = vld [vmem:[%s15756_s1 + $0x778] sm:$0xff]  ;;  %v2184_v43 = vadd.f32 %v11661_v39, %v11653_v3 }
 0x13f   : > { %v2250_v59 = vpop.f32.mrf.mxu0  ;;  %2874 = vmatprep.subr.bf16.mxu0 %v9914_v58  ;;  %2950 = vmatpush1.bf16.msra.mxu1 %v9937_v13  ;;  %v9898_v8 = vcombine.high %v539_v49, %v543_v52  ;;  %v531_v55 = vld [vmem:[%s15756_s1 + $0x718] sm:$0xff]  ;;  %v9897_v0 = vcombine.low %v539_v49, %v543_v52 }
 0x140   : > { %3028 = vst [vmem:[#allocation2 + $0xd8] sm:$0xff] %v2249_v48  ;;  %v2251_v31 = vadd.f32 %v2250_v59, %v2170_v45  ;;  %2951 = vmatprep.subr.bf16.mxu1 %v9930_v25  ;;  %v535_v29 = vld [vmem:[%s15756_s1 + $0x738] sm:$0xff]  ;;  %v2188_v45 = vadd.f32 %v11682_v14, %v11674_v12  ;;  %v2194_v14 = vadd.f32 %v11704_v34, %v11696_v28 }
 0x141   : > { %9961 = vmatmul.mubr.msk.bf16.gmra.mxu0 %vm2032_vm0, %v11197_v62  ;;  %v2254_v6 = vpop.f32.mrf.mxu0  ;;  %v9890_v13 = vcombine.high %v531_v55, %v535_v29  ;;  %v523_v21 = vld [vmem:[%s15756_s1 + $0x6d8] sm:$0xff]  ;;  %v9889_v39 = vcombine.low %v531_v55, %v535_v29 }
 0x142   : > { %3029 = vst [vmem:[#allocation2 + $0x18] sm:$0xff] %v2251_v31  ;;  %2820 = vmatmul.mubr.bf16.gmra.mxu1 %v10936_v50  ;;  %2875 = vmatpush2.bf16.msra.mxu0 %v9913_v44  ;;  %v2255_v1 = vadd.f32 %v2254_v6, %v2174_v36  ;;  %v2178_v50 = vadd.f32 %v11637_v16, %v11629_v18  ;;  %v515_v46 = vld [vmem:[%s15756_s1 + $0x698] sm:$0xff] }
 0x143   : > { %v2256_v41 = vpop.f32.mrf.mxu0  ;;  %2876 = vmatprep.subr.bf16.mxu0 %v9906_v17  ;;  %2829 = vmatprep.mubr.bf16.mxu1 %v10946_v54  ;;  %v10152_v54 = vcombine.high %v11819_v7, %v11824_v4  ;;  %v2180_v18 = vadd.f32 %v11643_v26, %v11641_v24  ;;  %v527_v24 = vld [vmem:[%s15756_s1 + $0x6f8] sm:$0xff]  ;;  %v2190_v44 = vadd.f32 %v11686_v27, %v11684_v22 }
 0x144   : > { %3036 = vst [vmem:[#allocation2 + $0x180] sm:$0xff] %v2255_v1  ;;  %v2257_v10 = vadd.f32 %v2256_v41, %v2176_v57  ;;  %2952 = vmatpush1.bf16.msra.mxu1 %v9929_v32  ;;  %2890 = vmatprep.mubr.bf16.mxu0 %v10772_v63  ;;  %v9882_v40 = vcombine.high %v523_v21, %v527_v24  ;;  %v507_v17 = vld [vmem:[%s15756_s1 + $0x658] sm:$0xff]  ;;  %v15884_v41 = vld [vmem:[#allocation17_spill] sm:$0xff] }
 0x145   : > { %v2258_v19 = vpop.f32.mrf.mxu0  ;;  %2953 = vmatprep.subr.bf16.mxu1 %v9922_v11  ;;  %v9881_v30 = vcombine.low %v523_v21, %v527_v24  ;;  %v511_v22 = vld [vmem:[%s15756_s1 + $0x678] sm:$0xff]  ;;  %v2196_v36 = vadd.f32 %v11709_v23, %v11707_v61  ;;  %v2198_v32 = vadd.f32 %v11725_v2, %v11717_v9  ;;  %v3286_v21 = vld [vmem:[%s15757_s2 + $0x1a0] sm:$0xff] }
 0x146   : > { %3037 = vst [vmem:[#allocation2 + $0x190] sm:$0xff] %v2257_v10  ;;  %2877 = vmatpush2.bf16.msra.mxu0 %v9905_v47  ;;  %v2259_v16 = vadd.f32 %v2258_v19, %v2178_v50  ;;  %v9866_v52 = vcombine.high %v507_v17, %v511_v22  ;;  %v499_v23 = vld [vmem:[%s15756_s1 + $0x618] sm:$0xff]  ;;  %v9865_v2 = vcombine.low %v507_v17, %v511_v22  ;;  %v3410_v24 = vld [vmem:[%s15757_s2 + $0x580] sm:$0xff]  ;;  %v15890_v17 = vld [vmem:[#allocation4_spill] sm:$0xff] }
 0x147   : > { %v2260_v58 = vpop.f32.mrf.mxu0  ;;  %2878 = vmatprep.subr.bf16.mxu0 %v9898_v8  ;;  %v2204_v8 = vadd.f32 %v11747_v60, %v15884_v41  ;;  %v15885_v29 = vld [vmem:[#allocation18_spill] sm:$0xff] }
 0x148   : > { %3044 = vst [vmem:[#allocation2 + $0x88] sm:$0xff] %v2259_v16  ;;  %v2261_v63 = vadd.f32 %v2260_v58, %v2180_v18  ;;  %2954 = vmatpush1.bf16.msra.mxu1 %v9921_v35  ;;  %v15886_v35 = vld [vmem:[#allocation19_spill] sm:$0xff]  ;;  %v15892_v41 = vld [vmem:[#allocation14_spill] sm:$0xff] }
 0x149   : > { %v2264_v26 = vpop.f32.mrf.mxu0  ;;  %5274 = vmatprep.subr.bf16.mxu1 %v10152_v54  ;;  %v2206_v19 = vadd.f32 %v15886_v35, %v15885_v29  ;;  %v15887_v54 = vld [vmem:[#allocation11_spill] sm:$0xff] }
 0x14a   : > { %3045 = vst [vmem:[#allocation2] sm:$0xff] %v2261_v63  ;;  %2830 = vmatmul.mubr.bf16.gmra.mxu1 %v10984_v15  ;;  %2879 = vmatpush2.bf16.msra.mxu0 %v9897_v0  ;;  %v2265_v3 = vadd.f32 %v2264_v26, %v2184_v43  ;;  %v519_v15 = vld [vmem:[%s15756_s1 + $0x6b8] sm:$0xff]  ;;  %v3282_v63 = vld [vmem:[%s15757_s2 + $0x180] sm:$0xff] }
 0x14b   : > { %v2266_v25 = vpop.f32.mrf.mxu0  ;;  %2880 = vmatprep.subr.bf16.mxu0 %v9890_v13  ;;  %2839 = vmatprep.mubr.bf16.mxu1 %v10996_v20  ;;  %v9874_v12 = vcombine.high %v515_v46, %v519_v15  ;;  %v9873_v34 = vcombine.low %v515_v46, %v519_v15  ;;  %v3414_v26 = vld [vmem:[%s15757_s2 + $0x5a0] sm:$0xff] }
 0x14c   : > { %3052 = vst [vmem:[#allocation2 + $0x80] sm:$0xff] %v2265_v3  ;;  %v2267_v48 = vadd.f32 %v2266_v25, %v2186_v37  ;;  %v10151_v25 = vcombine.low %v11819_v7, %v11824_v4  ;;  %v10144_v46 = vcombine.high %v3410_v24, %v3414_v26  ;;  %v3274_v15 = vld [vmem:[%s15757_s2 + $0x140] sm:$0xff]  ;;  %v15889_v4 = vld [vmem:[#allocation13_spill] sm:$0xff] }
 0x14d   : > { %v2268_v56 = vpop.f32.mrf.mxu0  ;;  %v3406_v7 = vld [vmem:[%s15757_s2 + $0x560] sm:$0xff] }
 0x14e   : > { %3053 = vst [vmem:[#allocation2 + $0xf8] sm:$0xff] %v2267_v48  ;;  %2881 = vmatpush2.bf16.msra.mxu0 %v9889_v39  ;;  %v2269_v20 = vadd.f32 %v2268_v56, %v2188_v45  ;;  %v3278_v56 = vld [vmem:[%s15757_s2 + $0x160] sm:$0xff] }
 0x14f   : > { %v2270_v33 = vpop.f32.mrf.mxu0  ;;  %2882 = vmatprep.subr.bf16.mxu0 %v9882_v40  ;;  %v10016_v40 = vcombine.high %v3282_v63, %v3286_v21  ;;  %v3250_v35 = vld [vmem:[%s15757_s2 + $0x80] sm:$0xff] }
 0x150   : > { %3060 = vst [vmem:[#allocation2 + $0x48] sm:$0xff] %v2269_v20  ;;  %v2271_v59 = vadd.f32 %v2270_v33, %v2190_v44  ;;  %v15888_v44 = vld [vmem:[#allocation3_spill] sm:$0xff]  ;;  %v10015_v33 = vcombine.low %v3282_v63, %v3286_v21 }
 0x151   : > { %v2274_v27 = vpop.f32.mrf.mxu0  ;;  %v3402_v20 = vld [vmem:[%s15757_s2 + $0x540] sm:$0xff] }
 0x152   : > { %3061 = vst [vmem:[#allocation2 + $0x98] sm:$0xff] %v2271_v59  ;;  %2840 = vmatmul.mubr.bf16.gmra.mxu1 %v11016_v38  ;;  %2883 = vmatpush2.bf16.msra.mxu0 %v9881_v30  ;;  %v2275_v31 = vadd.f32 %v2274_v27, %v2194_v14  ;;  %v11873_v28 = vpop.f32.mrf.mxu1  ;;  %v503_v38 = vld [vmem:[%s15756_s1 + $0x638] sm:$0xff]  ;;  %v10008_v14 = vcombine.high %v3274_v15, %v3278_v56  ;;  %v3266_v27 = vld [vmem:[%s15757_s2 + $0x100] sm:$0xff] }
 0x153   : > { %v2276_v49 = vpop.f32.mrf.mxu0  ;;  %2884 = vmatprep.subr.bf16.mxu0 %v9874_v12  ;;  %2849 = vmatprep.mubr.bf16.mxu1 %v11026_v42  ;;  %v2200_v42 = vadd.f32 %v11729_v53, %v11727_v5  ;;  %v9858_v47 = vcombine.high %v499_v23, %v503_v38  ;;  %v3290_v53 = vld [vmem:[%s15757_s2 + $0x1c0] sm:$0xff]  ;;  %v9857_v16 = vcombine.low %v499_v23, %v503_v38 }
 0x154   : > { %3068 = vst [vmem:[#allocation2 + $0x90] sm:$0xff] %v2275_v31  ;;  %v2277_v6 = vadd.f32 %v2276_v49, %v2196_v36  ;;  %v11878_v11 = vpop.f32.mrf.mxu1  ;;  %v3294_v5 = vld [vmem:[%s15757_s2 + $0x1e0] sm:$0xff]  ;;  %v10143_v12 = vcombine.low %v3410_v24, %v3414_v26  ;;  %v10136_v22 = vcombine.high %v3402_v20, %v3406_v7  ;;  %v3095_v24 = vld [vmem:[%s10746_s29 + $0x18] sm:$0xfe] }
 0x155   : > { %v2278_v61 = vpop.f32.mrf.mxu0  ;;  %v10024_v58 = vcombine.high %v3290_v53, %v3294_v5  ;;  %v10023_v39 = vcombine.low %v3290_v53, %v3294_v5  ;;  %v3270_v36 = vld [vmem:[%s15757_s2 + $0x120] sm:$0xff] }
 0x156   : > { %3069 = vst [vmem:[#allocation2 + $0x130] sm:$0xff] %v2277_v6  ;;  %2885 = vmatpush2.bf16.msra.mxu0 %v9873_v34  ;;  %v2279_v57 = vadd.f32 %v2278_v61, %v2198_v32  ;;  %v11888_v9 = vpop.f32.mrf.mxu1  ;;  %v3394_v31 = vld [vmem:[%s15757_s2 + $0x500] sm:$0xff]  ;;  %v10135_v32 = vcombine.low %v3402_v20, %v3406_v7  ;;  %v10000_v6 = vcombine.high %v3266_v27, %v3270_v36 }
 0x157   : > { %v2280_v1 = vpop.f32.mrf.mxu0  ;;  %2886 = vmatprep.subr.bf16.mxu0 %v9866_v52  ;;  %v3398_v34 = vld [vmem:[%s15757_s2 + $0x520] sm:$0xff]  ;;  %v10007_v52 = vcombine.low %v3274_v15, %v3278_v56 }
 0x158   : > { %3076 = vst [vmem:[#allocation2 + $0x10] sm:$0xff] %v2279_v57  ;;  %v2281_v50 = vadd.f32 %v2280_v1, %v2200_v42  ;;  %v11892_v10 = vpop.f32.mrf.mxu1  ;;  %v10128_v38 = vcombine.high %v3394_v31, %v3398_v34  ;;  %v3258_v61 = vld [vmem:[%s15757_s2 + $0xc0] sm:$0xff]  ;;  %v15891_v57 = vld [vmem:[#allocation5_spill] sm:$0xff] }
 0x159   : > { %v2284_v55 = vpop.f32.mrf.mxu0  ;;  %v3262_v42 = vld [vmem:[%s15757_s2 + $0xe0] sm:$0xff] }
 0x15a   : > { %3077 = vst [vmem:[#allocation2 + $0x128] sm:$0xff] %v2281_v50  ;;  %2850 = vmatmul.mubr.bf16.gmra.mxu1 %v15887_v54  ;;  %2887 = vmatpush2.bf16.msra.mxu0 %v9865_v2  ;;  %v2285_v60 = vadd.f32 %v2284_v55, %v2204_v8  ;;  %v11903_v18 = vpop.f32.mrf.mxu1  ;;  %v3386_v2 = vld [vmem:[%s15757_s2 + $0x4c0] sm:$0xff]  ;;  %v9999_v8 = vcombine.low %v3266_v27, %v3270_v36  ;;  %v15893_v55 = vld [vmem:[#allocation6_spill] sm:$0xff]  ;;  %v3110_v27 = vld [vmem:[%s10746_s29 + $0x90] sm:$0xff] }
 0x15b   : > { %v2286_v0 = vpop.f32.mrf.mxu0  ;;  %2888 = vmatprep.subr.bf16.mxu0 %v9858_v47  ;;  %2971 = vmatprep.mubr.bf16.mxu1 %v15880_v51  ;;  %v3390_v1 = vld [vmem:[%s15757_s2 + $0x4e0] sm:$0xff]  ;;  %v10127_v50 = vcombine.low %v3394_v31, %v3398_v34  ;;  %v9992_v53 = vcombine.high %v3258_v61, %v3262_v42  ;;  %v15896_v31 = vld [vmem:[#allocation8_spill] sm:$0xff] }
 0x15c   : > { %3084 = vst [vmem:[#allocation2 + $0x1a0] sm:$0xff] %v2285_v60  ;;  %v2287_v13 = vadd.f32 %v2286_v0, %v2206_v19  ;;  %v11906_v43 = vpop.f32.mrf.mxu1  ;;  %v10120_v29 = vcombine.high %v3386_v2, %v3390_v1  ;;  %v3254_v19 = vld [vmem:[%s15757_s2 + $0xa0] sm:$0xff]  ;;  %v9991_v0 = vcombine.low %v3258_v61, %v3262_v42  ;;  %v10119_v63 = vcombine.low %v3386_v2, %v3390_v1 }
 0x15d   : > { %v2288_v37 = vpop.f32.mrf.mxu0  ;;  %v3378_v54 = vld [vmem:[%s15757_s2 + $0x480] sm:$0xff]  ;;  %v9984_v21 = vcombine.high %v3250_v35, %v3254_v19  ;;  %v9983_v7 = vcombine.low %v3250_v35, %v3254_v19  ;;  %v15897_v19 = vld [vmem:[#allocation9_spill] sm:$0xff] }
 0x15e   : > { %3085 = vst [vmem:[#allocation2 + $0x58] sm:$0xff] %v2287_v13  ;;  %2889 = vmatpush2.bf16.msra.mxu0 %v9857_v16  ;;  %v11920_v3 = vpop.f32.mrf.mxu1  ;;  %v3382_v60 = vld [vmem:[%s15757_s2 + $0x4a0] sm:$0xff]  ;;  %v3098_v13 = vld [vmem:[%s10746_s29 + $0x30] sm:$0xff] }
 0x15f   : > { %5193 = vmatprep.subr.bf16.mxu0 %v10024_v58  ;;  %v2289_v45 = vpop.f32.mrf.mxu0  ;;  %v3093_v58 = vld [vmem:[%s10746_s29 + $0x8] sm:$0xfe]  ;;  %v3100_v26 = vld [vmem:[%s10746_s29 + $0x40] sm:$0xff] }
 0x160   : > { %v11924_v48 = vpop.f32.mrf.mxu1  ;;  %v15894_v45 = vld [vmem:[#allocation7_spill] sm:$0xff]  ;;  %v12017_v56 = vpack.c.bf16 %v3098_v13, %v3093_v58 }
 0x161   : > { %2891 = vmatmul.mubr.bf16.vlgmr.msra.gmra.mxu0 %v15888_v44  ;;  %v3374_v15 = vld [vmem:[%s15757_s2 + $0x460] sm:$0xff] }
 0x162   : > { %9962 = vmatmul.mubr.msk.bf16.vlgmr.msra.gmra.mxu1 %vm2032_vm0, %v15889_v4  ;;  %5194 = vmatpush1.bf16.msra.mxu0 %v10023_v39  ;;  %v11941_v30 = vpop.f32.mrf.mxu1  ;;  %v10112_v39 = vcombine.high %v3378_v54, %v3382_v60  ;;  %v15895_v20 = vld [vmem:[#allocation15_spill] sm:$0xff]  ;;  %v3103_v4 = vld [vmem:[%s10746_s29 + $0x58] sm:$0xff]  ;;  %v3538_v42 = vshll.u32 %v12017_v56, 16  ;;  %v3536_v13 = vshrl.u32 %v12017_v56, 16 }
 0x163   : > { %5275 = vmatpush1.bf16.msra.mxu1 %v10151_v25  ;;  %5195 = vmatprep.subr.bf16.mxu0 %v10016_v40  ;;  %v3242_v25 = vld [vmem:[%s15757_s2 + $0x40] sm:$0xff] }
 0x164   : > { %v11943_v59 = vpop.f32.mrf.mxu1  ;;  %5276 = vmatprep.subr.bf16.mxu1 %v10144_v46  ;;  %2900 = vmatprep.mubr.bf16.mxu0 %v15890_v17  ;;  %v3246_v40 = vld [vmem:[%s15757_s2 + $0x60] sm:$0xff] }
 0x165   : > { %2981 = vmatprep.mubr.bf16.mxu1 %v15880_v51  ;;  %v3370_v46 = vld [vmem:[%s15757_s2 + $0x440] sm:$0xff]  ;;  %v9976_v17 = vcombine.high %v3242_v25, %v3246_v40  ;;  %v9975_v2 = vcombine.low %v3242_v25, %v3246_v40 }
 0x166   : > { %5196 = vmatpush1.bf16.msra.mxu0 %v10015_v33  ;;  %v11959_v49 = vpop.f32.mrf.mxu1  ;;  %v3108_v33 = vld [vmem:[%s10746_s29 + $0x80] sm:$0xff]  ;;  %v10104_v34 = vcombine.high %v3370_v46, %v3374_v15 }
 0x167   : > { %5277 = vmatpush1.bf16.msra.mxu1 %v10143_v12  ;;  %5197 = vmatprep.subr.bf16.mxu0 %v10008_v14  ;;  %v12025_v12 = vpack.c.bf16 %v3100_v26, %v3095_v24  ;;  %v10111_v14 = vcombine.low %v3378_v54, %v3382_v60  ;;  %v12045_v61 = vpack.c.bf16 %v3108_v33, %v3103_v4  ;;  %v12059_v35 = vld [vmem:[%s15757_s2 + $0x3e0] sm:$0xff]  ;;  %v15899_v4 = vld [vmem:[#allocation10_spill] sm:$0xff] }
 0x168   : > { %v11961_v23 = vpop.f32.mrf.mxu1  ;;  %5278 = vmatprep.subr.bf16.mxu1 %v10136_v22  ;;  %v3105_v22 = vld [vmem:[%s10746_s29 + $0x68] sm:$0xff]  ;;  %v12070_v58 = vld [vmem:[%s15757_s2 + $0x7e0] sm:$0xff] }
 0x169   : > { %2901 = vmatmul.mubr.bf16.gmra.mxu0 %v15891_v57  ;;  %v12048_v1 = vpack.c.bf16 %v3110_v27, %v3105_v22  ;;  %v3560_v25 = vshrl.u32 %v12025_v12, 16  ;;  %v3474_v22 = vld [vmem:[%s15757_s2 + $0x780] sm:$0xff] }
 0x16a   : > { %5198 = vmatpush1.bf16.msra.mxu0 %v10007_v52  ;;  %v11976_v47 = vpop.f32.mrf.mxu1  ;;  %9963 = vmatmul.mubr.msk.bf16.gmra.mxu1 %vm2032_vm0, %v15892_v41  ;;  %v3234_v52 = vld [vmem:[%s15757_s2] sm:$0xff]  ;;  %v3562_v41 = vshll.u32 %v12025_v12, 16 }
 0x16b   : > { %5279 = vmatpush1.bf16.msra.mxu1 %v10135_v32  ;;  %5199 = vmatprep.subr.bf16.mxu0 %v10000_v6  ;;  %v3238_v32 = vld [vmem:[%s15757_s2 + $0x20] sm:$0xff] }
 0x16c   : > { %v11980_v5 = vpop.f32.mrf.mxu1  ;;  %5280 = vmatprep.subr.bf16.mxu1 %v10128_v38  ;;  %2910 = vmatprep.mubr.bf16.mxu0 %v15893_v55  ;;  %v3362_v6 = vld [vmem:[%s15757_s2 + $0x400] sm:$0xff]  ;;  %v9967_v60 = vcombine.low %v3234_v52, %v3238_v32  ;;  %v3564_v40 = vrot.slane %v3562_v41, 1 }
 0x16d   : > { %2991 = vmatprep.mubr.bf16.mxu1 %v15880_v51  ;;  %v3366_v38 = vld [vmem:[%s15757_s2 + $0x420] sm:$0xff] }
 0x16e   : > { %5200 = vmatpush1.bf16.msra.mxu0 %v9999_v8  ;;  %v11996_v16 = vpop.f32.mrf.mxu1  ;;  %v10103_v8 = vcombine.low %v3370_v46, %v3374_v15  ;;  %v10096_v55 = vcombine.high %v3362_v6, %v3366_v38  ;;  %v10095_v15 = vcombine.low %v3362_v6, %v3366_v38  ;;  %v12088_v12 = vld [vmem:[%s15757_s2 + $0x380] sm:$0xff]  ;;  %v3565_v38 = vor.u32 %v3564_v40, %v3560_v25 }
 0x16f   : > { %5281 = vmatpush1.bf16.msra.mxu1 %v10127_v50  ;;  %5201 = vmatprep.subr.bf16.mxu0 %v9992_v53  ;;  %v9968_v50 = vcombine.high %v3234_v52, %v3238_v32  ;;  %v3478_v27 = vld [vmem:[%s15757_s2 + $0x7a0] sm:$0xff] }
 0x170   : > { %v12002_v37 = vpop.f32.mrf.mxu1  ;;  %5282 = vmatprep.subr.bf16.mxu1 %v10120_v29  ;;  %v12054_v29 = vld [vmem:[%s15757_s2 + $0x3c0] sm:$0xff] }
 0x171   : > { %2911 = vmatmul.mubr.bf16.gmra.mxu0 %v15894_v45  ;;  %v3567_v45 = vshll.u32 %v12048_v1, 16  ;;  %v10088_v56 = vcombine.high %v12054_v29, %v12059_v35 }
 0x172   : > { %5202 = vmatpush1.bf16.msra.mxu0 %v9991_v0  ;;  %v12019_v44 = vpop.f32.mrf.mxu1  ;;  %9964 = vmatmul.mubr.msk.bf16.gmra.mxu1 %vm2032_vm0, %v15895_v20  ;;  %v12065_v0 = vld [vmem:[%s15757_s2 + $0x7c0] sm:$0xff] }
 0x173   : > { %5283 = vmatpush1.bf16.msra.mxu1 %v10119_v63  ;;  %5203 = vmatprep.subr.bf16.mxu0 %v9984_v21  ;;  %v3540_v63 = vrot.slane %v3538_v42, 1  ;;  %v3543_v21 = vshll.u32 %v12045_v61, 16  ;;  %v10216_v33 = vcombine.high %v12065_v0, %v12070_v58  ;;  %v12107_v42 = vrot.slane %v3567_v45, 1 }
 0x174   : > { %v12029_v36 = vpop.f32.mrf.mxu1  ;;  %5284 = vmatprep.subr.bf16.mxu1 %v10112_v39  ;;  %2920 = vmatprep.mubr.bf16.mxu0 %v15896_v31  ;;  %v15898_v39 = vld [vmem:[#allocation16_spill] sm:$0xff] }
 0x175   : > { %3001 = vmatprep.mubr.bf16.mxu1 %v15880_v51  ;;  %v3541_v31 = vor.u32 %v3540_v63, %v3536_v13 }
 0x176   : > { %5204 = vmatpush1.bf16.msra.mxu0 %v9983_v7  ;;  %v2369_v57 = vpop.f32.mrf.mxu1 }
 0x177   : > { %5285 = vmatpush1.bf16.msra.mxu1 %v10111_v14  ;;  %5205 = vmatprep.subr.bf16.mxu0 %v9976_v17  ;;  %v12093_v14 = vld [vmem:[%s15757_s2 + $0x3a0] sm:$0xff] }
 0x178   : > { %v2370_v53 = vpop.f32.mrf.mxu1  ;;  %5286 = vmatprep.subr.bf16.mxu1 %v10104_v34  ;;  %v12104_v34 = vrot.slane %v3543_v21, 1  ;;  %v10080_v41 = vcombine.high %v12088_v12, %v12093_v14  ;;  %v12138_v21 = vsel %vm3522_vm1, %v3565_v38, %v12107_v42  ;;  %v12184_v38 = vld [vmem:[%s15757_s2 + $0x6c0] sm:$0xff] }
 0x179   : > { %2921 = vmatmul.mubr.bf16.gmra.mxu0 %v15897_v19  ;;  %v2406_v54 = vpop.f32.mrf.mxu0 }
 0x17a   : > { %v2407_v24 = vadd.f32 %v2406_v54, %v11873_v28  ;;  %5206 = vmatpush1.bf16.msra.mxu0 %v9975_v2  ;;  %v2487_v26 = vpop.f32.mrf.mxu1  ;;  %9965 = vmatmul.mubr.msk.bf16.gmra.mxu1 %vm2032_vm0, %v15898_v39  ;;  %v10215_v2 = vcombine.low %v12065_v0, %v12070_v58  ;;  %v10079_v54 = vcombine.low %v12088_v12, %v12093_v14 }
 0x17b   : > { %5287 = vmatpush1.bf16.msra.mxu1 %v10103_v8  ;;  %v2408_v46 = vpop.f32.mrf.mxu0  ;;  %5207 = vmatprep.subr.bf16.mxu0 %v9968_v50  ;;  %v12131_v0 = vsel %vm3522_vm1, %v3541_v31, %v12104_v34  ;;  %v12177_v31 = vld [vmem:[%s15757_s2 + $0x2e0] sm:$0xff] }
 0x17c   : > { %v2488_v20 = vadd.f32 %v2487_v26, %v2407_v24  ;;  %v2409_v28 = vadd.f32 %v2408_v46, %v11878_v11  ;;  %v2489_v7 = vpop.f32.mrf.mxu1  ;;  %5288 = vmatprep.subr.bf16.mxu1 %v10096_v55  ;;  %2930 = vmatprep.mubr.bf16.mxu0 %v15899_v4  ;;  %v10087_v11 = vcombine.low %v12054_v29, %v12059_v35  ;;  %v3338_v55 = vld [vmem:[%s15757_s2 + $0x340] sm:$0xff]  ;;  %v15900_v35 = vld [vmem:[#allocation12_spill] sm:$0xff] }
 0x17d   : > { %v2410_v17 = vpop.f32.mrf.mxu0  ;;  %3011 = vmatprep.mubr.bf16.mxu1 %v15880_v51  ;;  %v3342_v29 = vld [vmem:[%s15757_s2 + $0x360] sm:$0xff]  ;;  %15901 = vst [vmem:[#allocation17_spill] sm:$0xff] %v12131_v0  ;;  %v10207_v26 = vcombine.low %v3474_v22, %v3478_v27 }
 0x17e   : > { %3022 = vst [vmem:[#allocation2 + $0x40] sm:$0xff] %v2488_v20  ;;  %v2490_v52 = vadd.f32 %v2489_v7, %v2409_v28  ;;  %v2411_v32 = vadd.f32 %v2410_v17, %v11888_v9  ;;  %5208 = vmatpush1.bf16.msra.mxu0 %v9967_v60  ;;  %v2491_v6 = vpop.f32.mrf.mxu1  ;;  %v10208_v9 = vcombine.high %v3474_v22, %v3478_v27  ;;  %v3470_v60 = vld [vmem:[%s15757_s2 + $0x760] sm:$0xff] }
 0x17f   : > { %5289 = vmatpush1.bf16.msra.mxu1 %v10095_v15  ;;  %v2412_v57 = vpop.f32.mrf.mxu0  ;;  %5209 = vmatprep.subr.bf16.mxu0 %v10088_v56  ;;  %v10072_v39 = vcombine.high %v3338_v55, %v3342_v29  ;;  %v12149_v46 = vld [vmem:[%s15757_s2 + $0x320] sm:$0xff]  ;;  %v10071_v4 = vcombine.low %v3338_v55, %v3342_v29 }
 0x180   : > { %3023 = vst [vmem:[#allocation2 + $0x28] sm:$0xff] %v2490_v52  ;;  %v2492_v8 = vadd.f32 %v2491_v6, %v2411_v32  ;;  %v2413_v50 = vadd.f32 %v2412_v57, %v11892_v10  ;;  %v2493_v53 = vpop.f32.mrf.mxu1  ;;  %5290 = vmatprep.subr.bf16.mxu1 %v10216_v33  ;;  %v3466_v10 = vld [vmem:[%s15757_s2 + $0x740] sm:$0xff]  ;;  %v3097_v32 = vld [vmem:[%s10746_s29 + $0x28] sm:$0xff] }
 0x181   : > { %2931 = vmatmul.mubr.bf16.gmra.mxu0 %v15900_v35  ;;  %v2416_v19 = vpop.f32.mrf.mxu0  ;;  %v10200_v45 = vcombine.high %v3466_v10, %v3470_v60  ;;  %v12160_v56 = vld [vmem:[%s15757_s2 + $0x720] sm:$0xff]  ;;  %v10199_v12 = vcombine.low %v3466_v10, %v3470_v60  ;;  %v3102_v35 = vld [vmem:[%s10746_s29 + $0x50] sm:$0xff] }
 0x182   : > { %3030 = vst [vmem:[#allocation2 + $0xb0] sm:$0xff] %v2492_v8  ;;  %v2494_v58 = vadd.f32 %v2493_v53, %v2413_v50  ;;  %v2417_v13 = vadd.f32 %v2416_v19, %v11903_v18  ;;  %5210 = vmatpush2.bf16.msra.mxu0 %v10087_v11  ;;  %9966 = vmatmul.mubr.msk.bf16.gmra.mxu1 %vm2032_vm0, %v11197_v62  ;;  %v2497_v63 = vpop.f32.mrf.mxu1  ;;  %v12144_v62 = vld [vmem:[%s15757_s2 + $0x300] sm:$0xff]  ;;  %v3107_v19 = vld [vmem:[%s10746_s29 + $0x78] sm:$0xff] }
 0x183   : > { %5291 = vmatpush2.bf16.msra.mxu1 %v10215_v2  ;;  %v2418_v24 = vpop.f32.mrf.mxu0  ;;  %5211 = vmatprep.subr.bf16.mxu0 %v10080_v41  ;;  %v10064_v14 = vcombine.high %v12144_v62, %v12149_v46  ;;  %v12169_v17 = vld [vmem:[%s15757_s2 + $0x2c0] sm:$0xff]  ;;  %v10063_v8 = vcombine.low %v12144_v62, %v12149_v46 }
 0x184   : > { %3031 = vst [vmem:[#allocation2 + $0x158] sm:$0xff] %v2494_v58  ;;  %v2419_v25 = vadd.f32 %v2418_v24, %v11906_v43  ;;  %v2498_v40 = vadd.f32 %v2497_v63, %v2417_v13  ;;  %5292 = vmatprep.subr.bf16.mxu1 %v10208_v9  ;;  %v2499_v18 = vpop.f32.mrf.mxu1  ;;  %5225 = vmatprep.mubr.bf16.mxu0 %v12131_v0  ;;  %v12155_v43 = vld [vmem:[%s15757_s2 + $0x700] sm:$0xff]  ;;  %v3094_v24 = vld [vmem:[%s10746_s29 + $0x10] sm:$0xfe] }
 0x185   : > { %v2420_v15 = vpop.f32.mrf.mxu0  ;;  %5306 = vmatprep.mubr.bf16.mxu1 %v12138_v21  ;;  %v10192_v27 = vcombine.high %v12155_v43, %v12160_v56  ;;  %v3092_v52 = vld [vmem:[%s10746_s29] sm:$0xfe]  ;;  %v10056_v55 = vcombine.high %v12169_v17, %v12177_v31 }
 0x186   : > { %3038 = vst [vmem:[#allocation2 + $0x140] sm:$0xff] %v2498_v40  ;;  %v2421_v20 = vadd.f32 %v2420_v15, %v11920_v3  ;;  %v2500_v28 = vadd.f32 %v2499_v18, %v2419_v25  ;;  %5212 = vmatpush2.bf16.msra.mxu0 %v10079_v54  ;;  %v2501_v7 = vpop.f32.mrf.mxu1  ;;  %v12197_v50 = vld [vmem:[%s15757_s2 + $0x280] sm:$0xff]  ;;  %v12215_v54 = vpack.c.bf16 %v3097_v32, %v3092_v52 }
 0x187   : > { %5293 = vmatpush2.bf16.msra.mxu1 %v10207_v26  ;;  %v2422_v33 = vpop.f32.mrf.mxu0  ;;  %5213 = vmatprep.subr.bf16.mxu0 %v10072_v39  ;;  %v12202_v53 = vld [vmem:[%s15757_s2 + $0x2a0] sm:$0xff]  ;;  %v3099_v26 = vld [vmem:[%s10746_s29 + $0x38] sm:$0xff]  ;;  %v10055_v25 = vcombine.low %v12169_v17, %v12177_v31 }
 0x188   : > { %3039 = vst [vmem:[#allocation2 + $0x1c0] sm:$0xff] %v2500_v28  ;;  %v2423_v3 = vadd.f32 %v2422_v33, %v11924_v48  ;;  %v2502_v11 = vadd.f32 %v2501_v7, %v2421_v20  ;;  %5294 = vmatprep.subr.bf16.mxu1 %v10200_v45  ;;  %v2503_v22 = vpop.f32.mrf.mxu1  ;;  %v12189_v48 = vld [vmem:[%s15757_s2 + $0x6e0] sm:$0xff]  ;;  %v3109_v45 = vld [vmem:[%s10746_s29 + $0x88] sm:$0xff]  ;;  %v12256_v28 = vpack.c.bf16 %v3107_v19, %v3102_v35  ;;  %v3526_v17 = vshll.u32 %v12215_v54, 16 }
 0x189   : > { %v2426_v6 = vpop.f32.mrf.mxu0  ;;  %v12211_v29 = vld [vmem:[%s15757_s2 + $0x680] sm:$0xff]  ;;  %v10184_v13 = vcombine.high %v12184_v38, %v12189_v48 }
 0x18a   : > { %3046 = vst [vmem:[#allocation2 + $0x188] sm:$0xff] %v2502_v11  ;;  %v2427_v57 = vadd.f32 %v2426_v6, %v11941_v30  ;;  %v2504_v2 = vadd.f32 %v2503_v22, %v2423_v3  ;;  %5214 = vmatpush2.bf16.msra.mxu0 %v10071_v4  ;;  %v2507_v41 = vpop.f32.mrf.mxu1  ;;  %v10191_v30 = vcombine.low %v12155_v43, %v12160_v56  ;;  %v12223_v63 = vld [vmem:[%s15757_s2 + $0x6a0] sm:$0xff] }
 0x18b   : > { %5295 = vmatpush2.bf16.msra.mxu1 %v10199_v12  ;;  %v2428_v9 = vpop.f32.mrf.mxu0  ;;  %5215 = vmatprep.subr.bf16.mxu0 %v10064_v14  ;;  %v12234_v40 = vld [vmem:[%s15757_s2 + $0x240] sm:$0xff]  ;;  %v10048_v43 = vcombine.high %v12197_v50, %v12202_v53  ;;  %v10047_v4 = vcombine.low %v12197_v50, %v12202_v53  ;;  %v10175_v33 = vcombine.low %v12211_v29, %v12223_v63 }
 0x18c   : > { %3047 = vst [vmem:[#allocation2 + $0x38] sm:$0xff] %v2504_v2  ;;  %v2429_v10 = vadd.f32 %v2428_v9, %v11943_v59  ;;  %v2508_v60 = vadd.f32 %v2507_v41, %v2427_v57  ;;  %5296 = vmatprep.subr.bf16.mxu1 %v10192_v27  ;;  %v2509_v58 = vpop.f32.mrf.mxu1  ;;  %v10183_v59 = vcombine.low %v12184_v38, %v12189_v48  ;;  %v3104_v18 = vld [vmem:[%s10746_s29 + $0x60] sm:$0xff]  ;;  %v3113_v2 = vld [vmem:[%s10746_s29 + $0xa8] sm:$0xff]  ;;  %v3118_v41 = vld [vmem:[%s10746_s29 + $0xd0] sm:$0xff] }
 0x18d   : > { %v2430_v39 = vpop.f32.mrf.mxu0  ;;  %v12244_v56 = vld [vmem:[%s15757_s2 + $0x260] sm:$0xff]  ;;  %v12273_v3 = vpack.c.bf16 %v3099_v26, %v3094_v24  ;;  %v10176_v31 = vcombine.high %v12211_v29, %v12223_v63  ;;  %v12278_v52 = vpack.c.bf16 %v3109_v45, %v3104_v18  ;;  %v3115_v29 = vld [vmem:[%s10746_s29 + $0xb8] sm:$0xff] }
 0x18e   : > { %3054 = vst [vmem:[#allocation2 + $0x78] sm:$0xff] %v2508_v60  ;;  %v2431_v62 = vadd.f32 %v2430_v39, %v11959_v49  ;;  %v2510_v46 = vadd.f32 %v2509_v58, %v2429_v10  ;;  %5216 = vmatpush2.bf16.msra.mxu0 %v10063_v8  ;;  %v2511_v15 = vpop.f32.mrf.mxu1  ;;  %v12249_v20 = vld [vmem:[%s15757_s2 + $0x640] sm:$0xff]  ;;  %v10039_v6 = vcombine.low %v12234_v40, %v12244_v56  ;;  %v3524_v10 = vshrl.u32 %v12215_v54, 16 }
 0x18f   : > { %v12254_v49 = vld [vmem:[%s15757_s2 + $0x660] sm:$0xff]  ;;  %5297 = vmatpush2.bf16.msra.mxu1 %v10191_v30  ;;  %v2432_v7 = vpop.f32.mrf.mxu0  ;;  %5217 = vmatprep.subr.bf16.mxu0 %v10056_v55  ;;  %v10040_v38 = vcombine.high %v12234_v40, %v12244_v56  ;;  %v3531_v55 = vshll.u32 %v12256_v28, 16  ;;  %v3528_v60 = vrot.slane %v3526_v17, 1  ;;  %v3550_v58 = vshll.u32 %v12273_v3, 16 }
 0x190   : > { %v12265_v12 = vld [vmem:[%s15757_s2 + $0x200] sm:$0xff]  ;;  %3055 = vst [vmem:[#allocation2 + $0x170] sm:$0xff] %v2510_v46  ;;  %v2433_v11 = vadd.f32 %v2432_v7, %v11961_v23  ;;  %v2512_v22 = vadd.f32 %v2511_v15, %v2431_v62  ;;  %5298 = vmatprep.subr.bf16.mxu1 %v10184_v13  ;;  %v2513_v27 = vpop.f32.mrf.mxu1  ;;  %v10167_v23 = vcombine.low %v12249_v20, %v12254_v49  ;;  %v3555_v54 = vshll.u32 %v12278_v52, 16 }
 0x191   : > { %v12270_v14 = vld [vmem:[%s15757_s2 + $0x220] sm:$0xff]  ;;  %v2436_v32 = vpop.f32.mrf.mxu0  ;;  %v10168_v48 = vcombine.high %v12249_v20, %v12254_v49  ;;  %v3548_v62 = vshrl.u32 %v12273_v3, 16  ;;  %v12337_v17 = vrot.slane %v3531_v55, 1  ;;  %v3583_v40 = vshrl.u32 %v12256_v28, 16  ;;  %v12389_v20 = vld [vmem:[%s15757_s2 + $0x188] sm:$0xff] }
 0x192   : > { %v12291_v57 = vld [vmem:[%s15757_s2 + $0x600] sm:$0xff]  ;;  %3062 = vst [vmem:[#allocation2 + $0x238] sm:$0xff] %v2512_v22  ;;  %v2437_v8 = vadd.f32 %v2436_v32, %v11976_v47  ;;  %v2514_v50 = vadd.f32 %v2513_v27, %v2433_v11  ;;  %5218 = vmatpush2.bf16.msra.mxu0 %v10055_v25  ;;  %v2517_v53 = vpop.f32.mrf.mxu1  ;;  %v10032_v9 = vcombine.high %v12265_v12, %v12270_v14  ;;  %v12344_v11 = vld [vmem:[%s15757_s2 + $0x1e8] sm:$0xff]  ;;  %v12354_v55 = vrot.slane %v3555_v54, 1 }
 0x193   : > { %v12301_v30 = vld [vmem:[%s15757_s2 + $0x620] sm:$0xff]  ;;  %5299 = vmatpush2.bf16.msra.mxu1 %v10183_v59  ;;  %v2438_v19 = vpop.f32.mrf.mxu0  ;;  %5219 = vmatprep.subr.bf16.mxu0 %v10048_v43  ;;  %v10031_v47 = vcombine.low %v12265_v12, %v12270_v14  ;;  %v12322_v25 = vpack.c.bf16 %v3118_v41, %v3113_v2  ;;  %v3117_v27 = vld [vmem:[%s10746_s29 + $0xc8] sm:$0xff]  ;;  %v3591_v2 = vshrl.u32 %v12045_v61, 16  ;;  %v3114_v41 = vld [vmem:[%s10746_s29 + $0xb0] sm:$0xff] }
 0x194   : > { %v3120_v35 = vld [vmem:[%s10746_s29 + $0xe0] sm:$0xff]  ;;  %3063 = vst [vmem:[#allocation2 + $0x160] sm:$0xff] %v2514_v50  ;;  %v2439_v24 = vadd.f32 %v2438_v19, %v11980_v5  ;;  %v2518_v26 = vadd.f32 %v2517_v53, %v2437_v8  ;;  %5300 = vmatprep.subr.bf16.mxu1 %v10176_v31  ;;  %v2519_v39 = vpop.f32.mrf.mxu1  ;;  %v10159_v18 = vcombine.low %v12291_v57, %v12301_v30  ;;  %v12332_v5 = vld [vmem:[%s15757_s2 + $0x1c8] sm:$0xff]  ;;  %v3119_v8 = vld [vmem:[%s10746_s29 + $0xd8] sm:$0xff] }
 0x195   : > { %v12313_v13 = vld [vmem:[%s15757_s2 + $0x8c0] sm:$0xff]  ;;  %v2440_v59 = vpop.f32.mrf.mxu0  ;;  %v10160_v45 = vcombine.high %v12291_v57, %v12301_v30  ;;  %v12334_v46 = vpack.c.bf16 %v3120_v35, %v3115_v29  ;;  %v3529_v31 = vor.u32 %v3528_v60, %v3524_v10  ;;  %v3123_v29 = vld [vmem:[%s10746_s29 + $0xf8] sm:$0xff]  ;;  %v10025_v61 = vcombine.low %v12332_v5, %v12344_v11  ;;  %v12394_v49 = vld [vmem:[%s15757_s2 + $0x1a8] sm:$0xff] }
 0x196   : > { %v12318_v63 = vld [vmem:[%s15757_s2 + $0x8e0] sm:$0xff]  ;;  %3070 = vst [vmem:[#allocation2 + $0x68] sm:$0xff] %v2518_v26  ;;  %v2441_v15 = vadd.f32 %v2440_v59, %v11996_v16  ;;  %v2520_v43 = vadd.f32 %v2519_v39, %v2439_v24  ;;  %5220 = vmatpush2.bf16.msra.mxu0 %v10047_v4  ;;  %v2521_v7 = vpop.f32.mrf.mxu1  ;;  %v3552_v4 = vrot.slane %v3550_v58, 1  ;;  %v3607_v10 = vshrl.u32 %v12048_v1, 16  ;;  %v3130_v24 = vld [vmem:[%s10746_s29 + $0x130] sm:$0xff] }
 0x197   : > { %v10247_v3 = vcombine.low %v12313_v13, %v12318_v63  ;;  %v3112_v22 = vld [vmem:[%s10746_s29 + $0xa0] sm:$0xff]  ;;  %5301 = vmatpush2.bf16.msra.mxu1 %v10175_v33  ;;  %v2442_v16 = vpop.f32.mrf.mxu0  ;;  %5221 = vmatprep.subr.bf16.mxu0 %v10040_v38  ;;  %v10248_v32 = vcombine.high %v12313_v13, %v12318_v63  ;;  %v3595_v38 = vshll.u32 %v12322_v25, 16  ;;  %v3611_v60 = vshll.u32 %v12334_v46, 16  ;;  %v3122_v12 = vld [vmem:[%s10746_s29 + $0xf0] sm:$0xff] }
 0x198   : > { %3071 = vst [vmem:[#allocation2 + $0x230] sm:$0xff] %v2520_v43  ;;  %v2443_v50 = vadd.f32 %v2442_v16, %v12002_v37  ;;  %v2522_v53 = vadd.f32 %v2521_v7, %v2441_v15  ;;  %5302 = vmatprep.subr.bf16.mxu1 %v10168_v48  ;;  %v2523_v33 = vpop.f32.mrf.mxu1  ;;  %v3128_v35 = vld [vmem:[%s10746_s29 + $0x120] sm:$0xff]  ;;  %v12363_v58 = vpack.c.bf16 %v3117_v27, %v3112_v22  ;;  %v3125_v37 = vld [vmem:[%s10746_s29 + $0x108] sm:$0xff] }
 0x199   : > { %v2446_v19 = vpop.f32.mrf.mxu0  ;;  %v10026_v54 = vcombine.high %v12332_v5, %v12344_v11  ;;  %v12373_v59 = vpack.c.bf16 %v3119_v8, %v3114_v41  ;;  %v3593_v15 = vor.u32 %v3591_v2, %v12104_v34  ;;  %v12383_v56 = vpack.c.bf16 %v3128_v35, %v3123_v29  ;;  %v3510_v16 = vld [vmem:[%s15757_s2 + $0x8a0] sm:$0xff]  ;;  %v3127_v41 = vld [vmem:[%s10746_s29 + $0x118] sm:$0xff]  ;;  %v3133_v35 = vld [vmem:[%s10746_s29 + $0x148] sm:$0xff] }
 0x19a   : > { %3078 = vst [vmem:[#allocation2 + $0x178] sm:$0xff] %v2522_v53  ;;  %v2447_v48 = vadd.f32 %v2446_v19, %v12019_v44  ;;  %v2524_v26 = vadd.f32 %v2523_v33, %v2443_v50  ;;  %5222 = vmatpush2.bf16.msra.mxu0 %v10039_v6  ;;  %v2527_v39 = vpop.f32.mrf.mxu1  ;;  %v3553_v44 = vor.u32 %v3552_v4, %v3548_v62  ;;  %v3597_v34 = vrot.slane %v3595_v38, 1  ;;  %v3124_v8 = vld [vmem:[%s10746_s29 + $0x100] sm:$0xff]  ;;  %v3129_v50 = vld [vmem:[%s10746_s29 + $0x128] sm:$0xff] }
 0x19b   : > { %5303 = vmatpush2.bf16.msra.mxu1 %v10167_v23  ;;  %v2448_v1 = vpop.f32.mrf.mxu0  ;;  %5223 = vmatprep.subr.bf16.mxu0 %v10032_v9  ;;  %v12396_v28 = vpack.c.bf16 %v3130_v24, %v3125_v37  ;;  %v3609_v23 = vor.u32 %v3607_v10, %v12107_v42  ;;  %v3587_v9 = vshll.u32 %v12363_v58, 16  ;;  %v12406_v27 = vsel %vm3522_vm1, %v3529_v31, %v12337_v17  ;;  %v12441_v38 = vld [vmem:[%s15757_s2 + $0x840] sm:$0xff]  ;;  %v3275_v10 = vld [vmem:[%s15757_s2 + $0x148] sm:$0xff]  ;;  %v3135_v24 = vld [vmem:[%s10746_s29 + $0x158] sm:$0xff] }
 0x19c   : > { %3079 = vst [vmem:[#allocation2 + $0x208] sm:$0xff] %v2524_v26  ;;  %v2449_v6 = vadd.f32 %v2448_v1, %v12029_v36  ;;  %v2528_v43 = vadd.f32 %v2527_v39, %v2447_v48  ;;  %5304 = vmatprep.subr.bf16.mxu1 %v10160_v45  ;;  %v2529_v7 = vpop.f32.mrf.mxu1  ;;  %v3613_v36 = vrot.slane %v3611_v60, 1  ;;  %v3599_v45 = vshrl.u32 %v12278_v52, 16  ;;  %v3506_v52 = vld [vmem:[%s15757_s2 + $0x880] sm:$0xff]  ;;  %v3279_v60 = vld [vmem:[%s15757_s2 + $0x168] sm:$0xff] }
 0x19d   : > { %v2450_v62 = vpop.f32.mrf.mxu0  ;;  %v3603_v42 = vshll.u32 %v12373_v59, 16  ;;  %v3631_v4 = vshrl.u32 %v12322_v25, 16  ;;  %v10017_v31 = vcombine.low %v12389_v20, %v12394_v49  ;;  %v10018_v2 = vcombine.high %v12389_v20, %v12394_v49  ;;  %v12446_v29 = vld [vmem:[%s15757_s2 + $0x860] sm:$0xff]  ;;  %v12473_v39 = vld [vmem:[%s15757_s2 + $0x128] sm:$0xff] }
 0x19e   : > { %3086 = vst [vmem:[#allocation2 + $0x118] sm:$0xff] %v2528_v43  ;;  %v2530_v22 = vadd.f32 %v2529_v7, %v2449_v6  ;;  %5224 = vmatpush2.bf16.msra.mxu0 %v10031_v47  ;;  %v2531_v14 = vpop.f32.mrf.mxu1  ;;  %v12422_v47 = vsel %vm3522_vm1, %v3553_v44, %v12354_v55  ;;  %v3635_v25 = vshll.u32 %v12383_v56, 16  ;;  %v12433_v57 = vsel %vm3522_vm1, %v3593_v15, %v3597_v34 }
 0x19f   : > { %5305 = vmatpush2.bf16.msra.mxu1 %v10159_v18  ;;  %15902 = vst [vmem:[#allocation18_spill] sm:$0xff] %v12422_v47  ;;  %5363 = vmatprep.subr.bf16.mxu0 %v10248_v32  ;;  %v2451_v53 = vpop.f32.mrf.mxu0  ;;  %v3585_v30 = vor.u32 %v3583_v40, %v12337_v17  ;;  %v3647_v18 = vshrl.u32 %v12334_v46, 16  ;;  %v3651_v32 = vshll.u32 %v12396_v28, 16  ;;  %v12451_v17 = vsel %vm3522_vm1, %v3609_v23, %v3613_v36  ;;  %v3490_v23 = vld [vmem:[%s15757_s2 + $0x800] sm:$0xff]  ;;  %v3263_v14 = vld [vmem:[%s15757_s2 + $0xe8] sm:$0xff] }
 0x1a0   : > { %3087 = vst [vmem:[#allocation2 + $0x20] sm:$0xff] %v2530_v22  ;;  %5436 = vmatprep.subr.bf16.mxu1 %v10026_v54  ;;  %v2532_v33 = vpop.f32.mrf.mxu1  ;;  %15903 = vst [vmem:[#allocation19_spill] sm:$0xff] %v12451_v17  ;;  %v3589_v46 = vrot.slane %v3587_v9, 1  ;;  %v3601_v19 = vor.u32 %v3599_v45, %v12354_v55  ;;  %v10240_v37 = vcombine.high %v3506_v52, %v3510_v16  ;;  %v3605_v48 = vrot.slane %v3603_v42, 1  ;;  %v12468_v55 = vld [vmem:[%s15757_s2 + $0x108] sm:$0xff] }
 0x1a1   : > { %5226 = vmatmul.mubr.bf16.vlgmr.msra.gmra.mxu0 %v12406_v27  ;;  %v10239_v26 = vcombine.low %v3506_v52, %v3510_v16  ;;  %v3633_v54 = vor.u32 %v3631_v4, %v3597_v34  ;;  %v12475_v1 = vpack.c.bf16 %v3127_v41, %v3122_v12  ;;  %v3637_v13 = vrot.slane %v3635_v25, 1  ;;  %v3134_v4 = vld [vmem:[%s10746_s29 + $0x150] sm:$0xff]  ;;  %v3259_v12 = vld [vmem:[%s15757_s2 + $0xc8] sm:$0xff] }
 0x1a2   : > { %5307 = vmatmul.mubr.bf16.vlgmr.msra.gmra.mxu1 %v12422_v47  ;;  %5364 = vmatpush1.bf16.msra.mxu0 %v10247_v3  ;;  %v12481_v63 = vpack.c.bf16 %v3129_v50, %v3124_v8  ;;  %v10232_v3 = vcombine.high %v12441_v38, %v12446_v29  ;;  %v12485_v44 = vpack.c.bf16 %v3133_v35, %v3133_v35  ;;  %v3653_v6 = vrot.slane %v3651_v32, 1  ;;  %v12538_v8 = vld [vmem:[%s15757_s2 + $0x5c8] sm:$0xff] }
 0x1a3   : > { %5437 = vmatpush1.bf16.msra.mxu1 %v10025_v61  ;;  %5235 = vmatprep.mubr.bf16.mxu0 %v12433_v57  ;;  %v10010_v15 = vcombine.high %v3275_v10, %v3279_v60  ;;  %v3649_v40 = vor.u32 %v3647_v18, %v3613_v36  ;;  %v12488_v43 = vpack.c.bf16 %v3135_v24, %v3135_v24  ;;  %v3623_v20 = vshrl.u32 %v12363_v58, 16  ;;  %v3494_v36 = vld [vmem:[%s15757_s2 + $0x820] sm:$0xff]  ;;  %v12543_v50 = vld [vmem:[%s15757_s2 + $0x5e8] sm:$0xff] }
 0x1a4   : > { %5438 = vmatprep.subr.bf16.mxu1 %v10018_v2  ;;  %5316 = vmatprep.mubr.bf16.mxu1 %v12451_v17  ;;  %v12491_v5 = vsel %vm3522_vm1, %v3585_v30, %v3589_v46  ;;  %v10009_v11 = vcombine.low %v3275_v10, %v3279_v60  ;;  %v10002_v61 = vcombine.high %v12468_v55, %v12473_v39  ;;  %v3627_v49 = vshll.u32 %v12475_v1, 16 }
 0x1a5   : > { %5365 = vmatprep.subr.bf16.mxu0 %v10240_v37  ;;  %v12496_v7 = vsel %vm3522_vm1, %v3601_v19, %v3605_v48  ;;  %v3639_v34 = vshrl.u32 %v12373_v59, 16  ;;  %v12508_v9 = vsel %vm3522_vm1, %v3633_v54, %v3637_v13  ;;  %v3643_v45 = vshll.u32 %v12481_v63, 16  ;;  %v3132_v59 = vld [vmem:[%s10746_s29 + $0x140] sm:$0xff]  ;;  %v3255_v19 = vld [vmem:[%s15757_s2 + $0xa8] sm:$0xff] }
 0x1a6   : > { %15904 = vst [vmem:[#allocation11_spill] sm:$0xff] %v12496_v7  ;;  %5366 = vmatpush1.bf16.msra.mxu0 %v10239_v26  ;;  %v3671_v58 = vshrl.u32 %v12383_v56, 16  ;;  %v3675_v62 = vshll.u32 %v12485_v44, 16  ;;  %v12515_v22 = vsel %vm3522_vm1, %v3649_v40, %v3653_v6  ;;  %v10231_v42 = vcombine.low %v12441_v38, %v12446_v29 }
 0x1a7   : > { %5439 = vmatpush1.bf16.msra.mxu1 %v10017_v31  ;;  %5367 = vmatprep.subr.bf16.mxu0 %v10232_v3  ;;  %15905 = vst [vmem:[#allocation3_spill] sm:$0xff] %v12515_v22  ;;  %v3687_v52 = vshrl.u32 %v12396_v28, 16  ;;  %v3691_v16 = vshll.u32 %v12488_v43, 16  ;;  %v10001_v56 = vcombine.low %v12468_v55, %v12473_v39  ;;  %v10224_v31 = vcombine.high %v3490_v23, %v3494_v36 }
 0x1a8   : > { %5440 = vmatprep.subr.bf16.mxu1 %v10010_v15  ;;  %v3625_v28 = vor.u32 %v3623_v20, %v3589_v46  ;;  %v3629_v2 = vrot.slane %v3627_v49, 1  ;;  %v3641_v25 = vor.u32 %v3639_v34, %v3605_v48  ;;  %v12533_v41 = vpack.c.bf16 %v3132_v59, %v3132_v59  ;;  %v3251_v46 = vld [vmem:[%s15757_s2 + $0x88] sm:$0xff]  ;;  %v3096_v34 = vld [vmem:[%s10746_s29 + $0x20] sm:$0xfe] }
 0x1a9   : > { %5236 = vmatmul.mubr.bf16.gmra.mxu0 %v12491_v5  ;;  %v3645_v53 = vrot.slane %v3643_v45, 1  ;;  %v3673_v30 = vor.u32 %v3671_v58, %v3637_v13  ;;  %v3677_v18 = vrot.slane %v3675_v62, 1  ;;  %v12546_v32 = vpack.c.bf16 %v3134_v4, %v3134_v4  ;;  %v3235_v45 = vld [vmem:[%s15757_s2 + $0x8] sm:$0xff]  ;;  %v3111_v4 = vld [vmem:[%s10746_s29 + $0x98] sm:$0xff] }
 0x1aa   : > { %5317 = vmatmul.mubr.bf16.gmra.mxu1 %v12496_v7  ;;  %5245 = vmatprep.mubr.bf16.mxu0 %v12508_v9  ;;  %v9994_v33 = vcombine.high %v3259_v12, %v3263_v14  ;;  %v3689_v38 = vor.u32 %v3687_v52, %v3653_v6  ;;  %v3693_v29 = vrot.slane %v3691_v16, 1  ;;  %v10223_v35 = vcombine.low %v3490_v23, %v3494_v36  ;;  %v3101_v23 = vld [vmem:[%s10746_s29 + $0x48] sm:$0xff]  ;;  %v3106_v16 = vld [vmem:[%s10746_s29 + $0x70] sm:$0xff] }
 0x1ab   : > { %5441 = vmatpush1.bf16.msra.mxu1 %v10009_v11  ;;  %5326 = vmatprep.mubr.bf16.mxu1 %v12515_v22  ;;  %v10154_v10 = vcombine.high %v12538_v8, %v12543_v50  ;;  %v12557_v60 = vsel %vm3522_vm1, %v3625_v28, %v3629_v2  ;;  %v9993_v37 = vcombine.low %v3259_v12, %v3263_v14  ;;  %v3663_v24 = vshrl.u32 %v12475_v1, 16  ;;  %v3243_v1 = vld [vmem:[%s15757_s2 + $0x48] sm:$0xff] }
 0x1ac   : > { %5442 = vmatprep.subr.bf16.mxu1 %v10002_v61  ;;  %5368 = vmatpush1.bf16.msra.mxu0 %v10231_v42  ;;  %v3667_v48 = vshll.u32 %v12533_v41, 16  ;;  %v12562_v26 = vsel %vm3522_vm1, %v3641_v25, %v3645_v53  ;;  %v12565_v55 = vsel %vm3522_vm1, %v3673_v30, %v3677_v18  ;;  %v3679_v39 = vshrl.u32 %v12481_v63, 16  ;;  %v3247_v63 = vld [vmem:[%s15757_s2 + $0x68] sm:$0xff] }
 0x1ad   : > { %5369 = vmatprep.subr.bf16.mxu0 %v10224_v31  ;;  %15906 = vst [vmem:[#allocation13_spill] sm:$0xff] %v12562_v26  ;;  %v3683_v54 = vshll.u32 %v12546_v32, 16  ;;  %v9986_v13 = vcombine.high %v3251_v46, %v3255_v19  ;;  %v12570_v3 = vsel %vm3522_vm1, %v3689_v38, %v3693_v29  ;;  %v3665_v15 = vor.u32 %v3663_v24, %v3629_v2  ;;  %v3355_v31 = vld [vmem:[%s15757_s2 + $0x3c8] sm:$0xff] }
 0x1ae   : > { %15907 = vst [vmem:[#allocation4_spill] sm:$0xff] %v12570_v3  ;;  %v3669_v40 = vrot.slane %v3667_v48, 1  ;;  %v3706_v6 = vshrl.u32 %v12485_v44, 16  ;;  %v9985_v11 = vcombine.low %v3251_v46, %v3255_v19  ;;  %v3681_v61 = vor.u32 %v3679_v39, %v3645_v53  ;;  %v3239_v44 = vld [vmem:[%s15757_s2 + $0x28] sm:$0xff] }
 0x1af   : > { %5443 = vmatpush1.bf16.msra.mxu1 %v10001_v56  ;;  %v3685_v20 = vrot.slane %v3683_v54, 1  ;;  %v3712_v49 = vshrl.u32 %v12488_v43, 16  ;;  %v9978_v36 = vcombine.high %v3243_v1, %v3247_v63  ;;  %v3141_v59 = vpack.c.bf16 %v3101_v23, %v3096_v34  ;;  %v3359_v28 = vld [vmem:[%s15757_s2 + $0x3e8] sm:$0xff] }
 0x1b0   : > { %5444 = vmatprep.subr.bf16.mxu1 %v9994_v33  ;;  %5370 = vmatpush1.bf16.msra.mxu0 %v10223_v35  ;;  %v12593_v58 = vsel %vm3522_vm1, %v3665_v15, %v3669_v40  ;;  %v12595_v62 = vor.u32 %v3706_v6, %v3677_v18  ;;  %v9977_v42 = vcombine.low %v3243_v1, %v3247_v63  ;;  %v3703_v14 = vshrl.u32 %v12533_v41, 16  ;;  %v3351_v46 = vld [vmem:[%s15757_s2 + $0x3a8] sm:$0xff] }
 0x1b1   : > { %5246 = vmatmul.mubr.bf16.gmra.mxu0 %v12557_v60  ;;  %5517 = vmatprep.subr.bf16.mxu0 %v10154_v10  ;;  %v12598_v43 = vsel %vm3522_vm1, %v3681_v61, %v3685_v20  ;;  %v12600_v52 = vor.u32 %v3712_v49, %v3693_v29  ;;  %v9970_v56 = vcombine.high %v3235_v45, %v3239_v44  ;;  %v3709_v25 = vshrl.u32 %v12546_v32, 16  ;;  %v3347_v32 = vld [vmem:[%s15757_s2 + $0x388] sm:$0xff] }
 0x1b2   : > { %5327 = vmatmul.mubr.bf16.gmra.mxu1 %v12562_v26  ;;  %5255 = vmatprep.mubr.bf16.mxu0 %v12565_v55  ;;  %15908 = vst [vmem:[#allocation5_spill] sm:$0xff] %v12598_v43  ;;  %v12619_v53 = vpack.c.bf16 %v3111_v4, %v3106_v16  ;;  %v3574_v30 = vshll.u32 %v3141_v59, 16  ;;  %v9969_v18 = vcombine.low %v3235_v45, %v3239_v44  ;;  %v3121_v1 = vld [vmem:[%s10746_s29 + $0xe8] sm:$0xff] }
 0x1b3   : > { %5445 = vmatpush1.bf16.msra.mxu1 %v9993_v37  ;;  %5336 = vmatprep.mubr.bf16.mxu1 %v12570_v3  ;;  %15909 = vst [vmem:[#allocation14_spill] sm:$0xff] %v12600_v52  ;;  %v10090_v38 = vcombine.high %v3355_v31, %v3359_v28  ;;  %v12628_v35 = vor.u32 %v3703_v14, %v3669_v40  ;;  %v3572_v37 = vshrl.u32 %v3141_v59, 16  ;;  %v3339_v6 = vld [vmem:[%s15757_s2 + $0x348] sm:$0xff] }
 0x1b4   : > { %5446 = vmatprep.subr.bf16.mxu1 %v9986_v13  ;;  %v12638_v10 = vor.u32 %v3709_v25, %v3685_v20  ;;  %v3576_v24 = vrot.slane %v3574_v30, 1  ;;  %v3579_v48 = vshll.u32 %v12619_v53, 16  ;;  %v10089_v54 = vcombine.low %v3355_v31, %v3359_v28  ;;  %v3116_v13 = vld [vmem:[%s10746_s29 + $0xc0] sm:$0xff]  ;;  %v3411_v59 = vld [vmem:[%s15757_s2 + $0x588] sm:$0xff] }
 0x1b5   : > { %15910 = vst [vmem:[#allocation6_spill] sm:$0xff] %v12628_v35  ;;  %v10082_v15 = vcombine.high %v3347_v32, %v3351_v46  ;;  %v12660_v34 = vpack.c.bf16 %v3121_v1, %v3116_v13  ;;  %v3331_v4 = vld [vmem:[%s15757_s2 + $0x308] sm:$0xff]  ;;  %v10153_v31 = vcombine.low %v12538_v8, %v12543_v50  ;;  %v3615_v25 = vshrl.u32 %v12619_v53, 16 }
 0x1b6   : > { %15911 = vst [vmem:[#allocation7_spill] sm:$0xff] %v12638_v10  ;;  %v3577_v20 = vor.u32 %v3576_v24, %v3572_v37  ;;  %v3581_v49 = vrot.slane %v3579_v48, 1  ;;  %v3131_v37 = vld [vmem:[%s10746_s29 + $0x138] sm:$0xff]  ;;  %v3403_v8 = vld [vmem:[%s15757_s2 + $0x548] sm:$0xff] }
 0x1b7   : > { %5447 = vmatpush1.bf16.msra.mxu1 %v9985_v11  ;;  %v3343_v11 = vld [vmem:[%s15757_s2 + $0x368] sm:$0xff]  ;;  %v3619_v30 = vshll.u32 %v12660_v34, 16 }
 0x1b8   : > { %5448 = vmatprep.subr.bf16.mxu1 %v9978_v36  ;;  %v10081_v36 = vcombine.low %v3347_v32, %v3351_v46  ;;  %v10074_v44 = vcombine.high %v3339_v6, %v3343_v11  ;;  %v12686_v28 = vsel %vm3522_vm1, %v3577_v20, %v3581_v49  ;;  %v3126_v46 = vld [vmem:[%s10746_s29 + $0x110] sm:$0xff]  ;;  %v3407_v50 = vld [vmem:[%s15757_s2 + $0x568] sm:$0xff] }
 0x1b9   : > { %5256 = vmatmul.mubr.bf16.gmra.mxu0 %v12593_v58  ;;  %v12605_v12 = vpop.f32.mrf.mxu0  ;;  %15912 = vst [vmem:[#allocation15_spill] sm:$0xff] %v12686_v28  ;;  %v3327_v13 = vld [vmem:[%s15757_s2 + $0x2e8] sm:$0xff]  ;;  %v12715_v20 = vpack.c.bf16 %v3131_v37, %v3126_v46 }
 0x1ba   : > { %5337 = vmatmul.mubr.bf16.gmra.mxu1 %v12598_v43  ;;  %v12615_v2 = vpop.f32.mrf.mxu1  ;;  %5265 = vmatprep.mubr.bf16.mxu0 %v12595_v62  ;;  %v3136_v43 = vld [vmem:[%s10746_s29 + $0x160] sm:$0xff] }
 0x1bb   : > { %5449 = vmatpush1.bf16.msra.mxu1 %v9977_v42  ;;  %v12621_v41 = vpop.f32.mrf.mxu0  ;;  %5346 = vmatprep.mubr.bf16.mxu1 %v12600_v52  ;;  %v3415_v42 = vld [vmem:[%s15757_s2 + $0x5a8] sm:$0xff]  ;;  %v12766_v26 = vpack.c.bf16 %v3136_v43, %v3136_v43 }
 0x1bc   : > { %v12624_v33 = vpop.f32.mrf.mxu1  ;;  %5450 = vmatprep.subr.bf16.mxu1 %v9970_v56  ;;  %v3335_v56 = vld [vmem:[%s15757_s2 + $0x328] sm:$0xff]  ;;  %v10146_v32 = vcombine.high %v3411_v59, %v3415_v42 }
 0x1bd   : > { %v12626_v29 = vpop.f32.mrf.mxu0  ;;  %v10066_v48 = vcombine.high %v3331_v4, %v3335_v56 }
 0x1be   : > { %v12636_v19 = vpop.f32.mrf.mxu1 }
 0x1bf   : > { %5451 = vmatpush1.bf16.msra.mxu1 %v9969_v18  ;;  %v12641_v39 = vpop.f32.mrf.mxu0 }
 0x1c0   : > { %v12645_v63 = vpop.f32.mrf.mxu1  ;;  %5452 = vmatprep.subr.bf16.mxu1 %v10090_v38  ;;  %v10073_v38 = vcombine.low %v3339_v6, %v3343_v11  ;;  %v3617_v6 = vor.u32 %v3615_v25, %v3581_v49  ;;  %v3621_v11 = vrot.slane %v3619_v30, 1  ;;  %v3399_v49 = vld [vmem:[%s15757_s2 + $0x528] sm:$0xff]  ;;  %v10137_v25 = vcombine.low %v3403_v8, %v3407_v50 }
 0x1c1   : > { %5266 = vmatmul.mubr.bf16.gmra.mxu0 %v12628_v35  ;;  %v12648_v40 = vpop.f32.mrf.mxu0 }
 0x1c2   : > { %5347 = vmatmul.mubr.bf16.gmra.mxu1 %v12638_v10  ;;  %v12657_v61 = vpop.f32.mrf.mxu1  ;;  %5387 = vmatprep.mubr.bf16.mxu0 %v15880_v51  ;;  %v12738_v30 = vsel %vm3522_vm1, %v3617_v6, %v3621_v11 }
 0x1c3   : > { %5453 = vmatpush2.bf16.msra.mxu1 %v10089_v54  ;;  %v12662_v23 = vpop.f32.mrf.mxu0  ;;  %5468 = vmatprep.mubr.bf16.mxu1 %v12131_v0  ;;  %v3323_v54 = vld [vmem:[%s15757_s2 + $0x2c8] sm:$0xff]  ;;  %v10138_v0 = vcombine.high %v3403_v8, %v3407_v50  ;;  %15913 = vst [vmem:[#allocation8_spill] sm:$0xff] %v12738_v30 }
 0x1c4   : > { %v12665_v45 = vpop.f32.mrf.mxu1  ;;  %5454 = vmatprep.subr.bf16.mxu1 %v10082_v15  ;;  %v10145_v15 = vcombine.low %v3411_v59, %v3415_v42  ;;  %v10058_v52 = vcombine.high %v3323_v54, %v3327_v13  ;;  %v3395_v59 = vld [vmem:[%s15757_s2 + $0x508] sm:$0xff]  ;;  %v10057_v37 = vcombine.low %v3323_v54, %v3327_v13 }
 0x1c5   : > { %v12673_v16 = vpop.f32.mrf.mxu0  ;;  %v3387_v8 = vld [vmem:[%s15757_s2 + $0x4c8] sm:$0xff]  ;;  %v10129_v13 = vcombine.low %v3395_v59, %v3399_v49 }
 0x1c6   : > { %v12681_v14 = vpop.f32.mrf.mxu1 }
 0x1c7   : > { %5455 = vmatpush2.bf16.msra.mxu1 %v10081_v36  ;;  %v12690_v18 = vpop.f32.mrf.mxu0 }
 0x1c8   : > { %v12694_v24 = vpop.f32.mrf.mxu1  ;;  %5456 = vmatprep.subr.bf16.mxu1 %v10074_v44  ;;  %v10065_v44 = vcombine.low %v3331_v4, %v3335_v56  ;;  %v3315_v4 = vld [vmem:[%s15757_s2 + $0x288] sm:$0xff] }
 0x1c9   : > { %10255 = vmatmul.mubr.msk.bf16.vlgmr.msra.gmra.mxu0 %vm2032_vm0, %v12686_v28  ;;  %v12704_v53 = vpop.f32.mrf.mxu0  ;;  %v3319_v56 = vld [vmem:[%s15757_s2 + $0x2a8] sm:$0xff] }
 0x1ca   : > { %5518 = vmatpush1.bf16.msra.mxu0 %v10153_v31  ;;  %v12712_v1 = vpop.f32.mrf.mxu1  ;;  %5397 = vmatprep.mubr.bf16.mxu0 %v15880_v51 }
 0x1cb   : > { %5457 = vmatpush2.bf16.msra.mxu1 %v10073_v38  ;;  %v12717_v36 = vpop.f32.mrf.mxu0  ;;  %5519 = vmatprep.subr.bf16.mxu0 %v10146_v32  ;;  %v3655_v38 = vshrl.u32 %v12660_v34, 16  ;;  %v3659_v32 = vshll.u32 %v12715_v20, 16  ;;  %v3391_v34 = vld [vmem:[%s15757_s2 + $0x4e8] sm:$0xff] }
 0x1cc   : > { %v12719_v10 = vpop.f32.mrf.mxu1  ;;  %5458 = vmatprep.subr.bf16.mxu1 %v10066_v48  ;;  %v10130_v48 = vcombine.high %v3395_v59, %v3399_v49  ;;  %v10122_v7 = vcombine.high %v3387_v8, %v3391_v34  ;;  %v3379_v59 = vld [vmem:[%s15757_s2 + $0x488] sm:$0xff] }
 0x1cd   : > { %v12727_v42 = vpop.f32.mrf.mxu0  ;;  %v3657_v6 = vor.u32 %v3655_v38, %v3621_v11  ;;  %v3383_v11 = vld [vmem:[%s15757_s2 + $0x4a8] sm:$0xff] }
 0x1ce   : > { %5520 = vmatpush1.bf16.msra.mxu0 %v10145_v15  ;;  %v12735_v31 = vpop.f32.mrf.mxu1  ;;  %v10050_v15 = vcombine.high %v3315_v4, %v3319_v56  ;;  %v3299_v49 = vld [vmem:[%s15757_s2 + $0x208] sm:$0xff]  ;;  %v10114_v47 = vcombine.high %v3379_v59, %v3383_v11 }
 0x1cf   : > { %5459 = vmatpush2.bf16.msra.mxu1 %v10065_v44  ;;  %v12742_v46 = vpop.f32.mrf.mxu0  ;;  %5521 = vmatprep.subr.bf16.mxu0 %v10138_v0  ;;  %v3307_v0 = vld [vmem:[%s15757_s2 + $0x248] sm:$0xff]  ;;  %v3661_v44 = vrot.slane %v3659_v32, 1  ;;  %v3695_v32 = vshrl.u32 %v12715_v20, 16 }
 0x1d0   : > { %v12745_v3 = vpop.f32.mrf.mxu1  ;;  %5460 = vmatprep.subr.bf16.mxu1 %v10058_v52  ;;  %v3311_v52 = vld [vmem:[%s15757_s2 + $0x268] sm:$0xff] }
 0x1d1   : > { %10256 = vmatmul.mubr.msk.bf16.gmra.mxu0 %vm2032_vm0, %v12738_v30  ;;  %v12755_v50 = vpop.f32.mrf.mxu0  ;;  %v10049_v30 = vcombine.low %v3315_v4, %v3319_v56  ;;  %v10042_v28 = vcombine.high %v3307_v0, %v3311_v52  ;;  %v3303_v4 = vld [vmem:[%s15757_s2 + $0x228] sm:$0xff]  ;;  %v12789_v38 = vsel %vm3522_vm1, %v3657_v6, %v3661_v44 }
 0x1d2   : > { %5522 = vmatpush1.bf16.msra.mxu0 %v10137_v25  ;;  %v12763_v54 = vpop.f32.mrf.mxu1  ;;  %5407 = vmatprep.mubr.bf16.mxu0 %v15880_v51  ;;  %v10121_v25 = vcombine.low %v3387_v8, %v3391_v34  ;;  %15915 = vst [vmem:[#allocation16_spill] sm:$0xff] %v12789_v38  ;;  %v3371_v8 = vld [vmem:[%s15757_s2 + $0x448] sm:$0xff] }
 0x1d3   : > { %5461 = vmatpush2.bf16.msra.mxu1 %v10057_v37  ;;  %v12768_v22 = vpop.f32.mrf.mxu0  ;;  %5523 = vmatprep.subr.bf16.mxu0 %v10130_v48  ;;  %v3699_v37 = vshll.u32 %v12766_v26, 16  ;;  %v3375_v20 = vld [vmem:[%s15757_s2 + $0x468] sm:$0xff] }
 0x1d4   : > { %v12770_v17 = vpop.f32.mrf.mxu1  ;;  %5462 = vmatprep.subr.bf16.mxu1 %v10050_v15  ;;  %v10041_v15 = vcombine.low %v3307_v0, %v3311_v52  ;;  %v10113_v0 = vcombine.low %v3379_v59, %v3383_v11  ;;  %v3697_v52 = vor.u32 %v3695_v32, %v3661_v44  ;;  %v3367_v59 = vld [vmem:[%s15757_s2 + $0x428] sm:$0xff]  ;;  %v10105_v11 = vcombine.low %v3371_v8, %v3375_v20 }
 0x1d5   : > { %v12778_v43 = vpop.f32.mrf.mxu0  ;;  %v3701_v6 = vrot.slane %v3699_v37, 1 }
 0x1d6   : > { %5524 = vmatpush1.bf16.msra.mxu0 %v10129_v13  ;;  %v12786_v56 = vpop.f32.mrf.mxu1  ;;  %v10034_v13 = vcombine.high %v3299_v49, %v3303_v4 }
 0x1d7   : > { %15914 = vst [vmem:[#allocation9_spill] sm:$0xff] %v12786_v56  ;;  %5463 = vmatpush2.bf16.msra.mxu1 %v10049_v30  ;;  %v12793_v48 = vpop.f32.mrf.mxu0  ;;  %5525 = vmatprep.subr.bf16.mxu0 %v10122_v7  ;;  %v3515_v7 = vld [vmem:[%s15757_s2 + $0x8c8] sm:$0xff]  ;;  %v12827_v32 = vsel %vm3522_vm1, %v3697_v52, %v3701_v6 }
 0x1d8   : > { %15916 = vst [vmem:[#allocation10_spill] sm:$0xff] %v12793_v48  ;;  %v12795_v35 = vpop.f32.mrf.mxu1  ;;  %5464 = vmatprep.subr.bf16.mxu1 %v10042_v28  ;;  %v3519_v28 = vld [vmem:[%s15757_s2 + $0x8e8] sm:$0xff]  ;;  %15919 = vst [vmem:[#allocation21_spill] sm:$0xff] %v12827_v32 }
 0x1d9   : > { %15917 = vst [vmem:[#allocation12_spill] sm:$0xff] %v12795_v35  ;;  %10257 = vmatmul.mubr.msk.bf16.gmra.mxu0 %vm2032_vm0, %v12789_v38  ;;  %v12805_v30 = vpop.f32.mrf.mxu0  ;;  %v10106_v35 = vcombine.high %v3371_v8, %v3375_v20  ;;  %v10250_v56 = vcombine.high %v3515_v7, %v3519_v28  ;;  %v2650_v8 = vadd.f32 %v12615_v2, %v12605_v12  ;;  %v3483_v20 = vld [vmem:[%s15757_s2 + $0x7c8] sm:$0xff] }
 0x1da   : > { %15918 = vst [vmem:[#allocation20_spill] sm:$0xff] %v12805_v30  ;;  %5526 = vmatpush1.bf16.msra.mxu0 %v10121_v25  ;;  %v12813_v34 = vpop.f32.mrf.mxu1  ;;  %5417 = vmatprep.mubr.bf16.mxu0 %v15880_v51  ;;  %v10033_v30 = vcombine.low %v3299_v49, %v3303_v4  ;;  %v3363_v25 = vld [vmem:[%s15757_s2 + $0x408] sm:$0xff] }
 0x1db   : > { %5465 = vmatpush2.bf16.msra.mxu1 %v10041_v15  ;;  %v12816_v38 = vpop.f32.mrf.mxu0  ;;  %5527 = vmatprep.subr.bf16.mxu0 %v10114_v47  ;;  %v3507_v47 = vld [vmem:[%s15757_s2 + $0x888] sm:$0xff]  ;;  %v10249_v15 = vcombine.low %v3515_v7, %v3519_v28 }
 0x1dc   : > { %v12818_v48 = vpop.f32.mrf.mxu1  ;;  %5466 = vmatprep.subr.bf16.mxu1 %v10034_v13  ;;  %v3511_v49 = vld [vmem:[%s15757_s2 + $0x8a8] sm:$0xff]  ;;  %v10098_v13 = vcombine.high %v3363_v25, %v3367_v59 }
 0x1dd   : > { %v2612_v44 = vpop.f32.mrf.mxu0  ;;  %v10242_v7 = vcombine.high %v3507_v47, %v3511_v49  ;;  %v3499_v12 = vld [vmem:[%s15757_s2 + $0x848] sm:$0xff] }
 0x1de   : > { %5528 = vmatpush1.bf16.msra.mxu0 %v10113_v0  ;;  %v2693_v4 = vpop.f32.mrf.mxu1  ;;  %v3487_v0 = vld [vmem:[%s15757_s2 + $0x7e8] sm:$0xff]  ;;  %v10097_v44 = vcombine.low %v3363_v25, %v3367_v59 }
 0x1df   : > { %5467 = vmatpush2.bf16.msra.mxu1 %v10033_v30  ;;  %v2613_v37 = vpop.f32.mrf.mxu0  ;;  %5529 = vmatprep.subr.bf16.mxu0 %v10106_v35  ;;  %v3715_v35 = vshrl.u32 %v12766_v26, 16  ;;  %v3503_v2 = vld [vmem:[%s15757_s2 + $0x868] sm:$0xff]  ;;  %v10218_v26 = vcombine.high %v3483_v20, %v3487_v0 }
 0x1e0   : > { %5606 = vmatprep.subr.bf16.mxu1 %v10250_v56  ;;  %v2694_v52 = vpop.f32.mrf.mxu1  ;;  %v2652_v56 = vadd.f32 %v12624_v33, %v12621_v41  ;;  %v10241_v37 = vcombine.low %v3507_v47, %v3511_v49  ;;  %v3475_v41 = vld [vmem:[%s15757_s2 + $0x788] sm:$0xff]  ;;  %v10234_v25 = vcombine.high %v3499_v12, %v3503_v2  ;;  %v10217_v47 = vcombine.low %v3483_v20, %v3487_v0 }
 0x1e1   : > { %10258 = vmatmul.mubr.msk.bf16.gmra.mxu0 %vm2032_vm0, %v12827_v32  ;;  %v2730_v30 = vpop.f32.mrf.mxu0  ;;  %v2654_v52 = vadd.f32 %v12636_v19, %v12626_v29  ;;  %v3479_v33 = vld [vmem:[%s15757_s2 + $0x7a8] sm:$0xff]  ;;  %v2656_v29 = vadd.f32 %v12645_v63, %v12641_v39  ;;  %v10233_v20 = vcombine.low %v3499_v12, %v3503_v2  ;;  %v12896_v12 = vld [vmem:[%s15757_s2 + $0x5f0] sm:$0xff] }
 0x1e2   : > { %5469 = vmatmul.mubr.bf16.vlgmr.msra.gmra.mxu1 %v12406_v27  ;;  %5530 = vmatpush1.bf16.msra.mxu0 %v10105_v11  ;;  %v2731_v28 = vadd.f32 %v2730_v30, %v2650_v8  ;;  %v12865_v11 = vor.u32 %v3715_v35, %v3701_v6  ;;  %v3491_v49 = vld [vmem:[%s15757_s2 + $0x808] sm:$0xff]  ;;  %v10210_v6 = vcombine.high %v3475_v41, %v3479_v33 }
 0x1e3   : > { %5607 = vmatpush1.bf16.msra.mxu1 %v10249_v15  ;;  %v2732_v4 = vpop.f32.mrf.mxu0  ;;  %5531 = vmatprep.subr.bf16.mxu0 %v10098_v13  ;;  %v3495_v15 = vld [vmem:[%s15757_s2 + $0x828] sm:$0xff]  ;;  %v2660_v8 = vadd.f32 %v12657_v61, %v12648_v40  ;;  %v2662_v40 = vadd.f32 %v12665_v45, %v12662_v23  ;;  %v10209_v35 = vcombine.low %v3475_v41, %v3479_v33 }
 0x1e4   : > { %3024 = vst [vmem:[#allocation2 + $0xe8] sm:$0xff] %v2731_v28  ;;  %v2733_v32 = vadd.f32 %v2732_v4, %v2652_v56  ;;  %5427 = vmatprep.mubr.bf16.mxu0 %v15880_v51  ;;  %5478 = vmatprep.mubr.bf16.mxu1 %v12433_v57  ;;  %v3467_v63 = vld [vmem:[%s15757_s2 + $0x748] sm:$0xff]  ;;  %v10226_v30 = vcombine.high %v3491_v49, %v3495_v15 }
 0x1e5   : > { %v2734_v59 = vpop.f32.mrf.mxu0  ;;  %5608 = vmatprep.subr.bf16.mxu1 %v10242_v7  ;;  %v12891_v7 = vld [vmem:[%s15757_s2 + $0x5d0] sm:$0xff]  ;;  %v2664_v45 = vadd.f32 %v12681_v14, %v12673_v16  ;;  %v3459_v28 = vld [vmem:[%s15757_s2 + $0x708] sm:$0xff]  ;;  %v10225_v4 = vcombine.low %v3491_v49, %v3495_v15  ;;  %v2666_v16 = vadd.f32 %v12694_v24, %v12690_v18  ;;  %v2674_v15 = vadd.f32 %v12735_v31, %v12727_v42 }
 0x1e6   : > { %3025 = vst [vmem:[#allocation2 + $0xf0] sm:$0xff] %v2733_v32  ;;  %5532 = vmatpush1.bf16.msra.mxu0 %v10097_v44  ;;  %v2735_v19 = vadd.f32 %v2734_v59, %v2654_v52  ;;  %v3471_v32 = vld [vmem:[%s15757_s2 + $0x768] sm:$0xff]  ;;  %v2680_v31 = vadd.f32 %v12763_v54, %v12755_v50 }
 0x1e7   : > { %v2736_v13 = vpop.f32.mrf.mxu0  ;;  %5533 = vmatprep.subr.bf16.mxu0 %v10218_v26  ;;  %5609 = vmatpush1.bf16.msra.mxu1 %v10241_v37  ;;  %v10202_v23 = vcombine.high %v3467_v63, %v3471_v32  ;;  %v3463_v44 = vld [vmem:[%s15757_s2 + $0x728] sm:$0xff]  ;;  %v10156_v37 = vcombine.high %v12891_v7, %v12896_v12  ;;  %v10201_v52 = vcombine.low %v3467_v63, %v3471_v32 }
 0x1e8   : > { %3032 = vst [vmem:[#allocation2 + $0x108] sm:$0xff] %v2735_v19  ;;  %v2737_v39 = vadd.f32 %v2736_v13, %v2656_v29  ;;  %5610 = vmatprep.subr.bf16.mxu1 %v10234_v25  ;;  %v10194_v33 = vcombine.high %v3459_v28, %v3463_v44  ;;  %v2670_v25 = vadd.f32 %v12712_v1, %v12704_v53  ;;  %v3451_v29 = vld [vmem:[%s15757_s2 + $0x6c8] sm:$0xff] }
 0x1e9   : > { %10259 = vmatmul.mubr.msk.bf16.gmra.mxu0 %vm2032_vm0, %v12865_v11  ;;  %v2740_v0 = vpop.f32.mrf.mxu0  ;;  %v3455_v18 = vld [vmem:[%s15757_s2 + $0x6e8] sm:$0xff]  ;;  %v2672_v19 = vadd.f32 %v12719_v10, %v12717_v36  ;;  %v10193_v1 = vcombine.low %v3459_v28, %v3463_v44  ;;  %v15921_v44 = vld [vmem:[#allocation10_spill] sm:$0xff] }
 0x1ea   : > { %3033 = vst [vmem:[#allocation2 + $0x110] sm:$0xff] %v2737_v39  ;;  %5479 = vmatmul.mubr.bf16.gmra.mxu1 %v12491_v5  ;;  %5534 = vmatpush2.bf16.msra.mxu0 %v10217_v47  ;;  %v2741_v61 = vadd.f32 %v2740_v0, %v2660_v8  ;;  %v10186_v49 = vcombine.high %v3451_v29, %v3455_v18  ;;  %v3443_v10 = vld [vmem:[%s15757_s2 + $0x688] sm:$0xff] }
 0x1eb   : > { %v2742_v2 = vpop.f32.mrf.mxu0  ;;  %5535 = vmatprep.subr.bf16.mxu0 %v10210_v6  ;;  %5488 = vmatprep.mubr.bf16.mxu1 %v12508_v9  ;;  %v3447_v36 = vld [vmem:[%s15757_s2 + $0x6a8] sm:$0xff]  ;;  %v2676_v8 = vadd.f32 %v12745_v3, %v12742_v46  ;;  %v10185_v63 = vcombine.low %v3451_v29, %v3455_v18  ;;  %v3292_v29 = vld [vmem:[%s15757_s2 + $0x1d0] sm:$0xff] }
 0x1ec   : > { %3040 = vst [vmem:[#allocation2 + $0xd0] sm:$0xff] %v2741_v61  ;;  %v2743_v56 = vadd.f32 %v2742_v2, %v2662_v40  ;;  %5611 = vmatpush1.bf16.msra.mxu1 %v10233_v20  ;;  %5549 = vmatprep.mubr.bf16.mxu0 %v12138_v21  ;;  %v10178_v42 = vcombine.high %v3443_v10, %v3447_v36  ;;  %v3435_v0 = vld [vmem:[%s15757_s2 + $0x648] sm:$0xff]  ;;  %v15920_v2 = vld [vmem:[#allocation9_spill] sm:$0xff] }
 0x1ed   : > { %v2744_v26 = vpop.f32.mrf.mxu0  ;;  %5612 = vmatprep.subr.bf16.mxu1 %v10226_v30  ;;  %v3439_v3 = vld [vmem:[%s15757_s2 + $0x668] sm:$0xff]  ;;  %v2682_v30 = vadd.f32 %v12770_v17, %v12768_v22  ;;  %v10177_v54 = vcombine.low %v3443_v10, %v3447_v36  ;;  %v3296_v18 = vld [vmem:[%s15757_s2 + $0x1f0] sm:$0xff] }
 0x1ee   : > { %3041 = vst [vmem:[#allocation2 + $0x138] sm:$0xff] %v2743_v56  ;;  %5536 = vmatpush2.bf16.msra.mxu0 %v10209_v35  ;;  %v2745_v14 = vadd.f32 %v2744_v26, %v2664_v45  ;;  %v10170_v35 = vcombine.high %v3435_v0, %v3439_v3  ;;  %v3427_v17 = vld [vmem:[%s15757_s2 + $0x608] sm:$0xff]  ;;  %v3412_v36 = vld [vmem:[%s15757_s2 + $0x590] sm:$0xff] }
 0x1ef   : > { %v2746_v41 = vpop.f32.mrf.mxu0  ;;  %5537 = vmatprep.subr.bf16.mxu0 %v10202_v23  ;;  %v2684_v23 = vadd.f32 %v15920_v2, %v12778_v43  ;;  %v3431_v22 = vld [vmem:[%s15757_s2 + $0x628] sm:$0xff] }
 0x1f0   : > { %3048 = vst [vmem:[#allocation2 + $0x1a8] sm:$0xff] %v2745_v14  ;;  %v2747_v59 = vadd.f32 %v2746_v41, %v2666_v16  ;;  %5613 = vmatpush1.bf16.msra.mxu1 %v10225_v4  ;;  %v15922_v4 = vld [vmem:[#allocation12_spill] sm:$0xff]  ;;  %v10169_v16 = vcombine.low %v3435_v0, %v3439_v3  ;;  %v3276_v3 = vld [vmem:[%s15757_s2 + $0x150] sm:$0xff] }
 0x1f1   : > { %v2750_v24 = vpop.f32.mrf.mxu0  ;;  %5760 = vmatprep.subr.bf16.mxu1 %v10156_v37  ;;  %v2686_v26 = vadd.f32 %v15922_v4, %v15921_v44  ;;  %v15923_v41 = vld [vmem:[#allocation20_spill] sm:$0xff]  ;;  %v3396_v44 = vld [vmem:[%s15757_s2 + $0x510] sm:$0xff] }
 0x1f2   : > { %3049 = vst [vmem:[#allocation2 + $0x220] sm:$0xff] %v2747_v59  ;;  %5489 = vmatmul.mubr.bf16.gmra.mxu1 %v12557_v60  ;;  %5538 = vmatpush2.bf16.msra.mxu0 %v10201_v52  ;;  %v2751_v53 = vadd.f32 %v2750_v24, %v2670_v25  ;;  %v10162_v52 = vcombine.high %v3427_v17, %v3431_v22  ;;  %v3400_v4 = vld [vmem:[%s15757_s2 + $0x530] sm:$0xff] }
 0x1f3   : > { %v2752_v47 = vpop.f32.mrf.mxu0  ;;  %5539 = vmatprep.subr.bf16.mxu0 %v10194_v33  ;;  %5498 = vmatprep.mubr.bf16.mxu1 %v12565_v55  ;;  %v2690_v33 = vadd.f32 %v12813_v34, %v15923_v41  ;;  %v10132_v41 = vcombine.high %v3396_v44, %v3400_v4 }
 0x1f4   : > { %3056 = vst [vmem:[#allocation2 + $0x198] sm:$0xff] %v2751_v53  ;;  %v2753_v13 = vadd.f32 %v2752_v47, %v2672_v19  ;;  %v2692_v19 = vadd.f32 %v12818_v48, %v12816_v38  ;;  %v15924_v53 = vld [vmem:[#allocation6_spill] sm:$0xff]  ;;  %v10161_v47 = vcombine.low %v3427_v17, %v3431_v22  ;;  %v3284_v38 = vld [vmem:[%s15757_s2 + $0x190] sm:$0xff] }
 0x1f5   : > { %v2754_v6 = vpop.f32.mrf.mxu0  ;;  %v3288_v48 = vld [vmem:[%s15757_s2 + $0x1b0] sm:$0xff] }
 0x1f6   : > { %3057 = vst [vmem:[#allocation2 + $0xe0] sm:$0xff] %v2753_v13  ;;  %5540 = vmatpush2.bf16.msra.mxu0 %v10193_v1  ;;  %v2755_v39 = vadd.f32 %v2754_v6, %v2674_v15  ;;  %v10028_v15 = vcombine.high %v3292_v29, %v3296_v18  ;;  %v3416_v6 = vld [vmem:[%s15757_s2 + $0x5b0] sm:$0xff] }
 0x1f7   : > { %v2756_v32 = vpop.f32.mrf.mxu0  ;;  %5541 = vmatprep.subr.bf16.mxu0 %v10186_v49  ;;  %v10148_v0 = vcombine.high %v3412_v36, %v3416_v6  ;;  %v3268_v22 = vld [vmem:[%s15757_s2 + $0x110] sm:$0xff] }
 0x1f8   : > { %3064 = vst [vmem:[#allocation2 + $0x50] sm:$0xff] %v2755_v39  ;;  %v2757_v20 = vadd.f32 %v2756_v32, %v2676_v8  ;;  %v10155_v32 = vcombine.low %v12891_v7, %v12896_v12  ;;  %v3408_v7 = vld [vmem:[%s15757_s2 + $0x570] sm:$0xff]  ;;  %v15926_v12 = vld [vmem:[#allocation15_spill] sm:$0xff] }
 0x1f9   : > { %v2760_v46 = vpop.f32.mrf.mxu0 }
 0x1fa   : > { %3065 = vst [vmem:[#allocation2 + $0x100] sm:$0xff] %v2757_v20  ;;  %5499 = vmatmul.mubr.bf16.gmra.mxu1 %v12593_v58  ;;  %5542 = vmatpush2.bf16.msra.mxu0 %v10185_v63  ;;  %v2761_v40 = vadd.f32 %v2760_v46, %v2680_v31  ;;  %v12945_v50 = vpop.f32.mrf.mxu1  ;;  %v10027_v63 = vcombine.low %v3292_v29, %v3296_v18  ;;  %v3280_v46 = vld [vmem:[%s15757_s2 + $0x170] sm:$0xff]  ;;  %v15928_v29 = vld [vmem:[#allocation11_spill] sm:$0xff] }
 0x1fb   : > { %v2762_v61 = vpop.f32.mrf.mxu0  ;;  %5543 = vmatprep.subr.bf16.mxu0 %v10178_v42  ;;  %5508 = vmatprep.mubr.bf16.mxu1 %v12595_v62  ;;  %v10020_v42 = vcombine.high %v3284_v38, %v3288_v48  ;;  %v10012_v2 = vcombine.high %v3276_v3, %v3280_v46  ;;  %v3388_v18 = vld [vmem:[%s15757_s2 + $0x4d0] sm:$0xff] }
 0x1fc   : > { %3072 = vst [vmem:[#allocation2 + $0x1d8] sm:$0xff] %v2761_v40  ;;  %v2763_v45 = vadd.f32 %v2762_v61, %v2682_v30  ;;  %v12950_v56 = vpop.f32.mrf.mxu1  ;;  %v15925_v30 = vld [vmem:[#allocation18_spill] sm:$0xff]  ;;  %v3404_v40 = vld [vmem:[%s15757_s2 + $0x550] sm:$0xff]  ;;  %v10019_v61 = vcombine.low %v3284_v38, %v3288_v48  ;;  %v15930_v38 = vld [vmem:[#allocation3_spill] sm:$0xff] }
 0x1fd   : > { %v2764_v28 = vpop.f32.mrf.mxu0  ;;  %v10140_v17 = vcombine.high %v3404_v40, %v3408_v7 }
 0x1fe   : > { %3073 = vst [vmem:[#allocation2 + $0x228] sm:$0xff] %v2763_v45  ;;  %5544 = vmatpush2.bf16.msra.mxu0 %v10177_v54  ;;  %v2765_v37 = vadd.f32 %v2764_v28, %v2684_v23  ;;  %v12960_v43 = vpop.f32.mrf.mxu1  ;;  %v15927_v45 = vld [vmem:[#allocation19_spill] sm:$0xff]  ;;  %v3272_v28 = vld [vmem:[%s15757_s2 + $0x130] sm:$0xff] }
 0x1ff   : > { %v2766_v14 = vpop.f32.mrf.mxu0  ;;  %5545 = vmatprep.subr.bf16.mxu0 %v10170_v35  ;;  %v10147_v35 = vcombine.low %v3412_v36, %v3416_v6  ;;  %v3252_v36 = vld [vmem:[%s15757_s2 + $0x90] sm:$0xff] }
 0x200   : > { %3080 = vst [vmem:[#allocation2 + $0x210] sm:$0xff] %v2765_v37  ;;  %v2767_v25 = vadd.f32 %v2766_v14, %v2686_v26  ;;  %v12964_v59 = vpop.f32.mrf.mxu1  ;;  %v10011_v37 = vcombine.low %v3276_v3, %v3280_v46  ;;  %v10004_v14 = vcombine.high %v3268_v22, %v3272_v28  ;;  %v3256_v6 = vld [vmem:[%s15757_s2 + $0xb0] sm:$0xff] }
 0x201   : > { %v2770_v24 = vpop.f32.mrf.mxu0 }
 0x202   : > { %3081 = vst [vmem:[#allocation2 + $0x1d0] sm:$0xff] %v2767_v25  ;;  %5509 = vmatmul.mubr.bf16.gmra.mxu1 %v15924_v53  ;;  %5546 = vmatpush2.bf16.msra.mxu0 %v10169_v16  ;;  %v2771_v34 = vadd.f32 %v2770_v24, %v2690_v33  ;;  %v12975_v1 = vpop.f32.mrf.mxu1  ;;  %v10139_v16 = vcombine.low %v3404_v40, %v3408_v7  ;;  %v3260_v33 = vld [vmem:[%s15757_s2 + $0xd0] sm:$0xff] }
 0x203   : > { %v2772_v49 = vpop.f32.mrf.mxu0  ;;  %5547 = vmatprep.subr.bf16.mxu0 %v10162_v52  ;;  %5630 = vmatprep.mubr.bf16.mxu1 %v15880_v51  ;;  %v3264_v25 = vld [vmem:[%s15757_s2 + $0xf0] sm:$0xff] }
 0x204   : > { %3088 = vst [vmem:[#allocation2 + $0x148] sm:$0xff] %v2771_v34  ;;  %v2773_v13 = vadd.f32 %v2772_v49, %v2692_v19  ;;  %v12978_v10 = vpop.f32.mrf.mxu1  ;;  %v3392_v24 = vld [vmem:[%s15757_s2 + $0x4f0] sm:$0xff]  ;;  %v15929_v34 = vld [vmem:[#allocation8_spill] sm:$0xff]  ;;  %v10131_v49 = vcombine.low %v3396_v44, %v3400_v4 }
 0x205   : > { %v2774_v8 = vpop.f32.mrf.mxu0  ;;  %v10124_v48 = vcombine.high %v3388_v18, %v3392_v24  ;;  %v3244_v40 = vld [vmem:[%s15757_s2 + $0x50] sm:$0xff] }
 0x206   : > { %3089 = vst [vmem:[#allocation2 + $0xa8] sm:$0xff] %v2773_v13  ;;  %5548 = vmatpush2.bf16.msra.mxu0 %v10161_v47  ;;  %v12992_v39 = vpop.f32.mrf.mxu1  ;;  %v10003_v47 = vcombine.low %v3268_v22, %v3272_v28  ;;  %v3380_v8 = vld [vmem:[%s15757_s2 + $0x490] sm:$0xff]  ;;  %v15932_v22 = vld [vmem:[#allocation16_spill] sm:$0xff]  ;;  %v9987_v28 = vcombine.low %v3252_v36, %v3256_v6 }
 0x207   : > { %5679 = vmatprep.subr.bf16.mxu0 %v10028_v15  ;;  %v2775_v31 = vpop.f32.mrf.mxu0  ;;  %v9996_v15 = vcombine.high %v3260_v33, %v3264_v25  ;;  %v3248_v7 = vld [vmem:[%s15757_s2 + $0x70] sm:$0xff] }
 0x208   : > { %v12996_v20 = vpop.f32.mrf.mxu1  ;;  %v10123_v31 = vcombine.low %v3388_v18, %v3392_v24  ;;  %v9980_v4 = vcombine.high %v3244_v40, %v3248_v7  ;;  %v3368_v18 = vld [vmem:[%s15757_s2 + $0x430] sm:$0xff] }
 0x209   : > { %5550 = vmatmul.mubr.bf16.vlgmr.msra.gmra.mxu0 %v15925_v30 }
 0x20a   : > { %10260 = vmatmul.mubr.msk.bf16.vlgmr.msra.gmra.mxu1 %vm2032_vm0, %v15926_v12  ;;  %5680 = vmatpush1.bf16.msra.mxu0 %v10027_v63  ;;  %v13013_v54 = vpop.f32.mrf.mxu1  ;;  %v3384_v63 = vld [vmem:[%s15757_s2 + $0x4b0] sm:$0xff] }
 0x20b   : > { %5761 = vmatpush1.bf16.msra.mxu1 %v10155_v32  ;;  %5681 = vmatprep.subr.bf16.mxu0 %v10020_v42  ;;  %v9995_v42 = vcombine.low %v3260_v33, %v3264_v25  ;;  %v10116_v46 = vcombine.high %v3380_v8, %v3384_v63  ;;  %v10115_v44 = vcombine.low %v3380_v8, %v3384_v63  ;;  %v3240_v33 = vld [vmem:[%s15757_s2 + $0x30] sm:$0xff] }
 0x20c   : > { %v13015_v23 = vpop.f32.mrf.mxu1  ;;  %5762 = vmatprep.subr.bf16.mxu1 %v10148_v0  ;;  %5559 = vmatprep.mubr.bf16.mxu0 %v15927_v45  ;;  %v9988_v0 = vcombine.high %v3252_v36, %v3256_v6  ;;  %v3364_v25 = vld [vmem:[%s15757_s2 + $0x410] sm:$0xff] }
 0x20d   : > { %5640 = vmatprep.mubr.bf16.mxu1 %v15880_v51  ;;  %v10100_v36 = vcombine.high %v3364_v25, %v3368_v18  ;;  %v3356_v6 = vld [vmem:[%s15757_s2 + $0x3d0] sm:$0xff] }
 0x20e   : > { %5682 = vmatpush1.bf16.msra.mxu0 %v10019_v61  ;;  %v13031_v26 = vpop.f32.mrf.mxu1  ;;  %v15931_v61 = vld [vmem:[#allocation13_spill] sm:$0xff] }
 0x20f   : > { %5763 = vmatpush1.bf16.msra.mxu1 %v10147_v35  ;;  %5683 = vmatprep.subr.bf16.mxu0 %v10012_v2  ;;  %v3372_v35 = vld [vmem:[%s15757_s2 + $0x450] sm:$0xff] }
 0x210   : > { %v13033_v52 = vpop.f32.mrf.mxu1  ;;  %5764 = vmatprep.subr.bf16.mxu1 %v10140_v17  ;;  %v3376_v2 = vld [vmem:[%s15757_s2 + $0x470] sm:$0xff] }
 0x211   : > { %5560 = vmatmul.mubr.bf16.gmra.mxu0 %v15928_v29  ;;  %v3360_v8 = vld [vmem:[%s15757_s2 + $0x3f0] sm:$0xff] }
 0x212   : > { %5684 = vmatpush1.bf16.msra.mxu0 %v10011_v37  ;;  %v13048_v19 = vpop.f32.mrf.mxu1  ;;  %10261 = vmatmul.mubr.msk.bf16.gmra.mxu1 %vm2032_vm0, %v15929_v34  ;;  %v15934_v63 = vld [vmem:[#allocation5_spill] sm:$0xff] }
 0x213   : > { %5765 = vmatpush1.bf16.msra.mxu1 %v10139_v16  ;;  %5685 = vmatprep.subr.bf16.mxu0 %v10004_v14  ;;  %v15933_v16 = vld [vmem:[#allocation4_spill] sm:$0xff]  ;;  %v10108_v14 = vcombine.high %v3372_v35, %v3376_v2 }
 0x214   : > { %v13052_v13 = vpop.f32.mrf.mxu1  ;;  %5766 = vmatprep.subr.bf16.mxu1 %v10132_v41  ;;  %5569 = vmatprep.mubr.bf16.mxu0 %v15930_v38  ;;  %v3236_v41 = vld [vmem:[%s15757_s2 + $0x10] sm:$0xff] }
 0x215   : > { %5650 = vmatprep.mubr.bf16.mxu1 %v15880_v51 }
 0x216   : > { %5686 = vmatpush1.bf16.msra.mxu0 %v10003_v47  ;;  %v13068_v32 = vpop.f32.mrf.mxu1  ;;  %v9979_v47 = vcombine.low %v3244_v40, %v3248_v7  ;;  %v15935_v7 = vld [vmem:[#allocation21_spill] sm:$0xff] }
 0x217   : > { %5767 = vmatpush1.bf16.msra.mxu1 %v10131_v49  ;;  %5687 = vmatprep.subr.bf16.mxu0 %v9996_v15  ;;  %v10107_v49 = vcombine.low %v3372_v35, %v3376_v2  ;;  %v9972_v15 = vcombine.high %v3236_v41, %v3240_v33  ;;  %v9971_v35 = vcombine.low %v3236_v41, %v3240_v33  ;;  %v3352_v41 = vld [vmem:[%s15757_s2 + $0x3b0] sm:$0xff] }
 0x218   : > { %v13070_v3 = vpop.f32.mrf.mxu1  ;;  %5768 = vmatprep.subr.bf16.mxu1 %v10124_v48 }
 0x219   : > { %5570 = vmatmul.mubr.bf16.gmra.mxu0 %v15931_v61 }
 0x21a   : > { %5688 = vmatpush1.bf16.msra.mxu0 %v9995_v42  ;;  %v13085_v17 = vpop.f32.mrf.mxu1  ;;  %10262 = vmatmul.mubr.msk.bf16.gmra.mxu1 %vm2032_vm0, %v15932_v22 }
 0x21b   : > { %5769 = vmatpush1.bf16.msra.mxu1 %v10123_v31  ;;  %5689 = vmatprep.subr.bf16.mxu0 %v9988_v0  ;;  %v3484_v31 = vld [vmem:[%s15757_s2 + $0x7d0] sm:$0xff] }
 0x21c   : > { %v13089_v37 = vpop.f32.mrf.mxu1  ;;  %5770 = vmatprep.subr.bf16.mxu1 %v10116_v46  ;;  %5579 = vmatprep.mubr.bf16.mxu0 %v15933_v16  ;;  %v3488_v0 = vld [vmem:[%s15757_s2 + $0x7f0] sm:$0xff] }
 0x21d   : > { %5660 = vmatprep.mubr.bf16.mxu1 %v15880_v51  ;;  %v10220_v22 = vcombine.high %v3484_v31, %v3488_v0 }
 0x21e   : > { %5690 = vmatpush1.bf16.msra.mxu0 %v9987_v28  ;;  %v2855_v24 = vpop.f32.mrf.mxu1  ;;  %v10099_v28 = vcombine.low %v3364_v25, %v3368_v18  ;;  %v3480_v25 = vld [vmem:[%s15757_s2 + $0x7b0] sm:$0xff] }
 0x21f   : > { %5771 = vmatpush1.bf16.msra.mxu1 %v10115_v44  ;;  %5691 = vmatprep.subr.bf16.mxu0 %v9980_v4  ;;  %v10092_v44 = vcombine.high %v3356_v6, %v3360_v8 }
 0x220   : > { %v2856_v48 = vpop.f32.mrf.mxu1  ;;  %5772 = vmatprep.subr.bf16.mxu1 %v10108_v14 }
 0x221   : > { %5580 = vmatmul.mubr.bf16.gmra.mxu0 %v15934_v63  ;;  %v2892_v42 = vpop.f32.mrf.mxu0  ;;  %v15936_v48 = vld [vmem:[#allocation14_spill] sm:$0xff] }
 0x222   : > { %v2893_v46 = vadd.f32 %v2892_v42, %v12945_v50  ;;  %5692 = vmatpush1.bf16.msra.mxu0 %v9979_v47  ;;  %v2973_v40 = vpop.f32.mrf.mxu1  ;;  %10263 = vmatmul.mubr.msk.bf16.gmra.mxu1 %vm2032_vm0, %v15935_v7  ;;  %v3348_v50 = vld [vmem:[%s15757_s2 + $0x390] sm:$0xff]  ;;  %v10219_v42 = vcombine.low %v3484_v31, %v3488_v0 }
 0x223   : > { %5773 = vmatpush1.bf16.msra.mxu1 %v10107_v49  ;;  %v2894_v2 = vpop.f32.mrf.mxu0  ;;  %5693 = vmatprep.subr.bf16.mxu0 %v9972_v15  ;;  %v10091_v15 = vcombine.low %v3356_v6, %v3360_v8  ;;  %v15937_v6 = vld [vmem:[#allocation7_spill] sm:$0xff]  ;;  %v3468_v31 = vld [vmem:[%s15757_s2 + $0x750] sm:$0xff] }
 0x224   : > { %v2974_v4 = vadd.f32 %v2973_v40, %v2893_v46  ;;  %v2895_v14 = vadd.f32 %v2894_v2, %v12950_v56  ;;  %v2975_v24 = vpop.f32.mrf.mxu1  ;;  %5774 = vmatprep.subr.bf16.mxu1 %v10100_v36  ;;  %5589 = vmatprep.mubr.bf16.mxu0 %v15936_v48  ;;  %v3476_v56 = vld [vmem:[%s15757_s2 + $0x790] sm:$0xff]  ;;  %v10084_v46 = vcombine.high %v3348_v50, %v3352_v41 }
 0x225   : > { %v2896_v33 = vpop.f32.mrf.mxu0  ;;  %5670 = vmatprep.mubr.bf16.mxu1 %v15880_v51  ;;  %v10212_v34 = vcombine.high %v3476_v56, %v3480_v25 }
 0x226   : > { %3026 = vst [vmem:[#allocation2 + $0x70] sm:$0xff] %v2974_v4  ;;  %v2976_v18 = vadd.f32 %v2975_v24, %v2895_v14  ;;  %v2897_v47 = vadd.f32 %v2896_v33, %v12960_v43  ;;  %5694 = vmatpush1.bf16.msra.mxu0 %v9971_v35  ;;  %v2977_v49 = vpop.f32.mrf.mxu1  ;;  %v3340_v4 = vld [vmem:[%s15757_s2 + $0x350] sm:$0xff]  ;;  %v10211_v14 = vcombine.low %v3476_v56, %v3480_v25 }
 0x227   : > { %5775 = vmatpush1.bf16.msra.mxu1 %v10099_v28  ;;  %v2898_v36 = vpop.f32.mrf.mxu0  ;;  %5695 = vmatprep.subr.bf16.mxu0 %v10092_v44  ;;  %v3344_v43 = vld [vmem:[%s15757_s2 + $0x370] sm:$0xff]  ;;  %v10083_v28 = vcombine.low %v3348_v50, %v3352_v41 }
 0x228   : > { %3027 = vst [vmem:[#allocation2 + $0x120] sm:$0xff] %v2976_v18  ;;  %v2978_v40 = vadd.f32 %v2977_v49, %v2897_v47  ;;  %v2899_v2 = vadd.f32 %v2898_v36, %v12964_v59  ;;  %v2979_v7 = vpop.f32.mrf.mxu1  ;;  %5776 = vmatprep.subr.bf16.mxu1 %v10220_v22  ;;  %v3472_v59 = vld [vmem:[%s15757_s2 + $0x770] sm:$0xff]  ;;  %v10076_v24 = vcombine.high %v3340_v4, %v3344_v43 }
 0x229   : > { %5590 = vmatmul.mubr.bf16.gmra.mxu0 %v15937_v6  ;;  %v2902_v8 = vpop.f32.mrf.mxu0  ;;  %v3336_v50 = vld [vmem:[%s15757_s2 + $0x330] sm:$0xff]  ;;  %v10075_v36 = vcombine.low %v3340_v4, %v3344_v43 }
 0x22a   : > { %3034 = vst [vmem:[#allocation2 + $0x1f8] sm:$0xff] %v2978_v40  ;;  %v2980_v22 = vadd.f32 %v2979_v7, %v2899_v2  ;;  %v2903_v0 = vadd.f32 %v2902_v8, %v12975_v1  ;;  %5696 = vmatpush2.bf16.msra.mxu0 %v10091_v15  ;;  %10264 = vmatmul.mubr.msk.bf16.gmra.mxu1 %vm2032_vm0, %v12865_v11  ;;  %v2983_v35 = vpop.f32.mrf.mxu1  ;;  %v3332_v1 = vld [vmem:[%s15757_s2 + $0x310] sm:$0xff] }
 0x22b   : > { %5777 = vmatpush2.bf16.msra.mxu1 %v10219_v42  ;;  %v2904_v44 = vpop.f32.mrf.mxu0  ;;  %5697 = vmatprep.subr.bf16.mxu0 %v10084_v46  ;;  %v10204_v7 = vcombine.high %v3468_v31, %v3472_v59  ;;  %v15938_v41 = vld [vmem:[#allocation17_spill] sm:$0xff]  ;;  %v10203_v46 = vcombine.low %v3468_v31, %v3472_v59  ;;  %v10068_v40 = vcombine.high %v3332_v1, %v3336_v50 }
 0x22c   : > { %3035 = vst [vmem:[#allocation2 + $0xb8] sm:$0xff] %v2980_v22  ;;  %v2905_v33 = vadd.f32 %v2904_v44, %v12978_v10  ;;  %v2984_v18 = vadd.f32 %v2983_v35, %v2903_v0  ;;  %5778 = vmatprep.subr.bf16.mxu1 %v10212_v34  ;;  %v2985_v47 = vpop.f32.mrf.mxu1  ;;  %5711 = vmatprep.mubr.bf16.mxu0 %v15938_v41  ;;  %v3460_v56 = vld [vmem:[%s15757_s2 + $0x710] sm:$0xff] }
 0x22d   : > { %v2906_v49 = vpop.f32.mrf.mxu0  ;;  %v3464_v10 = vld [vmem:[%s15757_s2 + $0x730] sm:$0xff]  ;;  %5792 = vmatprep.mubr.bf16.mxu1 %v12138_v21  ;;  %v10067_v44 = vcombine.low %v3332_v1, %v3336_v50 }
 0x22e   : > { %3042 = vst [vmem:[#allocation2 + $0x60] sm:$0xff] %v2984_v18  ;;  %v2907_v34 = vadd.f32 %v2906_v49, %v12992_v39  ;;  %v2986_v25 = vadd.f32 %v2985_v47, %v2905_v33  ;;  %5698 = vmatpush2.bf16.msra.mxu0 %v10083_v28  ;;  %v2987_v15 = vpop.f32.mrf.mxu1  ;;  %v10196_v0 = vcombine.high %v3460_v56, %v3464_v10  ;;  %v3324_v39 = vld [vmem:[%s15757_s2 + $0x2d0] sm:$0xff] }
 0x22f   : > { %5779 = vmatpush2.bf16.msra.mxu1 %v10211_v14  ;;  %v2908_v42 = vpop.f32.mrf.mxu0  ;;  %5699 = vmatprep.subr.bf16.mxu0 %v10076_v24  ;;  %v3328_v4 = vld [vmem:[%s15757_s2 + $0x2f0] sm:$0xff]  ;;  %v10195_v24 = vcombine.low %v3460_v56, %v3464_v10 }
 0x230   : > { %3043 = vst [vmem:[#allocation2 + $0x1b8] sm:$0xff] %v2986_v25  ;;  %v2909_v2 = vadd.f32 %v2908_v42, %v12996_v20  ;;  %v2988_v8 = vadd.f32 %v2987_v15, %v2907_v34  ;;  %5780 = vmatprep.subr.bf16.mxu1 %v10204_v7  ;;  %v2989_v22 = vpop.f32.mrf.mxu1  ;;  %v3452_v31 = vld [vmem:[%s15757_s2 + $0x6d0] sm:$0xff]  ;;  %v10060_v33 = vcombine.high %v3324_v39, %v3328_v4 }
 0x231   : > { %v2912_v43 = vpop.f32.mrf.mxu0  ;;  %v3456_v20 = vld [vmem:[%s15757_s2 + $0x6f0] sm:$0xff]  ;;  %v10059_v15 = vcombine.low %v3324_v39, %v3328_v4 }
 0x232   : > { %3050 = vst [vmem:[#allocation2 + $0x1e8] sm:$0xff] %v2988_v8  ;;  %v2913_v59 = vadd.f32 %v2912_v43, %v13013_v54  ;;  %v2990_v35 = vadd.f32 %v2989_v22, %v2909_v2  ;;  %5700 = vmatpush2.bf16.msra.mxu0 %v10075_v36  ;;  %v2993_v28 = vpop.f32.mrf.mxu1  ;;  %v10188_v49 = vcombine.high %v3452_v31, %v3456_v20  ;;  %v3316_v54 = vld [vmem:[%s15757_s2 + $0x290] sm:$0xff] }
 0x233   : > { %5781 = vmatpush2.bf16.msra.mxu1 %v10203_v46  ;;  %v2914_v14 = vpop.f32.mrf.mxu0  ;;  %5701 = vmatprep.subr.bf16.mxu0 %v10068_v40  ;;  %v3320_v1 = vld [vmem:[%s15757_s2 + $0x2b0] sm:$0xff]  ;;  %v10187_v42 = vcombine.low %v3452_v31, %v3456_v20 }
 0x234   : > { %3051 = vst [vmem:[#allocation2 + $0x1c8] sm:$0xff] %v2990_v35  ;;  %v2915_v18 = vadd.f32 %v2914_v14, %v13015_v23  ;;  %v2994_v47 = vadd.f32 %v2993_v28, %v2913_v59  ;;  %5782 = vmatprep.subr.bf16.mxu1 %v10196_v0  ;;  %v2995_v7 = vpop.f32.mrf.mxu1  ;;  %v3444_v56 = vld [vmem:[%s15757_s2 + $0x690] sm:$0xff]  ;;  %v10052_v46 = vcombine.high %v3316_v54, %v3320_v1 }
 0x235   : > { %v2916_v50 = vpop.f32.mrf.mxu0  ;;  %v3448_v23 = vld [vmem:[%s15757_s2 + $0x6b0] sm:$0xff]  ;;  %v10051_v59 = vcombine.low %v3316_v54, %v3320_v1 }
 0x236   : > { %3058 = vst [vmem:[#allocation2 + $0x1e0] sm:$0xff] %v2994_v47  ;;  %v2917_v10 = vadd.f32 %v2916_v50, %v13031_v26  ;;  %v2996_v34 = vadd.f32 %v2995_v7, %v2915_v18  ;;  %5702 = vmatpush2.bf16.msra.mxu0 %v10067_v44  ;;  %v2997_v25 = vpop.f32.mrf.mxu1  ;;  %v10180_v22 = vcombine.high %v3444_v56, %v3448_v23  ;;  %v3308_v26 = vld [vmem:[%s15757_s2 + $0x250] sm:$0xff] }
 0x237   : > { %5783 = vmatpush2.bf16.msra.mxu1 %v10195_v24  ;;  %v2918_v36 = vpop.f32.mrf.mxu0  ;;  %5703 = vmatprep.subr.bf16.mxu0 %v10060_v33  ;;  %v3312_v0 = vld [vmem:[%s15757_s2 + $0x270] sm:$0xff]  ;;  %v10179_v28 = vcombine.low %v3444_v56, %v3448_v23 }
 0x238   : > { %3059 = vst [vmem:[#allocation2 + $0x1f0] sm:$0xff] %v2996_v34  ;;  %v2919_v40 = vadd.f32 %v2918_v36, %v13033_v52  ;;  %v2998_v2 = vadd.f32 %v2997_v25, %v2917_v10  ;;  %5784 = vmatprep.subr.bf16.mxu1 %v10188_v49  ;;  %v2999_v8 = vpop.f32.mrf.mxu1  ;;  %v3436_v4 = vld [vmem:[%s15757_s2 + $0x650] sm:$0xff]  ;;  %v10044_v44 = vcombine.high %v3308_v26, %v3312_v0 }
 0x239   : > { %v2922_v39 = vpop.f32.mrf.mxu0  ;;  %v3440_v52 = vld [vmem:[%s15757_s2 + $0x670] sm:$0xff]  ;;  %v10043_v56 = vcombine.low %v3308_v26, %v3312_v0 }
 0x23a   : > { %3066 = vst [vmem:[#allocation2 + $0x30] sm:$0xff] %v2998_v2  ;;  %v2923_v43 = vadd.f32 %v2922_v39, %v13048_v19  ;;  %v3000_v31 = vadd.f32 %v2999_v8, %v2919_v40  ;;  %5704 = vmatpush2.bf16.msra.mxu0 %v10059_v15  ;;  %v3003_v20 = vpop.f32.mrf.mxu1  ;;  %v10172_v18 = vcombine.high %v3436_v4, %v3440_v52  ;;  %v3300_v19 = vld [vmem:[%s15757_s2 + $0x210] sm:$0xff]  ;;  %v3293_v2 = vld [vmem:[%s15757_s2 + $0x1d8] sm:$0xff] }
 0x23b   : > { %5785 = vmatpush2.bf16.msra.mxu1 %v10187_v42  ;;  %v2924_v35 = vpop.f32.mrf.mxu0  ;;  %5705 = vmatprep.subr.bf16.mxu0 %v10052_v46  ;;  %v3304_v47 = vld [vmem:[%s15757_s2 + $0x230] sm:$0xff]  ;;  %v10171_v10 = vcombine.low %v3436_v4, %v3440_v52 }
 0x23c   : > { %3067 = vst [vmem:[#allocation2 + $0x1b0] sm:$0xff] %v3000_v31  ;;  %v2925_v14 = vadd.f32 %v2924_v35, %v13052_v13  ;;  %v3004_v24 = vadd.f32 %v3003_v20, %v2923_v43  ;;  %5786 = vmatprep.subr.bf16.mxu1 %v10180_v22  ;;  %v3005_v33 = vpop.f32.mrf.mxu1  ;;  %v3428_v49 = vld [vmem:[%s15757_s2 + $0x610] sm:$0xff]  ;;  %v10036_v34 = vcombine.high %v3300_v19, %v3304_v47  ;;  %v3289_v35 = vld [vmem:[%s15757_s2 + $0x1b8] sm:$0xff] }
 0x23d   : > { %v2926_v7 = vpop.f32.mrf.mxu0  ;;  %v3432_v13 = vld [vmem:[%s15757_s2 + $0x630] sm:$0xff]  ;;  %v10035_v0 = vcombine.low %v3300_v19, %v3304_v47 }
 0x23e   : > { %3074 = vst [vmem:[#allocation2 + $0x218] sm:$0xff] %v3004_v24  ;;  %v2927_v54 = vadd.f32 %v2926_v7, %v13068_v32  ;;  %v3006_v1 = vadd.f32 %v3005_v33, %v2925_v14  ;;  %5706 = vmatpush2.bf16.msra.mxu0 %v10051_v59  ;;  %v3007_v50 = vpop.f32.mrf.mxu1  ;;  %v10164_v42 = vcombine.high %v3428_v49, %v3432_v13  ;;  %v3516_v32 = vld [vmem:[%s15757_s2 + $0x8d0] sm:$0xff] }
 0x23f   : > { %5787 = vmatpush2.bf16.msra.mxu1 %v10179_v28  ;;  %v2928_v23 = vpop.f32.mrf.mxu0  ;;  %5707 = vmatprep.subr.bf16.mxu0 %v10044_v44  ;;  %v3520_v46 = vld [vmem:[%s15757_s2 + $0x8f0] sm:$0xff]  ;;  %v10163_v4 = vcombine.low %v3428_v49, %v3432_v13 }
 0x240   : > { %3075 = vst [vmem:[#allocation2 + $0x200] sm:$0xff] %v3006_v1  ;;  %v2929_v25 = vadd.f32 %v2928_v23, %v13070_v3  ;;  %v3008_v15 = vadd.f32 %v3007_v50, %v2927_v54  ;;  %5788 = vmatprep.subr.bf16.mxu1 %v10172_v18  ;;  %v3009_v36 = vpop.f32.mrf.mxu1  ;;  %v3297_v3 = vld [vmem:[%s15757_s2 + $0x1f8] sm:$0xff]  ;;  %v10252_v52 = vcombine.high %v3516_v32, %v3520_v46  ;;  %v3512_v24 = vld [vmem:[%s15757_s2 + $0x8b0] sm:$0xff] }
 0x241   : > { %v2932_v40 = vpop.f32.mrf.mxu0  ;;  %v10030_v59 = vcombine.high %v3293_v2, %v3297_v3  ;;  %v10251_v14 = vcombine.low %v3516_v32, %v3520_v46  ;;  %v10029_v18 = vcombine.low %v3293_v2, %v3297_v3  ;;  %v3500_v49 = vld [vmem:[%s15757_s2 + $0x850] sm:$0xff]  ;;  %v3277_v54 = vld [vmem:[%s15757_s2 + $0x158] sm:$0xff] }
 0x242   : > { %3082 = vst [vmem:[#allocation2 + $0x168] sm:$0xff] %v3008_v15  ;;  %v2933_v8 = vadd.f32 %v2932_v40, %v13085_v17  ;;  %v3010_v22 = vadd.f32 %v3009_v36, %v2929_v25  ;;  %5708 = vmatpush2.bf16.msra.mxu0 %v10043_v56  ;;  %v3013_v26 = vpop.f32.mrf.mxu1  ;;  %v3285_v17 = vld [vmem:[%s15757_s2 + $0x198] sm:$0xff]  ;;  %v3504_v13 = vld [vmem:[%s15757_s2 + $0x870] sm:$0xff] }
 0x243   : > { %5789 = vmatpush2.bf16.msra.mxu1 %v10171_v10  ;;  %v2934_v39 = vpop.f32.mrf.mxu0  ;;  %5709 = vmatprep.subr.bf16.mxu0 %v10036_v34  ;;  %v10022_v47 = vcombine.high %v3285_v17, %v3289_v35  ;;  %v3281_v1 = vld [vmem:[%s15757_s2 + $0x178] sm:$0xff]  ;;  %v10021_v23 = vcombine.low %v3285_v17, %v3289_v35  ;;  %v10236_v10 = vcombine.high %v3500_v49, %v3504_v13  ;;  %v3492_v36 = vld [vmem:[%s15757_s2 + $0x810] sm:$0xff] }
 0x244   : > { %3083 = vst [vmem:[#allocation2 + $0xc0] sm:$0xff] %v3010_v22  ;;  %v2935_v43 = vadd.f32 %v2934_v39, %v13089_v37  ;;  %v3014_v31 = vadd.f32 %v3013_v26, %v2933_v8  ;;  %5790 = vmatprep.subr.bf16.mxu1 %v10164_v42  ;;  %v3015_v20 = vpop.f32.mrf.mxu1  ;;  %v3508_v37 = vld [vmem:[%s15757_s2 + $0x890] sm:$0xff]  ;;  %v10014_v34 = vcombine.high %v3277_v54, %v3281_v1  ;;  %v3269_v25 = vld [vmem:[%s15757_s2 + $0x118] sm:$0xff] }
 0x245   : > { %v2936_v28 = vpop.f32.mrf.mxu0  ;;  %v10244_v50 = vcombine.high %v3508_v37, %v3512_v24  ;;  %v10243_v56 = vcombine.low %v3508_v37, %v3512_v24  ;;  %v3273_v15 = vld [vmem:[%s15757_s2 + $0x138] sm:$0xff]  ;;  %v3496_v42 = vld [vmem:[%s15757_s2 + $0x830] sm:$0xff]  ;;  %v10013_v32 = vcombine.low %v3277_v54, %v3281_v1  ;;  %v10235_v40 = vcombine.low %v3500_v49, %v3504_v13 }
 0x246   : > { %3090 = vst [vmem:[#allocation2 + $0x150] sm:$0xff] %v3014_v31  ;;  %v3016_v44 = vadd.f32 %v3015_v20, %v2935_v43  ;;  %5710 = vmatpush2.bf16.msra.mxu0 %v10035_v0  ;;  %v3017_v33 = vpop.f32.mrf.mxu1  ;;  %v10006_v46 = vcombine.high %v3269_v25, %v3273_v15  ;;  %v3261_v2 = vld [vmem:[%s15757_s2 + $0xd8] sm:$0xff]  ;;  %v10228_v8 = vcombine.high %v3492_v36, %v3496_v42 }
 0x247   : > { %5791 = vmatpush2.bf16.msra.mxu1 %v10163_v4  ;;  %5849 = vmatprep.subr.bf16.mxu0 %v10252_v52  ;;  %v2937_v19 = vpop.f32.mrf.mxu0  ;;  %v3265_v3 = vld [vmem:[%s15757_s2 + $0xf8] sm:$0xff]  ;;  %v10005_v0 = vcombine.low %v3269_v25, %v3273_v15  ;;  %v10227_v4 = vcombine.low %v3492_v36, %v3496_v42 }
 0x248   : > { %3091 = vst [vmem:[#allocation2 + $0xa0] sm:$0xff] %v3016_v44  ;;  %5922 = vmatprep.subr.bf16.mxu1 %v10030_v59  ;;  %v3018_v7 = vpop.f32.mrf.mxu1  ;;  %v13293_v22 = vld [vmem:[%s15757_s2 + $0x5d8] sm:$0xff]  ;;  %v9998_v39 = vcombine.high %v3261_v2, %v3265_v3  ;;  %v9997_v20 = vcombine.low %v3261_v2, %v3265_v3 }
 0x249   : > { %5712 = vmatmul.mubr.bf16.vlgmr.msra.gmra.mxu0 %v12406_v27  ;;  %v13298_v26 = vld [vmem:[%s15757_s2 + $0x5f8] sm:$0xff] }
 0x24a   : > { %5793 = vmatmul.mubr.bf16.vlgmr.msra.gmra.mxu1 %v15925_v30  ;;  %5850 = vmatpush1.bf16.msra.mxu0 %v10251_v14  ;;  %v3253_v52 = vld [vmem:[%s15757_s2 + $0x98] sm:$0xff]  ;;  %v10158_v31 = vcombine.high %v13293_v22, %v13298_v26 }
 0x24b   : > { %5923 = vmatpush1.bf16.msra.mxu1 %v10029_v18  ;;  %5721 = vmatprep.mubr.bf16.mxu0 %v12433_v57  ;;  %v3257_v43 = vld [vmem:[%s15757_s2 + $0xb8] sm:$0xff] }
 0x24c   : > { %5924 = vmatprep.subr.bf16.mxu1 %v10022_v47  ;;  %5802 = vmatprep.mubr.bf16.mxu1 %v15927_v45  ;;  %v9990_v59 = vcombine.high %v3253_v52, %v3257_v43  ;;  %v3245_v17 = vld [vmem:[%s15757_s2 + $0x58] sm:$0xff]  ;;  %v9989_v28 = vcombine.low %v3253_v52, %v3257_v43  ;;  %v15942_v45 = vld [vmem:[#allocation16_spill] sm:$0xff] }
 0x24d   : > { %5851 = vmatprep.subr.bf16.mxu0 %v10244_v50  ;;  %v3249_v35 = vld [vmem:[%s15757_s2 + $0x78] sm:$0xff] }
 0x24e   : > { %5852 = vmatpush1.bf16.msra.mxu0 %v10243_v56  ;;  %v9982_v44 = vcombine.high %v3245_v17, %v3249_v35  ;;  %v3237_v14 = vld [vmem:[%s15757_s2 + $0x18] sm:$0xff]  ;;  %v9981_v24 = vcombine.low %v3245_v17, %v3249_v35 }
 0x24f   : > { %5925 = vmatpush1.bf16.msra.mxu1 %v10021_v23  ;;  %5853 = vmatprep.subr.bf16.mxu0 %v10236_v10  ;;  %v3241_v37 = vld [vmem:[%s15757_s2 + $0x38] sm:$0xff] }
 0x250   : > { %5926 = vmatprep.subr.bf16.mxu1 %v10014_v34  ;;  %v9974_v33 = vcombine.high %v3237_v14, %v3241_v37  ;;  %v3357_v19 = vld [vmem:[%s15757_s2 + $0x3d8] sm:$0xff]  ;;  %v9973_v13 = vcombine.low %v3237_v14, %v3241_v37 }
 0x251   : > { %5722 = vmatmul.mubr.bf16.gmra.mxu0 %v12491_v5  ;;  %v3361_v47 = vld [vmem:[%s15757_s2 + $0x3f8] sm:$0xff] }
 0x252   : > { %5803 = vmatmul.mubr.bf16.gmra.mxu1 %v15928_v29  ;;  %5731 = vmatprep.mubr.bf16.mxu0 %v12508_v9  ;;  %v10094_v1 = vcombine.high %v3357_v19, %v3361_v47  ;;  %v3349_v56 = vld [vmem:[%s15757_s2 + $0x398] sm:$0xff]  ;;  %v10093_v25 = vcombine.low %v3357_v19, %v3361_v47 }
 0x253   : > { %5927 = vmatpush1.bf16.msra.mxu1 %v10013_v32  ;;  %5812 = vmatprep.mubr.bf16.mxu1 %v15930_v38  ;;  %v3353_v23 = vld [vmem:[%s15757_s2 + $0x3b8] sm:$0xff] }
 0x254   : > { %5928 = vmatprep.subr.bf16.mxu1 %v10006_v46  ;;  %5854 = vmatpush1.bf16.msra.mxu0 %v10235_v40  ;;  %v10086_v36 = vcombine.high %v3349_v56, %v3353_v23  ;;  %v3341_v32 = vld [vmem:[%s15757_s2 + $0x358] sm:$0xff]  ;;  %v10085_v3 = vcombine.low %v3349_v56, %v3353_v23 }
 0x255   : > { %5855 = vmatprep.subr.bf16.mxu0 %v10228_v8  ;;  %v3345_v46 = vld [vmem:[%s15757_s2 + $0x378] sm:$0xff] }
 0x256   : > { %v3333_v43 = vld [vmem:[%s15757_s2 + $0x318] sm:$0xff]  ;;  %v10077_v17 = vcombine.low %v3341_v32, %v3345_v46 }
 0x257   : > { %5929 = vmatpush1.bf16.msra.mxu1 %v10005_v0  ;;  %v10078_v0 = vcombine.high %v3341_v32, %v3345_v46  ;;  %v3405_v14 = vld [vmem:[%s15757_s2 + $0x558] sm:$0xff] }
 0x258   : > { %5930 = vmatprep.subr.bf16.mxu1 %v9998_v39  ;;  %5856 = vmatpush1.bf16.msra.mxu0 %v10227_v4  ;;  %v3413_v39 = vld [vmem:[%s15757_s2 + $0x598] sm:$0xff] }
 0x259   : > { %5732 = vmatmul.mubr.bf16.gmra.mxu0 %v12557_v60  ;;  %6003 = vmatprep.subr.bf16.mxu0 %v10158_v31  ;;  %v3417_v4 = vld [vmem:[%s15757_s2 + $0x5b8] sm:$0xff] }
 0x25a   : > { %5813 = vmatmul.mubr.bf16.gmra.mxu1 %v15931_v61  ;;  %5741 = vmatprep.mubr.bf16.mxu0 %v12565_v55  ;;  %v10150_v35 = vcombine.high %v3413_v39, %v3417_v4  ;;  %v3409_v37 = vld [vmem:[%s15757_s2 + $0x578] sm:$0xff]  ;;  %v10149_v19 = vcombine.low %v3413_v39, %v3417_v4 }
 0x25b   : > { %5931 = vmatpush1.bf16.msra.mxu1 %v9997_v20  ;;  %5822 = vmatprep.mubr.bf16.mxu1 %v15933_v16  ;;  %v10157_v20 = vcombine.low %v13293_v22, %v13298_v26  ;;  %v3325_v26 = vld [vmem:[%s15757_s2 + $0x2d8] sm:$0xff]  ;;  %v10141_v39 = vcombine.low %v3405_v14, %v3409_v37 }
 0x25c   : > { %5932 = vmatprep.subr.bf16.mxu1 %v9990_v59  ;;  %v3317_v46 = vld [vmem:[%s15757_s2 + $0x298] sm:$0xff] }
 0x25d   : > { %v3381_v16 = vld [vmem:[%s15757_s2 + $0x498] sm:$0xff] }
 0x25e   : > { %v3373_v29 = vld [vmem:[%s15757_s2 + $0x458] sm:$0xff] }
 0x25f   : > { %5933 = vmatpush1.bf16.msra.mxu1 %v9989_v28 }
 0x260   : > { %5934 = vmatprep.subr.bf16.mxu1 %v9982_v44 }
 0x261   : > { %5742 = vmatmul.mubr.bf16.gmra.mxu0 %v12593_v58  ;;  %v13326_v18 = vpop.f32.mrf.mxu0 }
 0x262   : > { %5823 = vmatmul.mubr.bf16.gmra.mxu1 %v15934_v63  ;;  %v13335_v7 = vpop.f32.mrf.mxu1  ;;  %5751 = vmatprep.mubr.bf16.mxu0 %v12595_v62 }
 0x263   : > { %5935 = vmatpush1.bf16.msra.mxu1 %v9981_v24  ;;  %v13338_v49 = vpop.f32.mrf.mxu0  ;;  %5832 = vmatprep.mubr.bf16.mxu1 %v15936_v48  ;;  %v3329_v24 = vld [vmem:[%s15757_s2 + $0x2f8] sm:$0xff] }
 0x264   : > { %v13341_v54 = vpop.f32.mrf.mxu1  ;;  %5936 = vmatprep.subr.bf16.mxu1 %v9974_v33  ;;  %v10062_v23 = vcombine.high %v3325_v26, %v3329_v24 }
 0x265   : > { %v13343_v50 = vpop.f32.mrf.mxu0 }
 0x266   : > { %v13351_v10 = vpop.f32.mrf.mxu1 }
 0x267   : > { %5937 = vmatpush1.bf16.msra.mxu1 %v9973_v13  ;;  %v13353_v34 = vpop.f32.mrf.mxu0 }
 0x268   : > { %v13355_v15 = vpop.f32.mrf.mxu1  ;;  %5938 = vmatprep.subr.bf16.mxu1 %v10094_v1  ;;  %v10142_v1 = vcombine.high %v3405_v14, %v3409_v37  ;;  %v3309_v37 = vld [vmem:[%s15757_s2 + $0x258] sm:$0xff] }
 0x269   : > { %5752 = vmatmul.mubr.bf16.gmra.mxu0 %v15924_v53  ;;  %v13358_v42 = vpop.f32.mrf.mxu0  ;;  %v3365_v53 = vld [vmem:[%s15757_s2 + $0x418] sm:$0xff] }
 0x26a   : > { %5833 = vmatmul.mubr.bf16.gmra.mxu1 %v15937_v6  ;;  %v13367_v40 = vpop.f32.mrf.mxu1  ;;  %5873 = vmatprep.mubr.bf16.mxu0 %v15880_v51 }
 0x26b   : > { %5939 = vmatpush2.bf16.msra.mxu1 %v10093_v25  ;;  %v13370_v2 = vpop.f32.mrf.mxu0  ;;  %5954 = vmatprep.mubr.bf16.mxu1 %v15938_v41  ;;  %v3337_v41 = vld [vmem:[%s15757_s2 + $0x338] sm:$0xff] }
 0x26c   : > { %v13373_v8 = vpop.f32.mrf.mxu1  ;;  %5940 = vmatprep.subr.bf16.mxu1 %v10086_v36  ;;  %v10070_v44 = vcombine.high %v3333_v43, %v3337_v41  ;;  %v10069_v13 = vcombine.low %v3333_v43, %v3337_v41  ;;  %v3397_v25 = vld [vmem:[%s15757_s2 + $0x518] sm:$0xff]  ;;  %v10061_v43 = vcombine.low %v3325_v26, %v3329_v24 }
 0x26d   : > { %v13381_v52 = vpop.f32.mrf.mxu0  ;;  %v3401_v36 = vld [vmem:[%s15757_s2 + $0x538] sm:$0xff] }
 0x26e   : > { %v13389_v31 = vpop.f32.mrf.mxu1  ;;  %v10134_v41 = vcombine.high %v3397_v25, %v3401_v36  ;;  %v3313_v26 = vld [vmem:[%s15757_s2 + $0x278] sm:$0xff] }
 0x26f   : > { %5941 = vmatpush2.bf16.msra.mxu1 %v10085_v3  ;;  %v13393_v59 = vpop.f32.mrf.mxu0  ;;  %v3321_v3 = vld [vmem:[%s15757_s2 + $0x2b8] sm:$0xff]  ;;  %v10046_v63 = vcombine.high %v3309_v37, %v3313_v26 }
 0x270   : > { %v13395_v28 = vpop.f32.mrf.mxu1  ;;  %5942 = vmatprep.subr.bf16.mxu1 %v10078_v0 }
 0x271   : > { %10265 = vmatmul.mubr.msk.bf16.vlgmr.msra.gmra.mxu0 %vm2032_vm0, %v15926_v12  ;;  %v13405_v22 = vpop.f32.mrf.mxu0 }
 0x272   : > { %6004 = vmatpush1.bf16.msra.mxu0 %v10157_v20  ;;  %v13413_v33 = vpop.f32.mrf.mxu1  ;;  %5883 = vmatprep.mubr.bf16.mxu0 %v15880_v51 }
 0x273   : > { %5943 = vmatpush2.bf16.msra.mxu1 %v10077_v17  ;;  %v13416_v47 = vpop.f32.mrf.mxu0  ;;  %6005 = vmatprep.subr.bf16.mxu0 %v10150_v35  ;;  %v10054_v17 = vcombine.high %v3317_v46, %v3321_v3  ;;  %v3389_v35 = vld [vmem:[%s15757_s2 + $0x4d8] sm:$0xff] }
 0x274   : > { %v13418_v56 = vpop.f32.mrf.mxu1  ;;  %5944 = vmatprep.subr.bf16.mxu1 %v10070_v44  ;;  %v3393_v44 = vld [vmem:[%s15757_s2 + $0x4f8] sm:$0xff] }
 0x275   : > { %v13426_v32 = vpop.f32.mrf.mxu0  ;;  %v10126_v6 = vcombine.high %v3389_v35, %v3393_v44 }
 0x276   : > { %6006 = vmatpush1.bf16.msra.mxu0 %v10149_v19  ;;  %v13434_v0 = vpop.f32.mrf.mxu1  ;;  %v15939_v19 = vld [vmem:[#allocation8_spill] sm:$0xff] }
 0x277   : > { %5945 = vmatpush2.bf16.msra.mxu1 %v10069_v13  ;;  %v13436_v4 = vpop.f32.mrf.mxu0  ;;  %6007 = vmatprep.subr.bf16.mxu0 %v10142_v1  ;;  %v10133_v13 = vcombine.low %v3397_v25, %v3401_v36  ;;  %v3385_v25 = vld [vmem:[%s15757_s2 + $0x4b8] sm:$0xff] }
 0x278   : > { %v13438_v20 = vpop.f32.mrf.mxu1  ;;  %5946 = vmatprep.subr.bf16.mxu1 %v10062_v23  ;;  %v10053_v23 = vcombine.low %v3317_v46, %v3321_v3  ;;  %v3305_v46 = vld [vmem:[%s15757_s2 + $0x238] sm:$0xff]  ;;  %v10118_v61 = vcombine.high %v3381_v16, %v3385_v25 }
 0x279   : > { %10266 = vmatmul.mubr.msk.bf16.gmra.mxu0 %vm2032_vm0, %v15939_v19  ;;  %v13448_v14 = vpop.f32.mrf.mxu0 }
 0x27a   : > { %6008 = vmatpush1.bf16.msra.mxu0 %v10141_v39  ;;  %v13456_v24 = vpop.f32.mrf.mxu1  ;;  %5893 = vmatprep.mubr.bf16.mxu0 %v15880_v51  ;;  %v3301_v39 = vld [vmem:[%s15757_s2 + $0x218] sm:$0xff] }
 0x27b   : > { %5947 = vmatpush2.bf16.msra.mxu1 %v10061_v43  ;;  %v13459_v1 = vpop.f32.mrf.mxu0  ;;  %6009 = vmatprep.subr.bf16.mxu0 %v10134_v41  ;;  %v10125_v43 = vcombine.low %v3389_v35, %v3393_v44  ;;  %v10038_v19 = vcombine.high %v3301_v39, %v3305_v46 }
 0x27c   : > { %v13461_v48 = vpop.f32.mrf.mxu1  ;;  %5948 = vmatprep.subr.bf16.mxu1 %v10054_v17  ;;  %v10045_v17 = vcombine.low %v3309_v37, %v3313_v26  ;;  %v10117_v37 = vcombine.low %v3381_v16, %v3385_v25  ;;  %v3369_v16 = vld [vmem:[%s15757_s2 + $0x438] sm:$0xff] }
 0x27d   : > { %v13469_v36 = vpop.f32.mrf.mxu0 }
 0x27e   : > { %6010 = vmatpush1.bf16.msra.mxu0 %v10133_v13  ;;  %v13477_v3 = vpop.f32.mrf.mxu1  ;;  %v3377_v13 = vld [vmem:[%s15757_s2 + $0x478] sm:$0xff] }
 0x27f   : > { %5949 = vmatpush2.bf16.msra.mxu1 %v10053_v23  ;;  %v13479_v41 = vpop.f32.mrf.mxu0  ;;  %6011 = vmatprep.subr.bf16.mxu0 %v10126_v6  ;;  %v3517_v6 = vld [vmem:[%s15757_s2 + $0x8d8] sm:$0xff]  ;;  %v10037_v23 = vcombine.low %v3301_v39, %v3305_v46 }
 0x280   : > { %15940 = vst [vmem:[#allocation9_spill] sm:$0xff] %v13479_v41  ;;  %v13481_v38 = vpop.f32.mrf.mxu1  ;;  %5950 = vmatprep.subr.bf16.mxu1 %v10046_v63  ;;  %v3521_v63 = vld [vmem:[%s15757_s2 + $0x8f8] sm:$0xff] }
 0x281   : > { %15941 = vst [vmem:[#allocation10_spill] sm:$0xff] %v13481_v38  ;;  %10267 = vmatmul.mubr.msk.bf16.gmra.mxu0 %vm2032_vm0, %v15942_v45  ;;  %v13491_v35 = vpop.f32.mrf.mxu0  ;;  %v10110_v45 = vcombine.high %v3373_v29, %v3377_v13  ;;  %v10254_v30 = vcombine.high %v3517_v6, %v3521_v63 }
 0x282   : > { %15943 = vst [vmem:[#allocation12_spill] sm:$0xff] %v13491_v35  ;;  %6012 = vmatpush1.bf16.msra.mxu0 %v10125_v43  ;;  %v13499_v44 = vpop.f32.mrf.mxu1  ;;  %5903 = vmatprep.mubr.bf16.mxu0 %v15880_v51  ;;  %v10109_v43 = vcombine.low %v3373_v29, %v3377_v13  ;;  %v5309_v29 = vadd.f32 %v13335_v7, %v13326_v18  ;;  %v3489_v13 = vld [vmem:[%s15757_s2 + $0x7f8] sm:$0xff] }
 0x283   : > { %15944 = vst [vmem:[#allocation20_spill] sm:$0xff] %v13499_v44  ;;  %5951 = vmatpush2.bf16.msra.mxu1 %v10045_v17  ;;  %v13502_v26 = vpop.f32.mrf.mxu0  ;;  %6013 = vmatprep.subr.bf16.mxu0 %v10118_v61  ;;  %v3509_v61 = vld [vmem:[%s15757_s2 + $0x898] sm:$0xff]  ;;  %v10253_v17 = vcombine.low %v3517_v6, %v3521_v63  ;;  %v15947_v6 = vld [vmem:[#allocation21_spill] sm:$0xff]  ;;  %v5311_v7 = vadd.f32 %v13341_v54, %v13338_v49 }
 0x284   : > { %15945 = vst [vmem:[#allocation17_spill] sm:$0xff] %v13502_v26  ;;  %v13504_v12 = vpop.f32.mrf.mxu1  ;;  %5952 = vmatprep.subr.bf16.mxu1 %v10038_v19  ;;  %v3513_v19 = vld [vmem:[%s15757_s2 + $0x8b8] sm:$0xff]  ;;  %v5315_v54 = vadd.f32 %v13355_v15, %v13353_v34 }
 0x285   : > { %15946 = vst [vmem:[#allocation22_spill] sm:$0xff] %v13504_v12  ;;  %v5271_v25 = vpop.f32.mrf.mxu0  ;;  %v10102_v12 = vcombine.high %v3365_v53, %v3369_v16  ;;  %v10245_v44 = vcombine.low %v3509_v61, %v3513_v19 }
 0x286   : > { %6014 = vmatpush1.bf16.msra.mxu0 %v10117_v37  ;;  %v5352_v39 = vpop.f32.mrf.mxu1  ;;  %v3485_v25 = vld [vmem:[%s15757_s2 + $0x7d8] sm:$0xff] }
 0x287   : > { %5953 = vmatpush2.bf16.msra.mxu1 %v10037_v23  ;;  %v5272_v46 = vpop.f32.mrf.mxu0  ;;  %6015 = vmatprep.subr.bf16.mxu0 %v10110_v45  ;;  %v13529_v23 = vld [vmem:[%s15757_s2 + $0x858] sm:$0xff]  ;;  %v10101_v39 = vcombine.low %v3365_v53, %v3369_v16  ;;  %v10222_v26 = vcombine.high %v3485_v25, %v3489_v13  ;;  %v10221_v16 = vcombine.low %v3485_v25, %v3489_v13 }
 0x288   : > { %6092 = vmatprep.subr.bf16.mxu1 %v10254_v30  ;;  %v5353_v37 = vpop.f32.mrf.mxu1  ;;  %v13534_v45 = vld [vmem:[%s15757_s2 + $0x878] sm:$0xff]  ;;  %v10246_v30 = vcombine.high %v3509_v61, %v3513_v19  ;;  %v3162_v46 = vld [vmem:[#allocation2 + $0xc8] sm:$0xff]  ;;  %v5321_v13 = vadd.f32 %v13373_v8, %v13370_v2 }
 0x289   : > { %10268 = vmatmul.mubr.msk.bf16.gmra.mxu0 %vm2032_vm0, %v15947_v6  ;;  %v5389_v18 = vpop.f32.mrf.mxu0  ;;  %v10238_v35 = vcombine.high %v13529_v23, %v13534_v45  ;;  %v5313_v6 = vadd.f32 %v13351_v10, %v13343_v50  ;;  %v3481_v53 = vld [vmem:[%s15757_s2 + $0x7b8] sm:$0xff] }
 0x28a   : > { %5955 = vmatmul.mubr.bf16.vlgmr.msra.gmra.mxu1 %v12406_v27  ;;  %6016 = vmatpush1.bf16.msra.mxu0 %v10109_v43  ;;  %v5390_v63 = vadd.f32 %v5389_v18, %v5309_v29  ;;  %v3477_v27 = vld [vmem:[%s15757_s2 + $0x798] sm:$0xff]  ;;  %v10237_v29 = vcombine.low %v13529_v23, %v13534_v45  ;;  %v13584_v23 = vld [vmem:[%s15758_s3 + $0x5e0] sm:$0xff] }
 0x28b   : > { %6093 = vmatpush1.bf16.msra.mxu1 %v10253_v17  ;;  %v5391_v37 = vpop.f32.mrf.mxu0  ;;  %6017 = vmatprep.subr.bf16.mxu0 %v10102_v12  ;;  %v3163_v12 = vld [vmem:[#allocation2 + $0x8] sm:$0xff]  ;;  %v3497_v43 = vld [vmem:[%s15757_s2 + $0x838] sm:$0xff]  ;;  %v10214_v17 = vcombine.high %v3477_v27, %v3481_v53  ;;  %v3178_v45 = vld [vmem:[#allocation2 + $0x180] sm:$0xff] }
 0x28c   : > { %v6165_v38 = vadd.f32 %v5390_v63, %v3162_v46  ;;  %v5392_v41 = vadd.f32 %v5391_v37, %v5311_v7  ;;  %5913 = vmatprep.mubr.bf16.mxu0 %v15880_v51  ;;  %5964 = vmatprep.mubr.bf16.mxu1 %v12433_v57  ;;  %v3493_v57 = vld [vmem:[%s15757_s2 + $0x818] sm:$0xff] }
 0x28d   : > { %v5393_v49 = vpop.f32.mrf.mxu0  ;;  %6094 = vmatprep.subr.bf16.mxu1 %v10246_v30  ;;  %v3170_v61 = vld [vmem:[#allocation2 + $0xd8] sm:$0xff]  ;;  %v10229_v8 = vcombine.low %v3493_v57, %v3497_v43 }
 0x28e   : > { %6237 = vst [vmem:[#allocation2 + $0xc8] sm:$0xff] %v6165_v38  ;;  %v6166_v50 = vadd.f32 %v5392_v41, %v3163_v12  ;;  %6018 = vmatpush1.bf16.msra.mxu0 %v10101_v39  ;;  %v5394_v10 = vadd.f32 %v5393_v49, %v5313_v6  ;;  %v5319_v38 = vadd.f32 %v13367_v40, %v13358_v42  ;;  %v3469_v41 = vld [vmem:[%s15757_s2 + $0x758] sm:$0xff]  ;;  %v3186_v49 = vld [vmem:[#allocation2 + $0x88] sm:$0xff] }
 0x28f   : > { %v5395_v19 = vpop.f32.mrf.mxu0  ;;  %6019 = vmatprep.subr.bf16.mxu0 %v10222_v26  ;;  %6095 = vmatpush1.bf16.msra.mxu1 %v10245_v44  ;;  %v3473_v25 = vld [vmem:[%s15757_s2 + $0x778] sm:$0xff]  ;;  %v10213_v40 = vcombine.low %v3477_v27, %v3481_v53  ;;  %v10230_v44 = vcombine.high %v3493_v57, %v3497_v43 }
 0x290   : > { %6238 = vst [vmem:[#allocation2 + $0x8] sm:$0xff] %v6166_v50  ;;  %v6173_v34 = vadd.f32 %v5394_v10, %v3170_v61  ;;  %v5396_v15 = vadd.f32 %v5395_v19, %v5315_v54  ;;  %6096 = vmatprep.subr.bf16.mxu1 %v10238_v35  ;;  %v3171_v26 = vld [vmem:[#allocation2 + $0x18] sm:$0xff]  ;;  %v13579_v35 = vld [vmem:[%s15758_s3 + $0x5c0] sm:$0xff]  ;;  %v10206_v2 = vcombine.high %v3469_v41, %v3473_v25 }
 0x291   : > { %10269 = vmatmul.mubr.msk.bf16.gmra.mxu0 %vm2032_vm0, %v12865_v11  ;;  %v5399_v42 = vpop.f32.mrf.mxu0  ;;  %v3461_v39 = vld [vmem:[%s15757_s2 + $0x718] sm:$0xff]  ;;  %v10205_v12 = vcombine.low %v3469_v41, %v3473_v25  ;;  %v5331_v19 = vadd.f32 %v13418_v56, %v13416_v47 }
 0x292   : > { %6245 = vst [vmem:[#allocation2 + $0xd8] sm:$0xff] %v6173_v34  ;;  %v6174_v6 = vadd.f32 %v5396_v15, %v3171_v26  ;;  %5965 = vmatmul.mubr.bf16.gmra.mxu1 %v12491_v5  ;;  %6020 = vmatpush2.bf16.msra.mxu0 %v10221_v16  ;;  %v5400_v18 = vadd.f32 %v5399_v42, %v5319_v38  ;;  %v3465_v46 = vld [vmem:[%s15757_s2 + $0x738] sm:$0xff]  ;;  %v3202_v42 = vld [vmem:[#allocation2 + $0x48] sm:$0xff] }
 0x293   : > { %v5401_v30 = vpop.f32.mrf.mxu0  ;;  %6021 = vmatprep.subr.bf16.mxu0 %v10214_v17  ;;  %5974 = vmatprep.mubr.bf16.mxu1 %v12508_v9  ;;  %v5323_v5 = vadd.f32 %v13389_v31, %v13381_v52  ;;  %v3179_v9 = vld [vmem:[#allocation2 + $0x190] sm:$0xff]  ;;  %v10460_v52 = vcombine.high %v13579_v35, %v13584_v23  ;;  %v5325_v31 = vadd.f32 %v13395_v28, %v13393_v59  ;;  %v3453_v57 = vld [vmem:[%s15757_s2 + $0x6d8] sm:$0xff]  ;;  %v3187_v28 = vld [vmem:[#allocation2] sm:$0xff] }
 0x294   : > { %6246 = vst [vmem:[#allocation2 + $0x18] sm:$0xff] %v6174_v6  ;;  %v6181_v7 = vadd.f32 %v5400_v18, %v3178_v45  ;;  %v5402_v63 = vadd.f32 %v5401_v30, %v5321_v13  ;;  %6097 = vmatpush1.bf16.msra.mxu1 %v10237_v29  ;;  %6035 = vmatprep.mubr.bf16.mxu0 %v12138_v21  ;;  %v3457_v59 = vld [vmem:[%s15757_s2 + $0x6f8] sm:$0xff]  ;;  %v3194_v17 = vld [vmem:[#allocation2 + $0x80] sm:$0xff] }
 0x295   : > { %v5403_v37 = vpop.f32.mrf.mxu0  ;;  %6098 = vmatprep.subr.bf16.mxu1 %v10230_v44  ;;  %v10198_v50 = vcombine.high %v3461_v39, %v3465_v46  ;;  %v5329_v21 = vadd.f32 %v13413_v33, %v13405_v22  ;;  %v10197_v61 = vcombine.low %v3461_v39, %v3465_v46  ;;  %v10190_v34 = vcombine.high %v3453_v57, %v3457_v59  ;;  %v3445_v47 = vld [vmem:[%s15757_s2 + $0x698] sm:$0xff] }
 0x296   : > { %6253 = vst [vmem:[#allocation2 + $0x180] sm:$0xff] %v6181_v7  ;;  %v6182_v27 = vadd.f32 %v5402_v63, %v3179_v9  ;;  %6022 = vmatpush2.bf16.msra.mxu0 %v10213_v40  ;;  %v5404_v53 = vadd.f32 %v5403_v37, %v5323_v5  ;;  %v5333_v15 = vadd.f32 %v13434_v0, %v13426_v32  ;;  %v3195_v56 = vld [vmem:[#allocation2 + $0xf8] sm:$0xff]  ;;  %v3210_v7 = vld [vmem:[#allocation2 + $0x90] sm:$0xff] }
 0x297   : > { %v5405_v54 = vpop.f32.mrf.mxu0  ;;  %6023 = vmatprep.subr.bf16.mxu0 %v10206_v2  ;;  %v10189_v0 = vcombine.low %v3453_v57, %v3457_v59  ;;  %v5339_v13 = vadd.f32 %v13456_v24, %v13448_v14  ;;  %v3437_v45 = vld [vmem:[%s15757_s2 + $0x658] sm:$0xff]  ;;  %v5343_v46 = vadd.f32 %v13477_v3, %v13469_v36 }
 0x298   : > { %6254 = vst [vmem:[#allocation2 + $0x190] sm:$0xff] %v6182_v27  ;;  %v6189_v10 = vadd.f32 %v5404_v53, %v3186_v49  ;;  %v5406_v16 = vadd.f32 %v5405_v54, %v5325_v31  ;;  %6099 = vmatpush1.bf16.msra.mxu1 %v10229_v8  ;;  %v5341_v8 = vadd.f32 %v13461_v48, %v13459_v1  ;;  %v3433_v37 = vld [vmem:[%s15757_s2 + $0x638] sm:$0xff]  ;;  %v3218_v54 = vld [vmem:[#allocation2 + $0x10] sm:$0xff] }
 0x299   : > { %v5409_v43 = vpop.f32.mrf.mxu0  ;;  %8366 = vmatprep.subr.bf16.mxu1 %v10460_v52  ;;  %v3211_v52 = vld [vmem:[#allocation2 + $0x130] sm:$0xff]  ;;  %v15949_v27 = vld [vmem:[#allocation10_spill] sm:$0xff] }
 0x29a   : > { %6261 = vst [vmem:[#allocation2 + $0x88] sm:$0xff] %v6189_v10  ;;  %v6190_v22 = vadd.f32 %v5406_v16, %v3187_v28  ;;  %5975 = vmatmul.mubr.bf16.gmra.mxu1 %v12557_v60  ;;  %6024 = vmatpush2.bf16.msra.mxu0 %v10205_v12  ;;  %v5410_v33 = vadd.f32 %v5409_v43, %v5329_v21  ;;  %v3449_v60 = vld [vmem:[%s15757_s2 + $0x6b8] sm:$0xff]  ;;  %v15950_v10 = vld [vmem:[#allocation12_spill] sm:$0xff] }
 0x29b   : > { %v5411_v38 = vpop.f32.mrf.mxu0  ;;  %6025 = vmatprep.subr.bf16.mxu0 %v10198_v50  ;;  %5984 = vmatprep.mubr.bf16.mxu1 %v12565_v55  ;;  %v5335_v55 = vadd.f32 %v13438_v20, %v13436_v4  ;;  %v10182_v44 = vcombine.high %v3445_v47, %v3449_v60  ;;  %v3441_v4 = vld [vmem:[%s15757_s2 + $0x678] sm:$0xff]  ;;  %v10181_v2 = vcombine.low %v3445_v47, %v3449_v60  ;;  %v15951_v16 = vld [vmem:[#allocation20_spill] sm:$0xff] }
 0x29c   : > { %6262 = vst [vmem:[#allocation2] sm:$0xff] %v6190_v22  ;;  %v6197_v41 = vadd.f32 %v5410_v33, %v3194_v17  ;;  %v5412_v25 = vadd.f32 %v5411_v38, %v5331_v19  ;;  %v3203_v20 = vld [vmem:[#allocation2 + $0x98] sm:$0xff]  ;;  %v10174_v39 = vcombine.high %v3437_v45, %v3441_v4  ;;  %v10173_v49 = vcombine.low %v3437_v45, %v3441_v4  ;;  %v6511_v19 = vld [vmem:[%s15758_s3 + $0x1e0] sm:$0xff]  ;;  %v3219_v22 = vld [vmem:[#allocation2 + $0x128] sm:$0xff] }
 0x29d   : > { %v5413_v29 = vpop.f32.mrf.mxu0  ;;  %v5349_v57 = vadd.f32 %v15951_v16, %v15950_v10  ;;  %v15952_v38 = vld [vmem:[#allocation17_spill] sm:$0xff] }
 0x29e   : > { %6269 = vst [vmem:[#allocation2 + $0x80] sm:$0xff] %v6197_v41  ;;  %v6198_v26 = vadd.f32 %v5412_v25, %v3195_v56  ;;  %6026 = vmatpush2.bf16.msra.mxu0 %v10197_v61  ;;  %v5414_v32 = vadd.f32 %v5413_v29, %v5333_v15  ;;  %v6507_v61 = vld [vmem:[%s15758_s3 + $0x1c0] sm:$0xff]  ;;  %v15954_v25 = vld [vmem:[#allocation6_spill] sm:$0xff] }
 0x29f   : > { %v5415_v40 = vpop.f32.mrf.mxu0  ;;  %6027 = vmatprep.subr.bf16.mxu0 %v10190_v34  ;;  %v15953_v34 = vld [vmem:[#allocation22_spill] sm:$0xff]  ;;  %v3226_v56 = vld [vmem:[#allocation2 + $0x1a0] sm:$0x7f] }
 0x2a0   : > { %6270 = vst [vmem:[#allocation2 + $0xf8] sm:$0xff] %v6198_v26  ;;  %v6205_v6 = vadd.f32 %v5414_v32, %v3202_v42  ;;  %v5416_v18 = vadd.f32 %v5415_v40, %v5335_v55  ;;  %v5351_v15 = vadd.f32 %v15953_v34, %v15952_v38  ;;  %v10332_v55 = vcombine.high %v6507_v61, %v6511_v19  ;;  %v6499_v42 = vld [vmem:[%s15758_s3 + $0x180] sm:$0xff] }
 0x2a1   : > { %v5419_v30 = vpop.f32.mrf.mxu0  ;;  %v6503_v40 = vld [vmem:[%s15758_s3 + $0x1a0] sm:$0xff] }
 0x2a2   : > { %6277 = vst [vmem:[#allocation2 + $0x48] sm:$0xff] %v6205_v6  ;;  %v6206_v5 = vadd.f32 %v5416_v18, %v3203_v20  ;;  %5985 = vmatmul.mubr.bf16.gmra.mxu1 %v12593_v58  ;;  %6028 = vmatpush2.bf16.msra.mxu0 %v10189_v0  ;;  %v5420_v14 = vadd.f32 %v5419_v30, %v5339_v13  ;;  %v13633_v24 = vpop.f32.mrf.mxu1  ;;  %v3429_v58 = vld [vmem:[%s15757_s2 + $0x618] sm:$0xff]  ;;  %v6627_v13 = vld [vmem:[%s15758_s3 + $0x580] sm:$0xff] }
 0x2a3   : > { %v5421_v63 = vpop.f32.mrf.mxu0  ;;  %6029 = vmatprep.subr.bf16.mxu0 %v10182_v44  ;;  %5994 = vmatprep.mubr.bf16.mxu1 %v12595_v62  ;;  %v15948_v62 = vld [vmem:[#allocation9_spill] sm:$0xff]  ;;  %v10166_v21 = vcombine.high %v3429_v58, %v3433_v37  ;;  %v10165_v17 = vcombine.low %v3429_v58, %v3433_v37  ;;  %v3227_v44 = vld [vmem:[#allocation2 + $0x58] sm:$0x7f]  ;;  %v6631_v6 = vld [vmem:[%s15758_s3 + $0x5a0] sm:$0xff]  ;;  %v10331_v20 = vcombine.low %v6507_v61, %v6511_v19 }
 0x2a4   : > { %6278 = vst [vmem:[#allocation2 + $0x98] sm:$0xff] %v6206_v5  ;;  %v6213_v9 = vadd.f32 %v5420_v14, %v3210_v7  ;;  %v5422_v48 = vadd.f32 %v5421_v63, %v5341_v8  ;;  %v13638_v1 = vpop.f32.mrf.mxu1  ;;  %v5345_v53 = vadd.f32 %v15949_v27, %v15948_v62  ;;  %v10459_v30 = vcombine.low %v13579_v35, %v13584_v23  ;;  %v6491_v7 = vld [vmem:[%s15758_s3 + $0x140] sm:$0xff] }
 0x2a5   : > { %v5423_v31 = vpop.f32.mrf.mxu0  ;;  %v10452_v14 = vcombine.high %v6627_v13, %v6631_v6  ;;  %v6495_v63 = vld [vmem:[%s15758_s3 + $0x160] sm:$0xff]  ;;  %v10451_v58 = vcombine.low %v6627_v13, %v6631_v6 }
 0x2a6   : > { %6285 = vst [vmem:[#allocation2 + $0x90] sm:$0xff] %v6213_v9  ;;  %v6214_v36 = vadd.f32 %v5422_v48, %v3211_v52  ;;  %6030 = vmatpush2.bf16.msra.mxu0 %v10181_v2  ;;  %v5424_v3 = vadd.f32 %v5423_v31, %v5343_v46  ;;  %v13648_v12 = vpop.f32.mrf.mxu1  ;;  %v10324_v2 = vcombine.high %v6499_v42, %v6503_v40  ;;  %v6619_v35 = vld [vmem:[%s15758_s3 + $0x540] sm:$0xff] }
 0x2a7   : > { %v5425_v50 = vpop.f32.mrf.mxu0  ;;  %6031 = vmatprep.subr.bf16.mxu0 %v10174_v39  ;;  %v15955_v39 = vld [vmem:[#allocation18_spill] sm:$0xff]  ;;  %v6623_v23 = vld [vmem:[%s15758_s3 + $0x560] sm:$0xff]  ;;  %v10323_v48 = vcombine.low %v6499_v42, %v6503_v40  ;;  %v10316_v37 = vcombine.high %v6491_v7, %v6495_v63 }
 0x2a8   : > { %6286 = vst [vmem:[#allocation2 + $0x130] sm:$0xff] %v6214_v36  ;;  %v6221_v59 = vadd.f32 %v5424_v3, %v3218_v54  ;;  %v5426_v28 = vadd.f32 %v5425_v50, %v5345_v53  ;;  %v13652_v43 = vpop.f32.mrf.mxu1  ;;  %v15956_v46 = vld [vmem:[#allocation15_spill] sm:$0xff]  ;;  %v10444_v62 = vcombine.high %v6619_v35, %v6623_v23  ;;  %v10315_v54 = vcombine.low %v6491_v7, %v6495_v63 }
 0x2a9   : > { %v5429_v33 = vpop.f32.mrf.mxu0  ;;  %v15957_v31 = vld [vmem:[#allocation19_spill] sm:$0xff]  ;;  %v10443_v50 = vcombine.low %v6619_v35, %v6623_v23 }
 0x2aa   : > { %6293 = vst [vmem:[#allocation2 + $0x10] sm:$0xff] %v6221_v59  ;;  %v6222_v41 = vadd.f32 %v5426_v28, %v3219_v22  ;;  %5995 = vmatmul.mubr.bf16.gmra.mxu1 %v15954_v25  ;;  %6032 = vmatpush2.bf16.msra.mxu0 %v10173_v49  ;;  %v5430_v47 = vadd.f32 %v5429_v33, %v5349_v57  ;;  %v13663_v60 = vpop.f32.mrf.mxu1  ;;  %v6483_v27 = vld [vmem:[%s15758_s3 + $0x100] sm:$0xff]  ;;  %v15959_v33 = vld [vmem:[#allocation8_spill] sm:$0xff] }
 0x2ab   : > { %v5431_v29 = vpop.f32.mrf.mxu0  ;;  %6033 = vmatprep.subr.bf16.mxu0 %v10166_v21  ;;  %6116 = vmatprep.mubr.bf16.mxu1 %v15880_v51  ;;  %v6487_v53 = vld [vmem:[%s15758_s3 + $0x120] sm:$0xff] }
 0x2ac   : > { %6294 = vst [vmem:[#allocation2 + $0x128] sm:$0xff] %v6222_v41  ;;  %v6229_v26 = vadd.f32 %v5430_v47, %v3226_v56  ;;  %v5432_v32 = vadd.f32 %v5431_v29, %v5351_v15  ;;  %v13666_v0 = vpop.f32.mrf.mxu1  ;;  %v6611_v36 = vld [vmem:[%s15758_s3 + $0x500] sm:$0xff]  ;;  %v10308_v21 = vcombine.high %v6483_v27, %v6487_v53 }
 0x2ad   : > { %v5433_v18 = vpop.f32.mrf.mxu0  ;;  %v6615_v3 = vld [vmem:[%s15758_s3 + $0x520] sm:$0xff] }
 0x2ae   : > { %6301 = vst [vmem:[#allocation2 + $0x1a0] sm:$0x7f] %v6229_v26  ;;  %v6230_v45 = vadd.f32 %v5432_v32, %v3227_v44  ;;  %6034 = vmatpush2.bf16.msra.mxu0 %v10165_v17  ;;  %v13680_v4 = vpop.f32.mrf.mxu1  ;;  %v10436_v16 = vcombine.high %v6611_v36, %v6615_v3  ;;  %v6475_v57 = vld [vmem:[%s15758_s3 + $0xc0] sm:$0xff]  ;;  %v10307_v17 = vcombine.low %v6483_v27, %v6487_v53  ;;  %v6320_v27 = vld [vmem:[%s10746_s29 + $0x58] sm:$0xff] }
 0x2af   : > { %8285 = vmatprep.subr.bf16.mxu0 %v10332_v55  ;;  %v5434_v8 = vpop.f32.mrf.mxu0  ;;  %v6479_v59 = vld [vmem:[%s15758_s3 + $0xe0] sm:$0xff]  ;;  %v10435_v38 = vcombine.low %v6611_v36, %v6615_v3  ;;  %v6312_v36 = vld [vmem:[%s10746_s29 + $0x18] sm:$0xfc] }
 0x2b0   : > { %6302 = vst [vmem:[#allocation2 + $0x58] sm:$0x7f] %v6230_v45  ;;  %v13684_v5 = vpop.f32.mrf.mxu1  ;;  %v15958_v28 = vld [vmem:[#allocation11_spill] sm:$0xff]  ;;  %v10300_v34 = vcombine.high %v6475_v57, %v6479_v59  ;;  %v10299_v32 = vcombine.low %v6475_v57, %v6479_v59  ;;  %v15961_v45 = vld [vmem:[#allocation13_spill] sm:$0xff]  ;;  %v15962_v8 = vld [vmem:[#allocation16_spill] sm:$0xff] }
 0x2b1   : > { %6036 = vmatmul.mubr.bf16.vlgmr.msra.gmra.mxu0 %v15955_v39  ;;  %v6603_v61 = vld [vmem:[%s15758_s3 + $0x4c0] sm:$0xff] }
 0x2b2   : > { %10270 = vmatmul.mubr.msk.bf16.vlgmr.msra.gmra.mxu1 %vm2032_vm0, %v15956_v46  ;;  %8286 = vmatpush1.bf16.msra.mxu0 %v10331_v20  ;;  %v13701_v9 = vpop.f32.mrf.mxu1  ;;  %v6607_v19 = vld [vmem:[%s15758_s3 + $0x4e0] sm:$0xff] }
 0x2b3   : > { %8367 = vmatpush1.bf16.msra.mxu1 %v10459_v30  ;;  %8287 = vmatprep.subr.bf16.mxu0 %v10324_v2  ;;  %v15960_v41 = vld [vmem:[#allocation3_spill] sm:$0xff]  ;;  %v10428_v25 = vcombine.high %v6603_v61, %v6607_v19  ;;  %v10427_v42 = vcombine.low %v6603_v61, %v6607_v19 }
 0x2b4   : > { %v13703_v52 = vpop.f32.mrf.mxu1  ;;  %8368 = vmatprep.subr.bf16.mxu1 %v10452_v14  ;;  %6045 = vmatprep.mubr.bf16.mxu0 %v15957_v31  ;;  %v6467_v47 = vld [vmem:[%s15758_s3 + $0x80] sm:$0xff]  ;;  %v6310_v31 = vld [vmem:[%s10746_s29 + $0x8] sm:$0xfc] }
 0x2b5   : > { %6126 = vmatprep.mubr.bf16.mxu1 %v15880_v51  ;;  %v6471_v56 = vld [vmem:[%s15758_s3 + $0xa0] sm:$0xff] }
 0x2b6   : > { %8288 = vmatpush1.bf16.msra.mxu0 %v10323_v48  ;;  %v13719_v49 = vpop.f32.mrf.mxu1  ;;  %v6595_v29 = vld [vmem:[%s15758_s3 + $0x480] sm:$0xff]  ;;  %v10292_v40 = vcombine.high %v6467_v47, %v6471_v56  ;;  %v10291_v14 = vcombine.low %v6467_v47, %v6471_v56  ;;  %v15963_v48 = vld [vmem:[#allocation4_spill] sm:$0xff] }
 0x2b7   : > { %8369 = vmatpush1.bf16.msra.mxu1 %v10451_v58  ;;  %8289 = vmatprep.subr.bf16.mxu0 %v10316_v37  ;;  %v6599_v55 = vld [vmem:[%s15758_s3 + $0x4a0] sm:$0xff] }
 0x2b8   : > { %v13721_v10 = vpop.f32.mrf.mxu1  ;;  %8370 = vmatprep.subr.bf16.mxu1 %v10444_v62  ;;  %v10420_v13 = vcombine.high %v6595_v29, %v6599_v55  ;;  %v6459_v6 = vld [vmem:[%s15758_s3 + $0x40] sm:$0xff]  ;;  %v10419_v7 = vcombine.low %v6595_v29, %v6599_v55  ;;  %v6315_v62 = vld [vmem:[%s10746_s29 + $0x30] sm:$0xff] }
 0x2b9   : > { %6046 = vmatmul.mubr.bf16.gmra.mxu0 %v15958_v28  ;;  %v6463_v18 = vld [vmem:[%s15758_s3 + $0x60] sm:$0xff] }
 0x2ba   : > { %8290 = vmatpush1.bf16.msra.mxu0 %v10315_v54  ;;  %v13736_v22 = vpop.f32.mrf.mxu1  ;;  %10271 = vmatmul.mubr.msk.bf16.gmra.mxu1 %vm2032_vm0, %v15959_v33  ;;  %v6587_v20 = vld [vmem:[%s15758_s3 + $0x440] sm:$0xff]  ;;  %v10284_v63 = vcombine.high %v6459_v6, %v6463_v18  ;;  %v10283_v54 = vcombine.low %v6459_v6, %v6463_v18 }
 0x2bb   : > { %8371 = vmatpush1.bf16.msra.mxu1 %v10443_v50  ;;  %8291 = vmatprep.subr.bf16.mxu0 %v10308_v21  ;;  %v6591_v30 = vld [vmem:[%s15758_s3 + $0x460] sm:$0xff]  ;;  %v6322_v21 = vld [vmem:[%s10746_s29 + $0x68] sm:$0xff] }
 0x2bc   : > { %v13740_v15 = vpop.f32.mrf.mxu1  ;;  %8372 = vmatprep.subr.bf16.mxu1 %v10436_v16  ;;  %6055 = vmatprep.mubr.bf16.mxu0 %v15960_v41  ;;  %v13780_v39 = vld [vmem:[%s15758_s3] sm:$0xff]  ;;  %v10412_v58 = vcombine.high %v6587_v20, %v6591_v30  ;;  %v6327_v16 = vld [vmem:[%s10746_s29 + $0x90] sm:$0xff]  ;;  %v10411_v57 = vcombine.low %v6587_v20, %v6591_v30 }
 0x2bd   : > { %6136 = vmatprep.mubr.bf16.mxu1 %v15880_v51  ;;  %v13785_v35 = vld [vmem:[%s15758_s3 + $0x20] sm:$0xff]  ;;  %v6362_v29 = vpack.c.bf16 %v6327_v16, %v6322_v21 }
 0x2be   : > { %8292 = vmatpush1.bf16.msra.mxu0 %v10307_v17  ;;  %v13756_v26 = vpop.f32.mrf.mxu1  ;;  %v13790_v23 = vld [vmem:[%s15758_s3 + $0x400] sm:$0xff]  ;;  %v10276_v59 = vcombine.high %v13780_v39, %v13785_v35  ;;  %v15964_v17 = vld [vmem:[#allocation5_spill] sm:$0xff] }
 0x2bf   : > { %8373 = vmatpush1.bf16.msra.mxu1 %v10435_v38  ;;  %8293 = vmatprep.subr.bf16.mxu0 %v10300_v34  ;;  %v13798_v37 = vld [vmem:[%s15758_s3 + $0x420] sm:$0xff] }
 0x2c0   : > { %v13758_v44 = vpop.f32.mrf.mxu1  ;;  %8374 = vmatprep.subr.bf16.mxu1 %v10428_v25  ;;  %v6325_v53 = vld [vmem:[%s10746_s29 + $0x80] sm:$0xff]  ;;  %v10404_v61 = vcombine.high %v13790_v23, %v13798_v37  ;;  %v6355_v25 = vpack.c.bf16 %v6315_v62, %v6310_v31  ;;  %v10403_v6 = vcombine.low %v13790_v23, %v13798_v37  ;;  %v13872_v31 = vrot.slane %v6362_v29, 1 }
 0x2c1   : > { %6056 = vmatmul.mubr.bf16.gmra.mxu0 %v15961_v45  ;;  %v6317_v50 = vld [vmem:[%s10746_s29 + $0x40] sm:$0xff]  ;;  %v6360_v47 = vpack.c.bf16 %v6325_v53, %v6320_v27 }
 0x2c2   : > { %8294 = vmatpush1.bf16.msra.mxu0 %v10299_v32  ;;  %v13773_v2 = vpop.f32.mrf.mxu1  ;;  %10272 = vmatmul.mubr.msk.bf16.gmra.mxu1 %vm2032_vm0, %v15962_v8  ;;  %v13816_v19 = vld [vmem:[%s15758_s3 + $0x3c0] sm:$0xff]  ;;  %v6357_v56 = vpack.c.bf16 %v6317_v50, %v6312_v36 }
 0x2c3   : > { %8375 = vmatpush1.bf16.msra.mxu1 %v10427_v42  ;;  %8295 = vmatprep.subr.bf16.mxu0 %v10292_v40  ;;  %v13821_v33 = vld [vmem:[%s15758_s3 + $0x3e0] sm:$0xff]  ;;  %v15965_v42 = vld [vmem:[#allocation21_spill] sm:$0xff]  ;;  %v10275_v40 = vcombine.low %v13780_v39, %v13785_v35 }
 0x2c4   : > { %v13792_v46 = vpop.f32.mrf.mxu1  ;;  %8376 = vmatprep.subr.bf16.mxu1 %v10420_v13  ;;  %6065 = vmatprep.mubr.bf16.mxu0 %v15963_v48  ;;  %v13827_v34 = vld [vmem:[%s15758_s3 + $0x7c0] sm:$0xff]  ;;  %v10395_v18 = vcombine.low %v13816_v19, %v13821_v33  ;;  %v6768_v48 = vrot.slane %v6355_v25, 1  ;;  %v6774_v37 = vrot.slane %v6357_v56, 1 }
 0x2c5   : > { %6146 = vmatprep.mubr.bf16.mxu1 %v15880_v51  ;;  %v13832_v41 = vld [vmem:[%s15758_s3 + $0x7e0] sm:$0xff] }
 0x2c6   : > { %8296 = vmatpush1.bf16.msra.mxu0 %v10291_v14  ;;  %v5514_v3 = vpop.f32.mrf.mxu1  ;;  %v3164_v45 = vld [vmem:[#allocation2 + $0x40] sm:$0xff]  ;;  %v15966_v14 = vld [vmem:[#allocation14_spill] sm:$0xff]  ;;  %v10523_v50 = vcombine.low %v13827_v34, %v13832_v41 }
 0x2c7   : > { %8377 = vmatpush1.bf16.msra.mxu1 %v10419_v7  ;;  %8297 = vmatprep.subr.bf16.mxu0 %v10284_v63  ;;  %v10524_v7 = vcombine.high %v13827_v34, %v13832_v41  ;;  %v13852_v63 = vld [vmem:[%s15758_s3 + $0x380] sm:$0xff]  ;;  %v3165_v3 = vld [vmem:[#allocation2 + $0x28] sm:$0xff] }
 0x2c8   : > { %v5515_v28 = vpop.f32.mrf.mxu1  ;;  %8378 = vmatprep.subr.bf16.mxu1 %v10412_v58  ;;  %v13857_v39 = vld [vmem:[%s15758_s3 + $0x3a0] sm:$0xff]  ;;  %v13870_v58 = vrot.slane %v6360_v47, 1  ;;  %v13911_v47 = vsel %vm6764_vm2, %v6774_v37, %v13872_v31 }
 0x2c9   : > { %6066 = vmatmul.mubr.bf16.gmra.mxu0 %v15964_v17  ;;  %v5551_v38 = vpop.f32.mrf.mxu0  ;;  %v13868_v23 = vld [vmem:[%s15758_s3 + $0x7a0] sm:$0xff]  ;;  %v10388_v21 = vcombine.high %v13852_v63, %v13857_v39  ;;  %v10387_v41 = vcombine.low %v13852_v63, %v13857_v39 }
 0x2ca   : > { %v5552_v55 = vadd.f32 %v5551_v38, %v13633_v24  ;;  %8298 = vmatpush1.bf16.msra.mxu0 %v10283_v54  ;;  %v5632_v32 = vpop.f32.mrf.mxu1  ;;  %10273 = vmatmul.mubr.msk.bf16.gmra.mxu1 %vm2032_vm0, %v15965_v42  ;;  %v10396_v24 = vcombine.high %v13816_v19, %v13821_v33  ;;  %v13882_v16 = vld [vmem:[%s15758_s3 + $0x340] sm:$0xff]  ;;  %v13907_v25 = vsel %vm6764_vm2, %v6768_v48, %v13870_v58  ;;  %v3173_v42 = vld [vmem:[#allocation2 + $0x158] sm:$0xff] }
 0x2cb   : > { %8379 = vmatpush1.bf16.msra.mxu1 %v10411_v57  ;;  %v5553_v13 = vpop.f32.mrf.mxu0  ;;  %8299 = vmatprep.subr.bf16.mxu0 %v10276_v59  ;;  %v13890_v19 = vld [vmem:[%s15758_s3 + $0x360] sm:$0xff]  ;;  %15968 = vst [vmem:[#allocation9_spill] sm:$0xff] %v13907_v25 }
 0x2cc   : > { %v5633_v20 = vadd.f32 %v5632_v32, %v5552_v55  ;;  %v5554_v30 = vadd.f32 %v5553_v13, %v13638_v1  ;;  %v5634_v8 = vpop.f32.mrf.mxu1  ;;  %8380 = vmatprep.subr.bf16.mxu1 %v10404_v61  ;;  %6075 = vmatprep.mubr.bf16.mxu0 %v15966_v14  ;;  %v13863_v1 = vld [vmem:[%s15758_s3 + $0x780] sm:$0xff] }
 0x2cd   : > { %v5555_v35 = vpop.f32.mrf.mxu0  ;;  %6156 = vmatprep.mubr.bf16.mxu1 %v15880_v51  ;;  %v10516_v61 = vcombine.high %v13863_v1, %v13868_v23  ;;  %v13895_v33 = vld [vmem:[%s15758_s3 + $0x740] sm:$0xff]  ;;  %v10515_v13 = vcombine.low %v13863_v1, %v13868_v23  ;;  %v10379_v23 = vcombine.low %v13882_v16, %v13890_v19 }
 0x2ce   : > { %v6167_v62 = vadd.f32 %v5633_v20, %v3164_v45  ;;  %v5635_v27 = vadd.f32 %v5634_v8, %v5554_v30  ;;  %v5556_v53 = vadd.f32 %v5555_v35, %v13648_v12  ;;  %8300 = vmatpush1.bf16.msra.mxu0 %v10275_v40  ;;  %v5636_v36 = vpop.f32.mrf.mxu1  ;;  %v13900_v17 = vld [vmem:[%s15758_s3 + $0x760] sm:$0xff] }
 0x2cf   : > { %8381 = vmatpush1.bf16.msra.mxu1 %v10403_v6  ;;  %v5557_v54 = vpop.f32.mrf.mxu0  ;;  %8301 = vmatprep.subr.bf16.mxu0 %v10396_v24  ;;  %v15967_v38 = vld [vmem:[#allocation7_spill] sm:$0xff]  ;;  %v10380_v6 = vcombine.high %v13882_v16, %v13890_v19  ;;  %v10508_v24 = vcombine.high %v13895_v33, %v13900_v17  ;;  %v3188_v16 = vld [vmem:[#allocation2 + $0x188] sm:$0xff] }
 0x2d0   : > { %6239 = vst [vmem:[#allocation2 + $0x40] sm:$0xff] %v6167_v62  ;;  %v6168_v12 = vadd.f32 %v5635_v27, %v3165_v3  ;;  %v5637_v57 = vadd.f32 %v5636_v36, %v5556_v53  ;;  %v5558_v59 = vadd.f32 %v5557_v54, %v13652_v43  ;;  %v5638_v28 = vpop.f32.mrf.mxu1  ;;  %8382 = vmatprep.subr.bf16.mxu1 %v10524_v7  ;;  %v3172_v43 = vld [vmem:[#allocation2 + $0xb0] sm:$0xff]  ;;  %v13926_v20 = vld [vmem:[%s15758_s3 + $0x300] sm:$0xff] }
 0x2d1   : > { %6076 = vmatmul.mubr.bf16.gmra.mxu0 %v15967_v38  ;;  %v5561_v34 = vpop.f32.mrf.mxu0  ;;  %v13931_v30 = vld [vmem:[%s15758_s3 + $0x320] sm:$0xff]  ;;  %v10507_v62 = vcombine.low %v13895_v33, %v13900_v17  ;;  %v3189_v17 = vld [vmem:[#allocation2 + $0x38] sm:$0xff] }
 0x2d2   : > { %6240 = vst [vmem:[#allocation2 + $0x28] sm:$0xff] %v6168_v12  ;;  %v6175_v56 = vadd.f32 %v5637_v57, %v3172_v43  ;;  %v5639_v29 = vadd.f32 %v5638_v28, %v5558_v59  ;;  %v5562_v55 = vadd.f32 %v5561_v34, %v13663_v60  ;;  %8302 = vmatpush2.bf16.msra.mxu0 %v10395_v18  ;;  %v5642_v32 = vpop.f32.mrf.mxu1  ;;  %v3180_v8 = vld [vmem:[#allocation2 + $0x140] sm:$0xff] }
 0x2d3   : > { %10274 = vmatmul.mubr.msk.bf16.gmra.mxu1 %vm2032_vm0, %v12865_v11  ;;  %v5563_v40 = vpop.f32.mrf.mxu0  ;;  %8303 = vmatprep.subr.bf16.mxu0 %v10388_v21  ;;  %v6679_v7 = vld [vmem:[%s15758_s3 + $0x720] sm:$0xff]  ;;  %v10372_v27 = vcombine.high %v13926_v20, %v13931_v30  ;;  %v10371_v33 = vcombine.low %v13926_v20, %v13931_v30  ;;  %v3197_v20 = vld [vmem:[#allocation2 + $0x170] sm:$0xff] }
 0x2d4   : > { %8383 = vmatpush2.bf16.msra.mxu1 %v10523_v50  ;;  %6247 = vst [vmem:[#allocation2 + $0xb0] sm:$0xff] %v6175_v56  ;;  %v6176_v60 = vadd.f32 %v5639_v29, %v3173_v42  ;;  %v5564_v18 = vadd.f32 %v5563_v40, %v13666_v0  ;;  %v5643_v45 = vadd.f32 %v5642_v32, %v5562_v55  ;;  %v5644_v11 = vpop.f32.mrf.mxu1  ;;  %v13937_v0 = vld [vmem:[%s15758_s3 + $0x700] sm:$0xff]  ;;  %v3196_v40 = vld [vmem:[#allocation2 + $0x78] sm:$0xff] }
 0x2d5   : > { %8384 = vmatprep.subr.bf16.mxu1 %v10516_v61  ;;  %8317 = vmatprep.mubr.bf16.mxu0 %v13907_v25  ;;  %v5565_v14 = vpop.f32.mrf.mxu0  ;;  %v3181_v48 = vld [vmem:[#allocation2 + $0x1c0] sm:$0xff]  ;;  %v10500_v54 = vcombine.high %v13937_v0, %v6679_v7  ;;  %v10499_v38 = vcombine.low %v13937_v0, %v6679_v7 }
 0x2d6   : > { %8398 = vmatprep.mubr.bf16.mxu1 %v13911_v47  ;;  %6248 = vst [vmem:[#allocation2 + $0x158] sm:$0xff] %v6176_v60  ;;  %v6183_v63 = vadd.f32 %v5643_v45, %v3180_v8  ;;  %v5566_v39 = vadd.f32 %v5565_v14, %v13680_v4  ;;  %v5645_v35 = vadd.f32 %v5644_v11, %v5564_v18  ;;  %v5646_v1 = vpop.f32.mrf.mxu1  ;;  %v13955_v50 = vld [vmem:[%s15758_s3 + $0x2c0] sm:$0xff]  ;;  %v3204_v8 = vld [vmem:[#allocation2 + $0x238] sm:$0xff] }
 0x2d7   : > { %8304 = vmatpush2.bf16.msra.mxu0 %v10387_v41  ;;  %v5567_v37 = vpop.f32.mrf.mxu0  ;;  %v13960_v21 = vld [vmem:[%s15758_s3 + $0x2e0] sm:$0xff] }
 0x2d8   : > { %8385 = vmatpush2.bf16.msra.mxu1 %v10515_v13  ;;  %8305 = vmatprep.subr.bf16.mxu0 %v10380_v6  ;;  %6255 = vst [vmem:[#allocation2 + $0x140] sm:$0xff] %v6183_v63  ;;  %v6184_v53 = vadd.f32 %v5645_v35, %v3181_v48  ;;  %v5568_v4 = vadd.f32 %v5567_v37, %v13684_v5  ;;  %v5648_v3 = vpop.f32.mrf.mxu1  ;;  %v13965_v5 = vld [vmem:[%s15758_s3 + $0x6c0] sm:$0xff] }
 0x2d9   : > { %v5647_v36 = vadd.f32 %v5646_v1, %v5566_v39  ;;  %8386 = vmatprep.subr.bf16.mxu1 %v10508_v24  ;;  %v5571_v12 = vpop.f32.mrf.mxu0  ;;  %v13970_v57 = vld [vmem:[%s15758_s3 + $0x6e0] sm:$0xff]  ;;  %v10364_v34 = vcombine.high %v13955_v50, %v13960_v21  ;;  %v10363_v11 = vcombine.low %v13955_v50, %v13960_v21 }
 0x2da   : > { %6256 = vst [vmem:[#allocation2 + $0x1c0] sm:$0xff] %v6184_v53  ;;  %v5572_v28 = vadd.f32 %v5571_v12, %v13701_v9  ;;  %v5649_v61 = vadd.f32 %v5648_v3, %v5568_v4  ;;  %v5652_v19 = vpop.f32.mrf.mxu1  ;;  %v10492_v55 = vcombine.high %v13965_v5, %v13970_v57  ;;  %v13984_v32 = vld [vmem:[%s15758_s3 + $0x280] sm:$0xff]  ;;  %v10491_v14 = vcombine.low %v13965_v5, %v13970_v57  ;;  %v6319_v12 = vld [vmem:[%s10746_s29 + $0x50] sm:$0xff]  ;;  %v6324_v5 = vld [vmem:[%s10746_s29 + $0x78] sm:$0xff] }
 0x2db   : > { %v6191_v59 = vadd.f32 %v5647_v36, %v3188_v16  ;;  %8306 = vmatpush2.bf16.msra.mxu0 %v10379_v23  ;;  %v5573_v43 = vpop.f32.mrf.mxu0  ;;  %v13989_v42 = vld [vmem:[%s15758_s3 + $0x2a0] sm:$0xff]  ;;  %v6314_v16 = vld [vmem:[%s10746_s29 + $0x28] sm:$0xff] }
 0x2dc   : > { %8387 = vmatpush2.bf16.msra.mxu1 %v10507_v62  ;;  %8307 = vmatprep.subr.bf16.mxu0 %v10372_v27  ;;  %v6192_v41 = vadd.f32 %v5649_v61, %v3189_v17  ;;  %v5574_v56 = vadd.f32 %v5573_v43, %v13703_v52  ;;  %v5653_v9 = vadd.f32 %v5652_v19, %v5572_v28  ;;  %v5654_v29 = vpop.f32.mrf.mxu1  ;;  %v13994_v52 = vld [vmem:[%s15758_s3 + $0x680] sm:$0xff]  ;;  %v14065_v19 = vld [vmem:[%s10746_s29 + $0x10] sm:$0xfc] }
 0x2dd   : > { %6263 = vst [vmem:[#allocation2 + $0x188] sm:$0xff] %v6191_v59  ;;  %8388 = vmatprep.subr.bf16.mxu1 %v10500_v54  ;;  %v5575_v13 = vpop.f32.mrf.mxu0  ;;  %v13999_v6 = vld [vmem:[%s15758_s3 + $0x6a0] sm:$0xff]  ;;  %v10356_v0 = vcombine.high %v13984_v32, %v13989_v42  ;;  %v10355_v21 = vcombine.low %v13984_v32, %v13989_v42 }
 0x2de   : > { %6264 = vst [vmem:[#allocation2 + $0x38] sm:$0xff] %v6192_v41  ;;  %v6199_v24 = vadd.f32 %v5653_v9, %v3196_v40  ;;  %v5576_v60 = vadd.f32 %v5575_v13, %v13719_v49  ;;  %v5655_v18 = vadd.f32 %v5654_v29, %v5574_v56  ;;  %v5656_v45 = vpop.f32.mrf.mxu1  ;;  %v14011_v49 = vld [vmem:[%s15758_s3 + $0x240] sm:$0xff]  ;;  %v10484_v1 = vcombine.high %v13994_v52, %v13999_v6  ;;  %v6316_v41 = vld [vmem:[%s10746_s29 + $0x38] sm:$0xff]  ;;  %v6326_v9 = vld [vmem:[%s10746_s29 + $0x88] sm:$0xff] }
 0x2df   : > { %8308 = vmatpush2.bf16.msra.mxu0 %v10371_v33  ;;  %v5577_v30 = vpop.f32.mrf.mxu0  ;;  %v14019_v23 = vld [vmem:[%s15758_s3 + $0x260] sm:$0xff]  ;;  %v10483_v59 = vcombine.low %v13994_v52, %v13999_v6  ;;  %v3212_v29 = vld [vmem:[#allocation2 + $0x68] sm:$0xff]  ;;  %v6359_v40 = vpack.c.bf16 %v6324_v5, %v6319_v12  ;;  %v6335_v52 = vld [vmem:[%s10746_s29 + $0xd0] sm:$0xff] }
 0x2e0   : > { %8389 = vmatpush2.bf16.msra.mxu1 %v10499_v38  ;;  %8309 = vmatprep.subr.bf16.mxu0 %v10364_v34  ;;  %6271 = vst [vmem:[#allocation2 + $0x78] sm:$0xff] %v6199_v24  ;;  %v6200_v7 = vadd.f32 %v5655_v18, %v3197_v20  ;;  %v5578_v63 = vadd.f32 %v5577_v30, %v13721_v10  ;;  %v5658_v35 = vpop.f32.mrf.mxu1  ;;  %v14024_v48 = vld [vmem:[%s15758_s3 + $0x640] sm:$0xff]  ;;  %v6330_v13 = vld [vmem:[%s10746_s29 + $0xa8] sm:$0xff]  ;;  %v3213_v30 = vld [vmem:[#allocation2 + $0x230] sm:$0xff] }
 0x2e1   : > { %v5657_v39 = vadd.f32 %v5656_v45, %v5576_v60  ;;  %8390 = vmatprep.subr.bf16.mxu1 %v10492_v55  ;;  %v14029_v10 = vld [vmem:[%s15758_s3 + $0x660] sm:$0xff]  ;;  %v5581_v37 = vpop.f32.mrf.mxu0  ;;  %v10347_v32 = vcombine.low %v14011_v49, %v14019_v23 }
 0x2e2   : > { %v3205_v62 = vld [vmem:[#allocation2 + $0x160] sm:$0xff]  ;;  %6272 = vst [vmem:[#allocation2 + $0x170] sm:$0xff] %v6200_v7  ;;  %v5582_v3 = vadd.f32 %v5581_v37, %v13736_v22  ;;  %v5659_v54 = vadd.f32 %v5658_v35, %v5578_v63  ;;  %v5662_v50 = vpop.f32.mrf.mxu1  ;;  %v10348_v22 = vcombine.high %v14011_v49, %v14019_v23  ;;  %v10476_v34 = vcombine.high %v14024_v48, %v14029_v10 }
 0x2e3   : > { %v14034_v27 = vld [vmem:[%s15758_s3 + $0x200] sm:$0xff]  ;;  %v6207_v36 = vadd.f32 %v5657_v39, %v3204_v8  ;;  %8310 = vmatpush2.bf16.msra.mxu0 %v10363_v11  ;;  %v5583_v57 = vpop.f32.mrf.mxu0  ;;  %v10475_v42 = vcombine.low %v14024_v48, %v14029_v10  ;;  %v6332_v11 = vld [vmem:[%s10746_s29 + $0xb8] sm:$0xff]  ;;  %v14107_v48 = vld [vmem:[%s15758_s3 + $0x1e8] sm:$0xff] }
 0x2e4   : > { %v14039_v53 = vld [vmem:[%s15758_s3 + $0x220] sm:$0xff]  ;;  %8391 = vmatpush2.bf16.msra.mxu1 %v10491_v14  ;;  %8311 = vmatprep.subr.bf16.mxu0 %v10356_v0  ;;  %v6208_v33 = vadd.f32 %v5659_v54, %v3205_v62  ;;  %v5584_v17 = vadd.f32 %v5583_v57, %v13740_v15  ;;  %v5663_v43 = vadd.f32 %v5662_v50, %v5582_v3  ;;  %v5664_v38 = vpop.f32.mrf.mxu1  ;;  %v3220_v10 = vld [vmem:[#allocation2 + $0x178] sm:$0xff] }
 0x2e5   : > { %v14042_v4 = vld [vmem:[%s10746_s29] sm:$0xfc]  ;;  %6279 = vst [vmem:[#allocation2 + $0x238] sm:$0xff] %v6207_v36  ;;  %8392 = vmatprep.subr.bf16.mxu1 %v10484_v1  ;;  %v5585_v55 = vpop.f32.mrf.mxu0  ;;  %v10340_v45 = vcombine.high %v14034_v27, %v14039_v53  ;;  %v6356_v0 = vpack.c.bf16 %v6316_v41, %v14065_v19  ;;  %v10339_v62 = vcombine.low %v14034_v27, %v14039_v53  ;;  %v14111_v36 = vrot.slane %v6359_v40, 1  ;;  %v3228_v53 = vld [vmem:[#allocation2 + $0x118] sm:$0x7f] }
 0x2e6   : > { %v14057_v28 = vld [vmem:[%s15758_s3 + $0x600] sm:$0xff]  ;;  %v6354_v15 = vpack.c.bf16 %v6314_v16, %v14042_v4  ;;  %6280 = vst [vmem:[#allocation2 + $0x160] sm:$0xff] %v6208_v33  ;;  %v6215_v6 = vadd.f32 %v5663_v43, %v3212_v29  ;;  %v5586_v24 = vadd.f32 %v5585_v55, %v13756_v26  ;;  %v5665_v60 = vadd.f32 %v5664_v38, %v5584_v17  ;;  %v5666_v18 = vpop.f32.mrf.mxu1  ;;  %v14091_v26 = vld [vmem:[%s15758_s3 + $0x1c8] sm:$0xff]  ;;  %v6331_v17 = vld [vmem:[%s10746_s29 + $0xb0] sm:$0xff] }
 0x2e7   : > { %v14062_v61 = vld [vmem:[%s15758_s3 + $0x620] sm:$0xff]  ;;  %8312 = vmatpush2.bf16.msra.mxu0 %v10355_v21  ;;  %v5587_v8 = vpop.f32.mrf.mxu0  ;;  %v3221_v21 = vld [vmem:[#allocation2 + $0x208] sm:$0xff]  ;;  %v10334_v19 = vcombine.high %v14091_v26, %v14107_v48  ;;  %v6336_v43 = vld [vmem:[%s10746_s29 + $0xd8] sm:$0xff] }
 0x2e8   : > { %v6321_v56 = vld [vmem:[%s10746_s29 + $0x60] sm:$0xff]  ;;  %8393 = vmatpush2.bf16.msra.mxu1 %v10483_v59  ;;  %8313 = vmatprep.subr.bf16.mxu0 %v10348_v22  ;;  %v10468_v14 = vcombine.high %v14057_v28, %v14062_v61  ;;  %6287 = vst [vmem:[#allocation2 + $0x68] sm:$0xff] %v6215_v6  ;;  %v6216_v7 = vadd.f32 %v5665_v60, %v3213_v30  ;;  %v5668_v35 = vpop.f32.mrf.mxu1  ;;  %v6765_v4 = vrot.slane %v6354_v15, 1  ;;  %v6771_v59 = vrot.slane %v6356_v0, 1  ;;  %v6334_v33 = vld [vmem:[%s10746_s29 + $0xc8] sm:$0xff] }
 0x2e9   : > { %v6337_v20 = vld [vmem:[%s10746_s29 + $0xe0] sm:$0xff]  ;;  %v6361_v49 = vpack.c.bf16 %v6326_v9, %v6321_v56  ;;  %v5588_v63 = vadd.f32 %v5587_v8, %v13758_v44  ;;  %v5667_v39 = vadd.f32 %v5666_v18, %v5586_v24  ;;  %8394 = vmatprep.subr.bf16.mxu1 %v10476_v34  ;;  %v6365_v44 = vpack.c.bf16 %v6335_v52, %v6330_v13  ;;  %v5591_v37 = vpop.f32.mrf.mxu0  ;;  %v14130_v41 = vld [vmem:[%s15758_s3 + $0x188] sm:$0xff]  ;;  %v6340_v9 = vld [vmem:[%s10746_s29 + $0xf8] sm:$0xff] }
 0x2ea   : > { %v14097_v1 = vld [vmem:[%s15758_s3 + $0x8c0] sm:$0xff]  ;;  %v6367_v3 = vpack.c.bf16 %v6337_v20, %v6332_v11  ;;  %6288 = vst [vmem:[#allocation2 + $0x230] sm:$0xff] %v6216_v7  ;;  %v5592_v50 = vadd.f32 %v5591_v37, %v13773_v2  ;;  %v5672_v12 = vpop.f32.mrf.mxu1  ;;  %v10467_v5 = vcombine.low %v14057_v28, %v14062_v61  ;;  %v14138_v55 = vsel %vm6764_vm2, %v6765_v4, %v14111_v36  ;;  %v6342_v40 = vld [vmem:[%s10746_s29 + $0x108] sm:$0xff]  ;;  %v6347_v13 = vld [vmem:[%s10746_s29 + $0x130] sm:$0xff] }
 0x2eb   : > { %v14102_v23 = vld [vmem:[%s15758_s3 + $0x8e0] sm:$0xff]  ;;  %v6223_v54 = vadd.f32 %v5667_v39, %v3220_v10  ;;  %v5669_v16 = vadd.f32 %v5668_v35, %v5588_v63  ;;  %8314 = vmatpush2.bf16.msra.mxu0 %v10347_v32  ;;  %v5593_v27 = vpop.f32.mrf.mxu0  ;;  %v14117_v22 = vrot.slane %v6361_v49, 1  ;;  %v14132_v56 = vrot.slane %v6365_v44, 1 }
 0x2ec   : > { %v6329_v57 = vld [vmem:[%s10746_s29 + $0xa0] sm:$0xff]  ;;  %8395 = vmatpush2.bf16.msra.mxu1 %v10475_v42  ;;  %8315 = vmatprep.subr.bf16.mxu0 %v10340_v45  ;;  %v10556_v2 = vcombine.high %v14097_v1, %v14102_v23  ;;  %v5594_v61 = vadd.f32 %v5593_v27, %v13792_v46  ;;  %v5673_v38 = vadd.f32 %v5672_v12, %v5592_v50  ;;  %v5674_v34 = vpop.f32.mrf.mxu1  ;;  %v14145_v46 = vld [vmem:[%s15758_s3 + $0x1a8] sm:$0xff]  ;;  %v14147_v42 = vrot.slane %v6367_v3, 1  ;;  %v6339_v3 = vld [vmem:[%s10746_s29 + $0xf0] sm:$0xff] }
 0x2ed   : > { %6295 = vst [vmem:[#allocation2 + $0x178] sm:$0xff] %v6223_v54  ;;  %v6224_v28 = vadd.f32 %v5669_v16, %v3221_v21  ;;  %8396 = vmatprep.subr.bf16.mxu1 %v10468_v14  ;;  %v6345_v29 = vld [vmem:[%s10746_s29 + $0x120] sm:$0xff]  ;;  %v10555_v32 = vcombine.low %v14097_v1, %v14102_v23  ;;  %v5595_v15 = vpop.f32.mrf.mxu0  ;;  %v6364_v24 = vpack.c.bf16 %v6334_v33, %v6329_v57  ;;  %v6492_v23 = vld [vmem:[%s15758_s3 + $0x148] sm:$0xff]  ;;  %v6344_v54 = vld [vmem:[%s10746_s29 + $0x118] sm:$0xff] }
 0x2ee   : > { %v6231_v52 = vadd.f32 %v5673_v38, %v3228_v53  ;;  %v5675_v6 = vadd.f32 %v5674_v34, %v5594_v61  ;;  %v6366_v60 = vpack.c.bf16 %v6336_v43, %v6331_v17  ;;  %v6723_v18 = vld [vmem:[%s15758_s3 + $0x880] sm:$0xff]  ;;  %v5676_v11 = vpop.f32.mrf.mxu1  ;;  %v14159_v30 = vsel %vm6764_vm2, %v6771_v59, %v14117_v22  ;;  %v6350_v57 = vld [vmem:[%s10746_s29 + $0x148] sm:$0xff]  ;;  %v6352_v59 = vld [vmem:[%s10746_s29 + $0x158] sm:$0xff] }
 0x2ef   : > { %6296 = vst [vmem:[#allocation2 + $0x208] sm:$0xff] %v6224_v28  ;;  %8316 = vmatpush2.bf16.msra.mxu0 %v10339_v62  ;;  %v6727_v45 = vld [vmem:[%s15758_s3 + $0x8a0] sm:$0xff]  ;;  %15969 = vst [vmem:[#allocation10_spill] sm:$0xff] %v14159_v30  ;;  %v10333_v8 = vcombine.low %v14091_v26, %v14107_v48  ;;  %v6370_v14 = vpack.c.bf16 %v6345_v29, %v6340_v9  ;;  %v5596_v0 = vpop.f32.mrf.mxu0  ;;  %v10326_v7 = vcombine.high %v14130_v41, %v14145_v46  ;;  %v6496_v48 = vld [vmem:[%s15758_s3 + $0x168] sm:$0xff] }
 0x2f0   : > { %v3229_v20 = vld [vmem:[#allocation2 + $0x20] sm:$0x7f]  ;;  %8397 = vmatpush2.bf16.msra.mxu1 %v10467_v5  ;;  %8455 = vmatprep.subr.bf16.mxu0 %v10556_v2  ;;  %6303 = vst [vmem:[#allocation2 + $0x118] sm:$0x7f] %v6231_v52  ;;  %v14168_v63 = vsel %vm6764_vm2, %v13870_v58, %v14132_v56  ;;  %v6372_v39 = vpack.c.bf16 %v6347_v13, %v6342_v40  ;;  %v5677_v35 = vpop.f32.mrf.mxu1  ;;  %v14193_v10 = vrot.slane %v6364_v24, 1  ;;  %v6346_v5 = vld [vmem:[%s10746_s29 + $0x128] sm:$0xff] }
 0x2f1   : > { %v6232_v49 = vadd.f32 %v5675_v6, %v3229_v20  ;;  %8528 = vmatprep.subr.bf16.mxu1 %v10334_v19  ;;  %v14173_v1 = vld [vmem:[%s15758_s3 + $0x840] sm:$0xff]  ;;  %v14184_v58 = vsel %vm6764_vm2, %v13872_v31, %v14147_v42  ;;  %v10548_v44 = vcombine.high %v6723_v18, %v6727_v45  ;;  %v14195_v31 = vrot.slane %v6366_v60, 1  ;;  %v6484_v27 = vld [vmem:[%s15758_s3 + $0x108] sm:$0xff] }
 0x2f2   : > { %v14178_v26 = vld [vmem:[%s15758_s3 + $0x860] sm:$0xff]  ;;  %8318 = vmatmul.mubr.bf16.vlgmr.msra.gmra.mxu0 %v14138_v55  ;;  %15970 = vst [vmem:[#allocation12_spill] sm:$0xff] %v14184_v58  ;;  %v10547_v37 = vcombine.low %v6723_v18, %v6727_v45  ;;  %v10325_v62 = vcombine.low %v14130_v41, %v14145_v46  ;;  %v14200_v4 = vrot.slane %v6370_v14, 1  ;;  %v10318_v21 = vcombine.high %v6492_v23, %v6496_v48  ;;  %v6488_v53 = vld [vmem:[%s15758_s3 + $0x128] sm:$0xff]  ;;  %v6351_v18 = vld [vmem:[%s10746_s29 + $0x150] sm:$0xff] }
 0x2f3   : > { %6304 = vst [vmem:[#allocation2 + $0x20] sm:$0x7f] %v6232_v49  ;;  %8399 = vmatmul.mubr.bf16.vlgmr.msra.gmra.mxu1 %v14159_v30  ;;  %8456 = vmatpush1.bf16.msra.mxu0 %v10555_v32  ;;  %v10540_v50 = vcombine.high %v14173_v1, %v14178_v26  ;;  %v6796_v16 = vrot.slane %v6372_v39, 1  ;;  %v6341_v12 = vld [vmem:[%s10746_s29 + $0x100] sm:$0xff]  ;;  %v14220_v2 = vsel %vm6764_vm2, %v14111_v36, %v14193_v10  ;;  %v6480_v29 = vld [vmem:[%s15758_s3 + $0xe8] sm:$0xff] }
 0x2f4   : > { %8529 = vmatpush1.bf16.msra.mxu1 %v10333_v8  ;;  %8327 = vmatprep.mubr.bf16.mxu0 %v14168_v63  ;;  %v14225_v19 = vsel %vm6764_vm2, %v14117_v22, %v14195_v31  ;;  %v10317_v33 = vcombine.low %v6492_v23, %v6496_v48  ;;  %v6369_v17 = vpack.c.bf16 %v6344_v54, %v6339_v3  ;;  %v6707_v43 = vld [vmem:[%s15758_s3 + $0x800] sm:$0xff]  ;;  %v14261_v15 = vld [vmem:[%s15758_s3 + $0x5e8] sm:$0xff] }
 0x2f5   : > { %8530 = vmatprep.subr.bf16.mxu1 %v10326_v7  ;;  %8408 = vmatprep.mubr.bf16.mxu1 %v14184_v58  ;;  %15971 = vst [vmem:[#allocation20_spill] sm:$0xff] %v14225_v19  ;;  %v6711_v28 = vld [vmem:[%s15758_s3 + $0x820] sm:$0xff]  ;;  %v14236_v36 = vsel %vm6764_vm2, %v14132_v56, %v14200_v4  ;;  %v6371_v61 = vpack.c.bf16 %v6346_v5, %v6341_v12  ;;  %v6476_v56 = vld [vmem:[%s15758_s3 + $0xc8] sm:$0xff] }
 0x2f6   : > { %8457 = vmatprep.subr.bf16.mxu0 %v10548_v44  ;;  %v6375_v22 = vpack.c.bf16 %v6350_v57, %v6350_v57  ;;  %v10310_v38 = vcombine.high %v6484_v27, %v6488_v53  ;;  %v14240_v34 = vsel %vm6764_vm2, %v14147_v42, %v6796_v16  ;;  %v10539_v41 = vcombine.low %v14173_v1, %v14178_v26  ;;  %v14256_v42 = vld [vmem:[%s15758_s3 + $0x5c8] sm:$0xff]  ;;  %v6349_v6 = vld [vmem:[%s10746_s29 + $0x140] sm:$0xff] }
 0x2f7   : > { %8458 = vmatpush1.bf16.msra.mxu0 %v10547_v37  ;;  %15972 = vst [vmem:[#allocation17_spill] sm:$0xff] %v14240_v34  ;;  %v6377_v9 = vpack.c.bf16 %v6352_v59, %v6352_v59  ;;  %v10532_v32 = vcombine.high %v6707_v43, %v6711_v28  ;;  %v6790_v46 = vrot.slane %v6369_v17, 1  ;;  %v10309_v40 = vcombine.low %v6484_v27, %v6488_v53  ;;  %v6468_v11 = vld [vmem:[%s15758_s3 + $0x88] sm:$0xff]  ;;  %v6313_v27 = vld [vmem:[%s10746_s29 + $0x20] sm:$0xfc]  ;;  %v6323_v17 = vld [vmem:[%s10746_s29 + $0x70] sm:$0xff] }
 0x2f8   : > { %8531 = vmatpush1.bf16.msra.mxu1 %v10325_v62  ;;  %8459 = vmatprep.subr.bf16.mxu0 %v10540_v50  ;;  %v6794_v13 = vrot.slane %v6371_v61, 1  ;;  %v14264_v52 = vrot.slane %v6375_v22, 1  ;;  %v10302_v24 = vcombine.high %v6476_v56, %v6480_v29  ;;  %v10531_v45 = vcombine.low %v6707_v43, %v6711_v28  ;;  %v6472_v20 = vld [vmem:[%s15758_s3 + $0xa8] sm:$0xff]  ;;  %v6328_v43 = vld [vmem:[%s10746_s29 + $0x98] sm:$0xff] }
 0x2f9   : > { %8532 = vmatprep.subr.bf16.mxu1 %v10318_v21  ;;  %v14267_v60 = vrot.slane %v6377_v9, 1  ;;  %v10462_v8 = vcombine.high %v14256_v42, %v14261_v15  ;;  %v14280_v14 = vsel %vm6764_vm2, %v14193_v10, %v6790_v46  ;;  %v6374_v0 = vpack.c.bf16 %v6349_v6, %v6349_v6  ;;  %v6460_v23 = vld [vmem:[%s15758_s3 + $0x48] sm:$0xff] }
 0x2fa   : > { %8328 = vmatmul.mubr.bf16.gmra.mxu0 %v14220_v2  ;;  %v14284_v49 = vsel %vm6764_vm2, %v14195_v31, %v6794_v13  ;;  %v10301_v7 = vcombine.low %v6476_v56, %v6480_v29  ;;  %v14289_v39 = vsel %vm6764_vm2, %v14200_v4, %v14264_v52  ;;  %v6376_v35 = vpack.c.bf16 %v6351_v18, %v6351_v18  ;;  %v6464_v48 = vld [vmem:[%s15758_s3 + $0x68] sm:$0xff] }
 0x2fb   : > { %8409 = vmatmul.mubr.bf16.gmra.mxu1 %v14225_v19  ;;  %8337 = vmatprep.mubr.bf16.mxu0 %v14236_v36  ;;  %15973 = vst [vmem:[#allocation22_spill] sm:$0xff] %v14267_v60  ;;  %15974 = vst [vmem:[#allocation6_spill] sm:$0xff] %v14284_v49  ;;  %v10294_v1 = vcombine.high %v6468_v11, %v6472_v20  ;;  %v14293_v26 = vsel %vm6764_vm2, %v6796_v16, %v14267_v60  ;;  %v14304_v44 = vrot.slane %v6374_v0, 1  ;;  %v6452_v62 = vld [vmem:[%s15758_s3 + $0x8] sm:$0xff] }
 0x2fc   : > { %8533 = vmatpush1.bf16.msra.mxu1 %v10317_v33  ;;  %8418 = vmatprep.mubr.bf16.mxu1 %v14240_v34  ;;  %15975 = vst [vmem:[#allocation18_spill] sm:$0xff] %v14293_v26  ;;  %v10293_v10 = vcombine.low %v6468_v11, %v6472_v20  ;;  %v14307_v31 = vrot.slane %v6376_v35, 1  ;;  %v10286_v37 = vcombine.high %v6460_v23, %v6464_v48  ;;  %v6456_v4 = vld [vmem:[%s15758_s3 + $0x28] sm:$0xff] }
 0x2fd   : > { %8534 = vmatprep.subr.bf16.mxu1 %v10310_v38  ;;  %8460 = vmatpush1.bf16.msra.mxu0 %v10539_v41  ;;  %15976 = vst [vmem:[#allocation15_spill] sm:$0xff] %v14304_v44  ;;  %v14317_v3 = vsel %vm6764_vm2, %v6790_v46, %v14304_v44  ;;  %v10285_v50 = vcombine.low %v6460_v23, %v6464_v48  ;;  %v6572_v12 = vld [vmem:[%s15758_s3 + $0x3c8] sm:$0xff] }
 0x2fe   : > { %8461 = vmatprep.subr.bf16.mxu0 %v10532_v32  ;;  %15977 = vst [vmem:[#allocation19_spill] sm:$0xff] %v14307_v31  ;;  %v14321_v54 = vsel %vm6764_vm2, %v6794_v13, %v14307_v31  ;;  %v10278_v21 = vcombine.high %v6452_v62, %v6456_v4  ;;  %v6576_v5 = vld [vmem:[%s15758_s3 + $0x3e8] sm:$0xff]  ;;  %v10277_v59 = vcombine.low %v6452_v62, %v6456_v4 }
 0x2ff   : > { %15978 = vst [vmem:[#allocation11_spill] sm:$0xff] %v14321_v54  ;;  %v6318_v33 = vld [vmem:[%s10746_s29 + $0x48] sm:$0xff]  ;;  %v10398_v61 = vcombine.high %v6572_v12, %v6576_v5  ;;  %v6363_v29 = vpack.c.bf16 %v6328_v43, %v6323_v17  ;;  %v10397_v46 = vcombine.low %v6572_v12, %v6576_v5 }
 0x300   : > { %8535 = vmatpush1.bf16.msra.mxu1 %v10309_v40  ;;  %v6564_v38 = vld [vmem:[%s15758_s3 + $0x388] sm:$0xff]  ;;  %v6358_v56 = vpack.c.bf16 %v6318_v33, %v6313_v27 }
 0x301   : > { %8536 = vmatprep.subr.bf16.mxu1 %v10302_v24  ;;  %8462 = vmatpush1.bf16.msra.mxu0 %v10531_v45  ;;  %v6568_v41 = vld [vmem:[%s15758_s3 + $0x3a8] sm:$0xff]  ;;  %v6778_v20 = vrot.slane %v6363_v29, 1 }
 0x302   : > { %8338 = vmatmul.mubr.bf16.gmra.mxu0 %v14280_v14  ;;  %8609 = vmatprep.subr.bf16.mxu0 %v10462_v8  ;;  %v10390_v13 = vcombine.high %v6564_v38, %v6568_v41  ;;  %v6556_v24 = vld [vmem:[%s15758_s3 + $0x348] sm:$0xff]  ;;  %v6777_v11 = vrot.slane %v6358_v56, 1  ;;  %v10389_v0 = vcombine.low %v6564_v38, %v6568_v41 }
 0x303   : > { %8419 = vmatmul.mubr.bf16.gmra.mxu1 %v14284_v49  ;;  %8347 = vmatprep.mubr.bf16.mxu0 %v14289_v39  ;;  %v6560_v18 = vld [vmem:[%s15758_s3 + $0x368] sm:$0xff] }
 0x304   : > { %8537 = vmatpush1.bf16.msra.mxu1 %v10301_v7  ;;  %8428 = vmatprep.mubr.bf16.mxu1 %v14293_v26  ;;  %v6333_v7 = vld [vmem:[%s10746_s29 + $0xc0] sm:$0xff]  ;;  %v6338_v35 = vld [vmem:[%s10746_s29 + $0xe8] sm:$0xff]  ;;  %v10382_v23 = vcombine.high %v6556_v24, %v6560_v18  ;;  %v14398_v12 = vsel %vm6764_vm2, %v6777_v11, %v6778_v20  ;;  %v6343_v11 = vld [vmem:[%s10746_s29 + $0x110] sm:$0xff] }
 0x305   : > { %8538 = vmatprep.subr.bf16.mxu1 %v10294_v1  ;;  %v6628_v48 = vld [vmem:[%s15758_s3 + $0x588] sm:$0xff]  ;;  %15979 = vst [vmem:[#allocation8_spill] sm:$0xff] %v14398_v12  ;;  %v6368_v5 = vpack.c.bf16 %v6338_v35, %v6333_v7  ;;  %v6353_v26 = vld [vmem:[%s10746_s29 + $0x160] sm:$0xff] }
 0x306   : > { %v6548_v62 = vld [vmem:[%s15758_s3 + $0x308] sm:$0xff] }
 0x307   : > { %v6552_v4 = vld [vmem:[%s15758_s3 + $0x328] sm:$0xff] }
 0x308   : > { %8539 = vmatpush1.bf16.msra.mxu1 %v10293_v10  ;;  %v6632_v10 = vld [vmem:[%s15758_s3 + $0x5a8] sm:$0xff]  ;;  %v10374_v43 = vcombine.high %v6548_v62, %v6552_v4 }
 0x309   : > { %8540 = vmatprep.subr.bf16.mxu1 %v10286_v37  ;;  %v14324_v16 = vpop.f32.mrf.mxu0  ;;  %v10454_v33 = vcombine.high %v6628_v48, %v6632_v10  ;;  %v6540_v38 = vld [vmem:[%s15758_s3 + $0x2c8] sm:$0xff]  ;;  %v10453_v29 = vcombine.low %v6628_v48, %v6632_v10 }
 0x30a   : > { %8348 = vmatmul.mubr.bf16.gmra.mxu0 %v14317_v3  ;;  %v14333_v57 = vpop.f32.mrf.mxu1  ;;  %v6544_v41 = vld [vmem:[%s15758_s3 + $0x2e8] sm:$0xff] }
 0x30b   : > { %8429 = vmatmul.mubr.bf16.gmra.mxu1 %v14321_v54  ;;  %8357 = vmatprep.mubr.bf16.mxu0 %v14264_v52  ;;  %v14337_v53 = vpop.f32.mrf.mxu0  ;;  %v10366_v35 = vcombine.high %v6540_v38, %v6544_v41  ;;  %v6616_v48 = vld [vmem:[%s15758_s3 + $0x528] sm:$0xff] }
 0x30c   : > { %8541 = vmatpush1.bf16.msra.mxu1 %v10285_v50  ;;  %8438 = vmatprep.mubr.bf16.mxu1 %v14267_v60  ;;  %v14343_v28 = vpop.f32.mrf.mxu1 }
 0x30d   : > { %8542 = vmatprep.subr.bf16.mxu1 %v10278_v21  ;;  %v14345_v22 = vpop.f32.mrf.mxu0  ;;  %v10461_v21 = vcombine.low %v14256_v42, %v14261_v15  ;;  %v6624_v42 = vld [vmem:[%s15758_s3 + $0x568] sm:$0xff] }
 0x30e   : > { %v14353_v9 = vpop.f32.mrf.mxu1 }
 0x30f   : > { %v14355_v32 = vpop.f32.mrf.mxu0 }
 0x310   : > { %8543 = vmatpush1.bf16.msra.mxu1 %v10277_v59  ;;  %v14357_v40 = vpop.f32.mrf.mxu1  ;;  %v10381_v59 = vcombine.low %v6556_v24, %v6560_v18  ;;  %v10373_v24 = vcombine.low %v6548_v62, %v6552_v4  ;;  %v6532_v62 = vld [vmem:[%s15758_s3 + $0x288] sm:$0xff] }
 0x311   : > { %8544 = vmatprep.subr.bf16.mxu1 %v10398_v61  ;;  %v14360_v6 = vpop.f32.mrf.mxu0  ;;  %v6620_v61 = vld [vmem:[%s15758_s3 + $0x548] sm:$0xff] }
 0x312   : > { %8358 = vmatmul.mubr.bf16.gmra.mxu0 %v14304_v44  ;;  %v14369_v45 = vpop.f32.mrf.mxu1  ;;  %v10446_v18 = vcombine.high %v6620_v61, %v6624_v42  ;;  %v6536_v4 = vld [vmem:[%s15758_s3 + $0x2a8] sm:$0xff] }
 0x313   : > { %8439 = vmatmul.mubr.bf16.gmra.mxu1 %v14307_v31  ;;  %8479 = vmatprep.mubr.bf16.mxu0 %v15880_v51  ;;  %v14372_v8 = vpop.f32.mrf.mxu0  ;;  %v10358_v54 = vcombine.high %v6532_v62, %v6536_v4 }
 0x314   : > { %8545 = vmatpush2.bf16.msra.mxu1 %v10397_v46  ;;  %8560 = vmatprep.mubr.bf16.mxu1 %v13907_v25  ;;  %v14377_v1 = vpop.f32.mrf.mxu1  ;;  %v6788_v46 = vrot.slane %v6368_v5, 1  ;;  %v10445_v5 = vcombine.low %v6620_v61, %v6624_v42  ;;  %v10365_v25 = vcombine.low %v6540_v38, %v6544_v41  ;;  %v6524_v42 = vld [vmem:[%s15758_s3 + $0x248] sm:$0xff] }
 0x315   : > { %8546 = vmatprep.subr.bf16.mxu1 %v10390_v13  ;;  %v14385_v37 = vpop.f32.mrf.mxu0  ;;  %v6528_v38 = vld [vmem:[%s15758_s3 + $0x268] sm:$0xff] }
 0x316   : > { %v14393_v50 = vpop.f32.mrf.mxu1  ;;  %v10350_v34 = vcombine.high %v6524_v42, %v6528_v38  ;;  %v10349_v19 = vcombine.low %v6524_v42, %v6528_v38 }
 0x317   : > { %v14400_v27 = vpop.f32.mrf.mxu0 }
 0x318   : > { %8547 = vmatpush2.bf16.msra.mxu1 %v10389_v0  ;;  %v14402_v17 = vpop.f32.mrf.mxu1  ;;  %v6348_v0 = vld [vmem:[%s10746_s29 + $0x138] sm:$0xff] }
 0x319   : > { %8548 = vmatprep.subr.bf16.mxu1 %v10382_v23  ;;  %v14412_v15 = vpop.f32.mrf.mxu0  ;;  %v6612_v23 = vld [vmem:[%s15758_s3 + $0x508] sm:$0xff] }
 0x31a   : > { %10563 = vmatmul.mubr.msk.bf16.vlgmr.msra.gmra.mxu0 %vm2032_vm0, %v14398_v12  ;;  %v14420_v56 = vpop.f32.mrf.mxu1  ;;  %v10438_v31 = vcombine.high %v6612_v23, %v6616_v48 }
 0x31b   : > { %8610 = vmatpush1.bf16.msra.mxu0 %v10461_v21  ;;  %8489 = vmatprep.mubr.bf16.mxu0 %v15880_v51  ;;  %v14423_v13 = vpop.f32.mrf.mxu0 }
 0x31c   : > { %8549 = vmatpush2.bf16.msra.mxu1 %v10381_v59  ;;  %8611 = vmatprep.subr.bf16.mxu0 %v10454_v33  ;;  %v14427_v7 = vpop.f32.mrf.mxu1  ;;  %v14446_v59 = vsel %vm6764_vm2, %v6778_v20, %v6788_v46  ;;  %v6373_v33 = vpack.c.bf16 %v6348_v0, %v6343_v11  ;;  %v6608_v20 = vld [vmem:[%s15758_s3 + $0x4e8] sm:$0xff]  ;;  %v10357_v0 = vcombine.low %v6532_v62, %v6536_v4 }
 0x31d   : > { %8550 = vmatprep.subr.bf16.mxu1 %v10374_v43  ;;  %v14435_v10 = vpop.f32.mrf.mxu0  ;;  %15980 = vst [vmem:[#allocation3_spill] sm:$0xff] %v14446_v59 }
 0x31e   : > { %v14443_v21 = vpop.f32.mrf.mxu1 }
 0x31f   : > { %8612 = vmatpush1.bf16.msra.mxu0 %v10453_v29  ;;  %v14448_v43 = vpop.f32.mrf.mxu0  ;;  %v6604_v29 = vld [vmem:[%s15758_s3 + $0x4c8] sm:$0xff] }
 0x320   : > { %8551 = vmatpush2.bf16.msra.mxu1 %v10373_v24  ;;  %8613 = vmatprep.subr.bf16.mxu0 %v10446_v18  ;;  %v14450_v60 = vpop.f32.mrf.mxu1  ;;  %v10437_v24 = vcombine.low %v6612_v23, %v6616_v48  ;;  %v6798_v18 = vrot.slane %v6373_v33, 1  ;;  %v6600_v23 = vld [vmem:[%s15758_s3 + $0x4a8] sm:$0xff]  ;;  %v10429_v62 = vcombine.low %v6604_v29, %v6608_v20  ;;  %v6378_v33 = vpack.c.bf16 %v6353_v26, %v6353_v26 }
 0x321   : > { %8552 = vmatprep.subr.bf16.mxu1 %v10366_v35  ;;  %v14460_v61 = vpop.f32.mrf.mxu0  ;;  %v10430_v35 = vcombine.high %v6604_v29, %v6608_v20  ;;  %v6732_v29 = vld [vmem:[%s15758_s3 + $0x8c8] sm:$0xff] }
 0x322   : > { %10564 = vmatmul.mubr.msk.bf16.gmra.mxu0 %vm2032_vm0, %v14446_v59  ;;  %v14468_v41 = vpop.f32.mrf.mxu1  ;;  %v14493_v4 = vsel %vm6764_vm2, %v6788_v46, %v6798_v18  ;;  %v6592_v46 = vld [vmem:[%s15758_s3 + $0x468] sm:$0xff]  ;;  %v14518_v38 = vrot.slane %v6378_v33, 1 }
 0x323   : > { %8614 = vmatpush1.bf16.msra.mxu0 %v10445_v5  ;;  %8499 = vmatprep.mubr.bf16.mxu0 %v15880_v51  ;;  %v14471_v11 = vpop.f32.mrf.mxu0  ;;  %v6596_v5 = vld [vmem:[%s15758_s3 + $0x488] sm:$0xff]  ;;  %15981 = vst [vmem:[#allocation13_spill] sm:$0xff] %v14493_v4 }
 0x324   : > { %8553 = vmatpush2.bf16.msra.mxu1 %v10365_v25  ;;  %8615 = vmatprep.subr.bf16.mxu0 %v10438_v31  ;;  %v14474_v49 = vpop.f32.mrf.mxu1  ;;  %v6516_v25 = vld [vmem:[%s15758_s3 + $0x208] sm:$0xff]  ;;  %v10422_v58 = vcombine.high %v6596_v5, %v6600_v23  ;;  %v10421_v42 = vcombine.low %v6596_v5, %v6600_v23 }
 0x325   : > { %8554 = vmatprep.subr.bf16.mxu1 %v10358_v54  ;;  %v14482_v48 = vpop.f32.mrf.mxu0  ;;  %v6520_v31 = vld [vmem:[%s15758_s3 + $0x228] sm:$0xff] }
 0x326   : > { %v14490_v54 = vpop.f32.mrf.mxu1  ;;  %v10342_v30 = vcombine.high %v6516_v25, %v6520_v31  ;;  %v6584_v5 = vld [vmem:[%s15758_s3 + $0x428] sm:$0xff] }
 0x327   : > { %8616 = vmatpush1.bf16.msra.mxu0 %v10437_v24  ;;  %v14495_v59 = vpop.f32.mrf.mxu0  ;;  %v6588_v24 = vld [vmem:[%s15758_s3 + $0x448] sm:$0xff] }
 0x328   : > { %8555 = vmatpush2.bf16.msra.mxu1 %v10357_v0  ;;  %15982 = vst [vmem:[#allocation16_spill] sm:$0xff] %v14495_v59  ;;  %8617 = vmatprep.subr.bf16.mxu0 %v10430_v35  ;;  %v14497_v12 = vpop.f32.mrf.mxu1  ;;  %v10341_v35 = vcombine.low %v6516_v25, %v6520_v31  ;;  %v6728_v25 = vld [vmem:[%s15758_s3 + $0x8a8] sm:$0xff] }
 0x329   : > { %15983 = vst [vmem:[#allocation4_spill] sm:$0xff] %v14497_v12  ;;  %8556 = vmatprep.subr.bf16.mxu1 %v10350_v34  ;;  %v14507_v26 = vpop.f32.mrf.mxu0  ;;  %v6736_v34 = vld [vmem:[%s15758_s3 + $0x8e8] sm:$0xff] }
 0x32a   : > { %10565 = vmatmul.mubr.msk.bf16.gmra.mxu0 %vm2032_vm0, %v14493_v4  ;;  %15984 = vst [vmem:[#allocation5_spill] sm:$0xff] %v14507_v26  ;;  %v14515_v20 = vpop.f32.mrf.mxu1  ;;  %v10414_v4 = vcombine.high %v6588_v24, %v6592_v46  ;;  %v10558_v26 = vcombine.high %v6732_v29, %v6736_v34 }
 0x32b   : > { %8618 = vmatpush1.bf16.msra.mxu0 %v10429_v62  ;;  %15985 = vst [vmem:[#allocation21_spill] sm:$0xff] %v14515_v20  ;;  %8509 = vmatprep.mubr.bf16.mxu0 %v15880_v51  ;;  %v14520_v0 = vpop.f32.mrf.mxu0  ;;  %v6580_v62 = vld [vmem:[%s15758_s3 + $0x408] sm:$0xff] }
 0x32c   : > { %8557 = vmatpush2.bf16.msra.mxu1 %v10349_v19  ;;  %15986 = vst [vmem:[#allocation14_spill] sm:$0xff] %v14520_v0  ;;  %8619 = vmatprep.subr.bf16.mxu0 %v10422_v58  ;;  %v14522_v44 = vpop.f32.mrf.mxu1  ;;  %v10413_v19 = vcombine.low %v6588_v24, %v6592_v46  ;;  %v14532_v58 = vsel %vm6764_vm2, %v6798_v18, %v14518_v38  ;;  %v6700_v24 = vld [vmem:[%s15758_s3 + $0x7c8] sm:$0xff] }
 0x32d   : > { %15987 = vst [vmem:[#allocation7_spill] sm:$0xff] %v14522_v44  ;;  %8558 = vmatprep.subr.bf16.mxu1 %v10342_v30  ;;  %v5757_v23 = vpop.f32.mrf.mxu0  ;;  %15988 = vst [vmem:[#allocation23_spill] sm:$0xff] %v14532_v58  ;;  %v6724_v30 = vld [vmem:[%s15758_s3 + $0x888] sm:$0xff]  ;;  %v10557_v44 = vcombine.low %v6732_v29, %v6736_v34  ;;  %v5795_v18 = vadd.f32 %v14333_v57, %v14324_v16  ;;  %v10405_v34 = vcombine.low %v6580_v62, %v6584_v5 }
 0x32e   : > { %v5838_v31 = vpop.f32.mrf.mxu1  ;;  %v10406_v23 = vcombine.high %v6580_v62, %v6584_v5  ;;  %v6704_v46 = vld [vmem:[%s15758_s3 + $0x7e8] sm:$0xff]  ;;  %v10550_v57 = vcombine.high %v6724_v30, %v6728_v25  ;;  %v10549_v0 = vcombine.low %v6724_v30, %v6728_v25 }
 0x32f   : > { %8620 = vmatpush1.bf16.msra.mxu0 %v10421_v42  ;;  %v5758_v33 = vpop.f32.mrf.mxu0  ;;  %v3166_v31 = vld [vmem:[#allocation2 + $0xe8] sm:$0xff] }
 0x330   : > { %8559 = vmatpush2.bf16.msra.mxu1 %v10341_v35  ;;  %8621 = vmatprep.subr.bf16.mxu0 %v10414_v4  ;;  %v5839_v42 = vpop.f32.mrf.mxu1  ;;  %v14551_v35 = vld [vmem:[%s15758_s3 + $0x848] sm:$0xff] }
 0x331   : > { %8698 = vmatprep.subr.bf16.mxu1 %v10558_v26  ;;  %v14556_v4 = vld [vmem:[%s15758_s3 + $0x868] sm:$0xff]  ;;  %v5875_v16 = vpop.f32.mrf.mxu0  ;;  %v5797_v26 = vadd.f32 %v14343_v28, %v14337_v53  ;;  %v10526_v42 = vcombine.high %v6700_v24, %v6704_v46  ;;  %v3167_v28 = vld [vmem:[#allocation2 + $0xf0] sm:$0xff] }
 0x332   : > { %10566 = vmatmul.mubr.msk.bf16.gmra.mxu0 %vm2032_vm0, %v14532_v58  ;;  %v5876_v29 = vadd.f32 %v5875_v16, %v5795_v18  ;;  %v10542_v20 = vcombine.high %v14551_v35, %v14556_v4  ;;  %v5799_v58 = vadd.f32 %v14353_v9, %v14345_v22  ;;  %v6696_v53 = vld [vmem:[%s15758_s3 + $0x7a8] sm:$0xff]  ;;  %v5801_v22 = vadd.f32 %v14357_v40, %v14355_v32 }
 0x333   : > { %8561 = vmatmul.mubr.bf16.vlgmr.msra.gmra.mxu1 %v14138_v55  ;;  %8622 = vmatpush1.bf16.msra.mxu0 %v10413_v19  ;;  %v5877_v33 = vpop.f32.mrf.mxu0  ;;  %v10525_v19 = vcombine.low %v6700_v24, %v6704_v46  ;;  %v6708_v30 = vld [vmem:[%s15758_s3 + $0x808] sm:$0xff]  ;;  %v5805_v32 = vadd.f32 %v14369_v45, %v14360_v6  ;;  %v10541_v24 = vcombine.low %v14551_v35, %v14556_v4  ;;  %v3175_v46 = vld [vmem:[#allocation2 + $0x110] sm:$0xff] }
 0x334   : > { %8699 = vmatpush1.bf16.msra.mxu1 %v10557_v44  ;;  %8623 = vmatprep.subr.bf16.mxu0 %v10406_v23  ;;  %v6169_v12 = vadd.f32 %v5876_v29, %v3166_v31  ;;  %v5878_v59 = vadd.f32 %v5877_v33, %v5797_v26  ;;  %v6692_v44 = vld [vmem:[%s15758_s3 + $0x788] sm:$0xff]  ;;  %v14606_v35 = vld [vmem:[%s15758_s3 + $0x5f0] sm:$0xff]  ;;  %v5809_v31 = vadd.f32 %v14393_v50, %v14385_v37 }
 0x335   : > { %8519 = vmatprep.mubr.bf16.mxu0 %v15880_v51  ;;  %8570 = vmatprep.mubr.bf16.mxu1 %v14168_v63  ;;  %v5879_v62 = vpop.f32.mrf.mxu0  ;;  %v6712_v25 = vld [vmem:[%s15758_s3 + $0x828] sm:$0xff]  ;;  %v10518_v16 = vcombine.high %v6692_v44, %v6696_v53  ;;  %v10517_v45 = vcombine.low %v6692_v44, %v6696_v53  ;;  %v3182_v4 = vld [vmem:[#allocation2 + $0xd0] sm:$0xff]  ;;  %v5811_v50 = vadd.f32 %v14402_v17, %v14400_v27  ;;  %v3191_v17 = vld [vmem:[#allocation2 + $0x220] sm:$0xff] }
 0x336   : > { %8700 = vmatprep.subr.bf16.mxu1 %v10550_v57  ;;  %6241 = vst [vmem:[#allocation2 + $0xe8] sm:$0xff] %v6169_v12  ;;  %v6170_v9 = vadd.f32 %v5878_v59, %v3167_v28  ;;  %v5880_v5 = vadd.f32 %v5879_v62, %v5799_v58  ;;  %v3174_v23 = vld [vmem:[#allocation2 + $0x108] sm:$0xff]  ;;  %v5807_v57 = vadd.f32 %v14377_v1, %v14372_v8  ;;  %v3183_v28 = vld [vmem:[#allocation2 + $0x138] sm:$0xff] }
 0x337   : > { %8624 = vmatpush1.bf16.msra.mxu0 %v10405_v34  ;;  %v5881_v18 = vpop.f32.mrf.mxu0  ;;  %v6684_v59 = vld [vmem:[%s15758_s3 + $0x748] sm:$0xff]  ;;  %v10533_v1 = vcombine.low %v6708_v30, %v6712_v25 }
 0x338   : > { %8625 = vmatprep.subr.bf16.mxu0 %v10526_v42  ;;  %8701 = vmatpush1.bf16.msra.mxu1 %v10549_v0  ;;  %6242 = vst [vmem:[#allocation2 + $0xf0] sm:$0xff] %v6170_v9  ;;  %v6177_v40 = vadd.f32 %v5880_v5, %v3174_v23  ;;  %v5882_v12 = vadd.f32 %v5881_v18, %v5801_v22  ;;  %v6688_v58 = vld [vmem:[%s15758_s3 + $0x768] sm:$0xff] }
 0x339   : > { %8702 = vmatprep.subr.bf16.mxu1 %v10542_v20  ;;  %v5885_v6 = vpop.f32.mrf.mxu0  ;;  %v10534_v0 = vcombine.high %v6708_v30, %v6712_v25  ;;  %v14601_v20 = vld [vmem:[%s15758_s3 + $0x5d0] sm:$0xff]  ;;  %v10510_v8 = vcombine.high %v6684_v59, %v6688_v58  ;;  %v6676_v44 = vld [vmem:[%s15758_s3 + $0x708] sm:$0xff]  ;;  %v10509_v5 = vcombine.low %v6684_v59, %v6688_v58  ;;  %v5815_v23 = vadd.f32 %v14420_v56, %v14412_v15  ;;  %v3198_v58 = vld [vmem:[#allocation2 + $0x198] sm:$0xff] }
 0x33a   : > { %10567 = vmatmul.mubr.msk.bf16.gmra.mxu0 %vm2032_vm0, %v14518_v38  ;;  %6249 = vst [vmem:[#allocation2 + $0x108] sm:$0xff] %v6177_v40  ;;  %v6178_v26 = vadd.f32 %v5882_v12, %v3175_v46  ;;  %v5886_v29 = vadd.f32 %v5885_v6, %v5805_v32  ;;  %v6680_v53 = vld [vmem:[%s15758_s3 + $0x728] sm:$0xff]  ;;  %v10464_v37 = vcombine.high %v14601_v20, %v14606_v35 }
 0x33b   : > { %8571 = vmatmul.mubr.bf16.gmra.mxu1 %v14220_v2  ;;  %8626 = vmatpush2.bf16.msra.mxu0 %v10525_v19  ;;  %v5887_v34 = vpop.f32.mrf.mxu0  ;;  %v3190_v19 = vld [vmem:[#allocation2 + $0x1a8] sm:$0xff]  ;;  %v10502_v25 = vcombine.high %v6676_v44, %v6680_v53  ;;  %v10501_v12 = vcombine.low %v6676_v44, %v6680_v53  ;;  %v5817_v59 = vadd.f32 %v14427_v7, %v14423_v13 }
 0x33c   : > { %8627 = vmatprep.subr.bf16.mxu0 %v10518_v16  ;;  %8580 = vmatprep.mubr.bf16.mxu1 %v14236_v36  ;;  %6250 = vst [vmem:[#allocation2 + $0x110] sm:$0xff] %v6178_v26  ;;  %v6185_v33 = vadd.f32 %v5886_v29, %v3182_v4  ;;  %v5888_v42 = vadd.f32 %v5887_v34, %v5807_v57  ;;  %v6668_v32 = vld [vmem:[%s15758_s3 + $0x6c8] sm:$0xff]  ;;  %v3199_v57 = vld [vmem:[#allocation2 + $0xe0] sm:$0xff]  ;;  %v3206_v34 = vld [vmem:[#allocation2 + $0x50] sm:$0xff] }
 0x33d   : > { %8703 = vmatpush1.bf16.msra.mxu1 %v10541_v24  ;;  %8641 = vmatprep.mubr.bf16.mxu0 %v13911_v47  ;;  %v5889_v62 = vpop.f32.mrf.mxu0  ;;  %v6672_v27 = vld [vmem:[%s15758_s3 + $0x6e8] sm:$0xff]  ;;  %v5819_v6 = vadd.f32 %v14443_v21, %v14435_v10  ;;  %v5821_v29 = vadd.f32 %v14450_v60, %v14448_v43  ;;  %v3207_v43 = vld [vmem:[#allocation2 + $0x100] sm:$0xff] }
 0x33e   : > { %8704 = vmatprep.subr.bf16.mxu1 %v10534_v0  ;;  %6257 = vst [vmem:[#allocation2 + $0xd0] sm:$0xff] %v6185_v33  ;;  %v6186_v22 = vadd.f32 %v5888_v42, %v3183_v28  ;;  %v5890_v9 = vadd.f32 %v5889_v62, %v5809_v31  ;;  %v10494_v46 = vcombine.high %v6668_v32, %v6672_v27  ;;  %v6660_v13 = vld [vmem:[%s15758_s3 + $0x688] sm:$0xff] }
 0x33f   : > { %8628 = vmatpush2.bf16.msra.mxu0 %v10517_v45  ;;  %v5891_v30 = vpop.f32.mrf.mxu0  ;;  %v6664_v7 = vld [vmem:[%s15758_s3 + $0x6a8] sm:$0xff]  ;;  %v10493_v21 = vcombine.low %v6668_v32, %v6672_v27  ;;  %v5825_v31 = vadd.f32 %v14468_v41, %v14460_v61  ;;  %v5827_v62 = vadd.f32 %v14474_v49, %v14471_v11 }
 0x340   : > { %8629 = vmatprep.subr.bf16.mxu0 %v10510_v8  ;;  %6258 = vst [vmem:[#allocation2 + $0x138] sm:$0xff] %v6186_v22  ;;  %v6193_v18 = vadd.f32 %v5890_v9, %v3190_v19  ;;  %v5892_v16 = vadd.f32 %v5891_v30, %v5811_v50  ;;  %v6652_v44 = vld [vmem:[%s15758_s3 + $0x648] sm:$0xff]  ;;  %v10485_v28 = vcombine.low %v6660_v13, %v6664_v7  ;;  %v3214_v50 = vld [vmem:[#allocation2 + $0x1d8] sm:$0xff] }
 0x341   : > { %8705 = vmatpush1.bf16.msra.mxu1 %v10533_v1  ;;  %v5895_v40 = vpop.f32.mrf.mxu0  ;;  %v10486_v1 = vcombine.high %v6660_v13, %v6664_v7  ;;  %v6656_v60 = vld [vmem:[%s15758_s3 + $0x668] sm:$0xff]  ;;  %v6513_v13 = vld [vmem:[%s15758_s3 + $0x1f0] sm:$0xff] }
 0x342   : > { %8852 = vmatprep.subr.bf16.mxu1 %v10464_v37  ;;  %6265 = vst [vmem:[#allocation2 + $0x1a8] sm:$0xff] %v6193_v18  ;;  %v6194_v15 = vadd.f32 %v5892_v16, %v3191_v17  ;;  %v5896_v56 = vadd.f32 %v5895_v40, %v5815_v23  ;;  %v10478_v9 = vcombine.high %v6652_v44, %v6656_v60  ;;  %v6644_v30 = vld [vmem:[%s15758_s3 + $0x608] sm:$0xff]  ;;  %v3223_v7 = vld [vmem:[#allocation2 + $0x1d0] sm:$0xff] }
 0x343   : > { %8581 = vmatmul.mubr.bf16.gmra.mxu1 %v14280_v14  ;;  %8630 = vmatpush2.bf16.msra.mxu0 %v10509_v5  ;;  %v5897_v24 = vpop.f32.mrf.mxu0  ;;  %v5829_v5 = vadd.f32 %v14490_v54, %v14482_v48  ;;  %v3215_v23 = vld [vmem:[#allocation2 + $0x228] sm:$0xff]  ;;  %v10477_v40 = vcombine.low %v6652_v44, %v6656_v60 }
 0x344   : > { %8631 = vmatprep.subr.bf16.mxu0 %v10502_v25  ;;  %8590 = vmatprep.mubr.bf16.mxu1 %v14289_v39  ;;  %6266 = vst [vmem:[#allocation2 + $0x220] sm:$0xff] %v6194_v15  ;;  %v6201_v45 = vadd.f32 %v5896_v56, %v3198_v58  ;;  %v5898_v0 = vadd.f32 %v5897_v24, %v5817_v59  ;;  %v6648_v25 = vld [vmem:[%s15758_s3 + $0x628] sm:$0xff]  ;;  %v15991_v56 = vld [vmem:[#allocation5_spill] sm:$0xff] }
 0x345   : > { %v5899_v26 = vpop.f32.mrf.mxu0  ;;  %v15989_v16 = vld [vmem:[#allocation16_spill] sm:$0xff]  ;;  %v10470_v15 = vcombine.high %v6644_v30, %v6648_v25  ;;  %v15992_v58 = vld [vmem:[#allocation21_spill] sm:$0xff] }
 0x346   : > { %6273 = vst [vmem:[#allocation2 + $0x198] sm:$0xff] %v6201_v45  ;;  %v6202_v4 = vadd.f32 %v5898_v0, %v3199_v57  ;;  %v5900_v10 = vadd.f32 %v5899_v26, %v5819_v6  ;;  %v15990_v32 = vld [vmem:[#allocation4_spill] sm:$0xff]  ;;  %v5835_v24 = vadd.f32 %v15992_v58, %v15991_v56  ;;  %v6509_v0 = vld [vmem:[%s15758_s3 + $0x1d0] sm:$0xff]  ;;  %v10469_v26 = vcombine.low %v6644_v30, %v6648_v25 }
 0x347   : > { %8632 = vmatpush2.bf16.msra.mxu0 %v10501_v12  ;;  %v5901_v8 = vpop.f32.mrf.mxu0  ;;  %v5831_v27 = vadd.f32 %v15990_v32, %v15989_v16  ;;  %v3222_v12 = vld [vmem:[#allocation2 + $0x210] sm:$0xff]  ;;  %v15996_v32 = vld [vmem:[#allocation10_spill] sm:$0xff] }
 0x348   : > { %8633 = vmatprep.subr.bf16.mxu0 %v10494_v46  ;;  %6274 = vst [vmem:[#allocation2 + $0xe0] sm:$0xff] %v6202_v4  ;;  %v6209_v33 = vadd.f32 %v5900_v10, %v3206_v34  ;;  %v5902_v42 = vadd.f32 %v5901_v8, %v5821_v29  ;;  %v15993_v29 = vld [vmem:[#allocation14_spill] sm:$0xff]  ;;  %v15994_v4 = vld [vmem:[#allocation7_spill] sm:$0xff]  ;;  %v6497_v16 = vld [vmem:[%s15758_s3 + $0x170] sm:$0xff] }
 0x349   : > { %v5905_v53 = vpop.f32.mrf.mxu0  ;;  %v5837_v10 = vadd.f32 %v15994_v4, %v15993_v29  ;;  %v15995_v34 = vld [vmem:[#allocation15_spill] sm:$0xff]  ;;  %v6485_v58 = vld [vmem:[%s15758_s3 + $0x110] sm:$0xff] }
 0x34a   : > { %6281 = vst [vmem:[#allocation2 + $0x50] sm:$0xff] %v6209_v33  ;;  %v6210_v37 = vadd.f32 %v5902_v42, %v3207_v43  ;;  %v5906_v61 = vadd.f32 %v5905_v53, %v5825_v31  ;;  %v14655_v41 = vpop.f32.mrf.mxu1  ;;  %v3230_v31 = vld [vmem:[#allocation2 + $0x148] sm:$0x7f]  ;;  %v10336_v42 = vcombine.high %v6509_v0, %v6513_v13  ;;  %v6501_v53 = vld [vmem:[%s15758_s3 + $0x190] sm:$0xff] }
 0x34b   : > { %8591 = vmatmul.mubr.bf16.gmra.mxu1 %v14317_v3  ;;  %8634 = vmatpush2.bf16.msra.mxu0 %v10493_v21  ;;  %v5907_v22 = vpop.f32.mrf.mxu0  ;;  %v6477_v4 = vld [vmem:[%s15758_s3 + $0xd0] sm:$0xff] }
 0x34c   : > { %8635 = vmatprep.subr.bf16.mxu0 %v10486_v1  ;;  %8600 = vmatprep.mubr.bf16.mxu1 %v14264_v52  ;;  %6282 = vst [vmem:[#allocation2 + $0x100] sm:$0xff] %v6210_v37  ;;  %v6217_v19 = vadd.f32 %v5906_v61, %v3214_v50  ;;  %v5908_v49 = vadd.f32 %v5907_v22, %v5827_v62  ;;  %v14660_v11 = vpop.f32.mrf.mxu1  ;;  %v3231_v62 = vld [vmem:[#allocation2 + $0xa8] sm:$0x7f]  ;;  %v6629_v37 = vld [vmem:[%s15758_s3 + $0x590] sm:$0xff] }
 0x34d   : > { %v5909_v18 = vpop.f32.mrf.mxu0  ;;  %v6633_v61 = vld [vmem:[%s15758_s3 + $0x5b0] sm:$0xff] }
 0x34e   : > { %6289 = vst [vmem:[#allocation2 + $0x1d8] sm:$0xff] %v6217_v19  ;;  %v6218_v48 = vadd.f32 %v5908_v49, %v3215_v23  ;;  %v5910_v54 = vadd.f32 %v5909_v18, %v5829_v5  ;;  %v14670_v17 = vpop.f32.mrf.mxu1  ;;  %v10335_v5 = vcombine.low %v6509_v0, %v6513_v13  ;;  %v10463_v19 = vcombine.low %v14601_v20, %v14606_v35  ;;  %v6493_v18 = vld [vmem:[%s15758_s3 + $0x150] sm:$0xff] }
 0x34f   : > { %8636 = vmatpush2.bf16.msra.mxu0 %v10485_v28  ;;  %v5911_v59 = vpop.f32.mrf.mxu0  ;;  %v6505_v28 = vld [vmem:[%s15758_s3 + $0x1b0] sm:$0xff]  ;;  %v10456_v23 = vcombine.high %v6629_v37, %v6633_v61  ;;  %v10319_v13 = vcombine.low %v6493_v18, %v6497_v16 }
 0x350   : > { %8637 = vmatprep.subr.bf16.mxu0 %v10478_v9  ;;  %6290 = vst [vmem:[#allocation2 + $0x228] sm:$0xff] %v6218_v48  ;;  %v6225_v46 = vadd.f32 %v5910_v54, %v3222_v12  ;;  %v5912_v6 = vadd.f32 %v5911_v59, %v5831_v27  ;;  %v14674_v45 = vpop.f32.mrf.mxu1  ;;  %v10328_v49 = vcombine.high %v6501_v53, %v6505_v28  ;;  %v6621_v20 = vld [vmem:[%s15758_s3 + $0x550] sm:$0xff]  ;;  %v15997_v27 = vld [vmem:[#allocation8_spill] sm:$0xff] }
 0x351   : > { %v5915_v57 = vpop.f32.mrf.mxu0  ;;  %v6625_v35 = vld [vmem:[%s15758_s3 + $0x570] sm:$0xff]  ;;  %v10327_v54 = vcombine.low %v6501_v53, %v6505_v28  ;;  %v10320_v12 = vcombine.high %v6493_v18, %v6497_v16 }
 0x352   : > { %6297 = vst [vmem:[#allocation2 + $0x210] sm:$0xff] %v6225_v46  ;;  %v6226_v21 = vadd.f32 %v5912_v6, %v3223_v7  ;;  %v5916_v8 = vadd.f32 %v5915_v57, %v5835_v24  ;;  %v14685_v1 = vpop.f32.mrf.mxu1  ;;  %v10448_v56 = vcombine.high %v6621_v20, %v6625_v35  ;;  %v6489_v24 = vld [vmem:[%s15758_s3 + $0x130] sm:$0xff]  ;;  %v10447_v7 = vcombine.low %v6621_v20, %v6625_v35 }
 0x353   : > { %8601 = vmatmul.mubr.bf16.gmra.mxu1 %v15995_v34  ;;  %8638 = vmatpush2.bf16.msra.mxu0 %v10477_v40  ;;  %v5917_v33 = vpop.f32.mrf.mxu0  ;;  %v10455_v40 = vcombine.low %v6629_v37, %v6633_v61  ;;  %v6613_v46 = vld [vmem:[%s15758_s3 + $0x510] sm:$0xff]  ;;  %v10312_v57 = vcombine.high %v6485_v58, %v6489_v24 }
 0x354   : > { %8639 = vmatprep.subr.bf16.mxu0 %v10470_v15  ;;  %8722 = vmatprep.mubr.bf16.mxu1 %v15880_v51  ;;  %6298 = vst [vmem:[#allocation2 + $0x1d0] sm:$0xff] %v6226_v21  ;;  %v6233_v44 = vadd.f32 %v5916_v8, %v3230_v31  ;;  %v5918_v60 = vadd.f32 %v5917_v33, %v5837_v10  ;;  %v14688_v43 = vpop.f32.mrf.mxu1  ;;  %v15998_v15 = vld [vmem:[#allocation12_spill] sm:$0xff]  ;;  %v6617_v6 = vld [vmem:[%s15758_s3 + $0x530] sm:$0xff] }
 0x355   : > { %v5919_v50 = vpop.f32.mrf.mxu0  ;;  %v10440_v29 = vcombine.high %v6613_v46, %v6617_v6  ;;  %v6481_v10 = vld [vmem:[%s15758_s3 + $0xf0] sm:$0xff]  ;;  %v15999_v21 = vld [vmem:[#allocation20_spill] sm:$0xff] }
 0x356   : > { %6305 = vst [vmem:[#allocation2 + $0x148] sm:$0x7f] %v6233_v44  ;;  %v6234_v22 = vadd.f32 %v5918_v60, %v3231_v62  ;;  %v14702_v9 = vpop.f32.mrf.mxu1  ;;  %v6605_v8 = vld [vmem:[%s15758_s3 + $0x4d0] sm:$0xff]  ;;  %v10311_v44 = vcombine.low %v6485_v58, %v6489_v24  ;;  %v10439_v60 = vcombine.low %v6613_v46, %v6617_v6  ;;  %v10304_v53 = vcombine.high %v6477_v4, %v6481_v10 }
 0x357   : > { %8640 = vmatpush2.bf16.msra.mxu0 %v10469_v26  ;;  %v5920_v30 = vpop.f32.mrf.mxu0  ;;  %v6609_v31 = vld [vmem:[%s15758_s3 + $0x4f0] sm:$0xff] }
 0x358   : > { %8771 = vmatprep.subr.bf16.mxu0 %v10336_v42  ;;  %6306 = vst [vmem:[#allocation2 + $0xa8] sm:$0x7f] %v6234_v22  ;;  %v14706_v25 = vpop.f32.mrf.mxu1  ;;  %v16000_v42 = vld [vmem:[#allocation3_spill] sm:$0xff]  ;;  %v16001_v62 = vld [vmem:[#allocation17_spill] sm:$0xff]  ;;  %v10432_v37 = vcombine.high %v6605_v8, %v6609_v31  ;;  %v10431_v30 = vcombine.low %v6605_v8, %v6609_v31 }
 0x359   : > { %v6469_v61 = vld [vmem:[%s15758_s3 + $0x90] sm:$0xff] }
 0x35a   : > { %8642 = vmatmul.mubr.bf16.vlgmr.msra.gmra.mxu0 %v15996_v32  ;;  %v14723_v48 = vpop.f32.mrf.mxu1  ;;  %v6473_v50 = vld [vmem:[%s15758_s3 + $0xb0] sm:$0xff] }
 0x35b   : > { %10568 = vmatmul.mubr.msk.bf16.vlgmr.msra.gmra.mxu1 %vm2032_vm0, %v15997_v27  ;;  %8772 = vmatpush1.bf16.msra.mxu0 %v10335_v5  ;;  %v6597_v22 = vld [vmem:[%s15758_s3 + $0x490] sm:$0xff]  ;;  %v10295_v24 = vcombine.low %v6469_v61, %v6473_v50 }
 0x35c   : > { %8853 = vmatpush1.bf16.msra.mxu1 %v10463_v19  ;;  %8773 = vmatprep.subr.bf16.mxu0 %v10328_v49  ;;  %v14725_v59 = vpop.f32.mrf.mxu1  ;;  %v6601_v5 = vld [vmem:[%s15758_s3 + $0x4b0] sm:$0xff]  ;;  %v10303_v49 = vcombine.low %v6477_v4, %v6481_v10 }
 0x35d   : > { %8854 = vmatprep.subr.bf16.mxu1 %v10456_v23  ;;  %8651 = vmatprep.mubr.bf16.mxu0 %v15998_v15  ;;  %v10296_v23 = vcombine.high %v6469_v61, %v6473_v50  ;;  %v10424_v16 = vcombine.high %v6597_v22, %v6601_v5  ;;  %v6461_v20 = vld [vmem:[%s15758_s3 + $0x50] sm:$0xff]  ;;  %v10423_v46 = vcombine.low %v6597_v22, %v6601_v5  ;;  %v16005_v5 = vld [vmem:[#allocation11_spill] sm:$0xff] }
 0x35e   : > { %8732 = vmatprep.mubr.bf16.mxu1 %v15880_v51  ;;  %v14741_v0 = vpop.f32.mrf.mxu1  ;;  %v6465_v35 = vld [vmem:[%s15758_s3 + $0x70] sm:$0xff] }
 0x35f   : > { %8774 = vmatpush1.bf16.msra.mxu0 %v10327_v54  ;;  %v16002_v54 = vld [vmem:[#allocation6_spill] sm:$0xff]  ;;  %v16003_v58 = vld [vmem:[#allocation13_spill] sm:$0xff]  ;;  %v10288_v6 = vcombine.high %v6461_v20, %v6465_v35 }
 0x360   : > { %8855 = vmatpush1.bf16.msra.mxu1 %v10455_v40  ;;  %8775 = vmatprep.subr.bf16.mxu0 %v10320_v12  ;;  %v14743_v26 = vpop.f32.mrf.mxu1  ;;  %v6589_v40 = vld [vmem:[%s15758_s3 + $0x450] sm:$0xff] }
 0x361   : > { %8856 = vmatprep.subr.bf16.mxu1 %v10448_v56  ;;  %v6593_v12 = vld [vmem:[%s15758_s3 + $0x470] sm:$0xff] }
 0x362   : > { %8652 = vmatmul.mubr.bf16.gmra.mxu0 %v15999_v21  ;;  %v14758_v33 = vpop.f32.mrf.mxu1  ;;  %v6457_v4 = vld [vmem:[%s15758_s3 + $0x30] sm:$0xff] }
 0x363   : > { %8776 = vmatpush1.bf16.msra.mxu0 %v10319_v13  ;;  %10569 = vmatmul.mubr.msk.bf16.gmra.mxu1 %vm2032_vm0, %v16000_v42  ;;  %v6581_v10 = vld [vmem:[%s15758_s3 + $0x410] sm:$0xff] }
 0x364   : > { %8857 = vmatpush1.bf16.msra.mxu1 %v10447_v7  ;;  %8777 = vmatprep.subr.bf16.mxu0 %v10312_v57  ;;  %v14762_v28 = vpop.f32.mrf.mxu1  ;;  %v16004_v7 = vld [vmem:[#allocation18_spill] sm:$0xff]  ;;  %v10416_v57 = vcombine.high %v6589_v40, %v6593_v12  ;;  %v6585_v8 = vld [vmem:[%s15758_s3 + $0x430] sm:$0xff] }
 0x365   : > { %8858 = vmatprep.subr.bf16.mxu1 %v10440_v29  ;;  %8661 = vmatprep.mubr.bf16.mxu0 %v16001_v62  ;;  %v6453_v29 = vld [vmem:[%s15758_s3 + $0x10] sm:$0xff]  ;;  %v10408_v61 = vcombine.high %v6581_v10, %v6585_v8 }
 0x366   : > { %8742 = vmatprep.mubr.bf16.mxu1 %v15880_v51  ;;  %v14778_v19 = vpop.f32.mrf.mxu1  ;;  %v6573_v50 = vld [vmem:[%s15758_s3 + $0x3d0] sm:$0xff] }
 0x367   : > { %8778 = vmatpush1.bf16.msra.mxu0 %v10311_v44  ;;  %v10287_v44 = vcombine.low %v6461_v20, %v6465_v35  ;;  %v6577_v22 = vld [vmem:[%s15758_s3 + $0x3f0] sm:$0xff]  ;;  %v16006_v35 = vld [vmem:[#allocation23_spill] sm:$0xff] }
 0x368   : > { %8859 = vmatpush1.bf16.msra.mxu1 %v10439_v60  ;;  %8779 = vmatprep.subr.bf16.mxu0 %v10304_v53  ;;  %v14780_v18 = vpop.f32.mrf.mxu1  ;;  %v10415_v60 = vcombine.low %v6589_v40, %v6593_v12  ;;  %v10280_v53 = vcombine.high %v6453_v29, %v6457_v4  ;;  %v10279_v40 = vcombine.low %v6453_v29, %v6457_v4  ;;  %v14841_v29 = vld [vmem:[%s15758_s3 + $0x3b0] sm:$0xff] }
 0x369   : > { %8860 = vmatprep.subr.bf16.mxu1 %v10432_v37  ;;  %v3168_v4 = vld [vmem:[#allocation2 + $0x70] sm:$0xff] }
 0x36a   : > { %8662 = vmatmul.mubr.bf16.gmra.mxu0 %v16002_v54  ;;  %v14795_v56 = vpop.f32.mrf.mxu1  ;;  %v14860_v42 = vld [vmem:[%s15758_s3 + $0x350] sm:$0xff] }
 0x36b   : > { %8780 = vmatpush1.bf16.msra.mxu0 %v10303_v49  ;;  %10570 = vmatmul.mubr.msk.bf16.gmra.mxu1 %vm2032_vm0, %v16003_v58 }
 0x36c   : > { %8861 = vmatpush1.bf16.msra.mxu1 %v10431_v30  ;;  %8781 = vmatprep.subr.bf16.mxu0 %v10296_v23  ;;  %v14799_v13 = vpop.f32.mrf.mxu1  ;;  %v6701_v30 = vld [vmem:[%s15758_s3 + $0x7d0] sm:$0xff] }
 0x36d   : > { %8862 = vmatprep.subr.bf16.mxu1 %v10424_v16  ;;  %8671 = vmatprep.mubr.bf16.mxu0 %v16004_v7  ;;  %v6705_v23 = vld [vmem:[%s15758_s3 + $0x7f0] sm:$0xff] }
 0x36e   : > { %8752 = vmatprep.mubr.bf16.mxu1 %v15880_v51  ;;  %v6000_v31 = vpop.f32.mrf.mxu1  ;;  %v10528_v58 = vcombine.high %v6701_v30, %v6705_v23 }
 0x36f   : > { %8782 = vmatpush1.bf16.msra.mxu0 %v10295_v24  ;;  %v10407_v24 = vcombine.low %v6581_v10, %v6585_v8  ;;  %v14852_v8 = vld [vmem:[%s15758_s3 + $0x7b0] sm:$0xff] }
 0x370   : > { %8863 = vmatpush1.bf16.msra.mxu1 %v10423_v46  ;;  %8783 = vmatprep.subr.bf16.mxu0 %v10288_v6  ;;  %v6001_v37 = vpop.f32.mrf.mxu1  ;;  %v10400_v46 = vcombine.high %v6573_v50, %v6577_v22 }
 0x371   : > { %8864 = vmatprep.subr.bf16.mxu1 %v10416_v57  ;;  %v6037_v49 = vpop.f32.mrf.mxu0  ;;  %v16007_v37 = vld [vmem:[#allocation22_spill] sm:$0xff] }
 0x372   : > { %8672 = vmatmul.mubr.bf16.gmra.mxu0 %v16005_v5  ;;  %v6038_v16 = vadd.f32 %v6037_v49, %v14655_v41  ;;  %v6118_v20 = vpop.f32.mrf.mxu1  ;;  %v14836_v41 = vld [vmem:[%s15758_s3 + $0x390] sm:$0xff]  ;;  %v10399_v49 = vcombine.low %v6573_v50, %v6577_v22 }
 0x373   : > { %8784 = vmatpush1.bf16.msra.mxu0 %v10287_v44  ;;  %10571 = vmatmul.mubr.msk.bf16.gmra.mxu1 %vm2032_vm0, %v16006_v35  ;;  %v6039_v12 = vpop.f32.mrf.mxu0  ;;  %v10392_v35 = vcombine.high %v14836_v41, %v14841_v29  ;;  %v14868_v22 = vld [vmem:[%s15758_s3 + $0x370] sm:$0xff] }
 0x374   : > { %8865 = vmatpush1.bf16.msra.mxu1 %v10415_v60  ;;  %8785 = vmatprep.subr.bf16.mxu0 %v10280_v53  ;;  %v6119_v6 = vadd.f32 %v6118_v20, %v6038_v16  ;;  %v6040_v57 = vadd.f32 %v6039_v12, %v14660_v11  ;;  %v6120_v31 = vpop.f32.mrf.mxu1  ;;  %v14847_v11 = vld [vmem:[%s15758_s3 + $0x790] sm:$0xff]  ;;  %v3169_v16 = vld [vmem:[#allocation2 + $0x120] sm:$0xff]  ;;  %v10527_v12 = vcombine.low %v6701_v30, %v6705_v23 }
 0x375   : > { %8866 = vmatprep.subr.bf16.mxu1 %v10408_v61  ;;  %8681 = vmatprep.mubr.bf16.mxu0 %v16007_v37  ;;  %v6041_v10 = vpop.f32.mrf.mxu0  ;;  %v10520_v50 = vcombine.high %v14847_v11, %v14852_v8  ;;  %v14873_v30 = vld [vmem:[%s15758_s3 + $0x750] sm:$0xff] }
 0x376   : > { %8762 = vmatprep.mubr.bf16.mxu1 %v15880_v51  ;;  %v6171_v44 = vadd.f32 %v6119_v6, %v3168_v4  ;;  %v6121_v60 = vadd.f32 %v6120_v31, %v6040_v57  ;;  %v6042_v53 = vadd.f32 %v6041_v10, %v14670_v17  ;;  %v6122_v61 = vpop.f32.mrf.mxu1  ;;  %v14878_v23 = vld [vmem:[%s15758_s3 + $0x770] sm:$0xff] }
 0x377   : > { %8786 = vmatpush1.bf16.msra.mxu0 %v10279_v40  ;;  %v6043_v20 = vpop.f32.mrf.mxu0 }
 0x378   : > { %8867 = vmatpush1.bf16.msra.mxu1 %v10407_v24  ;;  %8787 = vmatprep.subr.bf16.mxu0 %v10400_v46  ;;  %6243 = vst [vmem:[#allocation2 + $0x70] sm:$0xff] %v6171_v44  ;;  %v6172_v6 = vadd.f32 %v6121_v60, %v3169_v16  ;;  %v6123_v57 = vadd.f32 %v6122_v61, %v6042_v53  ;;  %v6124_v40 = vpop.f32.mrf.mxu1  ;;  %v3177_v60 = vld [vmem:[#allocation2 + $0xb8] sm:$0xff] }
 0x379   : > { %v6044_v17 = vadd.f32 %v6043_v20, %v14674_v45  ;;  %8868 = vmatprep.subr.bf16.mxu1 %v10528_v58  ;;  %v3176_v45 = vld [vmem:[#allocation2 + $0x1f8] sm:$0xff]  ;;  %v16008_v58 = vld [vmem:[#allocation19_spill] sm:$0xff]  ;;  %v6047_v24 = vpop.f32.mrf.mxu0  ;;  %v10391_v46 = vcombine.low %v14836_v41, %v14841_v29  ;;  %v10519_v61 = vcombine.low %v14847_v11, %v14852_v8  ;;  %v10384_v41 = vcombine.high %v14860_v42, %v14868_v22  ;;  %v14901_v11 = vld [vmem:[%s15758_s3 + $0x330] sm:$0xff] }
 0x37a   : > { %8682 = vmatmul.mubr.bf16.gmra.mxu0 %v16008_v58  ;;  %6244 = vst [vmem:[#allocation2 + $0x120] sm:$0xff] %v6172_v6  ;;  %v6179_v31 = vadd.f32 %v6123_v57, %v3176_v45  ;;  %v6048_v10 = vadd.f32 %v6047_v24, %v14685_v1  ;;  %v6128_v44 = vpop.f32.mrf.mxu1  ;;  %v10512_v29 = vcombine.high %v14873_v30, %v14878_v23  ;;  %v16009_v8 = vld [vmem:[#allocation9_spill] sm:$0xff] }
 0x37b   : > { %v6125_v4 = vadd.f32 %v6124_v40, %v6044_v17  ;;  %8788 = vmatpush2.bf16.msra.mxu0 %v10399_v49  ;;  %10572 = vmatmul.mubr.msk.bf16.gmra.mxu1 %vm2032_vm0, %v14518_v38  ;;  %v6049_v53 = vpop.f32.mrf.mxu0  ;;  %v6681_v57 = vld [vmem:[%s15758_s3 + $0x730] sm:$0xff]  ;;  %v10383_v24 = vcombine.low %v14860_v42, %v14868_v22 }
 0x37c   : > { %8869 = vmatpush2.bf16.msra.mxu1 %v10527_v12  ;;  %8789 = vmatprep.subr.bf16.mxu0 %v10392_v35  ;;  %6251 = vst [vmem:[#allocation2 + $0x1f8] sm:$0xff] %v6179_v31  ;;  %v6050_v49 = vadd.f32 %v6049_v53, %v14688_v43  ;;  %v6129_v16 = vadd.f32 %v6128_v44, %v6048_v10  ;;  %v6130_v20 = vpop.f32.mrf.mxu1  ;;  %v14896_v35 = vld [vmem:[%s15758_s3 + $0x310] sm:$0xff]  ;;  %v3184_v12 = vld [vmem:[#allocation2 + $0x60] sm:$0xff]  ;;  %v3185_v31 = vld [vmem:[#allocation2 + $0x1b8] sm:$0xff] }
 0x37d   : > { %v6180_v1 = vadd.f32 %v6125_v4, %v3177_v60  ;;  %8870 = vmatprep.subr.bf16.mxu1 %v10520_v50  ;;  %8803 = vmatprep.mubr.bf16.mxu0 %v16009_v8  ;;  %v6051_v6 = vpop.f32.mrf.mxu0  ;;  %v14907_v43 = vld [vmem:[%s15758_s3 + $0x710] sm:$0xff]  ;;  %v10511_v10 = vcombine.low %v14873_v30, %v14878_v23  ;;  %v10376_v44 = vcombine.high %v14896_v35, %v14901_v11  ;;  %v3192_v30 = vld [vmem:[#allocation2 + $0x1e8] sm:$0xff] }
 0x37e   : > { %8884 = vmatprep.mubr.bf16.mxu1 %v13911_v47  ;;  %v6187_v17 = vadd.f32 %v6129_v16, %v3184_v12  ;;  %v6052_v40 = vadd.f32 %v6051_v6, %v14702_v9  ;;  %v6131_v50 = vadd.f32 %v6130_v20, %v6050_v49  ;;  %v6132_v45 = vpop.f32.mrf.mxu1  ;;  %v6541_v42 = vld [vmem:[%s15758_s3 + $0x2d0] sm:$0xff]  ;;  %v10375_v20 = vcombine.low %v14896_v35, %v14901_v11  ;;  %v3193_v12 = vld [vmem:[#allocation2 + $0x1c8] sm:$0xff]  ;;  %v3200_v11 = vld [vmem:[#allocation2 + $0x1e0] sm:$0xff] }
 0x37f   : > { %6252 = vst [vmem:[#allocation2 + $0xb8] sm:$0xff] %v6180_v1  ;;  %8790 = vmatpush2.bf16.msra.mxu0 %v10391_v46  ;;  %v6053_v4 = vpop.f32.mrf.mxu0  ;;  %v10504_v1 = vcombine.high %v14907_v43, %v6681_v57  ;;  %v6545_v22 = vld [vmem:[%s15758_s3 + $0x2f0] sm:$0xff] }
 0x380   : > { %8871 = vmatpush2.bf16.msra.mxu1 %v10519_v61  ;;  %8791 = vmatprep.subr.bf16.mxu0 %v10384_v41  ;;  %6259 = vst [vmem:[#allocation2 + $0x60] sm:$0xff] %v6187_v17  ;;  %v6188_v60 = vadd.f32 %v6131_v50, %v3185_v31  ;;  %v6054_v9 = vadd.f32 %v6053_v4, %v14706_v25  ;;  %v6134_v46 = vpop.f32.mrf.mxu1  ;;  %v6669_v61 = vld [vmem:[%s15758_s3 + $0x6d0] sm:$0xff] }
 0x381   : > { %v6133_v53 = vadd.f32 %v6132_v45, %v6052_v40  ;;  %8872 = vmatprep.subr.bf16.mxu1 %v10512_v29  ;;  %v6057_v23 = vpop.f32.mrf.mxu0  ;;  %v6673_v25 = vld [vmem:[%s15758_s3 + $0x6f0] sm:$0xff]  ;;  %v10503_v17 = vcombine.low %v14907_v43, %v6681_v57  ;;  %v10368_v40 = vcombine.high %v6541_v42, %v6545_v22 }
 0x382   : > { %6260 = vst [vmem:[#allocation2 + $0x1b8] sm:$0xff] %v6188_v60  ;;  %v6058_v29 = vadd.f32 %v6057_v23, %v14723_v48  ;;  %v6135_v49 = vadd.f32 %v6134_v46, %v6054_v9  ;;  %v6138_v16 = vpop.f32.mrf.mxu1  ;;  %v10496_v4 = vcombine.high %v6669_v61, %v6673_v25  ;;  %v6537_v35 = vld [vmem:[%s15758_s3 + $0x2b0] sm:$0xff] }
 0x383   : > { %v6195_v41 = vadd.f32 %v6133_v53, %v3192_v30  ;;  %8792 = vmatpush2.bf16.msra.mxu0 %v10383_v24  ;;  %v6059_v6 = vpop.f32.mrf.mxu0  ;;  %v6533_v24 = vld [vmem:[%s15758_s3 + $0x290] sm:$0xff]  ;;  %v10367_v53 = vcombine.low %v6541_v42, %v6545_v22  ;;  %v10495_v30 = vcombine.low %v6669_v61, %v6673_v25 }
 0x384   : > { %8873 = vmatpush2.bf16.msra.mxu1 %v10511_v10  ;;  %8793 = vmatprep.subr.bf16.mxu0 %v10376_v44  ;;  %v6196_v50 = vadd.f32 %v6135_v49, %v3193_v12  ;;  %v6060_v45 = vadd.f32 %v6059_v6, %v14725_v59  ;;  %v6139_v31 = vadd.f32 %v6138_v16, %v6058_v29  ;;  %v6140_v48 = vpop.f32.mrf.mxu1  ;;  %v6661_v43 = vld [vmem:[%s15758_s3 + $0x690] sm:$0xff] }
 0x385   : > { %6267 = vst [vmem:[#allocation2 + $0x1e8] sm:$0xff] %v6195_v41  ;;  %8874 = vmatprep.subr.bf16.mxu1 %v10504_v1  ;;  %v6061_v10 = vpop.f32.mrf.mxu0  ;;  %v6665_v59 = vld [vmem:[%s15758_s3 + $0x6b0] sm:$0xff]  ;;  %v10360_v23 = vcombine.high %v6533_v24, %v6537_v35 }
 0x386   : > { %6268 = vst [vmem:[#allocation2 + $0x1c8] sm:$0xff] %v6196_v50  ;;  %v6203_v57 = vadd.f32 %v6139_v31, %v3200_v11  ;;  %v6062_v44 = vadd.f32 %v6061_v10, %v14741_v0  ;;  %v6141_v60 = vadd.f32 %v6140_v48, %v6060_v45  ;;  %v6142_v9 = vpop.f32.mrf.mxu1  ;;  %v3201_v46 = vld [vmem:[#allocation2 + $0x1f0] sm:$0xff]  ;;  %v10488_v12 = vcombine.high %v6661_v43, %v6665_v59 }
 0x387   : > { %8794 = vmatpush2.bf16.msra.mxu0 %v10375_v20  ;;  %v6063_v1 = vpop.f32.mrf.mxu0  ;;  %v6525_v0 = vld [vmem:[%s15758_s3 + $0x250] sm:$0xff]  ;;  %v10359_v50 = vcombine.low %v6533_v24, %v6537_v35  ;;  %v10487_v48 = vcombine.low %v6661_v43, %v6665_v59  ;;  %v3216_v35 = vld [vmem:[#allocation2 + $0x218] sm:$0xff] }
 0x388   : > { %8875 = vmatpush2.bf16.msra.mxu1 %v10503_v17  ;;  %8795 = vmatprep.subr.bf16.mxu0 %v10368_v40  ;;  %6275 = vst [vmem:[#allocation2 + $0x1e0] sm:$0xff] %v6203_v57  ;;  %v6204_v41 = vadd.f32 %v6141_v60, %v3201_v46  ;;  %v6064_v29 = vadd.f32 %v6063_v1, %v14743_v26  ;;  %v6144_v16 = vpop.f32.mrf.mxu1  ;;  %v6529_v42 = vld [vmem:[%s15758_s3 + $0x270] sm:$0xff] }
 0x389   : > { %v6143_v49 = vadd.f32 %v6142_v9, %v6062_v44  ;;  %8876 = vmatprep.subr.bf16.mxu1 %v10496_v4  ;;  %v3208_v22 = vld [vmem:[#allocation2 + $0x30] sm:$0xff]  ;;  %v6067_v20 = vpop.f32.mrf.mxu0  ;;  %v10352_v4 = vcombine.high %v6525_v0, %v6529_v42 }
 0x38a   : > { %v6653_v61 = vld [vmem:[%s15758_s3 + $0x650] sm:$0xff]  ;;  %6276 = vst [vmem:[#allocation2 + $0x1f0] sm:$0xff] %v6204_v41  ;;  %v6068_v6 = vadd.f32 %v6067_v20, %v14758_v33  ;;  %v6145_v17 = vadd.f32 %v6144_v16, %v6064_v29  ;;  %v6148_v40 = vpop.f32.mrf.mxu1 }
 0x38b   : > { %v6657_v26 = vld [vmem:[%s15758_s3 + $0x670] sm:$0xff]  ;;  %v6211_v25 = vadd.f32 %v6143_v49, %v3208_v22  ;;  %8796 = vmatpush2.bf16.msra.mxu0 %v10367_v53  ;;  %v6069_v31 = vpop.f32.mrf.mxu0 }
 0x38c   : > { %v3209_v45 = vld [vmem:[#allocation2 + $0x1b0] sm:$0xff]  ;;  %8877 = vmatpush2.bf16.msra.mxu1 %v10495_v30  ;;  %8797 = vmatprep.subr.bf16.mxu0 %v10360_v23  ;;  %v6070_v10 = vadd.f32 %v6069_v31, %v14762_v28  ;;  %v6149_v57 = vadd.f32 %v6148_v40, %v6068_v6  ;;  %v6150_v44 = vpop.f32.mrf.mxu1  ;;  %v10480_v60 = vcombine.high %v6653_v61, %v6657_v26  ;;  %v3217_v23 = vld [vmem:[#allocation2 + $0x200] sm:$0xff] }
 0x38d   : > { %6283 = vst [vmem:[#allocation2 + $0x30] sm:$0xff] %v6211_v25  ;;  %v6212_v11 = vadd.f32 %v6145_v17, %v3209_v45  ;;  %8878 = vmatprep.subr.bf16.mxu1 %v10488_v12  ;;  %v6517_v33 = vld [vmem:[%s15758_s3 + $0x210] sm:$0xff]  ;;  %v6071_v9 = vpop.f32.mrf.mxu0  ;;  %v10351_v30 = vcombine.low %v6525_v0, %v6529_v42  ;;  %v10479_v29 = vcombine.low %v6653_v61, %v6657_v26  ;;  %v3224_v42 = vld [vmem:[#allocation2 + $0x168] sm:$0xff]  ;;  %v6510_v61 = vld [vmem:[%s15758_s3 + $0x1d8] sm:$0xff] }
 0x38e   : > { %v6521_v24 = vld [vmem:[%s15758_s3 + $0x230] sm:$0xff]  ;;  %v6219_v59 = vadd.f32 %v6149_v57, %v3216_v35  ;;  %v6072_v53 = vadd.f32 %v6071_v9, %v14778_v19  ;;  %v6151_v46 = vadd.f32 %v6150_v44, %v6070_v10  ;;  %v6152_v1 = vpop.f32.mrf.mxu1  ;;  %v3225_v31 = vld [vmem:[#allocation2 + $0xc0] sm:$0xff] }
 0x38f   : > { %v6645_v43 = vld [vmem:[%s15758_s3 + $0x610] sm:$0xff]  ;;  %6284 = vst [vmem:[#allocation2 + $0x1b0] sm:$0xff] %v6212_v11  ;;  %8798 = vmatpush2.bf16.msra.mxu0 %v10359_v50  ;;  %v6073_v41 = vpop.f32.mrf.mxu0  ;;  %v10344_v49 = vcombine.high %v6517_v33, %v6521_v24  ;;  %v10343_v45 = vcombine.low %v6517_v33, %v6521_v24  ;;  %v6506_v33 = vld [vmem:[%s15758_s3 + $0x1b8] sm:$0xff] }
 0x390   : > { %v6649_v28 = vld [vmem:[%s15758_s3 + $0x630] sm:$0xff]  ;;  %8879 = vmatpush2.bf16.msra.mxu1 %v10487_v48  ;;  %8799 = vmatprep.subr.bf16.mxu0 %v10352_v4  ;;  %6291 = vst [vmem:[#allocation2 + $0x218] sm:$0xff] %v6219_v59  ;;  %v6220_v16 = vadd.f32 %v6151_v46, %v3217_v23  ;;  %v6074_v12 = vadd.f32 %v6073_v41, %v14780_v18  ;;  %v6154_v20 = vpop.f32.mrf.mxu1  ;;  %v6514_v18 = vld [vmem:[%s15758_s3 + $0x1f8] sm:$0xff] }
 0x391   : > { %v6153_v22 = vadd.f32 %v6152_v1, %v6072_v53  ;;  %8880 = vmatprep.subr.bf16.mxu1 %v10480_v60  ;;  %v10472_v25 = vcombine.high %v6645_v43, %v6649_v28  ;;  %v6733_v19 = vld [vmem:[%s15758_s3 + $0x8d0] sm:$0xff]  ;;  %v6077_v6 = vpop.f32.mrf.mxu0  ;;  %v10471_v4 = vcombine.low %v6645_v43, %v6649_v28  ;;  %v10338_v35 = vcombine.high %v6510_v61, %v6514_v18  ;;  %v3233_v1 = vld [vmem:[#allocation2 + $0xa0] sm:$0x7f] }
 0x392   : > { %v6737_v0 = vld [vmem:[%s15758_s3 + $0x8f0] sm:$0xff]  ;;  %6292 = vst [vmem:[#allocation2 + $0x200] sm:$0xff] %v6220_v16  ;;  %v6078_v17 = vadd.f32 %v6077_v6, %v14795_v56  ;;  %v6155_v40 = vadd.f32 %v6154_v20, %v6074_v12  ;;  %v6502_v56 = vld [vmem:[%s15758_s3 + $0x198] sm:$0xff] }
 0x393   : > { %v6227_v26 = vadd.f32 %v6153_v22, %v3224_v42  ;;  %8800 = vmatpush2.bf16.msra.mxu0 %v10351_v30  ;;  %v6158_v50 = vpop.f32.mrf.mxu1  ;;  %v6079_v48 = vpop.f32.mrf.mxu0  ;;  %v10560_v11 = vcombine.high %v6733_v19, %v6737_v0  ;;  %v3232_v9 = vld [vmem:[#allocation2 + $0x150] sm:$0x7f]  ;;  %v10559_v59 = vcombine.low %v6733_v19, %v6737_v0  ;;  %v10337_v30 = vcombine.low %v6510_v61, %v6514_v18  ;;  %v6494_v22 = vld [vmem:[%s15758_s3 + $0x158] sm:$0xff] }
 0x394   : > { %8881 = vmatpush2.bf16.msra.mxu1 %v10479_v29  ;;  %8801 = vmatprep.subr.bf16.mxu0 %v10344_v49  ;;  %v6228_v10 = vadd.f32 %v6155_v40, %v3225_v31  ;;  %v6080_v57 = vadd.f32 %v6079_v48, %v14799_v13  ;;  %v6159_v44 = vadd.f32 %v6158_v50, %v6078_v17  ;;  %v6725_v13 = vld [vmem:[%s15758_s3 + $0x890] sm:$0xff]  ;;  %v6498_v20 = vld [vmem:[%s15758_s3 + $0x178] sm:$0xff] }
 0x395   : > { %6299 = vst [vmem:[#allocation2 + $0x168] sm:$0xff] %v6227_v26  ;;  %8882 = vmatprep.subr.bf16.mxu1 %v10472_v25  ;;  %v6160_v60 = vpop.f32.mrf.mxu1  ;;  %v6081_v24 = vpop.f32.mrf.mxu0  ;;  %v6729_v53 = vld [vmem:[%s15758_s3 + $0x8b0] sm:$0xff]  ;;  %v10330_v29 = vcombine.high %v6502_v56, %v6506_v33  ;;  %v10329_v0 = vcombine.low %v6502_v56, %v6506_v33  ;;  %v10322_v6 = vcombine.high %v6494_v22, %v6498_v20  ;;  %v6486_v61 = vld [vmem:[%s15758_s3 + $0x118] sm:$0xff] }
 0x396   : > { %6300 = vst [vmem:[#allocation2 + $0xc0] sm:$0xff] %v6228_v10  ;;  %v6235_v43 = vadd.f32 %v6159_v44, %v3232_v9  ;;  %v6161_v28 = vadd.f32 %v6160_v60, %v6080_v57  ;;  %v6717_v16 = vld [vmem:[%s15758_s3 + $0x850] sm:$0xff]  ;;  %v10552_v25 = vcombine.high %v6725_v13, %v6729_v53  ;;  %v10551_v19 = vcombine.low %v6725_v13, %v6729_v53  ;;  %v6490_v18 = vld [vmem:[%s15758_s3 + $0x138] sm:$0xff] }
 0x397   : > { %8802 = vmatpush2.bf16.msra.mxu0 %v10343_v45  ;;  %v6162_v46 = vpop.f32.mrf.mxu1  ;;  %v6082_v23 = vpop.f32.mrf.mxu0  ;;  %v6721_v12 = vld [vmem:[%s15758_s3 + $0x870] sm:$0xff]  ;;  %v10321_v40 = vcombine.low %v6494_v22, %v6498_v20  ;;  %v10314_v50 = vcombine.high %v6486_v61, %v6490_v18  ;;  %v6478_v31 = vld [vmem:[%s15758_s3 + $0xd8] sm:$0xff]  ;;  %v10313_v57 = vcombine.low %v6486_v61, %v6490_v18 }
 0x398   : > { %8883 = vmatpush2.bf16.msra.mxu1 %v10471_v4  ;;  %8941 = vmatprep.subr.bf16.mxu0 %v10560_v11  ;;  %6307 = vst [vmem:[#allocation2 + $0x150] sm:$0x7f] %v6235_v43  ;;  %v6236_v41 = vadd.f32 %v6161_v28, %v3233_v1  ;;  %v10544_v42 = vcombine.high %v6717_v16, %v6721_v12  ;;  %v6709_v26 = vld [vmem:[%s15758_s3 + $0x810] sm:$0xff]  ;;  %v6482_v48 = vld [vmem:[%s15758_s3 + $0xf8] sm:$0xff] }
 0x399   : > { %9014 = vmatprep.subr.bf16.mxu1 %v10338_v35  ;;  %v6163_v49 = vpop.f32.mrf.mxu1  ;;  %v6713_v17 = vld [vmem:[%s15758_s3 + $0x830] sm:$0xff]  ;;  %v10543_v45 = vcombine.low %v6717_v16, %v6721_v12  ;;  %v15047_v11 = vld [vmem:[%s15758_s3 + $0x5d8] sm:$0xff]  ;;  %v10306_v44 = vcombine.high %v6478_v31, %v6482_v48  ;;  %v10305_v33 = vcombine.low %v6478_v31, %v6482_v48 }
 0x39a   : > { %8804 = vmatmul.mubr.bf16.vlgmr.msra.gmra.mxu0 %v14138_v55  ;;  %6308 = vst [vmem:[#allocation2 + $0xa0] sm:$0x7f] %v6236_v41  ;;  %v10536_v4 = vcombine.high %v6709_v26, %v6713_v17  ;;  %v15052_v10 = vld [vmem:[%s15758_s3 + $0x5f8] sm:$0xff]  ;;  %v10535_v60 = vcombine.low %v6709_v26, %v6713_v17 }
 0x39b   : > { %8885 = vmatmul.mubr.bf16.vlgmr.msra.gmra.mxu1 %v15996_v32  ;;  %8942 = vmatpush1.bf16.msra.mxu0 %v10559_v59  ;;  %v6470_v35 = vld [vmem:[%s15758_s3 + $0x98] sm:$0xff]  ;;  %v10466_v56 = vcombine.high %v15047_v11, %v15052_v10 }
 0x39c   : > { %9015 = vmatpush1.bf16.msra.mxu1 %v10337_v30  ;;  %8813 = vmatprep.mubr.bf16.mxu0 %v14168_v63  ;;  %v6474_v9 = vld [vmem:[%s15758_s3 + $0xb8] sm:$0xff] }
 0x39d   : > { %9016 = vmatprep.subr.bf16.mxu1 %v10330_v29  ;;  %8894 = vmatprep.mubr.bf16.mxu1 %v15998_v15  ;;  %v10298_v24 = vcombine.high %v6470_v35, %v6474_v9  ;;  %v6462_v43 = vld [vmem:[%s15758_s3 + $0x58] sm:$0xff]  ;;  %v10297_v59 = vcombine.low %v6470_v35, %v6474_v9  ;;  %v16013_v15 = vld [vmem:[#allocation13_spill] sm:$0xff] }
 0x39e   : > { %8943 = vmatprep.subr.bf16.mxu0 %v10552_v25  ;;  %v6466_v28 = vld [vmem:[%s15758_s3 + $0x78] sm:$0xff] }
 0x39f   : > { %8944 = vmatpush1.bf16.msra.mxu0 %v10551_v19  ;;  %v10290_v13 = vcombine.high %v6462_v43, %v6466_v28  ;;  %v6454_v53 = vld [vmem:[%s15758_s3 + $0x18] sm:$0xff]  ;;  %v10289_v1 = vcombine.low %v6462_v43, %v6466_v28 }
 0x3a0   : > { %9017 = vmatpush1.bf16.msra.mxu1 %v10329_v0  ;;  %8945 = vmatprep.subr.bf16.mxu0 %v10544_v42  ;;  %v6458_v46 = vld [vmem:[%s15758_s3 + $0x38] sm:$0xff] }
 0x3a1   : > { %9018 = vmatprep.subr.bf16.mxu1 %v10322_v6  ;;  %v10282_v30 = vcombine.high %v6454_v53, %v6458_v46  ;;  %v6574_v41 = vld [vmem:[%s15758_s3 + $0x3d8] sm:$0xff]  ;;  %v10281_v12 = vcombine.low %v6454_v53, %v6458_v46 }
 0x3a2   : > { %8814 = vmatmul.mubr.bf16.gmra.mxu0 %v14220_v2  ;;  %v6578_v29 = vld [vmem:[%s15758_s3 + $0x3f8] sm:$0xff] }
 0x3a3   : > { %8895 = vmatmul.mubr.bf16.gmra.mxu1 %v15999_v21  ;;  %8823 = vmatprep.mubr.bf16.mxu0 %v14236_v36  ;;  %v10402_v20 = vcombine.high %v6574_v41, %v6578_v29  ;;  %v6566_v19 = vld [vmem:[%s15758_s3 + $0x398] sm:$0xff]  ;;  %v10401_v61 = vcombine.low %v6574_v41, %v6578_v29 }
 0x3a4   : > { %9019 = vmatpush1.bf16.msra.mxu1 %v10321_v40  ;;  %8904 = vmatprep.mubr.bf16.mxu1 %v16001_v62  ;;  %v6570_v0 = vld [vmem:[%s15758_s3 + $0x3b8] sm:$0xff] }
 0x3a5   : > { %9020 = vmatprep.subr.bf16.mxu1 %v10314_v50  ;;  %8946 = vmatpush1.bf16.msra.mxu0 %v10543_v45  ;;  %v10394_v26 = vcombine.high %v6566_v19, %v6570_v0  ;;  %v6558_v40 = vld [vmem:[%s15758_s3 + $0x358] sm:$0xff]  ;;  %v10393_v48 = vcombine.low %v6566_v19, %v6570_v0 }
 0x3a6   : > { %8947 = vmatprep.subr.bf16.mxu0 %v10536_v4  ;;  %v6562_v50 = vld [vmem:[%s15758_s3 + $0x378] sm:$0xff] }
 0x3a7   : > { %v6550_v9 = vld [vmem:[%s15758_s3 + $0x318] sm:$0xff]  ;;  %v10385_v43 = vcombine.low %v6558_v40, %v6562_v50 }
 0x3a8   : > { %9021 = vmatpush1.bf16.msra.mxu1 %v10313_v57  ;;  %v10386_v57 = vcombine.high %v6558_v40, %v6562_v50  ;;  %v6622_v53 = vld [vmem:[%s15758_s3 + $0x558] sm:$0xff] }
 0x3a9   : > { %9022 = vmatprep.subr.bf16.mxu1 %v10306_v44  ;;  %8948 = vmatpush1.bf16.msra.mxu0 %v10535_v60  ;;  %v6630_v44 = vld [vmem:[%s15758_s3 + $0x598] sm:$0xff] }
 0x3aa   : > { %8824 = vmatmul.mubr.bf16.gmra.mxu0 %v14280_v14  ;;  %9095 = vmatprep.subr.bf16.mxu0 %v10466_v56  ;;  %v6634_v60 = vld [vmem:[%s15758_s3 + $0x5b8] sm:$0xff] }
 0x3ab   : > { %8905 = vmatmul.mubr.bf16.gmra.mxu1 %v16002_v54  ;;  %8833 = vmatprep.mubr.bf16.mxu0 %v14289_v39  ;;  %v10458_v28 = vcombine.high %v6630_v44, %v6634_v60  ;;  %v6626_v46 = vld [vmem:[%s15758_s3 + $0x578] sm:$0xff]  ;;  %v10457_v41 = vcombine.low %v6630_v44, %v6634_v60 }
 0x3ac   : > { %9023 = vmatpush1.bf16.msra.mxu1 %v10305_v33  ;;  %8914 = vmatprep.mubr.bf16.mxu1 %v16004_v7  ;;  %v10465_v33 = vcombine.low %v15047_v11, %v15052_v10  ;;  %v6542_v10 = vld [vmem:[%s15758_s3 + $0x2d8] sm:$0xff]  ;;  %v10449_v44 = vcombine.low %v6622_v53, %v6626_v46 }
 0x3ad   : > { %9024 = vmatprep.subr.bf16.mxu1 %v10298_v24  ;;  %v6534_v50 = vld [vmem:[%s15758_s3 + $0x298] sm:$0xff] }
 0x3ae   : > { %v6598_v7 = vld [vmem:[%s15758_s3 + $0x498] sm:$0xff] }
 0x3af   : > { %v6590_v21 = vld [vmem:[%s15758_s3 + $0x458] sm:$0xff] }
 0x3b0   : > { %9025 = vmatpush1.bf16.msra.mxu1 %v10297_v59 }
 0x3b1   : > { %9026 = vmatprep.subr.bf16.mxu1 %v10290_v13 }
 0x3b2   : > { %8834 = vmatmul.mubr.bf16.gmra.mxu0 %v14317_v3  ;;  %v15080_v23 = vpop.f32.mrf.mxu0 }
 0x3b3   : > { %8915 = vmatmul.mubr.bf16.gmra.mxu1 %v16005_v5  ;;  %v15089_v49 = vpop.f32.mrf.mxu1  ;;  %8843 = vmatprep.mubr.bf16.mxu0 %v14264_v52 }
 0x3b4   : > { %9027 = vmatpush1.bf16.msra.mxu1 %v10289_v1  ;;  %v15092_v16 = vpop.f32.mrf.mxu0  ;;  %8924 = vmatprep.mubr.bf16.mxu1 %v16007_v37  ;;  %v6546_v1 = vld [vmem:[%s15758_s3 + $0x2f8] sm:$0xff] }
 0x3b5   : > { %v15095_v22 = vpop.f32.mrf.mxu1  ;;  %9028 = vmatprep.subr.bf16.mxu1 %v10282_v30  ;;  %v10370_v0 = vcombine.high %v6542_v10, %v6546_v1 }
 0x3b6   : > { %v15097_v25 = vpop.f32.mrf.mxu0 }
 0x3b7   : > { %v15105_v42 = vpop.f32.mrf.mxu1 }
 0x3b8   : > { %9029 = vmatpush1.bf16.msra.mxu1 %v10281_v12  ;;  %v15107_v6 = vpop.f32.mrf.mxu0 }
 0x3b9   : > { %v15109_v18 = vpop.f32.mrf.mxu1  ;;  %9030 = vmatprep.subr.bf16.mxu1 %v10402_v20  ;;  %v10450_v20 = vcombine.high %v6622_v53, %v6626_v46  ;;  %v6526_v46 = vld [vmem:[%s15758_s3 + $0x258] sm:$0xff] }
 0x3ba   : > { %8844 = vmatmul.mubr.bf16.gmra.mxu0 %v15995_v34  ;;  %v15112_v17 = vpop.f32.mrf.mxu0  ;;  %v6582_v34 = vld [vmem:[%s15758_s3 + $0x418] sm:$0xff] }
 0x3bb   : > { %8925 = vmatmul.mubr.bf16.gmra.mxu1 %v16008_v58  ;;  %v15121_v45 = vpop.f32.mrf.mxu1  ;;  %8965 = vmatprep.mubr.bf16.mxu0 %v15880_v51 }
 0x3bc   : > { %9031 = vmatpush2.bf16.msra.mxu1 %v10401_v61  ;;  %v15124_v31 = vpop.f32.mrf.mxu0  ;;  %9046 = vmatprep.mubr.bf16.mxu1 %v16009_v8  ;;  %v6554_v8 = vld [vmem:[%s15758_s3 + $0x338] sm:$0xff] }
 0x3bd   : > { %v15127_v4 = vpop.f32.mrf.mxu1  ;;  %9032 = vmatprep.subr.bf16.mxu1 %v10394_v26  ;;  %v10378_v13 = vcombine.high %v6550_v9, %v6554_v8  ;;  %v10377_v12 = vcombine.low %v6550_v9, %v6554_v8  ;;  %v6614_v61 = vld [vmem:[%s15758_s3 + $0x518] sm:$0xff]  ;;  %v10369_v9 = vcombine.low %v6542_v10, %v6546_v1 }
 0x3be   : > { %v15135_v35 = vpop.f32.mrf.mxu0  ;;  %v6618_v26 = vld [vmem:[%s15758_s3 + $0x538] sm:$0xff] }
 0x3bf   : > { %v15143_v56 = vpop.f32.mrf.mxu1  ;;  %v10442_v8 = vcombine.high %v6614_v61, %v6618_v26  ;;  %v6530_v10 = vld [vmem:[%s15758_s3 + $0x278] sm:$0xff] }
 0x3c0   : > { %9033 = vmatpush2.bf16.msra.mxu1 %v10393_v48  ;;  %v15147_v24 = vpop.f32.mrf.mxu0  ;;  %v6538_v48 = vld [vmem:[%s15758_s3 + $0x2b8] sm:$0xff]  ;;  %v10354_v5 = vcombine.high %v6526_v46, %v6530_v10 }
 0x3c1   : > { %v15149_v59 = vpop.f32.mrf.mxu1  ;;  %9034 = vmatprep.subr.bf16.mxu1 %v10386_v57 }
 0x3c2   : > { %10573 = vmatmul.mubr.msk.bf16.vlgmr.msra.gmra.mxu0 %vm2032_vm0, %v15997_v27  ;;  %v15159_v11 = vpop.f32.mrf.mxu0 }
 0x3c3   : > { %9096 = vmatpush1.bf16.msra.mxu0 %v10465_v33  ;;  %v15167_v30 = vpop.f32.mrf.mxu1  ;;  %8975 = vmatprep.mubr.bf16.mxu0 %v15880_v51 }
 0x3c4   : > { %9035 = vmatpush2.bf16.msra.mxu1 %v10385_v43  ;;  %v15170_v29 = vpop.f32.mrf.mxu0  ;;  %9097 = vmatprep.subr.bf16.mxu0 %v10458_v28  ;;  %v10362_v43 = vcombine.high %v6534_v50, %v6538_v48  ;;  %v6606_v28 = vld [vmem:[%s15758_s3 + $0x4d8] sm:$0xff] }
 0x3c5   : > { %v15172_v19 = vpop.f32.mrf.mxu1  ;;  %9036 = vmatprep.subr.bf16.mxu1 %v10378_v13  ;;  %v6610_v13 = vld [vmem:[%s15758_s3 + $0x4f8] sm:$0xff] }
 0x3c6   : > { %v15180_v40 = vpop.f32.mrf.mxu0  ;;  %v10434_v58 = vcombine.high %v6606_v28, %v6610_v13 }
 0x3c7   : > { %9098 = vmatpush1.bf16.msra.mxu0 %v10457_v41  ;;  %v15188_v57 = vpop.f32.mrf.mxu1  ;;  %v16010_v41 = vld [vmem:[#allocation3_spill] sm:$0xff] }
 0x3c8   : > { %9037 = vmatpush2.bf16.msra.mxu1 %v10377_v12  ;;  %v15190_v60 = vpop.f32.mrf.mxu0  ;;  %9099 = vmatprep.subr.bf16.mxu0 %v10450_v20  ;;  %v10441_v12 = vcombine.low %v6614_v61, %v6618_v26  ;;  %v6602_v61 = vld [vmem:[%s15758_s3 + $0x4b8] sm:$0xff] }
 0x3c9   : > { %v15192_v33 = vpop.f32.mrf.mxu1  ;;  %9038 = vmatprep.subr.bf16.mxu1 %v10370_v0  ;;  %v10361_v0 = vcombine.low %v6534_v50, %v6538_v48  ;;  %v6522_v50 = vld [vmem:[%s15758_s3 + $0x238] sm:$0xff]  ;;  %v10426_v54 = vcombine.high %v6598_v7, %v6602_v61 }
 0x3ca   : > { %10574 = vmatmul.mubr.msk.bf16.gmra.mxu0 %vm2032_vm0, %v16010_v41  ;;  %v15202_v53 = vpop.f32.mrf.mxu0 }
 0x3cb   : > { %9100 = vmatpush1.bf16.msra.mxu0 %v10449_v44  ;;  %v15210_v1 = vpop.f32.mrf.mxu1  ;;  %8985 = vmatprep.mubr.bf16.mxu0 %v15880_v51  ;;  %v6518_v44 = vld [vmem:[%s15758_s3 + $0x218] sm:$0xff] }
 0x3cc   : > { %9039 = vmatpush2.bf16.msra.mxu1 %v10369_v9  ;;  %v15213_v20 = vpop.f32.mrf.mxu0  ;;  %9101 = vmatprep.subr.bf16.mxu0 %v10442_v8  ;;  %v10433_v9 = vcombine.low %v6606_v28, %v6610_v13  ;;  %v10346_v41 = vcombine.high %v6518_v44, %v6522_v50 }
 0x3cd   : > { %v15215_v37 = vpop.f32.mrf.mxu1  ;;  %9040 = vmatprep.subr.bf16.mxu1 %v10362_v43  ;;  %v10353_v43 = vcombine.low %v6526_v46, %v6530_v10  ;;  %v10425_v46 = vcombine.low %v6598_v7, %v6602_v61  ;;  %v6586_v7 = vld [vmem:[%s15758_s3 + $0x438] sm:$0xff] }
 0x3ce   : > { %v15223_v26 = vpop.f32.mrf.mxu0 }
 0x3cf   : > { %9102 = vmatpush1.bf16.msra.mxu0 %v10441_v12  ;;  %v15231_v48 = vpop.f32.mrf.mxu1  ;;  %v6594_v12 = vld [vmem:[%s15758_s3 + $0x478] sm:$0xff] }
 0x3d0   : > { %9041 = vmatpush2.bf16.msra.mxu1 %v10361_v0  ;;  %v15233_v8 = vpop.f32.mrf.mxu0  ;;  %9103 = vmatprep.subr.bf16.mxu0 %v10434_v58  ;;  %v6734_v58 = vld [vmem:[%s15758_s3 + $0x8d8] sm:$0xff]  ;;  %v10345_v0 = vcombine.low %v6518_v44, %v6522_v50 }
 0x3d1   : > { %16011 = vst [vmem:[#allocation16_spill] sm:$0xff] %v15233_v8  ;;  %v15235_v62 = vpop.f32.mrf.mxu1  ;;  %9042 = vmatprep.subr.bf16.mxu1 %v10354_v5  ;;  %v6738_v5 = vld [vmem:[%s15758_s3 + $0x8f8] sm:$0xff] }
 0x3d2   : > { %16012 = vst [vmem:[#allocation4_spill] sm:$0xff] %v15235_v62  ;;  %10575 = vmatmul.mubr.msk.bf16.gmra.mxu0 %vm2032_vm0, %v16013_v15  ;;  %v15245_v28 = vpop.f32.mrf.mxu0  ;;  %v10418_v15 = vcombine.high %v6590_v21, %v6594_v12  ;;  %v10562_v32 = vcombine.high %v6734_v58, %v6738_v5 }
 0x3d3   : > { %16014 = vst [vmem:[#allocation5_spill] sm:$0xff] %v15245_v28  ;;  %9104 = vmatpush1.bf16.msra.mxu0 %v10433_v9  ;;  %v15253_v13 = vpop.f32.mrf.mxu1  ;;  %8995 = vmatprep.mubr.bf16.mxu0 %v15880_v51  ;;  %v10417_v9 = vcombine.low %v6590_v21, %v6594_v12  ;;  %v8401_v21 = vadd.f32 %v15089_v49, %v15080_v23  ;;  %v6706_v12 = vld [vmem:[%s15758_s3 + $0x7f8] sm:$0xff] }
 0x3d4   : > { %16015 = vst [vmem:[#allocation21_spill] sm:$0xff] %v15253_v13  ;;  %9043 = vmatpush2.bf16.msra.mxu1 %v10353_v43  ;;  %v15256_v10 = vpop.f32.mrf.mxu0  ;;  %9105 = vmatprep.subr.bf16.mxu0 %v10426_v54  ;;  %v6726_v54 = vld [vmem:[%s15758_s3 + $0x898] sm:$0xff]  ;;  %v10561_v43 = vcombine.low %v6734_v58, %v6738_v5  ;;  %v16018_v58 = vld [vmem:[#allocation23_spill] sm:$0xff]  ;;  %v8403_v49 = vadd.f32 %v15095_v22, %v15092_v16 }
 0x3d5   : > { %16016 = vst [vmem:[#allocation14_spill] sm:$0xff] %v15256_v10  ;;  %v15258_v27 = vpop.f32.mrf.mxu1  ;;  %9044 = vmatprep.subr.bf16.mxu1 %v10346_v41  ;;  %v6730_v41 = vld [vmem:[%s15758_s3 + $0x8b8] sm:$0xff]  ;;  %v8407_v22 = vadd.f32 %v15109_v18, %v15107_v6 }
 0x3d6   : > { %16017 = vst [vmem:[#allocation7_spill] sm:$0xff] %v15258_v27  ;;  %v8363_v61 = vpop.f32.mrf.mxu0  ;;  %v10410_v27 = vcombine.high %v6582_v34, %v6586_v7  ;;  %v10553_v13 = vcombine.low %v6726_v54, %v6730_v41 }
 0x3d7   : > { %9106 = vmatpush1.bf16.msra.mxu0 %v10425_v46  ;;  %v8444_v44 = vpop.f32.mrf.mxu1  ;;  %v6702_v61 = vld [vmem:[%s15758_s3 + $0x7d8] sm:$0xff] }
 0x3d8   : > { %9045 = vmatpush2.bf16.msra.mxu1 %v10345_v0  ;;  %v8364_v50 = vpop.f32.mrf.mxu0  ;;  %9107 = vmatprep.subr.bf16.mxu0 %v10418_v15  ;;  %v15283_v0 = vld [vmem:[%s15758_s3 + $0x858] sm:$0xff]  ;;  %v10409_v44 = vcombine.low %v6582_v34, %v6586_v7  ;;  %v10530_v10 = vcombine.high %v6702_v61, %v6706_v12  ;;  %v10529_v7 = vcombine.low %v6702_v61, %v6706_v12 }
 0x3d9   : > { %9184 = vmatprep.subr.bf16.mxu1 %v10562_v32  ;;  %v8445_v46 = vpop.f32.mrf.mxu1  ;;  %v15288_v15 = vld [vmem:[%s15758_s3 + $0x878] sm:$0xff]  ;;  %v10554_v32 = vcombine.high %v6726_v54, %v6730_v41  ;;  %v6379_v50 = vld [vmem:[#allocation2 + $0xc8] sm:$0xff]  ;;  %v8413_v12 = vadd.f32 %v15127_v4, %v15124_v31 }
 0x3da   : > { %10576 = vmatmul.mubr.msk.bf16.gmra.mxu0 %vm2032_vm0, %v16018_v58  ;;  %v8481_v23 = vpop.f32.mrf.mxu0  ;;  %v10546_v28 = vcombine.high %v15283_v0, %v15288_v15  ;;  %v8405_v58 = vadd.f32 %v15105_v42, %v15097_v25  ;;  %v6698_v34 = vld [vmem:[%s15758_s3 + $0x7b8] sm:$0xff] }
 0x3db   : > { %9047 = vmatmul.mubr.bf16.vlgmr.msra.gmra.mxu1 %v14138_v55  ;;  %9108 = vmatpush1.bf16.msra.mxu0 %v10417_v9  ;;  %v8482_v5 = vadd.f32 %v8481_v23, %v8401_v21  ;;  %v6694_v55 = vld [vmem:[%s15758_s3 + $0x798] sm:$0xff]  ;;  %v10545_v21 = vcombine.low %v15283_v0, %v15288_v15 }
 0x3dc   : > { %9185 = vmatpush1.bf16.msra.mxu1 %v10561_v43  ;;  %v8483_v46 = vpop.f32.mrf.mxu0  ;;  %9109 = vmatprep.subr.bf16.mxu0 %v10410_v27  ;;  %v6380_v27 = vld [vmem:[#allocation2 + $0x8] sm:$0xff]  ;;  %v6714_v9 = vld [vmem:[%s15758_s3 + $0x838] sm:$0xff]  ;;  %v10522_v43 = vcombine.high %v6694_v55, %v6698_v34 }
 0x3dd   : > { %v9257_v62 = vadd.f32 %v8482_v5, %v6379_v50  ;;  %v8484_v8 = vadd.f32 %v8483_v46, %v8403_v49  ;;  %9005 = vmatprep.mubr.bf16.mxu0 %v15880_v51  ;;  %9056 = vmatprep.mubr.bf16.mxu1 %v14168_v63  ;;  %v6710_v63 = vld [vmem:[%s15758_s3 + $0x818] sm:$0xff]  ;;  %v8415_v49 = vadd.f32 %v15143_v56, %v15135_v35 }
 0x3de   : > { %v8485_v16 = vpop.f32.mrf.mxu0  ;;  %9186 = vmatprep.subr.bf16.mxu1 %v10554_v32  ;;  %v6387_v54 = vld [vmem:[#allocation2 + $0xd8] sm:$0xff]  ;;  %v6395_v32 = vld [vmem:[#allocation2 + $0x180] sm:$0xff]  ;;  %v10537_v15 = vcombine.low %v6710_v63, %v6714_v9  ;;  %v8417_v35 = vadd.f32 %v15149_v59, %v15147_v24 }
 0x3df   : > { %9329 = vst [vmem:[#allocation2 + $0xc8] sm:$0xff] %v9257_v62  ;;  %v9258_v25 = vadd.f32 %v8484_v8, %v6380_v27  ;;  %9110 = vmatpush1.bf16.msra.mxu0 %v10409_v44  ;;  %v8486_v42 = vadd.f32 %v8485_v16, %v8405_v58  ;;  %v8411_v62 = vadd.f32 %v15121_v45, %v15112_v17  ;;  %v6686_v8 = vld [vmem:[%s15758_s3 + $0x758] sm:$0xff]  ;;  %v6404_v59 = vld [vmem:[#allocation2] sm:$0xff] }
 0x3e0   : > { %v8487_v41 = vpop.f32.mrf.mxu0  ;;  %9111 = vmatprep.subr.bf16.mxu0 %v10530_v10  ;;  %9187 = vmatpush1.bf16.msra.mxu1 %v10553_v13  ;;  %v6690_v61 = vld [vmem:[%s15758_s3 + $0x778] sm:$0xff]  ;;  %v10521_v45 = vcombine.low %v6694_v55, %v6698_v34  ;;  %v10538_v13 = vcombine.high %v6710_v63, %v6714_v9  ;;  %v6403_v55 = vld [vmem:[#allocation2 + $0x88] sm:$0xff]  ;;  %v8421_v16 = vadd.f32 %v15167_v30, %v15159_v11  ;;  %v6411_v9 = vld [vmem:[#allocation2 + $0x80] sm:$0xff] }
 0x3e1   : > { %9330 = vst [vmem:[#allocation2 + $0x8] sm:$0xff] %v9258_v25  ;;  %v9265_v6 = vadd.f32 %v8486_v42, %v6387_v54  ;;  %v8488_v18 = vadd.f32 %v8487_v41, %v8407_v22  ;;  %9188 = vmatprep.subr.bf16.mxu1 %v10546_v28  ;;  %v6388_v10 = vld [vmem:[#allocation2 + $0x18] sm:$0xff]  ;;  %v10514_v28 = vcombine.high %v6686_v8, %v6690_v61 }
 0x3e2   : > { %10577 = vmatmul.mubr.msk.bf16.gmra.mxu0 %vm2032_vm0, %v14518_v38  ;;  %v8491_v17 = vpop.f32.mrf.mxu0  ;;  %v6682_v5 = vld [vmem:[%s15758_s3 + $0x738] sm:$0xff]  ;;  %v10513_v46 = vcombine.low %v6686_v8, %v6690_v61  ;;  %v8423_v63 = vadd.f32 %v15172_v19, %v15170_v29  ;;  %v6419_v61 = vld [vmem:[#allocation2 + $0x48] sm:$0xff] }
 0x3e3   : > { %9337 = vst [vmem:[#allocation2 + $0xd8] sm:$0xff] %v9265_v6  ;;  %v15329_v58 = vadd.f32 %v8488_v18, %v6388_v10  ;;  %9057 = vmatmul.mubr.bf16.gmra.mxu1 %v14220_v2  ;;  %9112 = vmatpush2.bf16.msra.mxu0 %v10529_v7  ;;  %v8492_v23 = vadd.f32 %v8491_v17, %v8411_v62  ;;  %v6678_v2 = vld [vmem:[%s15758_s3 + $0x718] sm:$0xff] }
 0x3e4   : > { %v8493_v0 = vpop.f32.mrf.mxu0  ;;  %9113 = vmatprep.subr.bf16.mxu0 %v10522_v43  ;;  %9066 = vmatprep.mubr.bf16.mxu1 %v14236_v36  ;;  %v6396_v36 = vld [vmem:[#allocation2 + $0x190] sm:$0xff]  ;;  %v10506_v27 = vcombine.high %v6678_v2, %v6682_v5  ;;  %v6670_v25 = vld [vmem:[%s15758_s3 + $0x6d8] sm:$0xff]  ;;  %v10505_v7 = vcombine.low %v6678_v2, %v6682_v5  ;;  %v8425_v43 = vadd.f32 %v15188_v57, %v15180_v40 }
 0x3e5   : > { %9338 = vst [vmem:[#allocation2 + $0x18] sm:$0xff] %v15329_v58  ;;  %v9273_v31 = vadd.f32 %v8492_v23, %v6395_v32  ;;  %v8494_v4 = vadd.f32 %v8493_v0, %v8413_v12  ;;  %9189 = vmatpush1.bf16.msra.mxu1 %v10545_v21  ;;  %9127 = vmatprep.mubr.bf16.mxu0 %v13911_v47  ;;  %v6674_v24 = vld [vmem:[%s15758_s3 + $0x6f8] sm:$0xff] }
 0x3e6   : > { %v8495_v44 = vpop.f32.mrf.mxu0  ;;  %9190 = vmatprep.subr.bf16.mxu1 %v10538_v13  ;;  %v10498_v41 = vcombine.high %v6670_v25, %v6674_v24  ;;  %v6662_v29 = vld [vmem:[%s15758_s3 + $0x698] sm:$0xff]  ;;  %v10497_v57 = vcombine.low %v6670_v25, %v6674_v24  ;;  %v8431_v17 = vadd.f32 %v15210_v1, %v15202_v53  ;;  %v8433_v0 = vadd.f32 %v15215_v37, %v15213_v20 }
 0x3e7   : > { %9345 = vst [vmem:[#allocation2 + $0x180] sm:$0xff] %v9273_v31  ;;  %v9274_v56 = vadd.f32 %v8494_v4, %v6396_v36  ;;  %9114 = vmatpush2.bf16.msra.mxu0 %v10521_v45  ;;  %v8496_v50 = vadd.f32 %v8495_v44, %v8415_v49  ;;  %v6412_v19 = vld [vmem:[#allocation2 + $0xf8] sm:$0xff]  ;;  %v8435_v4 = vadd.f32 %v15231_v48, %v15223_v26  ;;  %v6428_v36 = vld [vmem:[#allocation2 + $0x130] sm:$0xff] }
 0x3e8   : > { %v8497_v34 = vpop.f32.mrf.mxu0  ;;  %9115 = vmatprep.subr.bf16.mxu0 %v10514_v28  ;;  %v6654_v12 = vld [vmem:[%s15758_s3 + $0x658] sm:$0xff] }
 0x3e9   : > { %9346 = vst [vmem:[#allocation2 + $0x190] sm:$0xff] %v9274_v56  ;;  %v9281_v47 = vadd.f32 %v8496_v50, %v6403_v55  ;;  %v8498_v22 = vadd.f32 %v8497_v34, %v8417_v35  ;;  %9191 = vmatpush1.bf16.msra.mxu1 %v10537_v15  ;;  %v6427_v15 = vld [vmem:[#allocation2 + $0x90] sm:$0xff]  ;;  %v6650_v5 = vld [vmem:[%s15758_s3 + $0x638] sm:$0xff]  ;;  %v16020_v35 = vld [vmem:[#allocation4_spill] sm:$0xff] }
 0x3ea   : > { %v8501_v42 = vpop.f32.mrf.mxu0  ;;  %v6435_v55 = vld [vmem:[#allocation2 + $0x10] sm:$0xff] }
 0x3eb   : > { %9353 = vst [vmem:[#allocation2 + $0x88] sm:$0xff] %v9281_v47  ;;  %v9282_v11 = vadd.f32 %v8498_v22, %v6404_v59  ;;  %9067 = vmatmul.mubr.bf16.gmra.mxu1 %v14280_v14  ;;  %9116 = vmatpush2.bf16.msra.mxu0 %v10513_v46  ;;  %v8502_v30 = vadd.f32 %v8501_v42, %v8421_v16  ;;  %v6666_v14 = vld [vmem:[%s15758_s3 + $0x6b8] sm:$0xff]  ;;  %v16021_v16 = vld [vmem:[#allocation5_spill] sm:$0xff]  ;;  %v6436_v42 = vld [vmem:[#allocation2 + $0x128] sm:$0xff] }
 0x3ec   : > { %v8503_v54 = vpop.f32.mrf.mxu0  ;;  %9117 = vmatprep.subr.bf16.mxu0 %v10506_v27  ;;  %9076 = vmatprep.mubr.bf16.mxu1 %v14289_v39  ;;  %v8427_v39 = vadd.f32 %v15192_v33, %v15190_v60  ;;  %v10490_v10 = vcombine.high %v6662_v29, %v6666_v14  ;;  %v6658_v60 = vld [vmem:[%s15758_s3 + $0x678] sm:$0xff]  ;;  %v10489_v32 = vcombine.low %v6662_v29, %v6666_v14  ;;  %v16022_v47 = vld [vmem:[#allocation21_spill] sm:$0xff] }
 0x3ed   : > { %9354 = vst [vmem:[#allocation2] sm:$0xff] %v9282_v11  ;;  %v9289_v62 = vadd.f32 %v8502_v30, %v6411_v9  ;;  %v8504_v6 = vadd.f32 %v8503_v54, %v8423_v63  ;;  %v6420_v33 = vld [vmem:[#allocation2 + $0x98] sm:$0xff]  ;;  %v10482_v31 = vcombine.high %v6654_v12, %v6658_v60  ;;  %v10481_v46 = vcombine.low %v6654_v12, %v6658_v60  ;;  %v16024_v30 = vld [vmem:[#allocation7_spill] sm:$0xff] }
 0x3ee   : > { %v8505_v18 = vpop.f32.mrf.mxu0  ;;  %v8441_v22 = vadd.f32 %v16022_v47, %v16021_v16  ;;  %v16023_v11 = vld [vmem:[#allocation14_spill] sm:$0xff]  ;;  %v6381_v16 = vld [vmem:[#allocation2 + $0x40] sm:$0xff] }
 0x3ef   : > { %9361 = vst [vmem:[#allocation2 + $0x80] sm:$0xff] %v9289_v62  ;;  %v9290_v8 = vadd.f32 %v8504_v6, %v6412_v19  ;;  %9118 = vmatpush2.bf16.msra.mxu0 %v10505_v7  ;;  %v8506_v40 = vadd.f32 %v8505_v18, %v8425_v43  ;;  %v8443_v9 = vadd.f32 %v16024_v30, %v16023_v11  ;;  %v6443_v6 = vld [vmem:[#allocation2 + $0x1a0] sm:$0x3f] }
 0x3f0   : > { %v8507_v21 = vpop.f32.mrf.mxu0  ;;  %9119 = vmatprep.subr.bf16.mxu0 %v10498_v41  ;;  %v16025_v41 = vld [vmem:[#allocation15_spill] sm:$0xff] }
 0x3f1   : > { %9362 = vst [vmem:[#allocation2 + $0xf8] sm:$0xff] %v9290_v8  ;;  %v9297_v45 = vadd.f32 %v8506_v40, %v6419_v61  ;;  %v8508_v13 = vadd.f32 %v8507_v21, %v8427_v39  ;;  %v6444_v39 = vld [vmem:[#allocation2 + $0x58] sm:$0x3f] }
 0x3f2   : > { %v8511_v23 = vpop.f32.mrf.mxu0 }
 0x3f3   : > { %9369 = vst [vmem:[#allocation2 + $0x48] sm:$0xff] %v9297_v45  ;;  %v9298_v28 = vadd.f32 %v8508_v13, %v6420_v33  ;;  %9077 = vmatmul.mubr.bf16.gmra.mxu1 %v14317_v3  ;;  %9120 = vmatpush2.bf16.msra.mxu0 %v10497_v57  ;;  %v8512_v53 = vadd.f32 %v8511_v23, %v8431_v17  ;;  %v15378_v1 = vpop.f32.mrf.mxu1  ;;  %v6646_v3 = vld [vmem:[%s15758_s3 + $0x618] sm:$0xff]  ;;  %v16027_v17 = vld [vmem:[#allocation8_spill] sm:$0xff] }
 0x3f4   : > { %v8513_v49 = vpop.f32.mrf.mxu0  ;;  %9121 = vmatprep.subr.bf16.mxu0 %v10490_v10  ;;  %9086 = vmatprep.mubr.bf16.mxu1 %v14264_v52  ;;  %v16019_v52 = vld [vmem:[#allocation16_spill] sm:$0xff]  ;;  %v10474_v27 = vcombine.high %v6646_v3, %v6650_v5  ;;  %v10473_v63 = vcombine.low %v6646_v3, %v6650_v5  ;;  %v16026_v10 = vld [vmem:[#allocation10_spill] sm:$0xff] }
 0x3f5   : > { %9370 = vst [vmem:[#allocation2 + $0x98] sm:$0xff] %v9298_v28  ;;  %v9305_v2 = vadd.f32 %v8512_v53, %v6427_v15  ;;  %v8514_v37 = vadd.f32 %v8513_v49, %v8433_v0  ;;  %v15383_v20 = vpop.f32.mrf.mxu1  ;;  %v8437_v56 = vadd.f32 %v16020_v35, %v16019_v52  ;;  %v16028_v13 = vld [vmem:[#allocation12_spill] sm:$0xff]  ;;  %v16031_v28 = vld [vmem:[#allocation17_spill] sm:$0xff] }
 0x3f6   : > { %v8515_v44 = vpop.f32.mrf.mxu0  ;;  %v16029_v23 = vld [vmem:[#allocation20_spill] sm:$0xff] }
 0x3f7   : > { %9377 = vst [vmem:[#allocation2 + $0x90] sm:$0xff] %v9305_v2  ;;  %v9306_v26 = vadd.f32 %v8514_v37, %v6428_v36  ;;  %9122 = vmatpush2.bf16.msra.mxu0 %v10489_v32  ;;  %v8516_v48 = vadd.f32 %v8515_v44, %v8435_v4  ;;  %v15393_v50 = vpop.f32.mrf.mxu1  ;;  %v16030_v32 = vld [vmem:[#allocation3_spill] sm:$0xff]  ;;  %v16033_v4 = vld [vmem:[#allocation13_spill] sm:$0xff]  ;;  %v16034_v37 = vld [vmem:[#allocation18_spill] sm:$0xff] }
 0x3f8   : > { %v8517_v34 = vpop.f32.mrf.mxu0  ;;  %9123 = vmatprep.subr.bf16.mxu0 %v10482_v31  ;;  %v16032_v31 = vld [vmem:[#allocation6_spill] sm:$0xff]  ;;  %v16035_v44 = vld [vmem:[#allocation11_spill] sm:$0xff] }
 0x3f9   : > { %9378 = vst [vmem:[#allocation2 + $0x130] sm:$0xff] %v9306_v26  ;;  %v9313_v25 = vadd.f32 %v8516_v48, %v6435_v55  ;;  %v8518_v24 = vadd.f32 %v8517_v34, %v8437_v56  ;;  %v15397_v59 = vpop.f32.mrf.mxu1  ;;  %v16036_v56 = vld [vmem:[#allocation23_spill] sm:$0xff]  ;;  %v16037_v48 = vld [vmem:[#allocation22_spill] sm:$0xff] }
 0x3fa   : > { %v8521_v7 = vpop.f32.mrf.mxu0 }
 0x3fb   : > { %9385 = vst [vmem:[#allocation2 + $0x10] sm:$0xff] %v9313_v25  ;;  %v9314_v54 = vadd.f32 %v8518_v24, %v6436_v42  ;;  %9087 = vmatmul.mubr.bf16.gmra.mxu1 %v16025_v41  ;;  %9124 = vmatpush2.bf16.msra.mxu0 %v10481_v46  ;;  %v8522_v43 = vadd.f32 %v8521_v7, %v8441_v22  ;;  %v15402_v62 = vpop.f32.mrf.mxu1  ;;  %v6382_v42 = vld [vmem:[#allocation2 + $0x28] sm:$0xff] }
 0x3fc   : > { %v8523_v29 = vpop.f32.mrf.mxu0  ;;  %9125 = vmatprep.subr.bf16.mxu0 %v10474_v27  ;;  %9208 = vmatprep.mubr.bf16.mxu1 %v15880_v51 }
 0x3fd   : > { %9386 = vst [vmem:[#allocation2 + $0x128] sm:$0xff] %v9314_v54  ;;  %v9321_v14 = vadd.f32 %v8522_v43, %v6443_v6  ;;  %v8524_v19 = vadd.f32 %v8523_v29, %v8443_v9  ;;  %v15405_v18 = vpop.f32.mrf.mxu1  ;;  %v16038_v9 = vld [vmem:[#allocation19_spill] sm:$0xff]  ;;  %v6390_v29 = vld [vmem:[#allocation2 + $0x158] sm:$0xff] }
 0x3fe   : > { %v8525_v8 = vpop.f32.mrf.mxu0 }
 0x3ff   : > { %9393 = vst [vmem:[#allocation2 + $0x1a0] sm:$0x3f] %v9321_v14  ;;  %v9322_v40 = vadd.f32 %v8524_v19, %v6444_v39  ;;  %9126 = vmatpush2.bf16.msra.mxu0 %v10473_v63  ;;  %v15407_v57 = vpop.f32.mrf.mxu1 }
 0x400   : > { %v8526_v61 = vpop.f32.mrf.mxu0 }
 0x401   : > { %9394 = vst [vmem:[#allocation2 + $0x58] sm:$0x3f] %v9322_v40  ;;  %v15409_v21 = vpop.f32.mrf.mxu1  ;;  %v6397_v40 = vld [vmem:[#allocation2 + $0x140] sm:$0xff] }
 0x402   : > { %9128 = vmatmul.mubr.bf16.vlgmr.msra.gmra.mxu0 %v16026_v10 }
 0x403   : > { %10578 = vmatmul.mubr.msk.bf16.vlgmr.msra.gmra.mxu1 %vm2032_vm0, %v16027_v17  ;;  %v15414_v45 = vpop.f32.mrf.mxu1  ;;  %9137 = vmatprep.mubr.bf16.mxu0 %v16028_v13  ;;  %v6398_v13 = vld [vmem:[#allocation2 + $0x1c0] sm:$0xff] }
 0x404   : > { %9218 = vmatprep.mubr.bf16.mxu1 %v15880_v51 }
 0x405   : > { %v15418_v12 = vpop.f32.mrf.mxu1 }
 0x407   : > { %v15420_v60 = vpop.f32.mrf.mxu1 }
 0x409   : > { %v15422_v33 = vpop.f32.mrf.mxu1 }
 0x40a   : > { %9138 = vmatmul.mubr.bf16.gmra.mxu0 %v16029_v23 }
 0x40b   : > { %10579 = vmatmul.mubr.msk.bf16.gmra.mxu1 %vm2032_vm0, %v16030_v32  ;;  %v15427_v0 = vpop.f32.mrf.mxu1  ;;  %9147 = vmatprep.mubr.bf16.mxu0 %v16031_v28 }
 0x40c   : > { %9228 = vmatprep.mubr.bf16.mxu1 %v15880_v51 }
 0x40d   : > { %v15431_v53 = vpop.f32.mrf.mxu1 }
 0x40f   : > { %v15433_v15 = vpop.f32.mrf.mxu1 }
 0x411   : > { %v15435_v49 = vpop.f32.mrf.mxu1 }
 0x412   : > { %9148 = vmatmul.mubr.bf16.gmra.mxu0 %v16032_v31 }
 0x413   : > { %10580 = vmatmul.mubr.msk.bf16.gmra.mxu1 %vm2032_vm0, %v16033_v4  ;;  %v15440_v2 = vpop.f32.mrf.mxu1  ;;  %9157 = vmatprep.mubr.bf16.mxu0 %v16034_v37  ;;  %v6405_v4 = vld [vmem:[#allocation2 + $0x188] sm:$0xff] }
 0x414   : > { %9238 = vmatprep.mubr.bf16.mxu1 %v15880_v51 }
 0x415   : > { %v15444_v3 = vpop.f32.mrf.mxu1 }
 0x417   : > { %v8606_v5 = vpop.f32.mrf.mxu1 }
 0x419   : > { %v8607_v36 = vpop.f32.mrf.mxu1 }
 0x41a   : > { %9158 = vmatmul.mubr.bf16.gmra.mxu0 %v16035_v44  ;;  %v8643_v52 = vpop.f32.mrf.mxu0 }
 0x41b   : > { %v8644_v35 = vadd.f32 %v8643_v52, %v15378_v1  ;;  %10581 = vmatmul.mubr.msk.bf16.gmra.mxu1 %vm2032_vm0, %v16036_v56  ;;  %v8724_v26 = vpop.f32.mrf.mxu1  ;;  %9167 = vmatprep.mubr.bf16.mxu0 %v16037_v48  ;;  %v6406_v52 = vld [vmem:[#allocation2 + $0x38] sm:$0xff] }
 0x41c   : > { %v8645_v46 = vpop.f32.mrf.mxu0  ;;  %9248 = vmatprep.mubr.bf16.mxu1 %v15880_v51 }
 0x41d   : > { %v8725_v55 = vadd.f32 %v8724_v26, %v8644_v35  ;;  %v8646_v34 = vadd.f32 %v8645_v46, %v15383_v20  ;;  %v8726_v27 = vpop.f32.mrf.mxu1  ;;  %v6389_v20 = vld [vmem:[#allocation2 + $0xb0] sm:$0xff]  ;;  %v6413_v46 = vld [vmem:[#allocation2 + $0x78] sm:$0xff] }
 0x41e   : > { %v8647_v47 = vpop.f32.mrf.mxu0 }
 0x41f   : > { %v15453_v22 = vadd.f32 %v8725_v55, %v6381_v16  ;;  %v8727_v25 = vadd.f32 %v8726_v27, %v8646_v34  ;;  %v8648_v1 = vadd.f32 %v8647_v47, %v15393_v50  ;;  %v8728_v24 = vpop.f32.mrf.mxu1  ;;  %v6414_v47 = vld [vmem:[#allocation2 + $0x170] sm:$0xff] }
 0x420   : > { %v8649_v7 = vpop.f32.mrf.mxu0 }
 0x421   : > { %9331 = vst [vmem:[#allocation2 + $0x40] sm:$0xff] %v15453_v22  ;;  %v15457_v63 = vadd.f32 %v8727_v25, %v6382_v42  ;;  %v8729_v11 = vadd.f32 %v8728_v24, %v8648_v1  ;;  %v8650_v51 = vadd.f32 %v8649_v7, %v15397_v59  ;;  %v8730_v30 = vpop.f32.mrf.mxu1  ;;  %v6421_v7 = vld [vmem:[#allocation2 + $0x238] sm:$0xff] }
 0x422   : > { %9168 = vmatmul.mubr.bf16.gmra.mxu0 %v16038_v9  ;;  %v8653_v54 = vpop.f32.mrf.mxu0  ;;  %v6422_v9 = vld [vmem:[#allocation2 + $0x160] sm:$0xff] }
 0x423   : > { %9332 = vst [vmem:[#allocation2 + $0x28] sm:$0xff] %v15457_v63  ;;  %v15462_v41 = vadd.f32 %v8729_v11, %v6389_v20  ;;  %v8731_v50 = vadd.f32 %v8730_v30, %v8650_v51  ;;  %v8654_v43 = vadd.f32 %v8653_v54, %v15402_v62  ;;  %10582 = vmatmul.mubr.msk.bf16.gmra.mxu1 %vm2032_vm0, %v14518_v38  ;;  %v8734_v6 = vpop.f32.mrf.mxu1 }
 0x424   : > { %v8655_v14 = vpop.f32.mrf.mxu0 }
 0x425   : > { %9339 = vst [vmem:[#allocation2 + $0xb0] sm:$0xff] %v15462_v41  ;;  %v15468_v59 = vadd.f32 %v8731_v50, %v6390_v29  ;;  %v8656_v19 = vadd.f32 %v8655_v14, %v15405_v18  ;;  %v8735_v39 = vadd.f32 %v8734_v6, %v8654_v43  ;;  %v8736_v8 = vpop.f32.mrf.mxu1  ;;  %v6429_v29 = vld [vmem:[#allocation2 + $0x68] sm:$0xff] }
 0x426   : > { %v8657_v61 = vpop.f32.mrf.mxu0 }
 0x427   : > { %9340 = vst [vmem:[#allocation2 + $0x158] sm:$0xff] %v15468_v59  ;;  %v15472_v10 = vadd.f32 %v8735_v39, %v6397_v40  ;;  %v8658_v62 = vadd.f32 %v8657_v61, %v15407_v57  ;;  %v8737_v38 = vadd.f32 %v8736_v8, %v8656_v19  ;;  %v8738_v17 = vpop.f32.mrf.mxu1  ;;  %v6430_v40 = vld [vmem:[#allocation2 + $0x230] sm:$0xff] }
 0x428   : > { %v8659_v23 = vpop.f32.mrf.mxu0 }
 0x429   : > { %9347 = vst [vmem:[#allocation2 + $0x140] sm:$0xff] %v15472_v10  ;;  %v15476_v32 = vadd.f32 %v8737_v38, %v6398_v13  ;;  %v8660_v18 = vadd.f32 %v8659_v23, %v15409_v21  ;;  %v8739_v28 = vadd.f32 %v8738_v17, %v8658_v62  ;;  %v8740_v31 = vpop.f32.mrf.mxu1  ;;  %v6437_v13 = vld [vmem:[#allocation2 + $0x178] sm:$0xff] }
 0x42a   : > { %v8663_v37 = vpop.f32.mrf.mxu0 }
 0x42b   : > { %9348 = vst [vmem:[#allocation2 + $0x1c0] sm:$0xff] %v15476_v32  ;;  %v15480_v5 = vadd.f32 %v8739_v28, %v6405_v4  ;;  %v8664_v57 = vadd.f32 %v8663_v37, %v15414_v45  ;;  %v8741_v36 = vadd.f32 %v8740_v31, %v8660_v18  ;;  %v8744_v44 = vpop.f32.mrf.mxu1  ;;  %v6438_v4 = vld [vmem:[#allocation2 + $0x208] sm:$0xff] }
 0x42c   : > { %v8665_v35 = vpop.f32.mrf.mxu0 }
 0x42d   : > { %9355 = vst [vmem:[#allocation2 + $0x188] sm:$0xff] %v15480_v5  ;;  %v15484_v56 = vadd.f32 %v8741_v36, %v6406_v52  ;;  %v8666_v21 = vadd.f32 %v8665_v35, %v15418_v12  ;;  %v8745_v26 = vadd.f32 %v8744_v44, %v8664_v57  ;;  %v8746_v48 = vpop.f32.mrf.mxu1  ;;  %v6445_v52 = vld [vmem:[#allocation2 + $0x118] sm:$0x3f] }
 0x42e   : > { %v8667_v55 = vpop.f32.mrf.mxu0 }
 0x42f   : > { %9356 = vst [vmem:[#allocation2 + $0x38] sm:$0xff] %v15484_v56  ;;  %v15488_v34 = vadd.f32 %v8745_v26, %v6413_v46  ;;  %v8668_v45 = vadd.f32 %v8667_v55, %v15420_v60  ;;  %v8747_v27 = vadd.f32 %v8746_v48, %v8666_v21  ;;  %v8748_v16 = vpop.f32.mrf.mxu1 }
 0x430   : > { %v8669_v25 = vpop.f32.mrf.mxu0 }
 0x431   : > { %9363 = vst [vmem:[#allocation2 + $0x78] sm:$0xff] %v15488_v34  ;;  %v15492_v1 = vadd.f32 %v8747_v27, %v6414_v47  ;;  %v8670_v12 = vadd.f32 %v8669_v25, %v15422_v33  ;;  %v8749_v24 = vadd.f32 %v8748_v16, %v8668_v45  ;;  %v8750_v42 = vpop.f32.mrf.mxu1 }
 0x432   : > { %v8673_v11 = vpop.f32.mrf.mxu0 }
 0x433   : > { %9364 = vst [vmem:[#allocation2 + $0x170] sm:$0xff] %v15492_v1  ;;  %v15496_v51 = vadd.f32 %v8749_v24, %v6421_v7  ;;  %v8674_v60 = vadd.f32 %v8673_v11, %v15427_v0  ;;  %v8751_v30 = vadd.f32 %v8750_v42, %v8670_v12  ;;  %v8754_v20 = vpop.f32.mrf.mxu1 }
 0x434   : > { %v8675_v54 = vpop.f32.mrf.mxu0 }
 0x435   : > { %16039 = vst [vmem:[#allocation9_spill] sm:$0xff] %v15496_v51  ;;  %9371 = vst [vmem:[#allocation2 + $0x238] sm:$0xff] %v15496_v51  ;;  %v15500_v50 = vadd.f32 %v8751_v30, %v6422_v9  ;;  %v8676_v33 = vadd.f32 %v8675_v54, %v15431_v53  ;;  %v8755_v43 = vadd.f32 %v8754_v20, %v8674_v60  ;;  %v8756_v6 = vpop.f32.mrf.mxu1 }
 0x436   : > { %v8677_v14 = vpop.f32.mrf.mxu0 }
 0x437   : > { %16040 = vst [vmem:[#allocation16_spill] sm:$0xff] %v15500_v50  ;;  %9372 = vst [vmem:[#allocation2 + $0x160] sm:$0xff] %v15500_v50  ;;  %v15504_v19 = vadd.f32 %v8755_v43, %v6429_v29  ;;  %v8678_v0 = vadd.f32 %v8677_v14, %v15433_v15  ;;  %v8757_v39 = vadd.f32 %v8756_v6, %v8676_v33  ;;  %v8758_v8 = vpop.f32.mrf.mxu1 }
 0x438   : > { %v8679_v61 = vpop.f32.mrf.mxu0 }
 0x439   : > { %16041 = vst [vmem:[#allocation4_spill] sm:$0xff] %v15504_v19  ;;  %9379 = vst [vmem:[#allocation2 + $0x68] sm:$0xff] %v15504_v19  ;;  %v15508_v62 = vadd.f32 %v8757_v39, %v6430_v40  ;;  %v8680_v53 = vadd.f32 %v8679_v61, %v15435_v49  ;;  %v8759_v38 = vadd.f32 %v8758_v8, %v8678_v0  ;;  %v8760_v17 = vpop.f32.mrf.mxu1 }
 0x43a   : > { %v8683_v23 = vpop.f32.mrf.mxu0 }
 0x43b   : > { %16042 = vst [vmem:[#allocation5_spill] sm:$0xff] %v15508_v62  ;;  %9380 = vst [vmem:[#allocation2 + $0x230] sm:$0xff] %v15508_v62  ;;  %v15512_v18 = vadd.f32 %v8759_v38, %v6437_v13  ;;  %v8684_v15 = vadd.f32 %v8683_v23, %v15440_v2  ;;  %v8761_v28 = vadd.f32 %v8760_v17, %v8680_v53  ;;  %v8764_v31 = vpop.f32.mrf.mxu1  ;;  %v6446_v2 = vld [vmem:[#allocation2 + $0x20] sm:$0x3f]  ;;  %v6384_v62 = vld [vmem:[#allocation2 + $0xf0] sm:$0xff] }
 0x43c   : > { %v8685_v37 = vpop.f32.mrf.mxu0 }
 0x43d   : > { %16043 = vst [vmem:[#allocation21_spill] sm:$0xff] %v15512_v18  ;;  %9387 = vst [vmem:[#allocation2 + $0x178] sm:$0xff] %v15512_v18  ;;  %v15516_v57 = vadd.f32 %v8761_v28, %v6438_v4  ;;  %v8686_v49 = vadd.f32 %v8685_v37, %v15444_v3  ;;  %v8765_v36 = vadd.f32 %v8764_v31, %v8684_v15  ;;  %v8766_v44 = vpop.f32.mrf.mxu1 }
 0x43e   : > { %v8687_v35 = vpop.f32.mrf.mxu0 }
 0x43f   : > { %16044 = vst [vmem:[#allocation14_spill] sm:$0xff] %v15516_v57  ;;  %9388 = vst [vmem:[#allocation2 + $0x208] sm:$0xff] %v15516_v57  ;;  %v9323_v21 = vadd.f32 %v8765_v36, %v6445_v52  ;;  %v8767_v26 = vadd.f32 %v8766_v44, %v8686_v49  ;;  %v8768_v48 = vpop.f32.mrf.mxu1 }
 0x440   : > { %v8688_v46 = vpop.f32.mrf.mxu0 }
 0x441   : > { %9395 = vst [vmem:[#allocation2 + $0x118] sm:$0x3f] %v9323_v21  ;;  %v9324_v55 = vadd.f32 %v8767_v26, %v6446_v2  ;;  %v8769_v45 = vpop.f32.mrf.mxu1  ;;  %v6383_v46 = vld [vmem:[#allocation2 + $0xe8] sm:$0xff] }
 0x443   : > { %9396 = vst [vmem:[#allocation2 + $0x20] sm:$0x3f] %v9324_v55 }
 0x45a   : > { %v8805_v27 = vpop.f32.mrf.mxu0 }
 0x45b   : > { %v8886_v16 = vpop.f32.mrf.mxu1 }
 0x45c   : > { %v8807_v47 = vpop.f32.mrf.mxu0  ;;  %v8887_v35 = vadd.f32 %v8886_v16, %v8805_v27 }
 0x45d   : > { %v8888_v25 = vpop.f32.mrf.mxu1 }
 0x45e   : > { %v8809_v3 = vpop.f32.mrf.mxu0  ;;  %v8889_v48 = vadd.f32 %v8888_v25, %v8807_v47 }
 0x45f   : > { %v8890_v12 = vpop.f32.mrf.mxu1 }
 0x460   : > { %v8811_v24 = vpop.f32.mrf.mxu0  ;;  %v8891_v45 = vadd.f32 %v8890_v12, %v8809_v3  ;;  %v6392_v3 = vld [vmem:[#allocation2 + $0x110] sm:$0xff] }
 0x461   : > { %v8892_v42 = vpop.f32.mrf.mxu1 }
 0x462   : > { %v8815_v7 = vpop.f32.mrf.mxu0  ;;  %v8893_v50 = vadd.f32 %v8892_v42, %v8811_v24  ;;  %v6399_v42 = vld [vmem:[#allocation2 + $0xd0] sm:$0xff] }
 0x463   : > { %v8896_v11 = vpop.f32.mrf.mxu1 }
 0x464   : > { %v8817_v60 = vpop.f32.mrf.mxu0  ;;  %v8897_v16 = vadd.f32 %v8896_v11, %v8815_v7  ;;  %v6400_v11 = vld [vmem:[#allocation2 + $0x138] sm:$0xff] }
 0x465   : > { %v8898_v30 = vpop.f32.mrf.mxu1 }
 0x466   : > { %v8819_v20 = vpop.f32.mrf.mxu0 }
 0x467   : > { %v8900_v9 = vpop.f32.mrf.mxu1 }
 0x468   : > { %v8821_v54 = vpop.f32.mrf.mxu0 }
 0x469   : > { %v8902_v33 = vpop.f32.mrf.mxu1 }
 0x46a   : > { %v15520_v43 = vpop.f32.mrf.mxu0 }
 0x46b   : > { %v15522_v6 = vpop.f32.mrf.mxu1 }
 0x46c   : > { %v15524_v29 = vpop.f32.mrf.mxu0 }
 0x46d   : > { %v15526_v14 = vpop.f32.mrf.mxu1 }
 0x46e   : > { %v15528_v0 = vpop.f32.mrf.mxu0 }
 0x46f   : > { %v15530_v39 = vpop.f32.mrf.mxu1 }
 0x470   : > { %v15532_v8 = vpop.f32.mrf.mxu0 }
 0x471   : > { %v15534_v40 = vpop.f32.mrf.mxu1 }
 0x472   : > { %v15536_v61 = vpop.f32.mrf.mxu0 }
 0x473   : > { %v15538_v53 = vpop.f32.mrf.mxu1 }
 0x474   : > { %v15540_v38 = vpop.f32.mrf.mxu0 }
 0x475   : > { %v15542_v17 = vpop.f32.mrf.mxu1 }
 0x476   : > { %v15544_v13 = vpop.f32.mrf.mxu0 }
 0x477   : > { %v15546_v23 = vpop.f32.mrf.mxu1 }
 0x478   : > { %v15548_v15 = vpop.f32.mrf.mxu0 }
 0x479   : > { %v15550_v28 = vpop.f32.mrf.mxu1 }
 0x47a   : > { %v15552_v31 = vpop.f32.mrf.mxu0 }
 0x47b   : > { %v15554_v4 = vpop.f32.mrf.mxu1 }
 0x47c   : > { %v15556_v37 = vpop.f32.mrf.mxu0 }
 0x47d   : > { %v15558_v49 = vpop.f32.mrf.mxu1 }
 0x47e   : > { %v8849_v36 = vpop.f32.mrf.mxu0 }
 0x47f   : > { %v8930_v44 = vpop.f32.mrf.mxu1 }
 0x480   : > { %v8850_v52 = vpop.f32.mrf.mxu0  ;;  %v6391_v44 = vld [vmem:[#allocation2 + $0x108] sm:$0xff] }
 0x481   : > { %v8931_v21 = vpop.f32.mrf.mxu1  ;;  %v8899_v52 = vadd.f32 %v8898_v30, %v8817_v60  ;;  %v6407_v30 = vld [vmem:[#allocation2 + $0x1a8] sm:$0xff] }
 0x482   : > { %v8967_v26 = vpop.f32.mrf.mxu0 }
 0x483   : > { %v8968_v2 = vadd.f32 %v8967_v26, %v8887_v35  ;;  %v8903_v26 = vadd.f32 %v8902_v33, %v8821_v54  ;;  %v8909_v54 = vadd.f32 %v15526_v14, %v15524_v29  ;;  %v8913_v29 = vadd.f32 %v15534_v40, %v15532_v8 }
 0x484   : > { %v8969_v55 = vpop.f32.mrf.mxu0  ;;  %v8919_v8 = vadd.f32 %v15542_v17, %v15540_v38  ;;  %v8923_v38 = vadd.f32 %v15550_v28, %v15548_v15  ;;  %v8929_v15 = vadd.f32 %v15558_v49, %v15556_v37 }
 0x485   : > { %v15560_v57 = vadd.f32 %v8968_v2, %v6383_v46  ;;  %v8970_v18 = vadd.f32 %v8969_v55, %v8889_v48  ;;  %v8907_v2 = vadd.f32 %v15522_v6, %v15520_v43  ;;  %v6408_v46 = vld [vmem:[#allocation2 + $0x220] sm:$0xff]  ;;  %v8911_v43 = vadd.f32 %v15530_v39, %v15528_v0 }
 0x486   : > { %v8971_v19 = vpop.f32.mrf.mxu0  ;;  %v8917_v0 = vadd.f32 %v15538_v53, %v15536_v61  ;;  %v8921_v61 = vadd.f32 %v15546_v23, %v15544_v13  ;;  %v8927_v13 = vadd.f32 %v15554_v4, %v15552_v31 }
 0x487   : > { %9333 = vst [vmem:[#allocation2 + $0xe8] sm:$0xff] %v15560_v57  ;;  %v15563_v51 = vadd.f32 %v8970_v18, %v6384_v62  ;;  %v8972_v36 = vadd.f32 %v8971_v19, %v8891_v45  ;;  %v8901_v18 = vadd.f32 %v8900_v9, %v8819_v20 }
 0x488   : > { %v8973_v27 = vpop.f32.mrf.mxu0 }
 0x489   : > { %9334 = vst [vmem:[#allocation2 + $0xf0] sm:$0xff] %v15563_v51  ;;  %v15566_v47 = vadd.f32 %v8972_v36, %v6391_v44  ;;  %v8974_v25 = vadd.f32 %v8973_v27, %v8893_v50  ;;  %v6415_v36 = vld [vmem:[#allocation2 + $0x198] sm:$0xff] }
 0x48a   : > { %v8977_v12 = vpop.f32.mrf.mxu0 }
 0x48b   : > { %9341 = vst [vmem:[#allocation2 + $0x108] sm:$0xff] %v15566_v47  ;;  %v15569_v35 = vadd.f32 %v8974_v25, %v6392_v3  ;;  %v8978_v24 = vadd.f32 %v8977_v12, %v8897_v16  ;;  %v6416_v16 = vld [vmem:[#allocation2 + $0xe0] sm:$0xff]  ;;  %v6423_v12 = vld [vmem:[#allocation2 + $0x50] sm:$0xff] }
 0x48c   : > { %v8979_v62 = vpop.f32.mrf.mxu0 }
 0x48d   : > { %9342 = vst [vmem:[#allocation2 + $0x110] sm:$0xff] %v15569_v35  ;;  %v15572_v19 = vadd.f32 %v8978_v24, %v6399_v42  ;;  %v8980_v7 = vadd.f32 %v8979_v62, %v8899_v52  ;;  %v6424_v42 = vld [vmem:[#allocation2 + $0x100] sm:$0xff] }
 0x48e   : > { %v8981_v21 = vpop.f32.mrf.mxu0 }
 0x48f   : > { %9349 = vst [vmem:[#allocation2 + $0xd0] sm:$0xff] %v15572_v19  ;;  %v15575_v50 = vadd.f32 %v8980_v7, %v6400_v11  ;;  %v8982_v60 = vadd.f32 %v8981_v21, %v8901_v18  ;;  %v6431_v11 = vld [vmem:[#allocation2 + $0x1d8] sm:$0xff] }
 0x490   : > { %v8983_v48 = vpop.f32.mrf.mxu0 }
 0x491   : > { %9350 = vst [vmem:[#allocation2 + $0x138] sm:$0xff] %v15575_v50  ;;  %v15580_v20 = vadd.f32 %v8982_v60, %v6407_v30  ;;  %v8984_v9 = vadd.f32 %v8983_v48, %v8903_v26  ;;  %v6432_v30 = vld [vmem:[#allocation2 + $0x228] sm:$0xff] }
 0x492   : > { %v8987_v55 = vpop.f32.mrf.mxu0 }
 0x493   : > { %9357 = vst [vmem:[#allocation2 + $0x1a8] sm:$0xff] %v15580_v20  ;;  %v15585_v33 = vadd.f32 %v8984_v9, %v6408_v46  ;;  %v8988_v45 = vadd.f32 %v8987_v55, %v8907_v2  ;;  %v6439_v46 = vld [vmem:[#allocation2 + $0x210] sm:$0xff] }
 0x494   : > { %v8989_v44 = vpop.f32.mrf.mxu0 }
 0x495   : > { %9358 = vst [vmem:[#allocation2 + $0x220] sm:$0xff] %v15585_v33  ;;  %v15590_v6 = vadd.f32 %v8988_v45, %v6415_v36  ;;  %v8990_v27 = vadd.f32 %v8989_v44, %v8909_v54  ;;  %v6440_v36 = vld [vmem:[#allocation2 + $0x1d0] sm:$0xff] }
 0x496   : > { %v8991_v25 = vpop.f32.mrf.mxu0 }
 0x497   : > { %9365 = vst [vmem:[#allocation2 + $0x198] sm:$0xff] %v15590_v6  ;;  %v15595_v14 = vadd.f32 %v8990_v27, %v6416_v16  ;;  %v8992_v3 = vadd.f32 %v8991_v25, %v8911_v43  ;;  %v6447_v16 = vld [vmem:[#allocation2 + $0x148] sm:$0x3f] }
 0x498   : > { %v8993_v52 = vpop.f32.mrf.mxu0 }
 0x499   : > { %9366 = vst [vmem:[#allocation2 + $0xe0] sm:$0xff] %v15595_v14  ;;  %v15600_v39 = vadd.f32 %v8992_v3, %v6423_v12  ;;  %v8994_v24 = vadd.f32 %v8993_v52, %v8913_v29  ;;  %v6448_v3 = vld [vmem:[#allocation2 + $0xa8] sm:$0x3f] }
 0x49a   : > { %v8997_v62 = vpop.f32.mrf.mxu0 }
 0x49b   : > { %9373 = vst [vmem:[#allocation2 + $0x50] sm:$0xff] %v15600_v39  ;;  %v15605_v40 = vadd.f32 %v8994_v24, %v6424_v42  ;;  %v8998_v18 = vadd.f32 %v8997_v62, %v8917_v0  ;;  %v9048_v7 = vpop.f32.mrf.mxu1 }
 0x49c   : > { %v8999_v21 = vpop.f32.mrf.mxu0 }
 0x49d   : > { %9374 = vst [vmem:[#allocation2 + $0x100] sm:$0xff] %v15605_v40  ;;  %v15610_v53 = vadd.f32 %v8998_v18, %v6431_v11  ;;  %v9000_v26 = vadd.f32 %v8999_v21, %v8919_v8  ;;  %v9050_v60 = vpop.f32.mrf.mxu1 }
 0x49e   : > { %v9001_v48 = vpop.f32.mrf.mxu0 }
 0x49f   : > { %9381 = vst [vmem:[#allocation2 + $0x1d8] sm:$0xff] %v15610_v53  ;;  %v15615_v17 = vadd.f32 %v9000_v26, %v6432_v30  ;;  %v9002_v2 = vadd.f32 %v9001_v48, %v8921_v61  ;;  %v9052_v9 = vpop.f32.mrf.mxu1  ;;  %v9529_v30 = vlaneseq }
 0x4a0   : > { %v9003_v55 = vpop.f32.mrf.mxu0 }
 0x4a1   : > { %9382 = vst [vmem:[#allocation2 + $0x228] sm:$0xff] %v15615_v17  ;;  %v15620_v23 = vadd.f32 %v9002_v2, %v6439_v46  ;;  %v9004_v54 = vadd.f32 %v9003_v55, %v8923_v38  ;;  %v9054_v45 = vpop.f32.mrf.mxu1  ;;  %v9530_v2 = vshrl.u32 %v9529_v30, 7 }
 0x4a2   : > { %v9007_v44 = vpop.f32.mrf.mxu0 }
 0x4a3   : > { %9389 = vst [vmem:[#allocation2 + $0x210] sm:$0xff] %v15620_v23  ;;  %v15625_v28 = vadd.f32 %v9004_v54, %v6440_v36  ;;  %v9008_v43 = vadd.f32 %v9007_v44, %v8927_v13  ;;  %v15627_v27 = vpop.f32.mrf.mxu1  ;;  %v9531_v36 = vsub.s32 0, %v9530_v2 }
 0x4a4   : > { %v9009_v31 = vpop.f32.mrf.mxu0 }
 0x4a5   : > { %16045 = vst [vmem:[#allocation7_spill] sm:$0xff] %v15625_v28  ;;  %9390 = vst [vmem:[#allocation2 + $0x1d0] sm:$0xff] %v15625_v28  ;;  %v9325_v4 = vadd.f32 %v9008_v43, %v6447_v16  ;;  %v9010_v25 = vadd.f32 %v9009_v31, %v8929_v15  ;;  %v15630_v29 = vpop.f32.mrf.mxu1  ;;  %v9527_v43 = vld [vmem:[%s15759_s4] sm:$0x3] }
 0x4a6   : > { %v9011_v12 = vpop.f32.mrf.mxu0 }
 0x4a7   : > { %9397 = vst [vmem:[#allocation2 + $0x148] sm:$0x3f] %v9325_v4  ;;  %v9326_v52 = vadd.f32 %v9010_v25, %v6448_v3  ;;  %v15632_v37 = vpop.f32.mrf.mxu1  ;;  %v6385_v4 = vld [vmem:[#allocation2 + $0x70] sm:$0xff]  ;;  %v9535_v25 = vsub.s32 1, %v9530_v2 }
 0x4a8   : > { %v9012_v49 = vpop.f32.mrf.mxu0 }
 0x4a9   : > { %9398 = vst [vmem:[#allocation2 + $0xa8] sm:$0x3f] %v9326_v52  ;;  %v15634_v0 = vpop.f32.mrf.mxu1 }
 0x4ab   : > { %v15636_v24 = vpop.f32.mrf.mxu1 }
 0x4ad   : > { %v15638_v42 = vpop.f32.mrf.mxu1 }
 0x4af   : > { %v15640_v62 = vpop.f32.mrf.mxu1 }
 0x4b1   : > { %v15642_v8 = vpop.f32.mrf.mxu1 }
 0x4b3   : > { %v15644_v18 = vpop.f32.mrf.mxu1 }
 0x4b5   : > { %v15646_v11 = vpop.f32.mrf.mxu1 }
 0x4b7   : > { %v15648_v21 = vpop.f32.mrf.mxu1 }
 0x4b9   : > { %v15650_v61 = vpop.f32.mrf.mxu1 }
 0x4bb   : > { %v15652_v26 = vpop.f32.mrf.mxu1 }
 0x4bd   : > { %v15654_v48 = vpop.f32.mrf.mxu1 }
 0x4be   : > { %16046 = vst [vmem:[#allocation15_spill] sm:$0xff] %v15654_v48  ;;  %v10597_v48 = vld [vmem:[#allocation2 + $0x8] sm:$0xff] }
 0x4bf   : > { %v9092_v38 = vpop.f32.mrf.mxu1 }
 0x4c0   : > { %v10596_v38 = vld [vmem:[#allocation2 + $0xc8] sm:$0xff] }
 0x4c1   : > { %v9093_v46 = vpop.f32.mrf.mxu1 }
 0x4c2   : > { %v9129_v55 = vpop.f32.mrf.mxu0  ;;  %v15660_v46 = vrot.slane %v9527_v43, %v9531_v36 }
 0x4c3   : > { %v9130_v13 = vadd.f32 %v9129_v55, %v9048_v7  ;;  %v9210_v54 = vpop.f32.mrf.mxu1  ;;  %v9437_v7 = vmax.f32 %v10596_v38, %v15453_v22  ;;  %v6386_v55 = vld [vmem:[#allocation2 + $0x120] sm:$0xff] }
 0x4c4   : > { %v9131_v44 = vpop.f32.mrf.mxu0 }
 0x4c5   : > { %v9211_v15 = vadd.f32 %v9210_v54, %v9130_v13  ;;  %v9132_v16 = vadd.f32 %v9131_v44, %v9050_v60  ;;  %v9212_v31 = vpop.f32.mrf.mxu1 }
 0x4c6   : > { %v9133_v3 = vpop.f32.mrf.mxu0 }
 0x4c7   : > { %v9263_v12 = vadd.f32 %v9211_v15, %v6385_v4  ;;  %v9213_v52 = vadd.f32 %v9212_v31, %v9132_v16  ;;  %v9134_v49 = vadd.f32 %v9133_v3, %v9052_v9  ;;  %v9214_v30 = vpop.f32.mrf.mxu1  ;;  %v9438_v15 = vmax.f32 %v10597_v48, %v15457_v63  ;;  %v6393_v16 = vld [vmem:[#allocation2 + $0x1f8] sm:$0xff] }
 0x4c8   : > { %v9135_v13 = vpop.f32.mrf.mxu0  ;;  %v15664_v9 = vrot.slane %v9527_v43, %v9535_v25 }
 0x4c9   : > { %9335 = vst [vmem:[#allocation2 + $0x70] sm:$0xff] %v9263_v12  ;;  %v9491_v54 = vmax.f32 %v15560_v57, %v9263_v12  ;;  %v9264_v60 = vadd.f32 %v9213_v52, %v6386_v55  ;;  %v9215_v44 = vadd.f32 %v9214_v30, %v9134_v49  ;;  %v9136_v28 = vadd.f32 %v9135_v13, %v9054_v45  ;;  %v9216_v2 = vpop.f32.mrf.mxu1  ;;  %v10598_v57 = vld [vmem:[#allocation2 + $0xd8] sm:$0xff] }
 0x4ca   : > { %v9139_v31 = vpop.f32.mrf.mxu0  ;;  %v9439_v12 = vmax.f32 %v10598_v57, %v15462_v41  ;;  %v6394_v45 = vld [vmem:[#allocation2 + $0xb8] sm:$0xff] }
 0x4cb   : > { %v9509_v22 = vmax.f32 %v9437_v7, %v9491_v54  ;;  %9336 = vst [vmem:[#allocation2 + $0x120] sm:$0xff] %v9264_v60  ;;  %v9492_v36 = vmax.f32 %v15563_v51, %v9264_v60  ;;  %v9271_v4 = vadd.f32 %v9215_v44, %v6393_v16  ;;  %v9217_v3 = vadd.f32 %v9216_v2, %v9136_v28  ;;  %v9220_v38 = vpop.f32.mrf.mxu1  ;;  %v6401_v54 = vld [vmem:[#allocation2 + $0x60] sm:$0xff] }
 0x4cc   : > { %v9140_v52 = vadd.f32 %v9139_v31, %v15627_v27  ;;  %v9141_v49 = vpop.f32.mrf.mxu0  ;;  %v9440_v51 = vmax.f32 %v15329_v58, %v15468_v59  ;;  %v10599_v58 = vld [vmem:[#allocation2 + $0x180] sm:$0xff] }
 0x4cd   : > { %v9539_v63 = vadd.f32 %v15660_v46, %v9509_v22  ;;  %v9510_v48 = vmax.f32 %v9438_v15, %v9492_v36  ;;  %9343 = vst [vmem:[#allocation2 + $0x1f8] sm:$0xff] %v9271_v4  ;;  %v9493_v43 = vmax.f32 %v15566_v47, %v9271_v4  ;;  %v9272_v25 = vadd.f32 %v9217_v3, %v6394_v45  ;;  %v9222_v30 = vpop.f32.mrf.mxu1  ;;  %v6402_v36 = vld [vmem:[#allocation2 + $0x1b8] sm:$0xff]  ;;  %v10600_v3 = vld [vmem:[#allocation2 + $0x190] sm:$0xff] }
 0x4ce   : > { %v9221_v41 = vadd.f32 %v9220_v38, %v9140_v52  ;;  %v9142_v28 = vadd.f32 %v9141_v49, %v15630_v29  ;;  %v9143_v27 = vpop.f32.mrf.mxu0  ;;  %v9441_v59 = vmax.f32 %v10599_v58, %v15472_v10  ;;  %v9442_v38 = vmax.f32 %v10600_v3, %v15476_v32  ;;  %v6409_v49 = vld [vmem:[#allocation2 + $0x1e8] sm:$0xff] }
 0x4cf   : > { %v9557_v7 = vmax.f32 %v9539_v63, 0.0  ;;  %v9540_v55 = vadd.f32 %v15664_v9, %v9510_v48  ;;  %v9511_v13 = vmax.f32 %v9439_v12, %v9493_v43  ;;  %9344 = vst [vmem:[#allocation2 + $0xb8] sm:$0xff] %v9272_v25  ;;  %v9494_v47 = vmax.f32 %v15569_v35, %v9272_v25  ;;  %v9224_v60 = vpop.f32.mrf.mxu1  ;;  %v10601_v43 = vld [vmem:[#allocation2 + $0x88] sm:$0xff] }
 0x4d0   : > { %v9279_v44 = vadd.f32 %v9221_v41, %v6401_v54  ;;  %v9223_v2 = vadd.f32 %v9222_v30, %v9142_v28  ;;  %v9144_v15 = vadd.f32 %v9143_v27, %v15632_v37  ;;  %v9145_v16 = vpop.f32.mrf.mxu0  ;;  %v9443_v25 = vmax.f32 %v10601_v43, %v15480_v5  ;;  %v16047_v43 = vld [vmem:[#allocation9_spill] sm:$0xff] }
 0x4d1   : > { %9575 = vst [vmem:[%s15677_s19] sm:$0xff] %v9557_v7  ;;  %v9558_v29 = vmax.f32 %v9540_v55, 0.0  ;;  %v9541_v31 = vadd.f32 %v15660_v46, %v9511_v13  ;;  %v9512_v22 = vmax.f32 %v9440_v51, %v9494_v47  ;;  %v9146_v4 = vadd.f32 %v9145_v16, %v15634_v0  ;;  %v9226_v35 = vpop.f32.mrf.mxu1  ;;  %v6410_v51 = vld [vmem:[#allocation2 + $0x1c8] sm:$0xff]  ;;  %v10603_v16 = vld [vmem:[#allocation2 + $0x80] sm:$0xff] }
 0x4d2   : > { %9351 = vst [vmem:[#allocation2 + $0x60] sm:$0xff] %v9279_v44  ;;  %v9495_v10 = vmax.f32 %v15572_v19, %v9279_v44  ;;  %v9280_v57 = vadd.f32 %v9223_v2, %v6402_v36  ;;  %v9225_v12 = vadd.f32 %v9224_v60, %v9144_v15  ;;  %v9149_v37 = vpop.f32.mrf.mxu0  ;;  %v6417_v60 = vld [vmem:[#allocation2 + $0x1e0] sm:$0xff] }
 0x4d3   : > { %9576 = vst [vmem:[%s15677_s19 + $0x8] sm:$0xff] %v9558_v29  ;;  %v9559_v45 = vmax.f32 %v9541_v31, 0.0  ;;  %v9542_v52 = vadd.f32 %v15664_v9, %v9512_v22  ;;  %v9227_v63 = vadd.f32 %v9226_v35, %v9146_v4  ;;  %v9150_v48 = vadd.f32 %v9149_v37, %v15636_v24  ;;  %v9230_v0 = vpop.f32.mrf.mxu1  ;;  %v10602_v24 = vld [vmem:[#allocation2] sm:$0xff] }
 0x4d4   : > { %v9513_v32 = vmax.f32 %v9441_v59, %v9495_v10  ;;  %9352 = vst [vmem:[#allocation2 + $0x1b8] sm:$0xff] %v9280_v57  ;;  %v9496_v19 = vmax.f32 %v15575_v50, %v9280_v57  ;;  %v9287_v30 = vadd.f32 %v9225_v12, %v6409_v49  ;;  %v9151_v41 = vpop.f32.mrf.mxu0  ;;  %v9444_v47 = vmax.f32 %v10602_v24, %v15484_v56  ;;  %v10604_v10 = vld [vmem:[#allocation2 + $0xf8] sm:$0xff]  ;;  %v6425_v12 = vld [vmem:[#allocation2 + $0x30] sm:$0xff] }
 0x4d5   : > { %9577 = vst [vmem:[%s15677_s19 + $0x10] sm:$0xff] %v9559_v45  ;;  %v9560_v28 = vmax.f32 %v9542_v52, 0.0  ;;  %v9288_v27 = vadd.f32 %v9227_v63, %v6410_v51  ;;  %v9231_v7 = vadd.f32 %v9230_v0, %v9150_v48  ;;  %v9152_v55 = vadd.f32 %v9151_v41, %v15638_v42  ;;  %v9232_v13 = vpop.f32.mrf.mxu1  ;;  %v10605_v0 = vld [vmem:[#allocation2 + $0x48] sm:$0xff] }
 0x4d6   : > { %v9543_v5 = vadd.f32 %v15660_v46, %v9513_v32  ;;  %v9514_v54 = vmax.f32 %v9442_v38, %v9496_v19  ;;  %9359 = vst [vmem:[#allocation2 + $0x1e8] sm:$0xff] %v9287_v30  ;;  %v9497_v50 = vmax.f32 %v15580_v20, %v9287_v30  ;;  %v9153_v58 = vpop.f32.mrf.mxu0  ;;  %v9445_v56 = vmax.f32 %v10603_v16, %v15488_v34  ;;  %v6418_v20 = vld [vmem:[#allocation2 + $0x1f0] sm:$0xff] }
 0x4d7   : > { %9578 = vst [vmem:[%s15677_s19 + $0x18] sm:$0xff] %v9560_v28  ;;  %9360 = vst [vmem:[#allocation2 + $0x1c8] sm:$0xff] %v9288_v27  ;;  %v9498_v59 = vmax.f32 %v15585_v33, %v9288_v27  ;;  %v9295_v44 = vadd.f32 %v9231_v7, %v6417_v60  ;;  %v9233_v2 = vadd.f32 %v9232_v13, %v9152_v55  ;;  %v9234_v15 = vpop.f32.mrf.mxu1  ;;  %v6426_v28 = vld [vmem:[#allocation2 + $0x1b0] sm:$0xff]  ;;  %v10606_v7 = vld [vmem:[#allocation2 + $0x98] sm:$0xff] }
 0x4d8   : > { %v9154_v42 = vadd.f32 %v9153_v58, %v15640_v62  ;;  %v9561_v29 = vmax.f32 %v9543_v5, 0.0  ;;  %v9544_v31 = vadd.f32 %v15664_v9, %v9514_v54  ;;  %v9515_v22 = vmax.f32 %v9443_v25, %v9497_v50  ;;  %v9155_v36 = vpop.f32.mrf.mxu0  ;;  %v16048_v55 = vld [vmem:[#allocation16_spill] sm:$0xff]  ;;  %v6433_v58 = vld [vmem:[#allocation2 + $0x218] sm:$0xff] }
 0x4d9   : > { %v9516_v4 = vmax.f32 %v9444_v47, %v9498_v59  ;;  %9367 = vst [vmem:[#allocation2 + $0x1e0] sm:$0xff] %v9295_v44  ;;  %v9499_v35 = vmax.f32 %v15590_v6, %v9295_v44  ;;  %v9296_v33 = vadd.f32 %v9233_v2, %v6418_v20  ;;  %v9236_v38 = vpop.f32.mrf.mxu1  ;;  %v9446_v62 = vmax.f32 %v10604_v10, %v15492_v1  ;;  %v10607_v44 = vld [vmem:[#allocation2 + $0x90] sm:$0xff]  ;;  %v16049_v2 = vld [vmem:[#allocation4_spill] sm:$0xff] }
 0x4da   : > { %v9235_v3 = vadd.f32 %v9234_v15, %v9154_v42  ;;  %9579 = vst [vmem:[%s15677_s19 + $0x20] sm:$0xff] %v9561_v29  ;;  %v9562_v57 = vmax.f32 %v9544_v31, 0.0  ;;  %v9545_v34 = vadd.f32 %v15660_v46, %v9515_v22  ;;  %v9156_v37 = vadd.f32 %v9155_v36, %v15642_v8  ;;  %v9159_v45 = vpop.f32.mrf.mxu0  ;;  %v6434_v22 = vld [vmem:[#allocation2 + $0x200] sm:$0xff]  ;;  %v6441_v10 = vld [vmem:[#allocation2 + $0x168] sm:$0xff] }
 0x4db   : > { %v9546_v52 = vadd.f32 %v15664_v9, %v9516_v4  ;;  %v9517_v49 = vmax.f32 %v9445_v56, %v9499_v35  ;;  %9368 = vst [vmem:[#allocation2 + $0x1f0] sm:$0xff] %v9296_v33  ;;  %v9500_v6 = vmax.f32 %v15595_v14, %v9296_v33  ;;  %v9240_v48 = vpop.f32.mrf.mxu1  ;;  %v9447_v1 = vmax.f32 %v10605_v0, %v16047_v43  ;;  %v10608_v4 = vld [vmem:[#allocation2 + $0x130] sm:$0xff] }
 0x4dc   : > { %v9303_v63 = vadd.f32 %v9235_v3, %v6425_v12  ;;  %9580 = vst [vmem:[%s15677_s19 + $0x28] sm:$0xff] %v9562_v57  ;;  %v9563_v25 = vmax.f32 %v9545_v34, 0.0  ;;  %v9237_v32 = vadd.f32 %v9236_v38, %v9156_v37  ;;  %v9160_v19 = vadd.f32 %v9159_v45, %v15644_v18  ;;  %v9161_v8 = vpop.f32.mrf.mxu0  ;;  %v16050_v35 = vld [vmem:[#allocation5_spill] sm:$0xff] }
 0x4dd   : > { %v9564_v30 = vmax.f32 %v9546_v52, 0.0  ;;  %v9547_v51 = vadd.f32 %v15660_v46, %v9517_v49  ;;  %v9518_v41 = vmax.f32 %v9446_v62, %v9500_v6  ;;  %v9242_v27 = vpop.f32.mrf.mxu1  ;;  %v9448_v13 = vmax.f32 %v10606_v7, %v16048_v55  ;;  %v16051_v52 = vld [vmem:[#allocation21_spill] sm:$0xff]  ;;  %v16054_v55 = vld [vmem:[#allocation7_spill] sm:$0xff] }
 0x4de   : > { %9375 = vst [vmem:[#allocation2 + $0x30] sm:$0xff] %v9303_v63  ;;  %v9501_v14 = vmax.f32 %v15600_v39, %v9303_v63  ;;  %9581 = vst [vmem:[%s15677_s19 + $0x30] sm:$0xff] %v9563_v25  ;;  %v9304_v24 = vadd.f32 %v9237_v32, %v6426_v28  ;;  %v9241_v47 = vadd.f32 %v9240_v48, %v9160_v19  ;;  %v9163_v18 = vpop.f32.mrf.mxu0  ;;  %v6442_v48 = vld [vmem:[#allocation2 + $0xc0] sm:$0xff] }
 0x4df   : > { %v9162_v5 = vadd.f32 %v9161_v8, %v15646_v11  ;;  %9582 = vst [vmem:[%s15677_s19 + $0x38] sm:$0xff] %v9564_v30  ;;  %v9565_v54 = vmax.f32 %v9547_v51, 0.0  ;;  %v9548_v50 = vadd.f32 %v15664_v9, %v9518_v41  ;;  %v9164_v39 = vadd.f32 %v9163_v18, %v15648_v21  ;;  %v9244_v59 = vpop.f32.mrf.mxu1  ;;  %v16052_v32 = vld [vmem:[#allocation15_spill] sm:$0xff]  ;;  %v10610_v8 = vld [vmem:[#allocation2 + $0x128] sm:$0xff]  ;;  %v16053_v30 = vld [vmem:[#allocation14_spill] sm:$0xff] }
 0x4e0   : > { %v9519_v60 = vmax.f32 %v9447_v1, %v9501_v14  ;;  %v9449_v42 = vmax.f32 %v10607_v44, %v16049_v2  ;;  %9376 = vst [vmem:[#allocation2 + $0x1b0] sm:$0xff] %v9304_v24  ;;  %v9502_v15 = vmax.f32 %v15605_v40, %v9304_v24  ;;  %v9311_v16 = vadd.f32 %v9241_v47, %v6433_v58  ;;  %v9165_v11 = vpop.f32.mrf.mxu0 }
 0x4e1   : > { %v9243_v56 = vadd.f32 %v9242_v27, %v9162_v5  ;;  %9583 = vst [vmem:[%s15677_s19 + $0x40] sm:$0xff] %v9565_v54  ;;  %v9566_v29 = vmax.f32 %v9548_v50, 0.0  ;;  %v9245_v20 = vadd.f32 %v9244_v59, %v9164_v39  ;;  %v9166_v36 = vadd.f32 %v9165_v11, %v15650_v61  ;;  %v9246_v21 = vpop.f32.mrf.mxu1  ;;  %v10609_v61 = vld [vmem:[#allocation2 + $0x10] sm:$0xff]  ;;  %v6450_v54 = vld [vmem:[#allocation2 + $0xa0] sm:$0x3f] }
 0x4e2   : > { %v9549_v31 = vadd.f32 %v15660_v46, %v9519_v60  ;;  %v9450_v33 = vmax.f32 %v10608_v4, %v16050_v35  ;;  %v9520_v3 = vmax.f32 %v9448_v13, %v9502_v15  ;;  %9383 = vst [vmem:[#allocation2 + $0x218] sm:$0xff] %v9311_v16  ;;  %v9503_v40 = vmax.f32 %v15610_v53, %v9311_v16  ;;  %v9169_v62 = vpop.f32.mrf.mxu0  ;;  %v9435_v16 = vld [vmem:[#allocation2 + $0x118] sm:$0xff]  ;;  %v9436_v11 = vld [vmem:[#allocation2 + $0x20] sm:$0xff] }
 0x4e3   : > { %v9312_v38 = vadd.f32 %v9243_v56, %v6434_v22  ;;  %9584 = vst [vmem:[%s15677_s19 + $0x48] sm:$0xff] %v9566_v29  ;;  %v9319_v34 = vadd.f32 %v9245_v20, %v6441_v10  ;;  %v9247_v12 = vadd.f32 %v9246_v21, %v9166_v36  ;;  %v9170_v37 = vadd.f32 %v9169_v62, %v15652_v26  ;;  %v9250_v45 = vpop.f32.mrf.mxu1  ;;  %v9417_v56 = vld [vmem:[#allocation2 + $0x1a0] sm:$0xff]  ;;  %v9471_v29 = vld [vmem:[#allocation2 + $0x148] sm:$0xff]  ;;  %v9418_v36 = vld [vmem:[#allocation2 + $0x58] sm:$0xff] }
 0x4e4   : > { %v9567_v57 = vmax.f32 %v9549_v31, 0.0  ;;  %v9451_v49 = vmax.f32 %v10609_v61, %v16051_v52  ;;  %v9550_v6 = vadd.f32 %v15664_v9, %v9520_v3  ;;  %v9521_v63 = vmax.f32 %v9449_v42, %v9503_v40  ;;  %v9171_v0 = vpop.f32.mrf.mxu0  ;;  %v9472_v21 = vld [vmem:[#allocation2 + $0xa8] sm:$0xff] }
 0x4e5   : > { %9384 = vst [vmem:[#allocation2 + $0x200] sm:$0xff] %v9312_v38  ;;  %v9504_v53 = vmax.f32 %v15615_v17, %v9312_v38  ;;  %9391 = vst [vmem:[#allocation2 + $0x168] sm:$0xff] %v9319_v34  ;;  %v9505_v43 = vmax.f32 %v15620_v23, %v9319_v34  ;;  %v9320_v1 = vadd.f32 %v9247_v12, %v6442_v48  ;;  %v9252_v19 = vpop.f32.mrf.mxu1  ;;  %v6449_v17 = vld [vmem:[#allocation2 + $0x150] sm:$0x3f] }
 0x4e6   : > { %9585 = vst [vmem:[%s15677_s19 + $0x50] sm:$0xff] %v9567_v57  ;;  %v9251_v25 = vadd.f32 %v9250_v45, %v9170_v37  ;;  %v9172_v26 = vadd.f32 %v9171_v0, %v16052_v32  ;;  %v9452_v51 = vmax.f32 %v10610_v8, %v16053_v30  ;;  %v9568_v41 = vmax.f32 %v9550_v6, 0.0  ;;  %v9173_v27 = vpop.f32.mrf.mxu0 }
 0x4e7   : > { %v9551_v14 = vadd.f32 %v15660_v46, %v9521_v63  ;;  %v9522_v28 = vmax.f32 %v9450_v33, %v9504_v53  ;;  %v9523_v7 = vmax.f32 %v9451_v49, %v9505_v43  ;;  %9392 = vst [vmem:[#allocation2 + $0xc0] sm:$0xff] %v9320_v1  ;;  %v9506_v23 = vmax.f32 %v16054_v55, %v9320_v1  ;;  %v9254_v47 = vpop.f32.mrf.mxu1 }
 0x4e8   : > { %v9327_v13 = vadd.f32 %v9251_v25, %v6449_v17  ;;  %v9253_v24 = vadd.f32 %v9252_v19, %v9172_v26  ;;  %9586 = vst [vmem:[%s15677_s19 + $0x58] sm:$0xff] %v9568_v41  ;;  %v9174_v50 = vpop.f32.mrf.mxu0  ;;  %v9453_v22 = vmax.f32 %v9417_v56, %v9435_v16  ;;  %v9454_v35 = vmax.f32 %v9418_v36, %v9436_v11 }
 0x4e9   : > { %v9569_v5 = vmax.f32 %v9551_v14, 0.0  ;;  %v9552_v18 = vadd.f32 %v15664_v9, %v9522_v28  ;;  %v9553_v60 = vadd.f32 %v15660_v46, %v9523_v7  ;;  %v9524_v58 = vmax.f32 %v9452_v51, %v9506_v23  ;;  %v9255_v59 = vpop.f32.mrf.mxu1 }
 0x4ea   : > { %9399 = vst [vmem:[#allocation2 + $0x150] sm:$0x3f] %v9327_v13  ;;  %v9328_v39 = vadd.f32 %v9253_v24, %v6450_v54 }
 0x4eb   : > { %9587 = vst [vmem:[%s15677_s19 + $0x60] sm:$0xff] %v9569_v5  ;;  %v9570_v44 = vmax.f32 %v9552_v18, 0.0  ;;  %v9571_v2 = vmax.f32 %v9553_v60, 0.0  ;;  %v9554_v42 = vadd.f32 %v15664_v9, %v9524_v58 }
 0x4ec   : > { %9400 = vst [vmem:[#allocation2 + $0xa0] sm:$0x3f] %v9328_v39 }
 0x4ed   : > { %9588 = vst [vmem:[%s15677_s19 + $0x68] sm:$0xff] %v9570_v44  ;;  %9589 = vst [vmem:[%s15677_s19 + $0x70] sm:$0xff] %v9571_v2  ;;  %v9572_v15 = vmax.f32 %v9554_v42, 0.0 }
 0x4ef   : > { %9590 = vst [vmem:[%s15677_s19 + $0x78] sm:$0xff] %v9572_v15 }
 0x4f1   : > { %v9489_v31 = vld [vmem:[#allocation2 + $0x150] sm:$0xff] }
 0x4f2   : > { %v9507_v20 = vmax.f32 %v9471_v29, %v9489_v31 }
 0x4f3   : > { %v9490_v4 = vld [vmem:[#allocation2 + $0xa0] sm:$0xff] }
 0x4f4   : > { %v9525_v33 = vmax.f32 %v9453_v22, %v9507_v20  ;;  %v9508_v3 = vmax.f32 %v9472_v21, %v9490_v4 }
 0x4f6   : > { %v9555_v40 = vadd.f32 %v15660_v46, %v9525_v33  ;;  %v9526_v38 = vmax.f32 %v9454_v35, %v9508_v3 }
 0x4f8   : > { %v9573_v10 = vmax.f32 %v9555_v40, 0.0  ;;  %v9556_v62 = vadd.f32 %v15664_v9, %v9526_v38 }
 0x4fa   : > { %9591 = vst [vmem:[%s15677_s19 + $0x80] sm:$0xff] %v9573_v10  ;;  %v9574_v57 = vmax.f32 %v9556_v62, 0.0 }
 0x4fc   : > { %9592 = vst [vmem:[%s15677_s19 + $0x88] sm:$0xff] %v9574_v57 }
 0x4fd PF: > { %s15_s18 = sadd.s32 1, %s10617_s18  }
 0x4fe   : > { %p12_p4 = scmp.ge.s32.totalorder %s15_s18, 4  }
 0x500   :  { %14 = sbr.rel (!%p12_p4) target bundleno = 1 (0x1), region = 70 }

</bundles_post_ra>
